<compile_context>
chip_gen: v7x
topology: tpu7x:2x2x1
jax: 0.10.0
libtpu: 0.0.40
codegen_flags: <defaults>
</compile_context>

<pallas_src>
import functools

import jax
import jax.numpy as jnp
from jax.experimental import pallas as pl
from jax.experimental.pallas import tpu as pltpu

EPS = 1e-8


# ---------------------------------------------------------------------------
# Pallas kernel 1: Geometric Vector Perceptron
# ---------------------------------------------------------------------------
def _gvp_kernel(s_ref, v_ref, wh_ref, wv_ref, ws_ref, b_ref,
                s_out_ref, v_out_ref, *, scalar_relu, vector_sigmoid):
    f32 = jnp.float32
    tn = s_ref.shape[0]

    s = s_ref[...]                                                    # (tn, si)

    # -- vector hidden path: fuse the 3 per-coordinate matmuls into one ------
    # coord-major block (3, tn, vi): stack the coordinate slabs along sublanes
    # so the MXU sees one (3*tn, vi) x (vi, h) matmul instead of three.
    v_all = jnp.concatenate([v_ref[0], v_ref[1], v_ref[2]], axis=0)   # (3*tn, vi)
    vh_all = jnp.dot(v_all, wh_ref[...], preferred_element_type=f32)  # (3*tn, h)
    vh0 = vh_all[0:tn]
    vh1 = vh_all[tn:2 * tn]
    vh2 = vh_all[2 * tn:3 * tn]
    vn = jnp.sqrt(jnp.maximum(vh0 * vh0 + vh1 * vh1 + vh2 * vh2, EPS))  # (tn, h)

    # -- scalar path: single matmul on [s | vn] vs. pre-concatenated weight --
    s_cat = jnp.concatenate([s, vn], axis=-1)                         # (tn, si+h)
    s_new = jnp.dot(s_cat, ws_ref[...], preferred_element_type=f32) + b_ref[...]

    # -- vector output path: one fused matmul again ---------------------------
    w_all = jnp.dot(vh_all, wv_ref[...], preferred_element_type=f32)  # (3*tn, vo)
    w0 = w_all[0:tn]
    w1 = w_all[tn:2 * tn]
    w2 = w_all[2 * tn:3 * tn]

    if vector_sigmoid:
        gate = jax.nn.sigmoid(
            jnp.sqrt(jnp.maximum(w0 * w0 + w1 * w1 + w2 * w2, EPS)))  # (tn, vo)
        w0, w1, w2 = w0 * gate, w1 * gate, w2 * gate
    if scalar_relu:
        s_new = jnp.maximum(s_new, 0.0)

    s_out_ref[...] = s_new
    v_out_ref[0] = w0
    v_out_ref[1] = w1
    v_out_ref[2] = w2


def gvp_pallas(s, v, p, *, scalar_relu, vector_sigmoid, tn=256):
    """GVP: (s (N, si), v (N, vi, 3)) -> (s' (N, so), v' (N, vo, 3))."""
    n, si = s.shape
    vi = v.shape[1]
    h = p["wh"].shape[1]
    vo = p["wv"].shape[1]
    so = p["ws"].shape[1]

    n_pad = ((n + tn - 1) // tn) * tn
    s_p = jnp.pad(s, ((0, n_pad - n), (0, 0)))
    v_cm = jnp.transpose(v, (2, 0, 1))                      # (3, N, vi) coord-major
    v_p = jnp.pad(v_cm, ((0, 0), (0, n_pad - n), (0, 0)))

    kernel = functools.partial(_gvp_kernel, scalar_relu=scalar_relu,
                               vector_sigmoid=vector_sigmoid)
    s_out, v_out_cm = pl.pallas_call(
        kernel,
        grid_spec=pltpu.PrefetchScalarGridSpec(
            num_scalar_prefetch=0,
            grid=(n_pad // tn,),
            in_specs=[
                pl.BlockSpec((tn, si), lambda i: (i, 0)),          # s
                pl.BlockSpec((3, tn, vi), lambda i: (0, i, 0)),    # v (coord-major)
                pl.BlockSpec((vi, h), lambda i: (0, 0)),           # wh
                pl.BlockSpec((h, vo), lambda i: (0, 0)),           # wv
                pl.BlockSpec((si + h, so), lambda i: (0, 0)),      # ws ([s|vn] -> so)
                pl.BlockSpec((1, so), lambda i: (0, 0)),           # b
            ],
            out_specs=[
                pl.BlockSpec((tn, so), lambda i: (i, 0)),
                pl.BlockSpec((3, tn, vo), lambda i: (0, i, 0)),
            ],
        ),
        out_shape=[
            jax.ShapeDtypeStruct((n_pad, so), jnp.float32),
            jax.ShapeDtypeStruct((3, n_pad, vo), jnp.float32),
        ],
        compiler_params=pltpu.CompilerParams(
            dimension_semantics=("parallel",)),
    )(s_p, v_p, p["wh"], p["wv"], p["ws"], p["b"])

    s_new = s_out[:n]
    v_new = jnp.transpose(v_out_cm, (1, 2, 0))[:n]          # back to (N, vo, 3)
    return s_new, v_new


# ---------------------------------------------------------------------------
# Pallas kernel 2: fused GRU-style combine  out = mask*(sig(z)*hid+(1-sig(z))*tanh(hat))
# ---------------------------------------------------------------------------
def _gru_combine_kernel(z_ref, hat_ref, hid_ref, m_ref, out_ref):
    z = jax.nn.sigmoid(z_ref[...])
    out_ref[...] = m_ref[...] * (z * hid_ref[...]
                                 + (1.0 - z) * jnp.tanh(hat_ref[...]))


def gru_combine_pallas(z_pre, hat_pre, hid, mask, *, tn=256):
    n, c = z_pre.shape
    n_pad = ((n + tn - 1) // tn) * tn
    pad = ((0, n_pad - n), (0, 0))
    z_p = jnp.pad(z_pre, pad)
    hat_p = jnp.pad(hat_pre, pad)
    hid_p = jnp.pad(hid, pad)
    m_p = jnp.pad(mask, pad)

    out = pl.pallas_call(
        _gru_combine_kernel,
        grid_spec=pltpu.PrefetchScalarGridSpec(
            num_scalar_prefetch=0,
            grid=(n_pad // tn,),
            in_specs=[
                pl.BlockSpec((tn, c), lambda i: (i, 0)),
                pl.BlockSpec((tn, c), lambda i: (i, 0)),
                pl.BlockSpec((tn, c), lambda i: (i, 0)),
                pl.BlockSpec((tn, 1), lambda i: (i, 0)),
            ],
            out_specs=pl.BlockSpec((tn, c), lambda i: (i, 0)),
        ),
        out_shape=jax.ShapeDtypeStruct((n_pad, c), jnp.float32),
        compiler_params=pltpu.CompilerParams(
            dimension_semantics=("parallel",)),
    )(z_p, hat_p, hid_p, m_p)
    return out[:n]


# ---------------------------------------------------------------------------
# Graph glue in plain JAX (data-dependent gather / segment ops)
# ---------------------------------------------------------------------------
def segment_softmax(x, seg, num_segments):
    """torch_geometric.utils.softmax: per-destination softmax over edges."""
    x_max = jax.ops.segment_max(x, seg, num_segments=num_segments)
    x_exp = jnp.exp(x - x_max[seg])
    denom = jax.ops.segment_sum(x_exp, seg, num_segments=num_segments)[seg]
    return x_exp / (denom + 1e-16)


def flood_layer(edge_index, s, v, p, gvp_fn):
    n_nodes = s.shape[0]
    loops = jnp.arange(n_nodes, dtype=edge_index.dtype)     # add_self_loops
    src = jnp.concatenate([edge_index[0], loops])
    dst = jnp.concatenate([edge_index[1], loops])

    s, v = gvp_fn(s, v, p["n_encode"], scalar_relu=True, vector_sigmoid=True)

    s_i, s_j = s[dst], s[src]
    v_i, v_j = v[dst], v[src]

    s_att = jnp.sum(s_i * s_j, axis=1, keepdims=True)
    s_att = jax.nn.leaky_relu(s_att, negative_slope=0.2)
    s_att = segment_softmax(s_att, dst, n_nodes)
    s_m = s_att * s_j

    v_att = jnp.sum(v_i * v_j, axis=(-2, -1), keepdims=True)
    v_att = jax.nn.leaky_relu(v_att, negative_slope=0.2)
    v_att = segment_softmax(v_att, dst, n_nodes)
    v_m = v_att * v_j

    s_m, v_m = gvp_fn(s_m, v_m, p["m_gvp"], scalar_relu=True, vector_sigmoid=True)

    s_aggr = jax.ops.segment_sum(s_m, dst, num_segments=n_nodes)
    v_aggr = jax.ops.segment_sum(v_m, dst, num_segments=n_nodes)

    return gvp_fn(s_aggr, v_aggr, p["u_gvp"], scalar_relu=True, vector_sigmoid=True)


def flood_block(edge_index, s, v, s_hid, v_hid, valid_seq_ind, params,
                *, gvp_fn, combine_fn):
    s, v = gvp_fn(s, v, params["gvp_layer"], scalar_relu=False, vector_sigmoid=False)
    mask = valid_seq_ind.astype(jnp.float32)[:, None]        # (N, 1)

    s_g_z, v_g_z = flood_layer(edge_index, s, v, params["z_in_conv"], gvp_fn)
    s_g_r, v_g_r = flood_layer(edge_index, s, v, params["r_in_conv"], gvp_fn)
    if s_hid is not None:
        zs, zv = flood_layer(edge_index, s_hid, v_hid, params["z_h_conv"], gvp_fn)
        s_g_z, v_g_z = s_g_z + zs, v_g_z + zv
        rs, rv = flood_layer(edge_index, s_hid, v_hid, params["r_h_conv"], gvp_fn)
        s_g_r, v_g_r = s_g_r + rs, v_g_r + rv

    # r gate is consumed before the candidate conv; the z-gate sigmoid is fused
    # into the combine kernel (z is only used there).
    s_g_r = jax.nn.sigmoid(s_g_r)
    v_g_r = jax.nn.sigmoid(v_g_r)

    s_hat, v_hat = flood_layer(edge_index, s, v, params["h_hat_in_conv"], gvp_fn)
    if s_hid is not None:
        hs, hv = flood_layer(edge_index, s_g_r * s_hid, v_g_r * v_hid,
                             params["h_hat_h_conv"], gvp_fn)
        s_hat, v_hat = s_hat + hs, v_hat + hv

    n, _ = s_hat.shape
    vo = v_hat.shape[1]
    s_hid_eff = s_hid if s_hid is not None else jnp.zeros_like(s_hat)
    v_hid_eff = v_hid if v_hid is not None else jnp.zeros_like(v_hat)

    s_out = combine_fn(s_g_z, s_hat, s_hid_eff, mask)
    v_out = combine_fn(v_g_z.reshape(n, vo * 3), v_hat.reshape(n, vo * 3),
                       v_hid_eff.reshape(n, vo * 3), mask).reshape(n, vo, 3)
    return s_out, v_out


# ---------------------------------------------------------------------------
# Pure-JAX references (same parameters, same graph glue) for verification
# ---------------------------------------------------------------------------
def gvp_ref(s, v, p, *, scalar_relu, vector_sigmoid, tn=None):
    del tn
    vt = jnp.swapaxes(v, -1, -2)                              # (N, 3, vi)
    vh = vt @ p["wh"]                                         # (N, 3, h)
    vn = jnp.sqrt(jnp.maximum(jnp.sum(vh * vh, axis=-2), EPS))
    s_new = jnp.concatenate([s, vn], axis=-1) @ p["ws"] + p["b"][0]
    v_new = jnp.swapaxes(vh @ p["wv"], -1, -2)                # (N, vo, 3)
    if vector_sigmoid:
        nrm = jnp.sqrt(jnp.maximum(jnp.sum(v_new * v_new, -1, keepdims=True), EPS))
        v_new = v_new * jax.nn.sigmoid(nrm)
    if scalar_relu:
        s_new = jnp.maximum(s_new, 0.0)
    return s_new, v_new


def gru_combine_ref(z_pre, hat_pre, hid, mask):
    z = jax.nn.sigmoid(z_pre)
    return mask * (z * hid + (1.0 - z) * jnp.tanh(hat_pre))


# ---------------------------------------------------------------------------
# Parameter construction (PyTorch GVP: wh/wv no bias, ws on [s|vn] with bias)
# ---------------------------------------------------------------------------
def make_gvp_params(key, in_dims, out_dims, scale=0.15):
    si, vi = in_dims
    so, vo = out_dims
    h = max(vi, vo)
    k = jax.random.split(key, 4)
    w = lambda kk, shp: (scale * jax.random.normal(kk, shp)).astype(jnp.float32)
    return {"wh": w(k[0], (vi, h)), "wv": w(k[1], (h, vo)),
            "ws": w(k[2], (si + h, so)), "b": w(k[3], (1, so))}


def make_flood_layer_params(key, dims):
    k = jax.random.split(key, 3)
    return {"n_encode": make_gvp_params(k[0], dims, dims),
            "m_gvp": make_gvp_params(k[1], dims, dims),
            "u_gvp": make_gvp_params(k[2], dims, dims)}


def make_flood_block_params(key, in_dims, out_dims):
    k = jax.random.split(key, 7)
    return {"gvp_layer": make_gvp_params(k[0], in_dims, out_dims),
            "z_in_conv": make_flood_layer_params(k[1], out_dims),
            "z_h_conv": make_flood_layer_params(k[2], out_dims),
            "r_in_conv": make_flood_layer_params(k[3], out_dims),
            "r_h_conv": make_flood_layer_params(k[4], out_dims),
            "h_hat_in_conv": make_flood_layer_params(k[5], out_dims),
            "h_hat_h_conv": make_flood_layer_params(k[6], out_dims)}


# ---------------------------------------------------------------------------
if __name__ == "__main__":
    in_dims = (20, 6)       # (scalar, vector) channels of the block input
    out_dims = (16, 8)      # (scalar, vector) channels of the hidden state
    n_nodes = 12
    n_edges = 30

    root = jax.random.PRNGKey(0)
    kp, ksrc, kdst, ks, kv, ksh, kvh, kvalid = jax.random.split(root, 8)

    params = make_flood_block_params(kp, in_dims, out_dims)

    edge_index = jnp.stack([
        jax.random.randint(ksrc, (n_edges,), 0, n_nodes),
        jax.random.randint(kdst, (n_edges,), 0, n_nodes),
    ])                                                        # (2, E) int32

    s = jax.random.normal(ks, (n_nodes, in_dims[0]), dtype=jnp.float32)
    v = jax.random.normal(kv, (n_nodes, in_dims[1], 3), dtype=jnp.float32)
    s_hid = jax.random.normal(ksh, (n_nodes, out_dims[0]), dtype=jnp.float32)
    v_hid = jax.random.normal(kvh, (n_nodes, out_dims[1], 3), dtype=jnp.float32)
    valid_seq_ind = jax.random.bernoulli(kvalid, 0.75, (n_nodes,))

    flood_block_tpu = jax.jit(functools.partial(
        flood_block, gvp_fn=gvp_pallas, combine_fn=gru_combine_pallas))

    s_out, v_out = jax.block_until_ready(
        flood_block_tpu(edge_index, s, v, s_hid, v_hid, valid_seq_ind, params))

    # pure-JAX reference (identical params + graph glue, JAX GVP/combine)
    s_expect, v_expect = jax.block_until_ready(
        flood_block(edge_index, s, v, s_hid, v_hid, valid_seq_ind, params,
                    gvp_fn=gvp_ref, combine_fn=gru_combine_ref))

    assert s_out.shape == (n_nodes, out_dims[0])
    assert v_out.shape == (n_nodes, out_dims[1], 3)
    err_s = float(jnp.max(jnp.abs(s_out - s_expect)))
    err_v = float(jnp.max(jnp.abs(v_out - v_expect)))
    assert err_s < 5e-3, f"scalar mismatch {err_s}"
    assert err_v < 5e-3, f"vector mismatch {err_v}"

    print("KERNEL_OK")
</pallas_src>

<mosaic_0001>
module attributes {stable_mosaic.version = 11 : i64} {
  func.func @_gvp_kernel(%arg0: i32, %arg1: memref<256x20xf32, #tpu.memory_space<vmem>>, %arg2: memref<3x256x6xf32, #tpu.memory_space<vmem>>, %arg3: memref<6x8xf32, #tpu.memory_space<vmem>>, %arg4: memref<8x8xf32, #tpu.memory_space<vmem>>, %arg5: memref<28x16xf32, #tpu.memory_space<vmem>>, %arg6: memref<1x16xf32, #tpu.memory_space<vmem>>, %arg7: memref<256x16xf32, #tpu.memory_space<vmem>>, %arg8: memref<3x256x8xf32, #tpu.memory_space<vmem>>) attributes {dimension_semantics = [#tpu.dimension_semantics<parallel>], iteration_bounds = array<i64: 1>, scalar_prefetch = 0 : i64, scratch_operands = 0 : i64, tpu.core_type = #tpu.core_type<tc>, window_params = [{transform_indices = @transform_0, window_bounds = array<i64: 256, 20>}, {transform_indices = @transform_1, window_bounds = array<i64: 3, 256, 6>}, {pipeline_mode = #tpu.pipeline_mode<synchronous>, transform_indices = @transform_2, window_bounds = array<i64: 6, 8>}, {pipeline_mode = #tpu.pipeline_mode<synchronous>, transform_indices = @transform_3, window_bounds = array<i64: 8, 8>}, {pipeline_mode = #tpu.pipeline_mode<synchronous>, transform_indices = @transform_4, window_bounds = array<i64: 28, 16>}, {pipeline_mode = #tpu.pipeline_mode<synchronous>, transform_indices = @transform_5, window_bounds = array<i64: 1, 16>}, {transform_indices = @transform_6, window_bounds = array<i64: 256, 16>}, {transform_indices = @transform_7, window_bounds = array<i64: 3, 256, 8>}]} {
    %c0 = arith.constant 0 : index
    %c0_0 = arith.constant 0 : index
    %0 = vector.load %arg1[%c0, %c0_0] : memref<256x20xf32, #tpu.memory_space<vmem>>, vector<256x20xf32>
    %c0_1 = arith.constant 0 : index
    %c0_2 = arith.constant 0 : index
    %c0_3 = arith.constant 0 : index
    %1 = vector.load %arg2[%c0_1, %c0_2, %c0_3] : memref<3x256x6xf32, #tpu.memory_space<vmem>>, vector<1x256x6xf32>
    %2 = vector.shape_cast %1 : vector<1x256x6xf32> to vector<256x6xf32>
    %c1 = arith.constant 1 : index
    %c0_4 = arith.constant 0 : index
    %c0_5 = arith.constant 0 : index
    %3 = vector.load %arg2[%c1, %c0_4, %c0_5] : memref<3x256x6xf32, #tpu.memory_space<vmem>>, vector<1x256x6xf32>
    %4 = vector.shape_cast %3 : vector<1x256x6xf32> to vector<256x6xf32>
    %c2 = arith.constant 2 : index
    %c0_6 = arith.constant 0 : index
    %c0_7 = arith.constant 0 : index
    %5 = vector.load %arg2[%c2, %c0_6, %c0_7] : memref<3x256x6xf32, #tpu.memory_space<vmem>>, vector<1x256x6xf32>
    %6 = vector.shape_cast %5 : vector<1x256x6xf32> to vector<256x6xf32>
    %7 = tpu.concatenate %2, %4, %6 in 0 : vector<256x6xf32>, vector<256x6xf32>, vector<256x6xf32> -> vector<768x6xf32>
    %c0_8 = arith.constant 0 : index
    %c0_9 = arith.constant 0 : index
    %8 = vector.load %arg3[%c0_8, %c0_9] : memref<6x8xf32, #tpu.memory_space<vmem>>, vector<6x8xf32>
    %cst = arith.constant dense<0.000000e+00> : vector<768x8xf32>
    %9 = tpu.matmul %7, %8, %cst {dimension_numbers = #tpu.dot_dimension_numbers<[1], [0], [0], [1], [0, 0, 1, 1], [], []>} : vector<768x6xf32>, vector<6x8xf32>, vector<768x8xf32> -> vector<768x8xf32>
    %10 = vector.extract_strided_slice %9 {offsets = [0, 0], sizes = [256, 8], strides = [1, 1]} : vector<768x8xf32> to vector<256x8xf32>
    %11 = vector.extract_strided_slice %9 {offsets = [256, 0], sizes = [256, 8], strides = [1, 1]} : vector<768x8xf32> to vector<256x8xf32>
    %12 = vector.extract_strided_slice %9 {offsets = [512, 0], sizes = [256, 8], strides = [1, 1]} : vector<768x8xf32> to vector<256x8xf32>
    %13 = arith.mulf %10, %10 : vector<256x8xf32>
    %14 = arith.mulf %11, %11 : vector<256x8xf32>
    %15 = arith.addf %13, %14 : vector<256x8xf32>
    %16 = arith.mulf %12, %12 : vector<256x8xf32>
    %17 = arith.addf %15, %16 : vector<256x8xf32>
    %cst_10 = arith.constant 9.99999993E-9 : f32
    %18 = vector.broadcast %cst_10 : f32 to vector<256x8xf32>
    %19 = arith.maximumf %17, %18 : vector<256x8xf32>
    %20 = math.sqrt %19 : vector<256x8xf32>
    %21 = tpu.concatenate %0, %20 in 1 : vector<256x20xf32>, vector<256x8xf32> -> vector<256x28xf32>
    %c0_11 = arith.constant 0 : index
    %c0_12 = arith.constant 0 : index
    %22 = vector.load %arg5[%c0_11, %c0_12] : memref<28x16xf32, #tpu.memory_space<vmem>>, vector<28x16xf32>
    %cst_13 = arith.constant dense<0.000000e+00> : vector<256x16xf32>
    %23 = tpu.matmul %21, %22, %cst_13 {dimension_numbers = #tpu.dot_dimension_numbers<[1], [0], [0], [1], [0, 0, 1, 1], [], []>} : vector<256x28xf32>, vector<28x16xf32>, vector<256x16xf32> -> vector<256x16xf32>
    %c0_14 = arith.constant 0 : index
    %c0_15 = arith.constant 0 : index
    %24 = vector.load %arg6[%c0_14, %c0_15] : memref<1x16xf32, #tpu.memory_space<vmem>>, vector<1x16xf32>
    %25 = vector.broadcast %24 : vector<1x16xf32> to vector<256x16xf32>
    %26 = arith.addf %23, %25 : vector<256x16xf32>
    %c0_16 = arith.constant 0 : index
    %c0_17 = arith.constant 0 : index
    %27 = vector.load %arg4[%c0_16, %c0_17] : memref<8x8xf32, #tpu.memory_space<vmem>>, vector<8x8xf32>
    %cst_18 = arith.constant dense<0.000000e+00> : vector<768x8xf32>
    %28 = tpu.matmul %9, %27, %cst_18 {dimension_numbers = #tpu.dot_dimension_numbers<[1], [0], [0], [1], [0, 0, 1, 1], [], []>} : vector<768x8xf32>, vector<8x8xf32>, vector<768x8xf32> -> vector<768x8xf32>
    %29 = vector.extract_strided_slice %28 {offsets = [0, 0], sizes = [256, 8], strides = [1, 1]} : vector<768x8xf32> to vector<256x8xf32>
    %30 = vector.extract_strided_slice %28 {offsets = [256, 0], sizes = [256, 8], strides = [1, 1]} : vector<768x8xf32> to vector<256x8xf32>
    %31 = vector.extract_strided_slice %28 {offsets = [512, 0], sizes = [256, 8], strides = [1, 1]} : vector<768x8xf32> to vector<256x8xf32>
    %c0_19 = arith.constant 0 : index
    %c0_20 = arith.constant 0 : index
    %32 = vector.load %arg7[%c0_19, %c0_20] : memref<256x16xf32, #tpu.memory_space<vmem>>, vector<256x16xf32>
    tpu.vector_store %arg7[%c0_19, %c0_20], %26 {strides = array<i32>} : memref<256x16xf32, #tpu.memory_space<vmem>>, vector<256x16xf32>,
    %c0_21 = arith.constant 0 : index
    %c0_22 = arith.constant 0 : index
    %c0_23 = arith.constant 0 : index
    %33 = vector.load %arg8[%c0_21, %c0_22, %c0_23] : memref<3x256x8xf32, #tpu.memory_space<vmem>>, vector<1x256x8xf32>
    %34 = vector.shape_cast %33 : vector<1x256x8xf32> to vector<256x8xf32>
    %35 = vector.shape_cast %29 : vector<256x8xf32> to vector<1x256x8xf32>
    tpu.vector_store %arg8[%c0_21, %c0_22, %c0_23], %35 {strides = array<i32>} : memref<3x256x8xf32, #tpu.memory_space<vmem>>, vector<1x256x8xf32>,
    %c1_24 = arith.constant 1 : index
    %c0_25 = arith.constant 0 : index
    %c0_26 = arith.constant 0 : index
    %36 = vector.load %arg8[%c1_24, %c0_25, %c0_26] : memref<3x256x8xf32, #tpu.memory_space<vmem>>, vector<1x256x8xf32>
    %37 = vector.shape_cast %36 : vector<1x256x8xf32> to vector<256x8xf32>
    %38 = vector.shape_cast %30 : vector<256x8xf32> to vector<1x256x8xf32>
    tpu.vector_store %arg8[%c1_24, %c0_25, %c0_26], %38 {strides = array<i32>} : memref<3x256x8xf32, #tpu.memory_space<vmem>>, vector<1x256x8xf32>,
    %c2_27 = arith.constant 2 : index
    %c0_28 = arith.constant 0 : index
    %c0_29 = arith.constant 0 : index
    %39 = vector.load %arg8[%c2_27, %c0_28, %c0_29] : memref<3x256x8xf32, #tpu.memory_space<vmem>>, vector<1x256x8xf32>
    %40 = vector.shape_cast %39 : vector<1x256x8xf32> to vector<256x8xf32>
    %41 = vector.shape_cast %31 : vector<256x8xf32> to vector<1x256x8xf32>
    tpu.vector_store %arg8[%c2_27, %c0_28, %c0_29], %41 {strides = array<i32>} : memref<3x256x8xf32, #tpu.memory_space<vmem>>, vector<1x256x8xf32>,
    return
  }
  func.func @transform_0(%arg0: i32) -> (i32, i32) {
    %c0_i32 = arith.constant 0 : i32
    %c0_i32_0 = arith.constant 0 : i32
    return %arg0, %c0_i32 : i32, i32
  }
  func.func @transform_1(%arg0: i32) -> (i32, i32, i32) {
    %c0_i32 = arith.constant 0 : i32
    %c0_i32_0 = arith.constant 0 : i32
    %c0_i32_1 = arith.constant 0 : i32
    return %c0_i32, %arg0, %c0_i32_0 : i32, i32, i32
  }
  func.func @transform_2(%arg0: i32) -> (i32, i32) {
    %c0_i32 = arith.constant 0 : i32
    %c0_i32_0 = arith.constant 0 : i32
    %c0_i32_1 = arith.constant 0 : i32
    return %c0_i32, %c0_i32_0 : i32, i32
  }
  func.func @transform_3(%arg0: i32) -> (i32, i32) {
    %c0_i32 = arith.constant 0 : i32
    %c0_i32_0 = arith.constant 0 : i32
    %c0_i32_1 = arith.constant 0 : i32
    return %c0_i32, %c0_i32_0 : i32, i32
  }
  func.func @transform_4(%arg0: i32) -> (i32, i32) {
    %c0_i32 = arith.constant 0 : i32
    %c0_i32_0 = arith.constant 0 : i32
    %c0_i32_1 = arith.constant 0 : i32
    return %c0_i32, %c0_i32_0 : i32, i32
  }
  func.func @transform_5(%arg0: i32) -> (i32, i32) {
    %c0_i32 = arith.constant 0 : i32
    %c0_i32_0 = arith.constant 0 : i32
    %c0_i32_1 = arith.constant 0 : i32
    return %c0_i32, %c0_i32_0 : i32, i32
  }
  func.func @transform_6(%arg0: i32) -> (i32, i32) {
    %c0_i32 = arith.constant 0 : i32
    %c0_i32_0 = arith.constant 0 : i32
    return %arg0, %c0_i32 : i32, i32
  }
  func.func @transform_7(%arg0: i32) -> (i32, i32, i32) {
    %c0_i32 = arith.constant 0 : i32
    %c0_i32_0 = arith.constant 0 : i32
    %c0_i32_1 = arith.constant 0 : i32
    return %c0_i32, %arg0, %c0_i32_0 : i32, i32, i32
  }
}

module attributes {stable_mosaic.version = 11 : i64} {
  func.func @_gvp_kernel(%arg0: i32, %arg1: memref<256x16xf32, #tpu.memory_space<vmem>>, %arg2: memref<3x256x8xf32, #tpu.memory_space<vmem>>, %arg3: memref<8x8xf32, #tpu.memory_space<vmem>>, %arg4: memref<8x8xf32, #tpu.memory_space<vmem>>, %arg5: memref<24x16xf32, #tpu.memory_space<vmem>>, %arg6: memref<1x16xf32, #tpu.memory_space<vmem>>, %arg7: memref<256x16xf32, #tpu.memory_space<vmem>>, %arg8: memref<3x256x8xf32, #tpu.memory_space<vmem>>) attributes {dimension_semantics = [#tpu.dimension_semantics<parallel>], iteration_bounds = array<i64: 1>, scalar_prefetch = 0 : i64, scratch_operands = 0 : i64, tpu.core_type = #tpu.core_type<tc>, window_params = [{transform_indices = @transform_0, window_bounds = array<i64: 256, 16>}, {transform_indices = @transform_1, window_bounds = array<i64: 3, 256, 8>}, {pipeline_mode = #tpu.pipeline_mode<synchronous>, transform_indices = @transform_2, window_bounds = array<i64: 8, 8>}, {pipeline_mode = #tpu.pipeline_mode<synchronous>, transform_indices = @transform_3, window_bounds = array<i64: 8, 8>}, {pipeline_mode = #tpu.pipeline_mode<synchronous>, transform_indices = @transform_4, window_bounds = array<i64: 24, 16>}, {pipeline_mode = #tpu.pipeline_mode<synchronous>, transform_indices = @transform_5, window_bounds = array<i64: 1, 16>}, {transform_indices = @transform_6, window_bounds = array<i64: 256, 16>}, {transform_indices = @transform_7, window_bounds = array<i64: 3, 256, 8>}]} {
    %c0 = arith.constant 0 : index
    %c0_0 = arith.constant 0 : index
    %0 = vector.load %arg1[%c0, %c0_0] : memref<256x16xf32, #tpu.memory_space<vmem>>, vector<256x16xf32>
    %c0_1 = arith.constant 0 : index
    %c0_2 = arith.constant 0 : index
    %c0_3 = arith.constant 0 : index
    %1 = vector.load %arg2[%c0_1, %c0_2, %c0_3] : memref<3x256x8xf32, #tpu.memory_space<vmem>>, vector<1x256x8xf32>
    %2 = vector.shape_cast %1 : vector<1x256x8xf32> to vector<256x8xf32>
    %c1 = arith.constant 1 : index
    %c0_4 = arith.constant 0 : index
    %c0_5 = arith.constant 0 : index
    %3 = vector.load %arg2[%c1, %c0_4, %c0_5] : memref<3x256x8xf32, #tpu.memory_space<vmem>>, vector<1x256x8xf32>
    %4 = vector.shape_cast %3 : vector<1x256x8xf32> to vector<256x8xf32>
    %c2 = arith.constant 2 : index
    %c0_6 = arith.constant 0 : index
    %c0_7 = arith.constant 0 : index
    %5 = vector.load %arg2[%c2, %c0_6, %c0_7] : memref<3x256x8xf32, #tpu.memory_space<vmem>>, vector<1x256x8xf32>
    %6 = vector.shape_cast %5 : vector<1x256x8xf32> to vector<256x8xf32>
    %7 = tpu.concatenate %2, %4, %6 in 0 : vector<256x8xf32>, vector<256x8xf32>, vector<256x8xf32> -> vector<768x8xf32>
    %c0_8 = arith.constant 0 : index
    %c0_9 = arith.constant 0 : index
    %8 = vector.load %arg3[%c0_8, %c0_9] : memref<8x8xf32, #tpu.memory_space<vmem>>, vector<8x8xf32>
    %cst = arith.constant dense<0.000000e+00> : vector<768x8xf32>
    %9 = tpu.matmul %7, %8, %cst {dimension_numbers = #tpu.dot_dimension_numbers<[1], [0], [0], [1], [0, 0, 1, 1], [], []>} : vector<768x8xf32>, vector<8x8xf32>, vector<768x8xf32> -> vector<768x8xf32>
    %10 = vector.extract_strided_slice %9 {offsets = [0, 0], sizes = [256, 8], strides = [1, 1]} : vector<768x8xf32> to vector<256x8xf32>
    %11 = vector.extract_strided_slice %9 {offsets = [256, 0], sizes = [256, 8], strides = [1, 1]} : vector<768x8xf32> to vector<256x8xf32>
    %12 = vector.extract_strided_slice %9 {offsets = [512, 0], sizes = [256, 8], strides = [1, 1]} : vector<768x8xf32> to vector<256x8xf32>
    %13 = arith.mulf %10, %10 : vector<256x8xf32>
    %14 = arith.mulf %11, %11 : vector<256x8xf32>
    %15 = arith.addf %13, %14 : vector<256x8xf32>
    %16 = arith.mulf %12, %12 : vector<256x8xf32>
    %17 = arith.addf %15, %16 : vector<256x8xf32>
    %cst_10 = arith.constant 9.99999993E-9 : f32
    %18 = vector.broadcast %cst_10 : f32 to vector<256x8xf32>
    %19 = arith.maximumf %17, %18 : vector<256x8xf32>
    %20 = math.sqrt %19 : vector<256x8xf32>
    %21 = tpu.concatenate %0, %20 in 1 : vector<256x16xf32>, vector<256x8xf32> -> vector<256x24xf32>
    %c0_11 = arith.constant 0 : index
    %c0_12 = arith.constant 0 : index
    %22 = vector.load %arg5[%c0_11, %c0_12] : memref<24x16xf32, #tpu.memory_space<vmem>>, vector<24x16xf32>
    %cst_13 = arith.constant dense<0.000000e+00> : vector<256x16xf32>
    %23 = tpu.matmul %21, %22, %cst_13 {dimension_numbers = #tpu.dot_dimension_numbers<[1], [0], [0], [1], [0, 0, 1, 1], [], []>} : vector<256x24xf32>, vector<24x16xf32>, vector<256x16xf32> -> vector<256x16xf32>
    %c0_14 = arith.constant 0 : index
    %c0_15 = arith.constant 0 : index
    %24 = vector.load %arg6[%c0_14, %c0_15] : memref<1x16xf32, #tpu.memory_space<vmem>>, vector<1x16xf32>
    %25 = vector.broadcast %24 : vector<1x16xf32> to vector<256x16xf32>
    %26 = arith.addf %23, %25 : vector<256x16xf32>
    %c0_16 = arith.constant 0 : index
    %c0_17 = arith.constant 0 : index
    %27 = vector.load %arg4[%c0_16, %c0_17] : memref<8x8xf32, #tpu.memory_space<vmem>>, vector<8x8xf32>
    %cst_18 = arith.constant dense<0.000000e+00> : vector<768x8xf32>
    %28 = tpu.matmul %9, %27, %cst_18 {dimension_numbers = #tpu.dot_dimension_numbers<[1], [0], [0], [1], [0, 0, 1, 1], [], []>} : vector<768x8xf32>, vector<8x8xf32>, vector<768x8xf32> -> vector<768x8xf32>
    %29 = vector.extract_strided_slice %28 {offsets = [0, 0], sizes = [256, 8], strides = [1, 1]} : vector<768x8xf32> to vector<256x8xf32>
    %30 = vector.extract_strided_slice %28 {offsets = [256, 0], sizes = [256, 8], strides = [1, 1]} : vector<768x8xf32> to vector<256x8xf32>
    %31 = vector.extract_strided_slice %28 {offsets = [512, 0], sizes = [256, 8], strides = [1, 1]} : vector<768x8xf32> to vector<256x8xf32>
    %32 = arith.mulf %29, %29 : vector<256x8xf32>
    %33 = arith.mulf %30, %30 : vector<256x8xf32>
    %34 = arith.addf %32, %33 : vector<256x8xf32>
    %35 = arith.mulf %31, %31 : vector<256x8xf32>
    %36 = arith.addf %34, %35 : vector<256x8xf32>
    %cst_19 = arith.constant 9.99999993E-9 : f32
    %37 = vector.broadcast %cst_19 : f32 to vector<256x8xf32>
    %38 = arith.maximumf %36, %37 : vector<256x8xf32>
    %39 = math.sqrt %38 : vector<256x8xf32>
    %40 = arith.negf %39 : vector<256x8xf32>
    %41 = math.exp %40 : vector<256x8xf32>
    %cst_20 = arith.constant 1.000000e+00 : f32
    %42 = vector.broadcast %cst_20 : f32 to vector<256x8xf32>
    %43 = arith.addf %42, %41 : vector<256x8xf32>
    %44 = arith.divf %42, %43 : vector<256x8xf32>
    %45 = arith.mulf %29, %44 : vector<256x8xf32>
    %46 = arith.mulf %30, %44 : vector<256x8xf32>
    %47 = arith.mulf %31, %44 : vector<256x8xf32>
    %cst_21 = arith.constant 0.000000e+00 : f32
    %48 = vector.broadcast %cst_21 : f32 to vector<256x16xf32>
    %49 = arith.maximumf %26, %48 : vector<256x16xf32>
    %c0_22 = arith.constant 0 : index
    %c0_23 = arith.constant 0 : index
    %50 = vector.load %arg7[%c0_22, %c0_23] : memref<256x16xf32, #tpu.memory_space<vmem>>, vector<256x16xf32>
    tpu.vector_store %arg7[%c0_22, %c0_23], %49 {strides = array<i32>} : memref<256x16xf32, #tpu.memory_space<vmem>>, vector<256x16xf32>,
    %c0_24 = arith.constant 0 : index
    %c0_25 = arith.constant 0 : index
    %c0_26 = arith.constant 0 : index
    %51 = vector.load %arg8[%c0_24, %c0_25, %c0_26] : memref<3x256x8xf32, #tpu.memory_space<vmem>>, vector<1x256x8xf32>
    %52 = vector.shape_cast %51 : vector<1x256x8xf32> to vector<256x8xf32>
    %53 = vector.shape_cast %45 : vector<256x8xf32> to vector<1x256x8xf32>
    tpu.vector_store %arg8[%c0_24, %c0_25, %c0_26], %53 {strides = array<i32>} : memref<3x256x8xf32, #tpu.memory_space<vmem>>, vector<1x256x8xf32>,
    %c1_27 = arith.constant 1 : index
    %c0_28 = arith.constant 0 : index
    %c0_29 = arith.constant 0 : index
    %54 = vector.load %arg8[%c1_27, %c0_28, %c0_29] : memref<3x256x8xf32, #tpu.memory_space<vmem>>, vector<1x256x8xf32>
    %55 = vector.shape_cast %54 : vector<1x256x8xf32> to vector<256x8xf32>
    %56 = vector.shape_cast %46 : vector<256x8xf32> to vector<1x256x8xf32>
    tpu.vector_store %arg8[%c1_27, %c0_28, %c0_29], %56 {strides = array<i32>} : memref<3x256x8xf32, #tpu.memory_space<vmem>>, vector<1x256x8xf32>,
    %c2_30 = arith.constant 2 : index
    %c0_31 = arith.constant 0 : index
    %c0_32 = arith.constant 0 : index
    %57 = vector.load %arg8[%c2_30, %c0_31, %c0_32] : memref<3x256x8xf32, #tpu.memory_space<vmem>>, vector<1x256x8xf32>
    %58 = vector.shape_cast %57 : vector<1x256x8xf32> to vector<256x8xf32>
    %59 = vector.shape_cast %47 : vector<256x8xf32> to vector<1x256x8xf32>
    tpu.vector_store %arg8[%c2_30, %c0_31, %c0_32], %59 {strides = array<i32>} : memref<3x256x8xf32, #tpu.memory_space<vmem>>, vector<1x256x8xf32>,
    return
  }
  func.func @transform_0(%arg0: i32) -> (i32, i32) {
    %c0_i32 = arith.constant 0 : i32
    %c0_i32_0 = arith.constant 0 : i32
    return %arg0, %c0_i32 : i32, i32
  }
  func.func @transform_1(%arg0: i32) -> (i32, i32, i32) {
    %c0_i32 = arith.constant 0 : i32
    %c0_i32_0 = arith.constant 0 : i32
    %c0_i32_1 = arith.constant 0 : i32
    return %c0_i32, %arg0, %c0_i32_0 : i32, i32, i32
  }
  func.func @transform_2(%arg0: i32) -> (i32, i32) {
    %c0_i32 = arith.constant 0 : i32
    %c0_i32_0 = arith.constant 0 : i32
    %c0_i32_1 = arith.constant 0 : i32
    return %c0_i32, %c0_i32_0 : i32, i32
  }
  func.func @transform_3(%arg0: i32) -> (i32, i32) {
    %c0_i32 = arith.constant 0 : i32
    %c0_i32_0 = arith.constant 0 : i32
    %c0_i32_1 = arith.constant 0 : i32
    return %c0_i32, %c0_i32_0 : i32, i32
  }
  func.func @transform_4(%arg0: i32) -> (i32, i32) {
    %c0_i32 = arith.constant 0 : i32
    %c0_i32_0 = arith.constant 0 : i32
    %c0_i32_1 = arith.constant 0 : i32
    return %c0_i32, %c0_i32_0 : i32, i32
  }
  func.func @transform_5(%arg0: i32) -> (i32, i32) {
    %c0_i32 = arith.constant 0 : i32
    %c0_i32_0 = arith.constant 0 : i32
    %c0_i32_1 = arith.constant 0 : i32
    return %c0_i32, %c0_i32_0 : i32, i32
  }
  func.func @transform_6(%arg0: i32) -> (i32, i32) {
    %c0_i32 = arith.constant 0 : i32
    %c0_i32_0 = arith.constant 0 : i32
    return %arg0, %c0_i32 : i32, i32
  }
  func.func @transform_7(%arg0: i32) -> (i32, i32, i32) {
    %c0_i32 = arith.constant 0 : i32
    %c0_i32_0 = arith.constant 0 : i32
    %c0_i32_1 = arith.constant 0 : i32
    return %c0_i32, %arg0, %c0_i32_0 : i32, i32, i32
  }
}

module attributes {stable_mosaic.version = 11 : i64} {
  func.func @_gru_combine_kernel(%arg0: i32, %arg1: memref<256x16xf32, #tpu.memory_space<vmem>>, %arg2: memref<256x16xf32, #tpu.memory_space<vmem>>, %arg3: memref<256x16xf32, #tpu.memory_space<vmem>>, %arg4: memref<256x1xf32, #tpu.memory_space<vmem>>, %arg5: memref<256x16xf32, #tpu.memory_space<vmem>>) attributes {dimension_semantics = [#tpu.dimension_semantics<parallel>], iteration_bounds = array<i64: 1>, scalar_prefetch = 0 : i64, scratch_operands = 0 : i64, tpu.core_type = #tpu.core_type<tc>, window_params = [{transform_indices = @transform_0, window_bounds = array<i64: 256, 16>}, {transform_indices = @transform_1, window_bounds = array<i64: 256, 16>}, {transform_indices = @transform_2, window_bounds = array<i64: 256, 16>}, {transform_indices = @transform_3, window_bounds = array<i64: 256, 1>}, {transform_indices = @transform_4, window_bounds = array<i64: 256, 16>}]} {
    %c0 = arith.constant 0 : index
    %c0_0 = arith.constant 0 : index
    %0 = vector.load %arg1[%c0, %c0_0] : memref<256x16xf32, #tpu.memory_space<vmem>>, vector<256x16xf32>
    %1 = arith.negf %0 : vector<256x16xf32>
    %2 = math.exp %1 : vector<256x16xf32>
    %cst = arith.constant 1.000000e+00 : f32
    %3 = vector.broadcast %cst : f32 to vector<256x16xf32>
    %4 = arith.addf %3, %2 : vector<256x16xf32>
    %5 = arith.divf %3, %4 : vector<256x16xf32>
    %c0_1 = arith.constant 0 : index
    %c0_2 = arith.constant 0 : index
    %6 = vector.load %arg4[%c0_1, %c0_2] : memref<256x1xf32, #tpu.memory_space<vmem>>, vector<256x1xf32>
    %c0_3 = arith.constant 0 : index
    %c0_4 = arith.constant 0 : index
    %7 = vector.load %arg3[%c0_3, %c0_4] : memref<256x16xf32, #tpu.memory_space<vmem>>, vector<256x16xf32>
    %8 = arith.mulf %5, %7 : vector<256x16xf32>
    %cst_5 = arith.constant 1.000000e+00 : f32
    %9 = vector.broadcast %cst_5 : f32 to vector<256x16xf32>
    %10 = arith.subf %9, %5 : vector<256x16xf32>
    %c0_6 = arith.constant 0 : index
    %c0_7 = arith.constant 0 : index
    %11 = vector.load %arg2[%c0_6, %c0_7] : memref<256x16xf32, #tpu.memory_space<vmem>>, vector<256x16xf32>
    %12 = math.tanh %11 : vector<256x16xf32>
    %13 = arith.mulf %10, %12 : vector<256x16xf32>
    %14 = arith.addf %8, %13 : vector<256x16xf32>
    %15 = vector.broadcast %6 : vector<256x1xf32> to vector<256x16xf32>
    %16 = arith.mulf %15, %14 : vector<256x16xf32>
    %c0_8 = arith.constant 0 : index
    %c0_9 = arith.constant 0 : index
    %17 = vector.load %arg5[%c0_8, %c0_9] : memref<256x16xf32, #tpu.memory_space<vmem>>, vector<256x16xf32>
    tpu.vector_store %arg5[%c0_8, %c0_9], %16 {strides = array<i32>} : memref<256x16xf32, #tpu.memory_space<vmem>>, vector<256x16xf32>,
    return
  }
  func.func @transform_0(%arg0: i32) -> (i32, i32) {
    %c0_i32 = arith.constant 0 : i32
    %c0_i32_0 = arith.constant 0 : i32
    return %arg0, %c0_i32 : i32, i32
  }
  func.func @transform_1(%arg0: i32) -> (i32, i32) {
    %c0_i32 = arith.constant 0 : i32
    %c0_i32_0 = arith.constant 0 : i32
    return %arg0, %c0_i32 : i32, i32
  }
  func.func @transform_2(%arg0: i32) -> (i32, i32) {
    %c0_i32 = arith.constant 0 : i32
    %c0_i32_0 = arith.constant 0 : i32
    return %arg0, %c0_i32 : i32, i32
  }
  func.func @transform_3(%arg0: i32) -> (i32, i32) {
    %c0_i32 = arith.constant 0 : i32
    %c0_i32_0 = arith.constant 0 : i32
    return %arg0, %c0_i32 : i32, i32
  }
  func.func @transform_4(%arg0: i32) -> (i32, i32) {
    %c0_i32 = arith.constant 0 : i32
    %c0_i32_0 = arith.constant 0 : i32
    return %arg0, %c0_i32 : i32, i32
  }
}

module attributes {stable_mosaic.version = 11 : i64} {
  func.func @_gru_combine_kernel(%arg0: i32, %arg1: memref<256x24xf32, #tpu.memory_space<vmem>>, %arg2: memref<256x24xf32, #tpu.memory_space<vmem>>, %arg3: memref<256x24xf32, #tpu.memory_space<vmem>>, %arg4: memref<256x1xf32, #tpu.memory_space<vmem>>, %arg5: memref<256x24xf32, #tpu.memory_space<vmem>>) attributes {dimension_semantics = [#tpu.dimension_semantics<parallel>], iteration_bounds = array<i64: 1>, scalar_prefetch = 0 : i64, scratch_operands = 0 : i64, tpu.core_type = #tpu.core_type<tc>, window_params = [{transform_indices = @transform_0, window_bounds = array<i64: 256, 24>}, {transform_indices = @transform_1, window_bounds = array<i64: 256, 24>}, {transform_indices = @transform_2, window_bounds = array<i64: 256, 24>}, {transform_indices = @transform_3, window_bounds = array<i64: 256, 1>}, {transform_indices = @transform_4, window_bounds = array<i64: 256, 24>}]} {
    %c0 = arith.constant 0 : index
    %c0_0 = arith.constant 0 : index
    %0 = vector.load %arg1[%c0, %c0_0] : memref<256x24xf32, #tpu.memory_space<vmem>>, vector<256x24xf32>
    %1 = arith.negf %0 : vector<256x24xf32>
    %2 = math.exp %1 : vector<256x24xf32>
    %cst = arith.constant 1.000000e+00 : f32
    %3 = vector.broadcast %cst : f32 to vector<256x24xf32>
    %4 = arith.addf %3, %2 : vector<256x24xf32>
    %5 = arith.divf %3, %4 : vector<256x24xf32>
    %c0_1 = arith.constant 0 : index
    %c0_2 = arith.constant 0 : index
    %6 = vector.load %arg4[%c0_1, %c0_2] : memref<256x1xf32, #tpu.memory_space<vmem>>, vector<256x1xf32>
    %c0_3 = arith.constant 0 : index
    %c0_4 = arith.constant 0 : index
    %7 = vector.load %arg3[%c0_3, %c0_4] : memref<256x24xf32, #tpu.memory_space<vmem>>, vector<256x24xf32>
    %8 = arith.mulf %5, %7 : vector<256x24xf32>
    %cst_5 = arith.constant 1.000000e+00 : f32
    %9 = vector.broadcast %cst_5 : f32 to vector<256x24xf32>
    %10 = arith.subf %9, %5 : vector<256x24xf32>
    %c0_6 = arith.constant 0 : index
    %c0_7 = arith.constant 0 : index
    %11 = vector.load %arg2[%c0_6, %c0_7] : memref<256x24xf32, #tpu.memory_space<vmem>>, vector<256x24xf32>
    %12 = math.tanh %11 : vector<256x24xf32>
    %13 = arith.mulf %10, %12 : vector<256x24xf32>
    %14 = arith.addf %8, %13 : vector<256x24xf32>
    %15 = vector.broadcast %6 : vector<256x1xf32> to vector<256x24xf32>
    %16 = arith.mulf %15, %14 : vector<256x24xf32>
    %c0_8 = arith.constant 0 : index
    %c0_9 = arith.constant 0 : index
    %17 = vector.load %arg5[%c0_8, %c0_9] : memref<256x24xf32, #tpu.memory_space<vmem>>, vector<256x24xf32>
    tpu.vector_store %arg5[%c0_8, %c0_9], %16 {strides = array<i32>} : memref<256x24xf32, #tpu.memory_space<vmem>>, vector<256x24xf32>,
    return
  }
  func.func @transform_0(%arg0: i32) -> (i32, i32) {
    %c0_i32 = arith.constant 0 : i32
    %c0_i32_0 = arith.constant 0 : i32
    return %arg0, %c0_i32 : i32, i32
  }
  func.func @transform_1(%arg0: i32) -> (i32, i32) {
    %c0_i32 = arith.constant 0 : i32
    %c0_i32_0 = arith.constant 0 : i32
    return %arg0, %c0_i32 : i32, i32
  }
  func.func @transform_2(%arg0: i32) -> (i32, i32) {
    %c0_i32 = arith.constant 0 : i32
    %c0_i32_0 = arith.constant 0 : i32
    return %arg0, %c0_i32 : i32, i32
  }
  func.func @transform_3(%arg0: i32) -> (i32, i32) {
    %c0_i32 = arith.constant 0 : i32
    %c0_i32_0 = arith.constant 0 : i32
    return %arg0, %c0_i32 : i32, i32
  }
  func.func @transform_4(%arg0: i32) -> (i32, i32) {
    %c0_i32 = arith.constant 0 : i32
    %c0_i32_0 = arith.constant 0 : i32
    return %arg0, %c0_i32 : i32, i32
  }
}

</mosaic_0001>

<bundles_post_ra>
// kernel: flood_block.21
= control target key start
LH: loop header
LB: loop body
LE: loop exit
PB: predicated region body
PF: predicated region fallthrough
CT: control target
= control target key end

     0   :  { %vm445_vm0 = vcmask 1045504   ;;  %vm156_vm1 = vcmask 48128   ;;  %s3895_s29 = smov 20   ;;  %s6106_s2 = inlined_call_operand.vmem [shape: f32[6,8], index: 2, kind: input, shape index: {}]   ;;  %s6107_s1 = inlined_call_operand.vmem [shape: f32[3,256,6], index: 1, kind: input, shape index: {}]   ;;  %s6108_s4 = inlined_call_operand.vmem [shape: f32[28,16], index: 4, kind: input, shape index: {}]   ;;  %s6109_s3 = inlined_call_operand.vmem [shape: f32[8,8], index: 3, kind: input, shape index: {}]   ;;  %s6110_s0 = inlined_call_operand.vmem [shape: f32[256,20], index: 0, kind: input, shape index: {}]   ;;  %s6111_s5 = inlined_call_operand.vmem [shape: f32[1,16], index: 5, kind: input, shape index: {}]   ;;  %s6112_s6 = inlined_call_operand.vmem [shape: f32[256,16], index: 6, kind: output, shape index: {0}]   ;;  %s6113_s7 = inlined_call_operand.vmem [shape: f32[3,256,8], index: 7, kind: output, shape index: {1}]  }
   0x1   :  { %v155_v0 = vld [vmem:[%s6106_s2] sm:$0x3f]  ;;  %v58_v2 = vld [vmem:[%s6107_s1 + $0x8] sm:$0xff]  ;;  %v59_v3 = vld [vmem:[%s6107_s1 + $0x10] sm:$0xff] }
   0x2   :  { %v57_v1 = vld [vmem:[%s6107_s1] sm:$0xff]  ;;  %3467 = vmatprep.subr.msk.mxu0 %vm445_vm0, %v155_v0  ;;  %v60_v4 = vld [vmem:[%s6107_s1 + $0x18] sm:$0xff]  ;;  %v62_v6 = vld [vmem:[%s6107_s1 + $0x28] sm:$0xff] }
   0x3   :  { %3469 = vmatprep.mubr.msk.f32.mxu0 %vm156_vm1, %v57_v1  ;;  %3468 = vmatpush3.msk.msra.mxu0 %vm445_vm0, %v155_v0  ;;  %v61_v5 = vld [vmem:[%s6107_s1 + $0x20] sm:$0xff]  ;;  %v63_v7 = vld [vmem:[%s6107_s1 + $0x30] sm:$0xff]  ;;  %v64_v8 = vld [vmem:[%s6107_s1 + $0x38] sm:$0xff] }
   0x4   :  { %3470 = vmatmul.mubr.msk.f32.vlgmr.msra.gmra.mrb[0].mxu0 %vm156_vm1, %v58_v2  ;;  %v65_v9 = vld [vmem:[%s6107_s1 + $0x40] sm:$0xff]  ;;  %v66_v10 = vld [vmem:[%s6107_s1 + $0x48] sm:$0xff]  ;;  %v67_v11 = vld [vmem:[%s6107_s1 + $0x50] sm:$0xff] }
   0x5   :  { %3472 = vmatprep.mubr.msk.f32.mxu0 %vm156_vm1, %v59_v3  ;;  %v68_v12 = vld [vmem:[%s6107_s1 + $0x58] sm:$0xff]  ;;  %v69_v13 = vld [vmem:[%s6107_s1 + $0x60] sm:$0xff]  ;;  %v70_v14 = vld [vmem:[%s6107_s1 + $0x68] sm:$0xff] }
   0x6   :  { %v71_v15 = vld [vmem:[%s6107_s1 + $0x70] sm:$0xff]  ;;  %v72_v16 = vld [vmem:[%s6107_s1 + $0x78] sm:$0xff]  ;;  %v73_v17 = vld [vmem:[%s6107_s1 + $0x80] sm:$0xff] }
   0x7   :  { %v74_v18 = vld [vmem:[%s6107_s1 + $0x88] sm:$0xff]  ;;  %v75_v19 = vld [vmem:[%s6107_s1 + $0x90] sm:$0xff]  ;;  %v76_v20 = vld [vmem:[%s6107_s1 + $0x98] sm:$0xff] }
   0x8   :  { %3473 = vmatmul.mubr.msk.f32.gmra.mrb[2].mxu0 %vm156_vm1, %v60_v4  ;;  %v77_v21 = vld [vmem:[%s6107_s1 + $0xa0] sm:$0xff]  ;;  %v78_v22 = vld [vmem:[%s6107_s1 + $0xa8] sm:$0xff]  ;;  %v79_v23 = vld [vmem:[%s6107_s1 + $0xb0] sm:$0xff] }
   0x9   :  { %3475 = vmatprep.mubr.msk.f32.mxu0 %vm156_vm1, %v61_v5  ;;  %v80_v24 = vld [vmem:[%s6107_s1 + $0xb8] sm:$0xff]  ;;  %v81_v25 = vld [vmem:[%s6107_s1 + $0xc0] sm:$0xff]  ;;  %v82_v26 = vld [vmem:[%s6107_s1 + $0xc8] sm:$0xff] }
   0xa   :  { %v83_v27 = vld [vmem:[%s6107_s1 + $0xd0] sm:$0xff]  ;;  %v84_v28 = vld [vmem:[%s6107_s1 + $0xd8] sm:$0xff]  ;;  %v85_v29 = vld [vmem:[%s6107_s1 + $0xe0] sm:$0xff] }
   0xb   :  { %v86_v30 = vld [vmem:[%s6107_s1 + $0xe8] sm:$0xff]  ;;  %v87_v31 = vld [vmem:[%s6107_s1 + $0xf0] sm:$0xff]  ;;  %v88_v32 = vld [vmem:[%s6107_s1 + $0xf8] sm:$0xff] }
   0xc   :  { %3476 = vmatmul.mubr.msk.f32.gmra.mrb[4].mxu0 %vm156_vm1, %v62_v6  ;;  %v2882_v33 = vld [vmem:[%s6107_s1 + $0x100] sm:$0xff]  ;;  %v2883_v34 = vld [vmem:[%s6107_s1 + $0x108] sm:$0xff]  ;;  %v2884_v35 = vld [vmem:[%s6107_s1 + $0x110] sm:$0xff] }
   0xd   :  { %3478 = vmatprep.mubr.msk.f32.mxu0 %vm156_vm1, %v63_v7  ;;  %v2885_v36 = vld [vmem:[%s6107_s1 + $0x118] sm:$0xff]  ;;  %v2886_v37 = vld [vmem:[%s6107_s1 + $0x120] sm:$0xff]  ;;  %v2887_v38 = vld [vmem:[%s6107_s1 + $0x128] sm:$0xff] }
   0xe   :  { %v2888_v39 = vld [vmem:[%s6107_s1 + $0x130] sm:$0xff]  ;;  %v2889_v40 = vld [vmem:[%s6107_s1 + $0x138] sm:$0xff]  ;;  %v2890_v41 = vld [vmem:[%s6107_s1 + $0x140] sm:$0xff] }
   0xf   :  { %v2891_v42 = vld [vmem:[%s6107_s1 + $0x148] sm:$0xff]  ;;  %v2892_v43 = vld [vmem:[%s6107_s1 + $0x150] sm:$0xff]  ;;  %v2893_v44 = vld [vmem:[%s6107_s1 + $0x158] sm:$0xff] }
  0x10   :  { %3479 = vmatmul.mubr.msk.f32.gmra.mrb[6].mxu0 %vm156_vm1, %v64_v8  ;;  %v2894_v45 = vld [vmem:[%s6107_s1 + $0x160] sm:$0xff]  ;;  %v2895_v46 = vld [vmem:[%s6107_s1 + $0x168] sm:$0xff]  ;;  %v2896_v47 = vld [vmem:[%s6107_s1 + $0x170] sm:$0xff] }
  0x11   :  { %3481 = vmatprep.mubr.msk.f32.mxu0 %vm156_vm1, %v65_v9  ;;  %v2897_v48 = vld [vmem:[%s6107_s1 + $0x178] sm:$0xff]  ;;  %v2898_v49 = vld [vmem:[%s6107_s1 + $0x180] sm:$0xff]  ;;  %v2899_v50 = vld [vmem:[%s6107_s1 + $0x188] sm:$0xff] }
  0x12   :  { %v2900_v51 = vld [vmem:[%s6107_s1 + $0x190] sm:$0xff]  ;;  %v2901_v52 = vld [vmem:[%s6107_s1 + $0x198] sm:$0xff]  ;;  %v2902_v53 = vld [vmem:[%s6107_s1 + $0x1a0] sm:$0xff] }
  0x13   :  { %v2903_v54 = vld [vmem:[%s6107_s1 + $0x1a8] sm:$0xff]  ;;  %v2904_v55 = vld [vmem:[%s6107_s1 + $0x1b0] sm:$0xff]  ;;  %v2905_v56 = vld [vmem:[%s6107_s1 + $0x1b8] sm:$0xff] }
  0x14   :  { %3482 = vmatmul.mubr.msk.f32.gmra.mrb[8].mxu0 %vm156_vm1, %v66_v10  ;;  %v2906_v57 = vld [vmem:[%s6107_s1 + $0x1c0] sm:$0xff]  ;;  %v2907_v58 = vld [vmem:[%s6107_s1 + $0x1c8] sm:$0xff]  ;;  %v2908_v59 = vld [vmem:[%s6107_s1 + $0x1d0] sm:$0xff] }
  0x15   :  { %3484 = vmatprep.mubr.msk.f32.mxu0 %vm156_vm1, %v67_v11  ;;  %v2909_v60 = vld [vmem:[%s6107_s1 + $0x1d8] sm:$0xff]  ;;  %v2910_v61 = vld [vmem:[%s6107_s1 + $0x1e0] sm:$0xff]  ;;  %v2911_v62 = vld [vmem:[%s6107_s1 + $0x1e8] sm:$0xff] }
  0x16   :  { %v2912_v63 = vld [vmem:[%s6107_s1 + $0x1f0] sm:$0xff]  ;;  %v2913_v0 = vld [vmem:[%s6107_s1 + $0x1f8] sm:$0xff]  ;;  %v2914_v1 = vld [vmem:[%s6107_s1 + $0x200] sm:$0xff] }
  0x17   :  { %v2915_v2 = vld [vmem:[%s6107_s1 + $0x208] sm:$0xff]  ;;  %v2916_v3 = vld [vmem:[%s6107_s1 + $0x210] sm:$0xff]  ;;  %v2917_v4 = vld [vmem:[%s6107_s1 + $0x218] sm:$0xff] }
  0x18   :  { %3485 = vmatmul.mubr.msk.f32.gmra.mrb[10].mxu0 %vm156_vm1, %v68_v12  ;;  %v2918_v5 = vld [vmem:[%s6107_s1 + $0x220] sm:$0xff]  ;;  %v2919_v6 = vld [vmem:[%s6107_s1 + $0x228] sm:$0xff]  ;;  %v2920_v7 = vld [vmem:[%s6107_s1 + $0x230] sm:$0xff] }
  0x19   :  { %3487 = vmatprep.mubr.msk.f32.mxu0 %vm156_vm1, %v69_v13  ;;  %v2921_v8 = vld [vmem:[%s6107_s1 + $0x238] sm:$0xff]  ;;  %v2922_v9 = vld [vmem:[%s6107_s1 + $0x240] sm:$0xff]  ;;  %v2923_v10 = vld [vmem:[%s6107_s1 + $0x248] sm:$0xff] }
  0x1a   :  { %v2924_v11 = vld [vmem:[%s6107_s1 + $0x250] sm:$0xff]  ;;  %v2925_v12 = vld [vmem:[%s6107_s1 + $0x258] sm:$0xff]  ;;  %v2926_v13 = vld [vmem:[%s6107_s1 + $0x260] sm:$0xff] }
  0x1c   :  { %3488 = vmatmul.mubr.msk.f32.gmra.mrb[12].mxu0 %vm156_vm1, %v70_v14  ;;  %v2927_v14 = vld [vmem:[%s6107_s1 + $0x268] sm:$0xff] }
  0x1d   :  { %3490 = vmatprep.mubr.msk.f32.mxu0 %vm156_vm1, %v71_v15  ;;  %v2928_v15 = vld [vmem:[%s6107_s1 + $0x270] sm:$0xff] }
  0x20   :  { %3491 = vmatmul.mubr.msk.f32.gmra.mrb[14].mxu0 %vm156_vm1, %v72_v16  ;;  %v2929_v16 = vld [vmem:[%s6107_s1 + $0x278] sm:$0xff] }
  0x21   :  { %3493 = vmatprep.mubr.msk.f32.mxu0 %vm156_vm1, %v73_v17  ;;  %v2930_v17 = vld [vmem:[%s6107_s1 + $0x280] sm:$0xff] }
  0x24   :  { %3494 = vmatmul.mubr.msk.f32.gmra.mrb[16].mxu0 %vm156_vm1, %v74_v18  ;;  %v2931_v18 = vld [vmem:[%s6107_s1 + $0x288] sm:$0xff] }
  0x25   :  { %3496 = vmatprep.mubr.msk.f32.mxu0 %vm156_vm1, %v75_v19  ;;  %v2932_v19 = vld [vmem:[%s6107_s1 + $0x290] sm:$0xff] }
  0x28   :  { %3497 = vmatmul.mubr.msk.f32.gmra.mrb[18].mxu0 %vm156_vm1, %v76_v20  ;;  %v2933_v20 = vld [vmem:[%s6107_s1 + $0x298] sm:$0xff] }
  0x29   :  { %3499 = vmatprep.mubr.msk.f32.mxu0 %vm156_vm1, %v77_v21  ;;  %v2934_v21 = vld [vmem:[%s6107_s1 + $0x2a0] sm:$0xff] }
  0x2c   :  { %3500 = vmatmul.mubr.msk.f32.gmra.mrb[20].mxu0 %vm156_vm1, %v78_v22  ;;  %v2935_v22 = vld [vmem:[%s6107_s1 + $0x2a8] sm:$0xff] }
  0x2d   :  { %3502 = vmatprep.mubr.msk.f32.mxu0 %vm156_vm1, %v79_v23  ;;  %v2936_v23 = vld [vmem:[%s6107_s1 + $0x2b0] sm:$0xff] }
  0x30   :  { %3503 = vmatmul.mubr.msk.f32.gmra.mrb[22].mxu0 %vm156_vm1, %v80_v24  ;;  %v2937_v24 = vld [vmem:[%s6107_s1 + $0x2b8] sm:$0xff] }
  0x31   :  { %3505 = vmatprep.mubr.msk.f32.mxu0 %vm156_vm1, %v81_v25  ;;  %v2938_v25 = vld [vmem:[%s6107_s1 + $0x2c0] sm:$0xff] }
  0x34   :  { %3506 = vmatmul.mubr.msk.f32.gmra.mrb[24].mxu0 %vm156_vm1, %v82_v26  ;;  %v2939_v26 = vld [vmem:[%s6107_s1 + $0x2c8] sm:$0xff] }
  0x35   :  { %3508 = vmatprep.mubr.msk.f32.mxu0 %vm156_vm1, %v83_v27  ;;  %v2940_v27 = vld [vmem:[%s6107_s1 + $0x2d0] sm:$0xff] }
  0x38   :  { %3509 = vmatmul.mubr.msk.f32.gmra.mrb[26].mxu0 %vm156_vm1, %v84_v28  ;;  %v2941_v28 = vld [vmem:[%s6107_s1 + $0x2d8] sm:$0xff] }
  0x39   :  { %3511 = vmatprep.mubr.msk.f32.mxu0 %vm156_vm1, %v85_v29  ;;  %v2942_v29 = vld [vmem:[%s6107_s1 + $0x2e0] sm:$0xff] }
  0x3c   :  { %3512 = vmatmul.mubr.msk.f32.gmra.mrb[28].mxu0 %vm156_vm1, %v86_v30  ;;  %v2943_v30 = vld [vmem:[%s6107_s1 + $0x2e8] sm:$0xff] }
  0x3d   :  { %3514 = vmatprep.mubr.msk.f32.mxu0 %vm156_vm1, %v87_v31  ;;  %v2944_v31 = vld [vmem:[%s6107_s1 + $0x2f0] sm:$0xff] }
  0x40   :  { %3515 = vmatmul.mubr.msk.f32.gmra.mrb[30].mxu0 %vm156_vm1, %v88_v32  ;;  %v2945_v32 = vld [vmem:[%s6107_s1 + $0x2f8] sm:$0xff] }
  0x41   :  { %3517 = vmatprep.mubr.msk.f32.mxu0 %vm156_vm1, %v2882_v33 }
  0x44   :  { %3518 = vmatmul.mubr.msk.f32.gmra.mrb[32].mxu0 %vm156_vm1, %v2883_v34 }
  0x45   :  { %3520 = vmatprep.mubr.msk.f32.mxu0 %vm156_vm1, %v2884_v35 }
  0x48   :  { %3521 = vmatmul.mubr.msk.f32.gmra.mrb[34].mxu0 %vm156_vm1, %v2885_v36 }
  0x49   :  { %3523 = vmatprep.mubr.msk.f32.mxu0 %vm156_vm1, %v2886_v37 }
  0x4c   :  { %3524 = vmatmul.mubr.msk.f32.gmra.mrb[36].mxu0 %vm156_vm1, %v2887_v38 }
  0x4d   :  { %3526 = vmatprep.mubr.msk.f32.mxu0 %vm156_vm1, %v2888_v39 }
  0x50   :  { %3527 = vmatmul.mubr.msk.f32.gmra.mrb[38].mxu0 %vm156_vm1, %v2889_v40 }
  0x51   :  { %3529 = vmatprep.mubr.msk.f32.mxu0 %vm156_vm1, %v2890_v41 }
  0x54   :  { %3530 = vmatmul.mubr.msk.f32.gmra.mrb[40].mxu0 %vm156_vm1, %v2891_v42 }
  0x55   :  { %3532 = vmatprep.mubr.msk.f32.mxu0 %vm156_vm1, %v2892_v43 }
  0x58   :  { %3533 = vmatmul.mubr.msk.f32.gmra.mrb[42].mxu0 %vm156_vm1, %v2893_v44 }
  0x59   :  { %3535 = vmatprep.mubr.msk.f32.mxu0 %vm156_vm1, %v2894_v45 }
  0x5c   :  { %3536 = vmatmul.mubr.msk.f32.gmra.mrb[44].mxu0 %vm156_vm1, %v2895_v46 }
  0x5d   :  { %3538 = vmatprep.mubr.msk.f32.mxu0 %vm156_vm1, %v2896_v47 }
  0x60   :  { %3539 = vmatmul.mubr.msk.f32.gmra.mrb[46].mxu0 %vm156_vm1, %v2897_v48 }
  0x61   :  { %3541 = vmatprep.mubr.msk.f32.mxu0 %vm156_vm1, %v2898_v49 }
  0x64   :  { %3542 = vmatmul.mubr.msk.f32.gmra.mrb[48].mxu0 %vm156_vm1, %v2899_v50 }
  0x65   :  { %3544 = vmatprep.mubr.msk.f32.mxu0 %vm156_vm1, %v2900_v51 }
  0x68   :  { %3545 = vmatmul.mubr.msk.f32.gmra.mrb[50].mxu0 %vm156_vm1, %v2901_v52 }
  0x69   :  { %3547 = vmatprep.mubr.msk.f32.mxu0 %vm156_vm1, %v2902_v53 }
  0x6c   :  { %3548 = vmatmul.mubr.msk.f32.gmra.mrb[52].mxu0 %vm156_vm1, %v2903_v54 }
  0x6d   :  { %3550 = vmatprep.mubr.msk.f32.mxu0 %vm156_vm1, %v2904_v55 }
  0x70   :  { %3551 = vmatmul.mubr.msk.f32.gmra.mrb[54].mxu0 %vm156_vm1, %v2905_v56 }
  0x71   :  { %3553 = vmatprep.mubr.msk.f32.mxu0 %vm156_vm1, %v2906_v57 }
  0x74   :  { %3554 = vmatmul.mubr.msk.f32.gmra.mrb[56].mxu0 %vm156_vm1, %v2907_v58 }
  0x75   :  { %3556 = vmatprep.mubr.msk.f32.mxu0 %vm156_vm1, %v2908_v59 }
  0x78   :  { %3557 = vmatmul.mubr.msk.f32.gmra.mrb[58].mxu0 %vm156_vm1, %v2909_v60 }
  0x79   :  { %3559 = vmatprep.mubr.msk.f32.mxu0 %vm156_vm1, %v2910_v61 }
  0x7c   :  { %3560 = vmatmul.mubr.msk.f32.gmra.mrb[60].mxu0 %vm156_vm1, %v2911_v62 }
  0x7d   :  { %3562 = vmatprep.mubr.msk.f32.mxu0 %vm156_vm1, %v2912_v63 }
  0x80   :  { %3563 = vmatmul.mubr.msk.f32.gmra.mrb[62].mxu0 %vm156_vm1, %v2913_v0 }
  0x81   :  { %3565 = vmatprep.mubr.msk.f32.mxu0 %vm156_vm1, %v2914_v1 }
  0x84   :  { %3566 = vmatmul.mubr.msk.f32.gmra.mrb[64].mxu0 %vm156_vm1, %v2915_v2 }
  0x85   :  { %3568 = vmatprep.mubr.msk.f32.mxu0 %vm156_vm1, %v2916_v3 }
  0x88   :  { %3569 = vmatmul.mubr.msk.f32.gmra.mrb[66].mxu0 %vm156_vm1, %v2917_v4 }
  0x89   :  { %3571 = vmatprep.mubr.msk.f32.mxu0 %vm156_vm1, %v2918_v5 }
  0x8c   :  { %3572 = vmatmul.mubr.msk.f32.gmra.mrb[68].mxu0 %vm156_vm1, %v2919_v6 }
  0x8d   :  { %3574 = vmatprep.mubr.msk.f32.mxu0 %vm156_vm1, %v2920_v7 }
  0x90   :  { %3575 = vmatmul.mubr.msk.f32.gmra.mrb[70].mxu0 %vm156_vm1, %v2921_v8 }
  0x91   :  { %3577 = vmatprep.mubr.msk.f32.mxu0 %vm156_vm1, %v2922_v9 }
  0x94   :  { %3578 = vmatmul.mubr.msk.f32.gmra.mrb[72].mxu0 %vm156_vm1, %v2923_v10 }
  0x95   :  { %3580 = vmatprep.mubr.msk.f32.mxu0 %vm156_vm1, %v2924_v11 }
  0x98   :  { %3581 = vmatmul.mubr.msk.f32.gmra.mrb[74].mxu0 %vm156_vm1, %v2925_v12 }
  0x99   :  { %3583 = vmatprep.mubr.msk.f32.mxu0 %vm156_vm1, %v2926_v13 }
  0x9c   :  { %3584 = vmatmul.mubr.msk.f32.gmra.mrb[76].mxu0 %vm156_vm1, %v2927_v14 }
  0x9d   :  { %3586 = vmatprep.mubr.msk.f32.mxu0 %vm156_vm1, %v2928_v15 }
  0xa0   :  { %3587 = vmatmul.mubr.msk.f32.gmra.mrb[78].mxu0 %vm156_vm1, %v2929_v16 }
  0xa1   :  { %3589 = vmatprep.mubr.msk.f32.mxu0 %vm156_vm1, %v2930_v17 }
  0xa4   :  { %3590 = vmatmul.mubr.msk.f32.gmra.mrb[80].mxu0 %vm156_vm1, %v2931_v18 }
  0xa5   :  { %3592 = vmatprep.mubr.msk.f32.mxu0 %vm156_vm1, %v2932_v19 }
  0xa8   :  { %3593 = vmatmul.mubr.msk.f32.gmra.mrb[82].mxu0 %vm156_vm1, %v2933_v20 }
  0xa9   :  { %3595 = vmatprep.mubr.msk.f32.mxu0 %vm156_vm1, %v2934_v21 }
  0xac   :  { %3596 = vmatmul.mubr.msk.f32.gmra.mrb[84].mxu0 %vm156_vm1, %v2935_v22 }
  0xad   :  { %3598 = vmatprep.mubr.msk.f32.mxu0 %vm156_vm1, %v2936_v23 }
  0xb0   :  { %3599 = vmatmul.mubr.msk.f32.gmra.mrb[86].mxu0 %vm156_vm1, %v2937_v24 }
  0xb1   :  { %3601 = vmatprep.mubr.msk.f32.mxu0 %vm156_vm1, %v2938_v25 }
  0xb4   :  { %3602 = vmatmul.mubr.msk.f32.gmra.mrb[88].mxu0 %vm156_vm1, %v2939_v26 }
  0xb5   :  { %3604 = vmatprep.mubr.msk.f32.mxu0 %vm156_vm1, %v2940_v27 }
  0xb8   :  { %3605 = vmatmul.mubr.msk.f32.gmra.mrb[90].mxu0 %vm156_vm1, %v2941_v28 }
  0xb9   :  { %3607 = vmatprep.mubr.msk.f32.mxu0 %vm156_vm1, %v2942_v29 }
  0xbc   :  { %3608 = vmatmul.mubr.msk.f32.gmra.mrb[92].mxu0 %vm156_vm1, %v2943_v30 }
  0xbd   :  { %3610 = vmatprep.mubr.msk.f32.mxu0 %vm156_vm1, %v2944_v31 }
  0xc0   :  { %3611 = vmatmul.mubr.msk.f32.gmra.mrb[94].mxu0 %vm156_vm1, %v2945_v32 }
  0xd7   :  { %v4324_v33 = vpop.f32.mrb[0].mxu0 }
  0xd8   :  { %v4326_v34 = vpop.f32.mrb[1].mxu0  ;;  %v995_v2 = vmul.f32 %v4324_v33, %v4324_v33 }
  0xd9   :  { %v994_v5 = vmul.f32 %v4326_v34, %v4326_v34 }
  0xdb   :  { %v4328_v35 = vpop.f32.mrb[2].mxu0 }
  0xdc   :  { %v4330_v36 = vpop.f32.mrb[3].mxu0  ;;  %v997_v10 = vmul.f32 %v4328_v35, %v4328_v35 }
  0xdd   :  { %v996_v13 = vmul.f32 %v4330_v36, %v4330_v36 }
  0xdf   :  { %v4332_v37 = vpop.f32.mrb[4].mxu0 }
  0xe0   :  { %v4334_v38 = vpop.f32.mrb[5].mxu0  ;;  %v999_v18 = vmul.f32 %v4332_v37, %v4332_v37 }
  0xe1   :  { %v998_v21 = vmul.f32 %v4334_v38, %v4334_v38 }
  0xe3   :  { %v4336_v39 = vpop.f32.mrb[6].mxu0 }
  0xe4   :  { %v4338_v40 = vpop.f32.mrb[7].mxu0  ;;  %v1001_v26 = vmul.f32 %v4336_v39, %v4336_v39 }
  0xe5   :  { %v1000_v29 = vmul.f32 %v4338_v40, %v4338_v40 }
  0xe7   :  { %v4340_v41 = vpop.f32.mrb[8].mxu0 }
  0xe8   :  { %v4342_v42 = vpop.f32.mrb[9].mxu0 }
  0xeb   :  { %v4344_v43 = vpop.f32.mrb[10].mxu0 }
  0xec   :  { %v4346_v44 = vpop.f32.mrb[11].mxu0 }
  0xef   :  { %v4348_v45 = vpop.f32.mrb[12].mxu0 }
  0xf0   :  { %6195 = vst [vmem:[#allocation2_spill] sm:$0xff] %v4348_v45  ;;  %v4350_v46 = vpop.f32.mrb[13].mxu0 }
  0xf3   :  { %v4352_v47 = vpop.f32.mrb[14].mxu0 }
  0xf4   :  { %6196 = vst [vmem:[#allocation3_spill] sm:$0xff] %v4352_v47  ;;  %v4354_v48 = vpop.f32.mrb[15].mxu0 }
  0xf5   :  { %6197 = vst [vmem:[#allocation4_spill] sm:$0xff] %v4354_v48 }
  0xf7   :  { %v4356_v49 = vpop.f32.mrb[16].mxu0 }
  0xf8   :  { %6198 = vst [vmem:[#allocation5_spill] sm:$0xff] %v4356_v49  ;;  %v4358_v50 = vpop.f32.mrb[17].mxu0 }
  0xf9   :  { %6199 = vst [vmem:[#allocation6_spill] sm:$0xff] %v4358_v50 }
  0xfb   :  { %v4360_v51 = vpop.f32.mrb[18].mxu0 }
  0xfc   :  { %6200 = vst [vmem:[#allocation7_spill] sm:$0xff] %v4360_v51  ;;  %v4362_v52 = vpop.f32.mrb[19].mxu0 }
  0xfd   :  { %6201 = vst [vmem:[#allocation8_spill] sm:$0xff] %v4362_v52 }
  0xff   :  { %v4364_v53 = vpop.f32.mrb[20].mxu0 }
 0x100   :  { %6202 = vst [vmem:[#allocation9_spill] sm:$0xff] %v4364_v53  ;;  %v4366_v54 = vpop.f32.mrb[21].mxu0 }
 0x101   :  { %6203 = vst [vmem:[#allocation10_spill] sm:$0xff] %v4366_v54 }
 0x103   :  { %v4368_v55 = vpop.f32.mrb[22].mxu0 }
 0x104   :  { %6204 = vst [vmem:[#allocation11_spill] sm:$0xff] %v4368_v55  ;;  %v4370_v56 = vpop.f32.mrb[23].mxu0 }
 0x105   :  { %6205 = vst [vmem:[#allocation12_spill] sm:$0xff] %v4370_v56 }
 0x107   :  { %v4372_v57 = vpop.f32.mrb[24].mxu0 }
 0x108   :  { %6206 = vst [vmem:[#allocation13_spill] sm:$0xff] %v4372_v57  ;;  %v4374_v58 = vpop.f32.mrb[25].mxu0 }
 0x109   :  { %6207 = vst [vmem:[#allocation14_spill] sm:$0xff] %v4374_v58 }
 0x10b   :  { %v4376_v59 = vpop.f32.mrb[26].mxu0 }
 0x10c   :  { %6208 = vst [vmem:[#allocation15_spill] sm:$0xff] %v4376_v59  ;;  %v4378_v60 = vpop.f32.mrb[27].mxu0 }
 0x10d   :  { %6209 = vst [vmem:[#allocation16_spill] sm:$0xff] %v4378_v60 }
 0x10f   :  { %v4380_v61 = vpop.f32.mrb[28].mxu0 }
 0x110   :  { %6210 = vst [vmem:[#allocation17_spill] sm:$0xff] %v4380_v61  ;;  %v4382_v62 = vpop.f32.mrb[29].mxu0 }
 0x111   :  { %6211 = vst [vmem:[#allocation18_spill] sm:$0xff] %v4382_v62 }
 0x113   :  { %v4384_v63 = vpop.f32.mrb[30].mxu0 }
 0x114   :  { %6212 = vst [vmem:[#allocation19_spill] sm:$0xff] %v4384_v63  ;;  %v4386_v0 = vpop.f32.mrb[31].mxu0 }
 0x115   :  { %6213 = vst [vmem:[#allocation20_spill] sm:$0xff] %v4386_v0 }
 0x117   :  { %v4388_v1 = vpop.f32.mrb[32].mxu0 }
 0x118   :  { %6214 = vst [vmem:[#allocation21_spill] sm:$0xff] %v4388_v1  ;;  %v1027_v3 = vmul.f32 %v4388_v1, %v4388_v1  ;;  %v4394_v4 = vpop.f32.mrb[33].mxu0 }
 0x119   :  { %6215 = vst [vmem:[#allocation22_spill] sm:$0xff] %v4394_v4  ;;  %v1026_v6 = vmul.f32 %v4394_v4, %v4394_v4  ;;  %v1016_v4 = vmul.f32 %v4370_v56, %v4370_v56  ;;  %v1018_v56 = vmul.f32 %v4374_v58, %v4374_v58  ;;  %v1020_v58 = vmul.f32 %v4378_v60, %v4378_v60 }
 0x11a   :  { %v4400_v7 = vadd.f32 %v1027_v3, %v995_v2  ;;  %v1003_v3 = vmul.f32 %v4340_v41, %v4340_v41  ;;  %v1022_v60 = vmul.f32 %v4382_v62, %v4382_v62  ;;  %v1025_v62 = vmul.f32 %v4384_v63, %v4384_v63 }
 0x11b   :  { %v4402_v8 = vadd.f32 %v1026_v6, %v994_v5  ;;  %v4404_v9 = vpop.f32.mrb[34].mxu0 }
 0x11c   :  { %6216 = vst [vmem:[#allocation23_spill] sm:$0xff] %v4404_v9  ;;  %v1029_v11 = vmul.f32 %v4404_v9, %v4404_v9  ;;  %v4410_v12 = vpop.f32.mrb[35].mxu0 }
 0x11d   :  { %6217 = vst [vmem:[#allocation24_spill] sm:$0xff] %v4410_v12  ;;  %v1028_v14 = vmul.f32 %v4410_v12, %v4410_v12  ;;  %v1014_v12 = vmul.f32 %v4366_v54, %v4366_v54 }
 0x11e   :  { %v4416_v15 = vadd.f32 %v1029_v11, %v997_v10  ;;  %v1002_v10 = vmul.f32 %v4342_v42, %v4342_v42 }
 0x11f   :  { %v4418_v16 = vadd.f32 %v1028_v14, %v996_v13  ;;  %v4420_v17 = vpop.f32.mrb[36].mxu0 }
 0x120   :  { %6218 = vst [vmem:[#allocation25_spill] sm:$0xff] %v4420_v17  ;;  %v1031_v19 = vmul.f32 %v4420_v17, %v4420_v17  ;;  %v4426_v20 = vpop.f32.mrb[37].mxu0 }
 0x121   :  { %6219 = vst [vmem:[#allocation26_spill] sm:$0xff] %v4426_v20  ;;  %v1030_v22 = vmul.f32 %v4426_v20, %v4426_v20  ;;  %v1012_v20 = vmul.f32 %v4362_v52, %v4362_v52 }
 0x122   :  { %v4432_v23 = vadd.f32 %v1031_v19, %v999_v18  ;;  %v1005_v19 = vmul.f32 %v4344_v43, %v4344_v43 }
 0x123   :  { %v4434_v24 = vadd.f32 %v1030_v22, %v998_v21  ;;  %v4436_v25 = vpop.f32.mrb[38].mxu0 }
 0x124   :  { %6220 = vst [vmem:[#allocation27_spill] sm:$0xff] %v4436_v25  ;;  %v1033_v27 = vmul.f32 %v4436_v25, %v4436_v25  ;;  %v4442_v28 = vpop.f32.mrb[39].mxu0 }
 0x125   :  { %6221 = vst [vmem:[#allocation28_spill] sm:$0xff] %v4442_v28  ;;  %v1032_v30 = vmul.f32 %v4442_v28, %v4442_v28  ;;  %v1010_v28 = vmul.f32 %v4358_v50, %v4358_v50 }
 0x126   :  { %v4448_v31 = vadd.f32 %v1033_v27, %v1001_v26  ;;  %v1004_v26 = vmul.f32 %v4346_v44, %v4346_v44 }
 0x127   :  { %v4450_v32 = vadd.f32 %v1032_v30, %v1000_v29  ;;  %v4452_v2 = vpop.f32.mrb[40].mxu0 }
 0x128   :  { %6222 = vst [vmem:[#allocation29_spill] sm:$0xff] %v4452_v2  ;;  %v1035_v5 = vmul.f32 %v4452_v2, %v4452_v2  ;;  %v4458_v6 = vpop.f32.mrb[41].mxu0 }
 0x129   :  { %6223 = vst [vmem:[#allocation30_spill] sm:$0xff] %v4458_v6  ;;  %v1034_v11 = vmul.f32 %v4458_v6, %v4458_v6  ;;  %v1008_v6 = vmul.f32 %v4354_v48, %v4354_v48 }
 0x12a   :  { %v4464_v13 = vadd.f32 %v1035_v5, %v1003_v3  ;;  %v1007_v5 = vmul.f32 %v4348_v45, %v4348_v45 }
 0x12b   :  { %v4466_v14 = vadd.f32 %v1034_v11, %v1002_v10  ;;  %v4468_v18 = vpop.f32.mrb[42].mxu0 }
 0x12c   :  { %6224 = vst [vmem:[#allocation31_spill] sm:$0xff] %v4468_v18  ;;  %v1037_v21 = vmul.f32 %v4468_v18, %v4468_v18  ;;  %v4474_v22 = vpop.f32.mrb[43].mxu0  ;;  %v1006_v18 = vmul.f32 %v4350_v46, %v4350_v46 }
 0x12d   :  { %6225 = vst [vmem:[#allocation32_spill] sm:$0xff] %v4474_v22  ;;  %v1036_v27 = vmul.f32 %v4474_v22, %v4474_v22 }
 0x12e   :  { %v4480_v29 = vadd.f32 %v1037_v21, %v1005_v19 }
 0x12f   :  { %v4482_v30 = vadd.f32 %v1036_v27, %v1004_v26  ;;  %v4484_v3 = vpop.f32.mrb[44].mxu0  ;;  %v1009_v27 = vmul.f32 %v4352_v47, %v4352_v47 }
 0x130   :  { %6226 = vst [vmem:[#allocation33_spill] sm:$0xff] %v4484_v3  ;;  %v1039_v10 = vmul.f32 %v4484_v3, %v4484_v3  ;;  %v4490_v11 = vpop.f32.mrb[45].mxu0 }
 0x131   :  { %6227 = vst [vmem:[#allocation34_spill] sm:$0xff] %v4490_v11  ;;  %v1038_v22 = vmul.f32 %v4490_v11, %v4490_v11 }
 0x132   :  { %v4496_v19 = vadd.f32 %v1039_v10, %v1007_v5  ;;  %v1011_v10 = vmul.f32 %v4356_v49, %v4356_v49 }
 0x133   :  { %v4498_v21 = vadd.f32 %v1038_v22, %v1006_v18  ;;  %v4500_v26 = vpop.f32.mrb[46].mxu0 }
 0x134   :  { %6228 = vst [vmem:[#allocation35_spill] sm:$0xff] %v4500_v26  ;;  %v1041_v3 = vmul.f32 %v4500_v26, %v4500_v26  ;;  %v4506_v2 = vpop.f32.mrb[47].mxu0 }
 0x135   :  { %6229 = vst [vmem:[#allocation36_spill] sm:$0xff] %v4506_v2  ;;  %v1040_v11 = vmul.f32 %v4506_v2, %v4506_v2 }
 0x136   :  { %v4512_v5 = vadd.f32 %v1041_v3, %v1009_v27  ;;  %v1013_v27 = vmul.f32 %v4360_v51, %v4360_v51 }
 0x137   :  { %v4514_v18 = vadd.f32 %v1040_v11, %v1008_v6  ;;  %v4516_v22 = vpop.f32.mrb[48].mxu0 }
 0x138   :  { %6230 = vst [vmem:[#allocation37_spill] sm:$0xff] %v4516_v22  ;;  %v1043_v26 = vmul.f32 %v4516_v22, %v4516_v22  ;;  %v4522_v25 = vpop.f32.mrb[49].mxu0 }
 0x139   :  { %6231 = vst [vmem:[#allocation38_spill] sm:$0xff] %v4522_v25  ;;  %v1042_v2 = vmul.f32 %v4522_v25, %v4522_v25 }
 0x13a   :  { %v4528_v3 = vadd.f32 %v1043_v26, %v1011_v10  ;;  %v1015_v10 = vmul.f32 %v4364_v53, %v4364_v53 }
 0x13b   :  { %v4530_v6 = vadd.f32 %v1042_v2, %v1010_v28  ;;  %v4532_v11 = vpop.f32.mrb[50].mxu0 }
 0x13c   :  { %6232 = vst [vmem:[#allocation39_spill] sm:$0xff] %v4532_v11  ;;  %v1045_v22 = vmul.f32 %v4532_v11, %v4532_v11  ;;  %v4538_v17 = vpop.f32.mrb[51].mxu0 }
 0x13d   :  { %6233 = vst [vmem:[#allocation40_spill] sm:$0xff] %v4538_v17  ;;  %v1044_v25 = vmul.f32 %v4538_v17, %v4538_v17 }
 0x13e   :  { %v4544_v26 = vadd.f32 %v1045_v22, %v1013_v27  ;;  %v1017_v27 = vmul.f32 %v4368_v55, %v4368_v55 }
 0x13f   :  { %v4546_v28 = vadd.f32 %v1044_v25, %v1012_v20  ;;  %v4548_v2 = vpop.f32.mrb[52].mxu0 }
 0x140   :  { %6234 = vst [vmem:[#allocation41_spill] sm:$0xff] %v4548_v2  ;;  %v1047_v11 = vmul.f32 %v4548_v2, %v4548_v2  ;;  %v4554_v9 = vpop.f32.mrb[53].mxu0 }
 0x141   :  { %6235 = vst [vmem:[#allocation42_spill] sm:$0xff] %v4554_v9  ;;  %v1046_v17 = vmul.f32 %v4554_v9, %v4554_v9 }
 0x142   :  { %v4560_v22 = vadd.f32 %v1047_v11, %v1015_v10  ;;  %v1019_v10 = vmul.f32 %v4372_v57, %v4372_v57 }
 0x143   :  { %v4562_v20 = vadd.f32 %v1046_v17, %v1014_v12  ;;  %v4564_v25 = vpop.f32.mrb[54].mxu0 }
 0x144   :  { %6236 = vst [vmem:[#allocation43_spill] sm:$0xff] %v4564_v25  ;;  %v1049_v2 = vmul.f32 %v4564_v25, %v4564_v25  ;;  %v4570_v1 = vpop.f32.mrb[55].mxu0 }
 0x145   :  { %6237 = vst [vmem:[#allocation44_spill] sm:$0xff] %v4570_v1  ;;  %v1048_v9 = vmul.f32 %v4570_v1, %v4570_v1 }
 0x146   :  { %v4576_v11 = vadd.f32 %v1049_v2, %v1017_v27  ;;  %v1021_v27 = vmul.f32 %v4376_v59, %v4376_v59 }
 0x147   :  { %v4578_v12 = vadd.f32 %v1048_v9, %v1016_v4  ;;  %v4580_v17 = vpop.f32.mrb[56].mxu0 }
 0x148   :  { %6238 = vst [vmem:[#allocation45_spill] sm:$0xff] %v4580_v17  ;;  %v1051_v25 = vmul.f32 %v4580_v17, %v4580_v17  ;;  %v4586_v55 = vpop.f32.mrb[57].mxu0 }
 0x149   :  { %6239 = vst [vmem:[#allocation46_spill] sm:$0xff] %v4586_v55  ;;  %v1050_v1 = vmul.f32 %v4586_v55, %v4586_v55 }
 0x14a   :  { %v4592_v2 = vadd.f32 %v1051_v25, %v1019_v10  ;;  %v1023_v10 = vmul.f32 %v4380_v61, %v4380_v61 }
 0x14b   :  { %v4594_v4 = vadd.f32 %v1050_v1, %v1018_v56  ;;  %v4596_v9 = vpop.f32.mrb[58].mxu0 }
 0x14c   :  { %6240 = vst [vmem:[#allocation47_spill] sm:$0xff] %v4596_v9  ;;  %v1053_v17 = vmul.f32 %v4596_v9, %v4596_v9  ;;  %v4602_v57 = vpop.f32.mrb[59].mxu0 }
 0x14d   :  { %6241 = vst [vmem:[#allocation48_spill] sm:$0xff] %v4602_v57  ;;  %v1052_v55 = vmul.f32 %v4602_v57, %v4602_v57 }
 0x14e   :  { %v4608_v25 = vadd.f32 %v1053_v17, %v1021_v27 }
 0x14f   :  { %v4610_v56 = vadd.f32 %v1052_v55, %v1020_v58  ;;  %v4612_v1 = vpop.f32.mrb[60].mxu0  ;;  %v1571_v55 = vld [vmem:[%s6108_s4] sm:$0xff]  ;;  %v1572_v58 = vld [vmem:[%s6108_s4 + $0x8] sm:$0xff] }
 0x150   :  { %6242 = vst [vmem:[#allocation49_spill] sm:$0xff] %v4612_v1  ;;  %v1055_v9 = vmul.f32 %v4612_v1, %v4612_v1  ;;  %v4618_v59 = vpop.f32.mrb[61].mxu0  ;;  %v3815_v61 = vpack.c.bf16 %v1572_v58, %v1571_v55 }
 0x151   :  { %6243 = vst [vmem:[#allocation50_spill] sm:$0xff] %v4618_v59  ;;  %v1054_v57 = vmul.f32 %v4618_v59, %v4618_v59  ;;  %v1024_v59 = vmul.f32 %v4386_v0, %v4386_v0 }
 0x152   :  { %v4624_v17 = vadd.f32 %v1055_v9, %v1023_v10  ;;  %3825 = vmatprep.subr.bf16.mxu1 %v3815_v61  ;;  %3816 = vmatprep.subr.bf16.mxu0 %v3815_v61 }
 0x153   :  { %v4632_v27 = vadd.f32 %v1054_v57, %v1022_v60  ;;  %v4634_v1 = vpop.f32.mrb[62].mxu0  ;;  %3827 = vmatpush3.bf16.msra.mxu1 %v3815_v61  ;;  %3818 = vmatpush3.bf16.msra.mxu0 %v3815_v61 }
 0x154   :  { %6244 = vst [vmem:[#allocation51_spill] sm:$0xff] %v4634_v1  ;;  %v1057_v9 = vmul.f32 %v4634_v1, %v4634_v1  ;;  %v4640_v10 = vpop.f32.mrb[63].mxu0 }
 0x155   :  { %6245 = vst [vmem:[#allocation52_spill] sm:$0xff] %v4640_v10  ;;  %v1056_v53 = vmul.f32 %v4640_v10, %v4640_v10 }
 0x156   :  { %v4646_v57 = vadd.f32 %v1057_v9, %v1025_v62 }
 0x157   :  { %v4648_v60 = vadd.f32 %v1056_v53, %v1024_v59  ;;  %v4650_v55 = vpop.f32.mrb[64].mxu0 }
 0x158   :  { %6246 = vst [vmem:[#allocation53_spill] sm:$0xff] %v4650_v55  ;;  %v1091_v58 = vmul.f32 %v4650_v55, %v4650_v55  ;;  %v4654_v1 = vpop.f32.mrb[65].mxu0 }
 0x159   :  { %6247 = vst [vmem:[#allocation54_spill] sm:$0xff] %v4654_v1  ;;  %v1090_v63 = vmul.f32 %v4654_v1, %v4654_v1 }
 0x15a   :  { %v1123_v10 = vadd.f32 %v1091_v58, %v4400_v7 }
 0x15b   :  { %v1122_v0 = vadd.f32 %v1090_v63, %v4402_v8  ;;  %v4660_v62 = vpop.f32.mrb[66].mxu0 }
 0x15c   :  { %6248 = vst [vmem:[#allocation55_spill] sm:$0xff] %v4660_v62  ;;  %v1093_v53 = vmul.f32 %v4660_v62, %v4660_v62  ;;  %v4664_v59 = vpop.f32.mrb[67].mxu0 }
 0x15d   :  { %6249 = vst [vmem:[#allocation56_spill] sm:$0xff] %v4664_v59  ;;  %v1092_v61 = vmul.f32 %v4664_v59, %v4664_v59 }
 0x15e   :  { %v1125_v9 = vadd.f32 %v1093_v53, %v4416_v15 }
 0x15f   :  { %v1124_v55 = vadd.f32 %v1092_v61, %v4418_v16  ;;  %v4670_v54 = vpop.f32.mrb[68].mxu0 }
 0x160   :  { %6250 = vst [vmem:[#allocation57_spill] sm:$0xff] %v4670_v54  ;;  %v1095_v7 = vmul.f32 %v4670_v54, %v4670_v54  ;;  %v4674_v63 = vpop.f32.mrb[69].mxu0 }
 0x161   :  { %6251 = vst [vmem:[#allocation58_spill] sm:$0xff] %v4674_v63  ;;  %v1094_v8 = vmul.f32 %v4674_v63, %v4674_v63 }
 0x162   :  { %v4679_v58 = vadd.f32 %v1095_v7, %v4432_v23 }
 0x163   :  { %v4682_v62 = vadd.f32 %v1094_v8, %v4434_v24  ;;  %v4684_v59 = vpop.f32.mrb[70].mxu0 }
 0x164   :  { %6252 = vst [vmem:[#allocation59_spill] sm:$0xff] %v4684_v59  ;;  %v1097_v15 = vmul.f32 %v4684_v59, %v4684_v59  ;;  %v4688_v16 = vpop.f32.mrb[71].mxu0 }
 0x165   :  { %6253 = vst [vmem:[#allocation60_spill] sm:$0xff] %v4688_v16  ;;  %v1096_v53 = vmul.f32 %v4688_v16, %v4688_v16 }
 0x166   :  { %v4693_v61 = vadd.f32 %v1097_v15, %v4448_v31 }
 0x167   :  { %v4696_v54 = vadd.f32 %v1096_v53, %v4450_v32  ;;  %v4698_v23 = vpop.f32.mrb[72].mxu0 }
 0x168   :  { %6254 = vst [vmem:[#allocation61_spill] sm:$0xff] %v4698_v23  ;;  %v1099_v24 = vmul.f32 %v4698_v23, %v4698_v23  ;;  %v4702_v7 = vpop.f32.mrb[73].mxu0 }
 0x169   :  { %6255 = vst [vmem:[#allocation62_spill] sm:$0xff] %v4702_v7  ;;  %v1098_v8 = vmul.f32 %v4702_v7, %v4702_v7 }
 0x16a   :  { %v4707_v59 = vadd.f32 %v1099_v24, %v4464_v13 }
 0x16b   :  { %v4710_v16 = vadd.f32 %v1098_v8, %v4466_v14  ;;  %v4712_v31 = vpop.f32.mrb[74].mxu0 }
 0x16c   :  { %6256 = vst [vmem:[#allocation63_spill] sm:$0xff] %v4712_v31  ;;  %v1101_v32 = vmul.f32 %v4712_v31, %v4712_v31  ;;  %v4716_v15 = vpop.f32.mrb[75].mxu0 }
 0x16d   :  { %6257 = vst [vmem:[#allocation64_spill] sm:$0xff] %v4716_v15  ;;  %v1100_v53 = vmul.f32 %v4716_v15, %v4716_v15 }
 0x16e   :  { %v4721_v23 = vadd.f32 %v1101_v32, %v4480_v29 }
 0x16f   :  { %v4724_v7 = vadd.f32 %v1100_v53, %v4482_v30  ;;  %v4726_v13 = vpop.f32.mrb[76].mxu0 }
 0x170   :  { %6258 = vst [vmem:[#allocation65_spill] sm:$0xff] %v4726_v13  ;;  %v1103_v14 = vmul.f32 %v4726_v13, %v4726_v13  ;;  %v4730_v24 = vpop.f32.mrb[77].mxu0 }
 0x171   :  { %6259 = vst [vmem:[#allocation66_spill] sm:$0xff] %v4730_v24  ;;  %v1102_v8 = vmul.f32 %v4730_v24, %v4730_v24 }
 0x172   :  { %v4735_v31 = vadd.f32 %v1103_v14, %v4496_v19 }
 0x173   :  { %v4738_v15 = vadd.f32 %v1102_v8, %v4498_v21  ;;  %v4740_v29 = vpop.f32.mrb[78].mxu0 }
 0x174   :  { %6260 = vst [vmem:[#allocation67_spill] sm:$0xff] %v4740_v29  ;;  %v1105_v30 = vmul.f32 %v4740_v29, %v4740_v29  ;;  %v4744_v32 = vpop.f32.mrb[79].mxu0 }
 0x175   :  { %6261 = vst [vmem:[#allocation68_spill] sm:$0xff] %v4744_v32  ;;  %v1104_v53 = vmul.f32 %v4744_v32, %v4744_v32 }
 0x176   :  { %v4749_v13 = vadd.f32 %v1105_v30, %v4512_v5  ;;  %v4766_v5 = vmax.f32 %v1123_v10, 1e-08 }
 0x177   :  { %v4752_v24 = vadd.f32 %v1104_v53, %v4514_v18  ;;  %v4754_v19 = vpop.f32.mrb[80].mxu0 }
 0x178   :  { %6262 = vst [vmem:[#allocation69_spill] sm:$0xff] %v4754_v19  ;;  %v1107_v21 = vmul.f32 %v4754_v19, %v4754_v19  ;;  %v4758_v14 = vpop.f32.mrb[81].mxu0  ;;  %v4774_v19 = vmax.f32 %v1122_v0, 1e-08 }
 0x179   :  { %6263 = vst [vmem:[#allocation70_spill] sm:$0xff] %v4758_v14  ;;  %v1106_v8 = vmul.f32 %v4758_v14, %v4758_v14 }
 0x17a   :  { %v1139_v29 = vadd.f32 %v1107_v21, %v4528_v3  ;;  %v4786_v21 = vmax.f32 %v1125_v9, 1e-08 }
 0x17b   :  { %v1138_v32 = vadd.f32 %v1106_v8, %v4530_v6  ;;  %v4764_v63 = vpop.f32.mrb[82].mxu0 }
 0x17c   :  { %6264 = vst [vmem:[#allocation71_spill] sm:$0xff] %v4764_v63  ;;  %v4768_v18 = vmax.f32 %v1139_v29, 1e-08  ;;  %v1109_v30 = vmul.f32 %v4764_v63, %v4764_v63  ;;  %v4772_v53 = vpop.f32.mrb[83].mxu0 }
 0x17d   :  { %6265 = vst [vmem:[#allocation72_spill] sm:$0xff] %v4772_v53  ;;  %v4776_v1 = vmax.f32 %v1138_v32, 1e-08  ;;  %v1108_v3 = vmul.f32 %v4772_v53, %v4772_v53 }
 0x17e   :  { %v1141_v6 = vadd.f32 %v1109_v30, %v4544_v26  ;;  %3831 = vrsqrt.f32 %v4768_v18  ;;  %v4795_v26 = vmax.f32 %v1124_v55, 1e-08  ;;  %vm1307_vm2 = vcmp.eq.f32.partialorder %v4768_v18, inf }
 0x17f   :  { %v1140_v10 = vadd.f32 %v1108_v3, %v4546_v28  ;;  %v4783_v29 = vpop.f32.mrb[84].mxu0  ;;  %3833 = vrsqrt.f32 %v4776_v1  ;;  %vm1300_vm3 = vcmp.eq.f32.partialorder %v4776_v1, inf  ;;  %vm1309_vm4 = vcmp.eq.f32.partialorder %v4768_v18, 0.0 }
 0x180   :  { %6266 = vst [vmem:[#allocation73_spill] sm:$0xff] %v4783_v29  ;;  %v4788_v8 = vmax.f32 %v1141_v6, 1e-08  ;;  %v1111_v0 = vmul.f32 %v4783_v29, %v4783_v29  ;;  %v4792_v32 = vpop.f32.mrb[85].mxu0  ;;  %3835 = vrsqrt.f32 %v4766_v5  ;;  %vm1302_vm5 = vcmp.eq.f32.partialorder %v4776_v1, 0.0 }
 0x181   :  { %6267 = vst [vmem:[#allocation74_spill] sm:$0xff] %v4792_v32  ;;  %v4797_v30 = vmax.f32 %v1140_v10, 1e-08  ;;  %v1110_v28 = vmul.f32 %v4792_v32, %v4792_v32  ;;  %3837 = vrsqrt.f32 %v4774_v19  ;;  %v1303_v53 = vand.u32 2147483648, %v4776_v1 }
 0x182   :  { %v1143_v9 = vadd.f32 %v1111_v0, %v4560_v22  ;;  %3839 = vrsqrt.f32 %v4788_v8  ;;  %vm1321_vm6 = vcmp.eq.f32.partialorder %v4788_v8, inf  ;;  %vm1323_vm8 = vcmp.eq.f32.partialorder %v4788_v8, 0.0 }
 0x183   :  { %v1142_v3 = vadd.f32 %v1110_v28, %v4562_v20  ;;  %v4805_v6 = vpop.f32.mrb[86].mxu0  ;;  %3841 = vrsqrt.f32 %v4797_v30  ;;  %vm1314_vm7 = vcmp.eq.f32.partialorder %v4797_v30, inf  ;;  %vm1316_vm9 = vcmp.eq.f32.partialorder %v4797_v30, 0.0 }
 0x184   :  { %6268 = vst [vmem:[#allocation75_spill] sm:$0xff] %v4805_v6  ;;  %v4808_v29 = vmax.f32 %v1143_v9, 1e-08  ;;  %v1113_v55 = vmul.f32 %v4805_v6, %v4805_v6  ;;  %v4812_v10 = vpop.f32.mrb[87].mxu0  ;;  %3843 = vrsqrt.f32 %v4786_v21  ;;  %v1317_v47 = vand.u32 2147483648, %v4797_v30 }
 0x185   :  { %6269 = vst [vmem:[#allocation76_spill] sm:$0xff] %v4812_v10  ;;  %v4815_v32 = vmax.f32 %v1142_v3, 1e-08  ;;  %v1112_v22 = vmul.f32 %v4812_v10, %v4812_v10  ;;  %3845 = vrsqrt.f32 %v4795_v26 }
 0x186   :  { %v1145_v20 = vadd.f32 %v1113_v55, %v4576_v11  ;;  %3847 = vrsqrt.f32 %v4808_v29  ;;  %vm1335_vm10 = vcmp.eq.f32.partialorder %v4808_v29, inf  ;;  %vm1337_vm12 = vcmp.eq.f32.partialorder %v4808_v29, 0.0 }
 0x187   :  { %v1144_v0 = vadd.f32 %v1112_v22, %v4578_v12  ;;  %v4823_v28 = vpop.f32.mrb[88].mxu0  ;;  %3849 = vrsqrt.f32 %v4815_v32  ;;  %vm1328_vm11 = vcmp.eq.f32.partialorder %v4815_v32, inf  ;;  %vm1330_vm13 = vcmp.eq.f32.partialorder %v4815_v32, 0.0 }
 0x188   :  { %6270 = vst [vmem:[#allocation77_spill] sm:$0xff] %v4823_v28  ;;  %v3832_v9 = vpop.eup %3831  ;;  %v4827_v3 = vmax.f32 %v1145_v20, 1e-08  ;;  %v1115_v6 = vmul.f32 %v4823_v28, %v4823_v28  ;;  %v4831_v10 = vpop.f32.mrb[89].mxu0 }
 0x189   :  { %6271 = vst [vmem:[#allocation78_spill] sm:$0xff] %v4831_v10  ;;  %v3834_v11 = vpop.eup %3833  ;;  %v4835_v12 = vmax.f32 %v1144_v0, 1e-08  ;;  %v1114_v55 = vmul.f32 %v4831_v10, %v4831_v10  ;;  %v1306_v22 = vmul.f32 %v3832_v9, %v4768_v18  ;;  %v1310_v10 = vand.u32 2147483648, %v4768_v18 }
 0x18a   :  { %v4841_v20 = vpop.eup %3835  ;;  %v1147_v28 = vadd.f32 %v1115_v6, %v4592_v2  ;;  %v1299_v63 = vmul.f32 %v3834_v11, %v4776_v1  ;;  %3851 = vrsqrt.f32 %v4827_v3  ;;  %vm1349_vm0 = vcmp.eq.f32.partialorder %v4827_v3, inf }
 0x18b   :  { %v4847_v14 = vpop.eup %3837  ;;  %v1146_v0 = vadd.f32 %v1114_v55, %v4594_v4  ;;  %v4850_v51 = vpop.f32.mrb[90].mxu0  ;;  %3853 = vrsqrt.f32 %v4835_v12  ;;  %vm1342_vm14 = vcmp.eq.f32.partialorder %v4835_v12, inf  ;;  %vm1344_vm15 = vcmp.eq.f32.partialorder %v4835_v12, 0.0 }
 0x18c   :  { %6272 = vst [vmem:[#allocation79_spill] sm:$0xff] %v4850_v51  ;;  %v3840_v9 = vpop.eup %3839  ;;  %v1117_v2 = vmul.f32 %v4850_v51, %v4850_v51  ;;  %v4857_v6 = vpop.f32.mrb[91].mxu0  ;;  %v1301_v11 = vsel %vm1300_vm3, %v4776_v1, %v1299_v63  ;;  %v1308_v51 = vsel %vm1307_vm2, %v4768_v18, %v1306_v22  ;;  %vm1351_vm1 = vcmp.eq.f32.partialorder %v4827_v3, 0.0 }
 0x18d   :  { %6273 = vst [vmem:[#allocation80_spill] sm:$0xff] %v4857_v6  ;;  %v3842_v4 = vpop.eup %3841  ;;  %v1116_v55 = vmul.f32 %v4857_v6, %v4857_v6  ;;  %v1304_v52 = vsel %vm1302_vm5, %v1303_v53, %v1301_v11  ;;  %v4874_v63 = vmax.f32 %v1146_v0, 1e-08  ;;  %v1320_v1 = vmul.f32 %v3840_v9, %v4788_v8 }
 0x18e   :  { %v4872_v49 = vpop.eup %3843  ;;  %v1149_v50 = vadd.f32 %v1117_v2, %v4608_v25  ;;  %1474 = vrot.lane.b32.xlu0 %v1304_v52, %s3895_s29  ;;  %v1313_v6 = vmul.f32 %v3842_v4, %v4797_v30  ;;  %v1324_v0 = vand.u32 2147483648, %v4788_v8  ;;  %v4888_v2 = vmax.f32 %v1147_v28, 1e-08 }
 0x18f   :  { %v4880_v53 = vpop.eup %3845  ;;  %v1148_v11 = vadd.f32 %v1116_v55, %v4610_v56  ;;  %v4883_v22 = vpop.f32.mrb[92].mxu0  ;;  %v1311_v28 = vsel %vm1309_vm4, %v1310_v10, %v1308_v51  ;;  %3855 = vrsqrt.f32 %v4874_v63  ;;  %vm1356_vm2 = vcmp.eq.f32.partialorder %v4874_v63, inf }
 0x190   :  { %6274 = vst [vmem:[#allocation81_spill] sm:$0xff] %v4883_v22  ;;  %v3848_v25 = vpop.eup %3847  ;;  %v1119_v52 = vmul.f32 %v4883_v22, %v4883_v22  ;;  %v4892_v4 = vpop.f32.mrb[93].mxu0  ;;  %v1315_v56 = vsel %vm1314_vm7, %v4797_v30, %v1313_v6  ;;  %v1322_v6 = vsel %vm1321_vm6, %v4788_v8, %v1320_v1  ;;  %v4920_v10 = vmax.f32 %v1149_v50, 1e-08 }
 0x191   :  { %6275 = vst [vmem:[#allocation82_spill] sm:$0xff] %v4892_v4  ;;  %v3850_v9 = vpop.eup %3849  ;;  %v1118_v55 = vmul.f32 %v4892_v4, %v4892_v4  ;;  %v1318_v22 = vsel %vm1316_vm9, %v1317_v47, %v1315_v56  ;;  %v1334_v48 = vmul.f32 %v3848_v25, %v4808_v29  ;;  %v1331_v47 = vand.u32 2147483648, %v4815_v32 }
 0x192   :  { %v1151_v45 = vadd.f32 %v1119_v52, %v4624_v17  ;;  %1476 = vrot.lane.b32.xlu0 %v1311_v28, %s3895_s29  ;;  %1478 = vrot.lane.b32.xlu1 %v1318_v22, %s3895_s29  ;;  %v1327_v4 = vmul.f32 %v3850_v9, %v4815_v32  ;;  %v1338_v17 = vand.u32 2147483648, %v4808_v29  ;;  %v4922_v22 = vmax.f32 %v1148_v11, 1e-08 }
 0x193   :  { %v1150_v51 = vadd.f32 %v1118_v55, %v4632_v27  ;;  %v4915_v18 = vpop.f32.mrb[94].mxu0  ;;  %v1325_v9 = vsel %vm1323_vm8, %v1324_v0, %v1322_v6  ;;  %v1336_v11 = vsel %vm1335_vm10, %v4808_v29, %v1334_v48  ;;  %3857 = vrsqrt.f32 %v4888_v2 }
 0x194   :  { %v3852_v30 = vpop.eup %3851  ;;  %v1121_v1 = vmul.f32 %v4915_v18, %v4915_v18  ;;  %v4926_v25 = vpop.f32.mrb[95].mxu0  ;;  %v1329_v27 = vsel %vm1328_vm11, %v4815_v32, %v1327_v4  ;;  %v1345_v48 = vand.u32 2147483648, %v4835_v12  ;;  %v4949_v0 = vmax.f32 %v1151_v45, 1e-08 }
 0x195   :  { %v3854_v52 = vpop.eup %3853  ;;  %v1120_v56 = vmul.f32 %v4926_v25, %v4926_v25  ;;  %v1332_v50 = vsel %vm1330_vm13, %v1331_v47, %v1329_v27  ;;  %v1348_v4 = vmul.f32 %v3852_v30, %v4827_v3  ;;  %v4944_v28 = vmax.f32 %v1150_v51, 1e-08 }
 0x196   :  { %v1153_v55 = vadd.f32 %v1121_v1, %v4646_v57  ;;  %1480 = vrot.lane.b32.xlu1 %v1325_v9, %s3895_s29  ;;  %1482 = vrot.lane.b32.xlu0 %v1332_v50, %s3895_s29  ;;  %v1341_v32 = vmul.f32 %v3854_v52, %v4835_v12  ;;  %3859 = vrsqrt.f32 %v4922_v22  ;;  %v1339_v51 = vsel %vm1337_vm12, %v1338_v17, %v1336_v11 }
 0x197   :  { %v1152_v8 = vadd.f32 %v1120_v56, %v4648_v60  ;;  %v1350_v45 = vsel %vm1349_vm0, %v4827_v3, %v1348_v4  ;;  %3861 = vrsqrt.f32 %v4920_v10  ;;  %v1352_v30 = vand.u32 2147483648, %v4827_v3 }
 0x198   :  { %v1343_v57 = vsel %vm1342_vm14, %v4835_v12, %v1341_v32  ;;  %v4959_v60 = vmax.f32 %v1153_v55, 1e-08  ;;  %v4966_v12 = vmax.f32 %v4679_v58, 1e-08  ;;  %3863 = vrsqrt.f32 %v4944_v28 }
 0x199   :  { %v4954_v6 = vmax.f32 %v1152_v8, 1e-08  ;;  %v1346_v47 = vsel %vm1344_vm15, %v1345_v48, %v1343_v57  ;;  %v3856_v29 = vpop.eup %3855  ;;  %v4971_v17 = vmax.f32 %v4682_v62, 1e-08  ;;  %3865 = vrsqrt.f32 %v4949_v0 }
 0x19a   :  { %1484 = vrot.lane.b32.xlu1 %v1339_v51, %s3895_s29  ;;  %1486 = vrot.lane.b32.xlu0 %v1346_v47, %s3895_s29  ;;  %v4976_v1 = vmax.f32 %v4696_v54, 1e-08  ;;  %v1353_v27 = vsel %vm1351_vm1, %v1352_v30, %v1350_v45  ;;  %v1355_v52 = vmul.f32 %v3856_v29, %v4874_v63  ;;  %v1359_v58 = vand.u32 2147483648, %v4874_v63 }
 0x19b   :  { %3867 = vrsqrt.f32 %v4954_v6  ;;  %vm1358_vm3 = vcmp.eq.f32.partialorder %v4874_v63, 0.0  ;;  %v4989_v56 = vmax.f32 %v4693_v61, 1e-08  ;;  %v4995_v11 = vmax.f32 %v4710_v16, 1e-08 }
 0x19c   :  { %3869 = vrsqrt.f32 %v4959_v60  ;;  %v1357_v62 = vsel %vm1356_vm2, %v4874_v63, %v1355_v52  ;;  %vm1363_vm4 = vcmp.eq.f32.partialorder %v4888_v2, inf  ;;  %vm1365_vm5 = vcmp.eq.f32.partialorder %v4888_v2, 0.0 }
 0x19d   :  { %3871 = vrsqrt.f32 %v4966_v12  ;;  %v3858_v54 = vpop.eup %3857  ;;  %v1360_v3 = vsel %vm1358_vm3, %v1359_v58, %v1357_v62  ;;  %v1366_v63 = vand.u32 2147483648, %v4888_v2  ;;  %vm1370_vm6 = vcmp.eq.f32.partialorder %v4922_v22, inf  ;;  %v1573_v58 = vld [vmem:[%s6108_s4 + $0x10] sm:$0xff]  ;;  %v1574_v62 = vld [vmem:[%s6108_s4 + $0x18] sm:$0xf] }
 0x19e   :  { %1488 = vrot.lane.b32.xlu1 %v1353_v27, %s3895_s29  ;;  %3873 = vrsqrt.f32 %v4971_v17  ;;  %1490 = vrot.lane.b32.xlu0 %v1360_v3, %s3895_s29  ;;  %v1362_v9 = vmul.f32 %v3858_v54, %v4888_v2  ;;  %vm1372_vm7 = vcmp.eq.f32.partialorder %v4922_v22, 0.0  ;;  %v1373_v8 = vand.u32 2147483648, %v4922_v22 }
 0x19f   :  { %3875 = vrsqrt.f32 %v4976_v1  ;;  %vm1377_vm8 = vcmp.eq.f32.partialorder %v4920_v10, inf  ;;  %vm1379_vm9 = vcmp.eq.f32.partialorder %v4920_v10, 0.0  ;;  %v1380_v57 = vand.u32 2147483648, %v4920_v10 }
 0x1a0   :  { %v3860_v50 = vpop.eup %3859  ;;  %v1364_v55 = vsel %vm1363_vm4, %v4888_v2, %v1362_v9  ;;  %vm1384_vm10 = vcmp.eq.f32.partialorder %v4944_v28, inf  ;;  %vm1386_vm11 = vcmp.eq.f32.partialorder %v4944_v28, 0.0  ;;  %v1387_v30 = vand.u32 2147483648, %v4944_v28 }
 0x1a1   :  { %v1369_v61 = vmul.f32 %v3860_v50, %v4922_v22  ;;  %v3862_v32 = vpop.eup %3861  ;;  %v1367_v4 = vsel %vm1365_vm5, %v1366_v63, %v1364_v55  ;;  %vm1391_vm12 = vcmp.eq.f32.partialorder %v4949_v0, inf  ;;  %v1394_v52 = vand.u32 2147483648, %v4949_v0 }
 0x1a2   :  { %v3864_v16 = vpop.eup %3863  ;;  %1492 = vrot.lane.b32.xlu1 %v1367_v4, %s3895_s29  ;;  %v1376_v2 = vmul.f32 %v3862_v32, %v4920_v10  ;;  %vm1398_vm13 = vcmp.eq.f32.partialorder %v4954_v6, inf  ;;  %vm1679_vm14 = vcmask 1043456   ;;  %vm1393_vm15 = vcmp.eq.f32.partialorder %v4949_v0, 0.0 }
 0x1a3   :  { %v1371_v48 = vsel %vm1370_vm6, %v4922_v22, %v1369_v61  ;;  %v3866_v51 = vpop.eup %3865  ;;  %v1383_v45 = vmul.f32 %v3864_v16, %v4944_v28  ;;  %v3819_v16 = vpack.c.bf16 %v1574_v62, %v1573_v58  ;;  %vm1400_vm0 = vcmp.eq.f32.partialorder %v4954_v6, 0.0 }
 0x1a4   :  { %v1374_v47 = vsel %vm1372_vm7, %v1373_v8, %v1371_v48  ;;  %v1378_v27 = vsel %vm1377_vm8, %v4920_v10, %v1376_v2  ;;  %v1390_v22 = vmul.f32 %v3866_v51, %v4949_v0  ;;  %v1401_v8 = vand.u32 2147483648, %v4954_v6 }
 0x1a5   :  { %v3868_v29 = vpop.eup %3867  ;;  %1494 = vrot.lane.b32.xlu0 %v1374_v47, %s3895_s29  ;;  %v1381_v3 = vsel %vm1379_vm9, %v1380_v57, %v1378_v27  ;;  %v1385_v9 = vsel %vm1384_vm10, %v4944_v28, %v1383_v45  ;;  %v1187_v28 = vmul.f32 %v4847_v14, %v4774_v19  ;;  %3877 = vrsqrt.f32 %v4989_v56  ;;  %v5057_v57 = vld [vmem:[%s6109_s3] sm:$0xff] }
 0x1a6   :  { %v3870_v54 = vpop.eup %3869  ;;  %v1397_v50 = vmul.f32 %v3868_v29, %v4954_v6  ;;  %1496 = vrot.lane.b32.xlu1 %v1381_v3, %s3895_s29  ;;  %v1388_v55 = vsel %vm1386_vm11, %v1387_v30, %v1385_v9  ;;  %v1392_v61 = vsel %vm1391_vm12, %v4949_v0, %v1390_v22  ;;  %vm3896_vm1 = vmmov 1  }
 0x1a7   :  { %v5033_v63 = vpop.eup %3871  ;;  %v1404_v10 = vmul.f32 %v3870_v54, %v4959_v60  ;;  %vm5050_vm2 = vmpackc.low %vm1679_vm14, %vm3896_vm1  ;;  %v5060_v51 = vmax.f32 %v4707_v59, 1e-08  ;;  %v1395_v0 = vsel %vm1393_vm15, %v1394_v52, %v1392_v61  ;;  %vm1405_vm3 = vcmp.eq.f32.partialorder %v4959_v60, inf }
 0x1a8   :  { %v3874_v32 = vpop.eup %3873  ;;  %v1399_v4 = vsel %vm1398_vm13, %v4954_v6, %v1397_v50  ;;  %3826 = vmatprep.subr.msk.bf16.mxu1 %vm5050_vm2, %v3819_v16  ;;  %3821 = vmatprep.subr.msk.bf16.mxu0 %vm5050_vm2, %v3819_v16  ;;  %v1194_v47 = vmul.f32 %v4841_v20, %v4766_v5  ;;  %v5074_v59 = vmax.f32 %v4724_v7, 1e-08  ;;  %v1408_v45 = vand.u32 2147483648, %v4959_v60 }
 0x1a9   :  { %v5042_v48 = vpop.eup %3875  ;;  %1498 = vrot.lane.b32.xlu0 %v1388_v55, %s3895_s29  ;;  %v1402_v6 = vsel %vm1400_vm0, %v1401_v8, %v1399_v4  ;;  %v1406_v14 = vsel %vm1405_vm3, %v4959_v60, %v1404_v10  ;;  %3828 = vmatpush3.bf16.msk.msra.mxu1 %vm5050_vm2, %v3819_v16  ;;  %vm1188_vm4 = vcmp.eq.f32.partialorder %v4774_v19, inf  ;;  %3879 = vrsqrt.f32 %v4995_v11 }
 0x1aa   :  { %1500 = vrot.lane.b32.xlu1 %v1395_v0, %s3895_s29  ;;  %3669 = vmatprep.subr.mxu1 %v5057_v57  ;;  %vm1407_vm5 = vcmp.eq.f32.partialorder %v4959_v60, 0.0  ;;  %v1189_v20 = vsel %vm1188_vm4, %v4774_v19, %v1187_v28  ;;  %vm1195_vm6 = vcmp.eq.f32.partialorder %v4766_v5, inf  ;;  %v1201_v7 = vmul.f32 %v4880_v53, %v4795_v26 }
 0x1ab   :  { %3824 = vmatpush3.bf16.msk.msra.mxu0 %vm5050_vm2, %v3819_v16  ;;  %v5089_v30 = vmax.f32 %v4721_v23, 1e-08  ;;  %v1409_v29 = vsel %vm1407_vm5, %v1408_v45, %v1406_v14  ;;  %v1191_v27 = vand.u32 2147483648, %v4774_v19  ;;  %3881 = vrsqrt.f32 %v5060_v51 }
 0x1ac   :  { %vm1190_vm7 = vcmp.eq.f32.partialorder %v4774_v19, 0.0  ;;  %v1196_v60 = vsel %vm1195_vm6, %v4766_v5, %v1194_v47  ;;  %v1198_v22 = vand.u32 2147483648, %v4766_v5  ;;  %v1208_v52 = vmul.f32 %v4872_v49, %v4786_v21 }
 0x1ad   :  { %1502 = vrot.lane.b32.xlu0 %v1402_v6, %s3895_s29  ;;  %v5100_v53 = vmax.f32 %v4738_v15, 1e-08  ;;  %v1192_v23 = vsel %vm1190_vm7, %v1191_v27, %v1189_v20  ;;  %vm1202_vm8 = vcmp.eq.f32.partialorder %v4795_v26, inf  ;;  %3883 = vrsqrt.f32 %v5074_v59 }
 0x1ae   :  { %1504 = vrot.lane.b32.xlu1 %v1409_v29, %s3895_s29  ;;  %vm1197_vm9 = vcmp.eq.f32.partialorder %v4766_v5, 0.0  ;;  %v1203_v19 = vsel %vm1202_vm8, %v4795_v26, %v1201_v7  ;;  %vm1209_vm10 = vcmp.eq.f32.partialorder %v4786_v21, inf  ;;  %v1215_v58 = vmul.f32 %v3874_v32, %v4971_v17 }
 0x1af   :  { %v5110_v49 = vmax.f32 %v4735_v31, 1e-08  ;;  %v1199_v15 = vsel %vm1197_vm9, %v1198_v22, %v1196_v60  ;;  %v1205_v62 = vand.u32 2147483648, %v4795_v26  ;;  %3885 = vrsqrt.f32 %v5089_v30  ;;  %v3878_v54 = vpop.eup %3877 }
 0x1b0   :  { %vm1204_vm11 = vcmp.eq.f32.partialorder %v4795_v26, 0.0  ;;  %v1210_v5 = vsel %vm1209_vm10, %v4786_v21, %v1208_v52  ;;  %v1212_v3 = vand.u32 2147483648, %v4786_v21  ;;  %v1222_v9 = vmul.f32 %v5033_v63, %v4966_v12 }
 0x1b1   :  { %1442 = vrot.lane.b32.xlu0 %v1192_v23, %s3895_s29  ;;  %v5121_v31 = vmax.f32 %v4752_v24, 1e-08  ;;  %v1206_v50 = vsel %vm1204_vm11, %v1205_v62, %v1203_v19  ;;  %vm1216_vm12 = vcmp.eq.f32.partialorder %v4971_v17, inf  ;;  %3887 = vrsqrt.f32 %v5100_v53 }
 0x1b2   :  { %1444 = vrot.lane.b32.xlu1 %v1199_v15, %s3895_s29  ;;  %vm1211_vm13 = vcmp.eq.f32.partialorder %v4786_v21, 0.0  ;;  %v1217_v26 = vsel %vm1216_vm12, %v4971_v17, %v1215_v58  ;;  %vm1223_vm14 = vcmp.eq.f32.partialorder %v4966_v12, inf  ;;  %v1229_v55 = vmul.f32 %v5042_v48, %v4976_v1 }
 0x1b3   :  { %v3880_v63 = vpop.eup %3879  ;;  %v5132_v24 = vmax.f32 %v4749_v13, 1e-08  ;;  %v1213_v61 = vsel %vm1211_vm13, %v1212_v3, %v1210_v5  ;;  %v1219_v10 = vand.u32 2147483648, %v4971_v17  ;;  %3889 = vrsqrt.f32 %v5110_v49 }
 0x1b4   :  { %vm1218_vm15 = vcmp.eq.f32.partialorder %v4971_v17, 0.0  ;;  %v1224_v21 = vsel %vm1223_vm14, %v4966_v12, %v1222_v9  ;;  %v1236_v32 = vmul.f32 %v3878_v54, %v4989_v56  ;;  %v1226_v16 = vand.u32 2147483648, %v4966_v12 }
 0x1b5   :  { %1446 = vrot.lane.b32.xlu0 %v1206_v50, %s3895_s29  ;;  %v3882_v4 = vpop.eup %3881  ;;  %v1220_v8 = vsel %vm1218_vm15, %v1219_v10, %v1217_v26  ;;  %vm1230_vm0 = vcmp.eq.f32.partialorder %v4976_v1, inf  ;;  %3891 = vrsqrt.f32 %v5121_v31  ;;  %vm1225_vm1 = vcmp.eq.f32.partialorder %v4966_v12, 0.0 }
 0x1b6   :  { %1448 = vrot.lane.b32.xlu1 %v1213_v61, %s3895_s29  ;;  %v1231_v13 = vsel %vm1230_vm0, %v4976_v1, %v1229_v55  ;;  %v1243_v17 = vmul.f32 %v3880_v63, %v4995_v11  ;;  %v1227_v28 = vsel %vm1225_vm1, %v1226_v16, %v1224_v21  ;;  %v1233_v2 = vand.u32 2147483648, %v4976_v1  ;;  %v41_v16 = vld [vmem:[%s6110_s0 + $0x80] sm:$0xff] }
 0x1b7   :  { %v3884_v48 = vpop.eup %3883  ;;  %vm1237_vm2 = vcmp.eq.f32.partialorder %v4989_v56, inf  ;;  %3893 = vrsqrt.f32 %v5132_v24  ;;  %vm1232_vm3 = vcmp.eq.f32.partialorder %v4976_v1, 0.0  ;;  %v1250_v12 = vmul.f32 %v3882_v4, %v5060_v51 }
 0x1b8   :  { %v1238_v0 = vsel %vm1237_vm2, %v4989_v56, %v1236_v32  ;;  %v1234_v14 = vsel %vm1232_vm3, %v1233_v2, %v1231_v13  ;;  %v1240_v47 = vand.u32 2147483648, %v4989_v56  ;;  %vm1244_vm4 = vcmp.eq.f32.partialorder %v4995_v11, inf }
 0x1b9   :  { %1450 = vrot.lane.b32.xlu0 %v1220_v8, %s3895_s29  ;;  %v3886_v6 = vpop.eup %3885  ;;  %vm1239_vm5 = vcmp.eq.f32.partialorder %v4989_v56, 0.0  ;;  %v1245_v45 = vsel %vm1244_vm4, %v4995_v11, %v1243_v17  ;;  %v1257_v20 = vmul.f32 %v3884_v48, %v5074_v59  ;;  %v1247_v29 = vand.u32 2147483648, %v4995_v11  ;;  %v42_v17 = vld [vmem:[%s6110_s0 + $0x88] sm:$0xff] }
 0x1ba   :  { %1452 = vrot.lane.b32.xlu1 %v1227_v28, %s3895_s29  ;;  %v1241_v1 = vsel %vm1239_vm5, %v1240_v47, %v1238_v0  ;;  %vm1251_vm6 = vcmp.eq.f32.partialorder %v5060_v51, inf  ;;  %vm1246_vm7 = vcmp.eq.f32.partialorder %v4995_v11, 0.0  ;;  %v1264_v60 = vmul.f32 %v3886_v6, %v5089_v30  ;;  %v45_v6 = vld [vmem:[%s6110_s0 + $0xa0] sm:$0xff] }
 0x1bb   :  { %v3888_v7 = vpop.eup %3887  ;;  %v1252_v27 = vsel %vm1251_vm6, %v5060_v51, %v1250_v12  ;;  %v1248_v56 = vsel %vm1246_vm7, %v1247_v29, %v1245_v45  ;;  %v1254_v52 = vand.u32 2147483648, %v5060_v51  ;;  %vm1258_vm8 = vcmp.eq.f32.partialorder %v5074_v59, inf  ;;  %v44_v12 = vld [vmem:[%s6110_s0 + $0x98] sm:$0xff] }
 0x1bc   :  { %vm1253_vm9 = vcmp.eq.f32.partialorder %v5060_v51, 0.0  ;;  %v1259_v23 = vsel %vm1258_vm8, %v5074_v59, %v1257_v20  ;;  %v1271_v19 = vmul.f32 %v3888_v7, %v5100_v53  ;;  %v1261_v15 = vand.u32 2147483648, %v5074_v59  ;;  %v46_v7 = vld [vmem:[%s6110_s0 + $0xa8] sm:$0xff] }
 0x1bd   :  { %1454 = vrot.lane.b32.xlu0 %v1234_v14, %s3895_s29  ;;  %v3890_v22 = vpop.eup %3889  ;;  %v1255_v11 = vsel %vm1253_vm9, %v1254_v52, %v1252_v27  ;;  %vm1265_vm10 = vcmp.eq.f32.partialorder %v5089_v30, inf  ;;  %vm1260_vm11 = vcmp.eq.f32.partialorder %v5074_v59, 0.0  ;;  %v1268_v3 = vand.u32 2147483648, %v5089_v30 }
 0x1be   :  { %1456 = vrot.lane.b32.xlu1 %v1241_v1, %s3895_s29  ;;  %v1266_v62 = vsel %vm1265_vm10, %v5089_v30, %v1264_v60  ;;  %v1278_v54 = vmul.f32 %v3890_v22, %v5110_v49  ;;  %v1262_v51 = vsel %vm1260_vm11, %v1261_v15, %v1259_v23  ;;  %vm1272_vm12 = vcmp.eq.f32.partialorder %v5100_v53, inf  ;;  %v47_v1 = vld [vmem:[%s6110_s0 + $0xb0] sm:$0xff]  ;;  %v48_v22 = vld [vmem:[%s6110_s0 + $0xb8] sm:$0xff]  ;;  %v49_v23 = vld [vmem:[%s6110_s0 + $0xc0] sm:$0xff] }
 0x1bf   :  { %v3892_v58 = vpop.eup %3891  ;;  %vm1267_vm13 = vcmp.eq.f32.partialorder %v5089_v30, 0.0  ;;  %v1273_v9 = vsel %vm1272_vm12, %v5100_v53, %v1271_v19  ;;  %v1275_v59 = vand.u32 2147483648, %v5100_v53  ;;  %vm1279_vm14 = vcmp.eq.f32.partialorder %v5110_v49, inf }
 0x1c0   :  { %v1285_v50 = vmul.f32 %v3892_v58, %v5121_v31  ;;  %v1269_v26 = vsel %vm1267_vm13, %v1268_v3, %v1266_v62  ;;  %vm1274_vm15 = vcmp.eq.f32.partialorder %v5100_v53, 0.0  ;;  %v1280_v55 = vsel %vm1279_vm14, %v5110_v49, %v1278_v54  ;;  %v51_v62 = vld [vmem:[%s6110_s0 + $0xd0] sm:$0xff] }
 0x1c1   :  { %1458 = vrot.lane.b32.xlu0 %v1248_v56, %s3895_s29  ;;  %v3894_v5 = vpop.eup %3893  ;;  %v1276_v61 = vsel %vm1274_vm15, %v1275_v59, %v1273_v9  ;;  %v1282_v30 = vand.u32 2147483648, %v5110_v49  ;;  %vm1286_vm0 = vcmp.eq.f32.partialorder %v5121_v31, inf  ;;  %vm1281_vm1 = vcmp.eq.f32.partialorder %v5110_v49, 0.0 }
 0x1c2   :  { %1460 = vrot.lane.b32.xlu1 %v1255_v11, %s3895_s29  ;;  %v1292_v63 = vmul.f32 %v3894_v5, %v5132_v24  ;;  %v1287_v10 = vsel %vm1286_vm0, %v5121_v31, %v1285_v50  ;;  %v1289_v32 = vand.u32 2147483648, %v5121_v31  ;;  %vm1293_vm2 = vcmp.eq.f32.partialorder %v5132_v24, inf  ;;  %v50_v11 = vld [vmem:[%s6110_s0 + $0xc8] sm:$0xff]  ;;  %v53_v50 = vld [vmem:[%s6110_s0 + $0xe0] sm:$0xff] }
 0x1c3   :  { %v1283_v21 = vsel %vm1281_vm1, %v1282_v30, %v1280_v55  ;;  %vm1288_vm3 = vcmp.eq.f32.partialorder %v5121_v31, 0.0  ;;  %v1296_v8 = vand.u32 2147483648, %v5132_v24  ;;  %vm1295_vm4 = vcmp.eq.f32.partialorder %v5132_v24, 0.0  ;;  %v54_v55 = vld [vmem:[%s6110_s0 + $0xe8] sm:$0xff]  ;;  %v55_v30 = vld [vmem:[%s6110_s0 + $0xf0] sm:$0xff] }
 0x1c4   :  { %v1294_v53 = vsel %vm1293_vm2, %v5132_v24, %v1292_v63  ;;  %v1290_v4 = vsel %vm1288_vm3, %v1289_v32, %v1287_v10  ;;  %vm1538_vm5 = vcmask 162816   ;;  %vm1582_vm6 = vcmask 228352   ;;  %v43_v24 = vld [vmem:[%s6110_s0 + $0x90] sm:$0xff]  ;;  %v56_v32 = vld [vmem:[%s6110_s0 + $0xf8] sm:$0xff] }
 0x1c5   :  { %1462 = vrot.lane.b32.xlu0 %v1262_v51, %s3895_s29  ;;  %v1297_v49 = vsel %vm1295_vm4, %v1296_v8, %v1294_v53  ;;  %v52_v51 = vld [vmem:[%s6110_s0 + $0xd8] sm:$0xff]  ;;  %v25_v8 = vld [vmem:[%s6110_s0] sm:$0xff]  ;;  %vm1909_vm7 = vcmask 64512   ;;  %vm2743_vm8 = vcmask 130048  }
 0x1c6   :  { %1464 = vrot.lane.b32.xlu1 %v1269_v26, %s3895_s29 }
 0x1c9   :  { %1466 = vrot.lane.b32.xlu0 %v1276_v61, %s3895_s29 }
 0x1ca   :  { %1468 = vrot.lane.b32.xlu1 %v1283_v21, %s3895_s29 }
 0x1cd   :  { %1470 = vrot.lane.b32.xlu0 %v1290_v4, %s3895_s29 }
 0x1ce   :  { %1472 = vrot.lane.b32.xlu1 %v1297_v49, %s3895_s29 }
 0x200   :  { %v1475_v13 = vpop.permute.xlu0 %1474 }
 0x201   :  { %v1555_v31 = vsel %vm1538_vm5, %v41_v16, %v1475_v13  ;;  %v26_v13 = vld [vmem:[%s6110_s0 + $0x8] sm:$0xff] }
 0x202   :  { %3645 = vmatprep.mubr.msk.f32.mxu1 %vm1582_vm6, %v1555_v31 }
 0x204   :  { %v1477_v48 = vpop.permute.xlu0 %1476  ;;  %v1479_v28 = vpop.permute.xlu1 %1478 }
 0x205   :  { %v1556_v2 = vsel %vm1538_vm5, %v42_v17, %v1477_v48  ;;  %v1557_v0 = vsel %vm1538_vm5, %v43_v24, %v1479_v28  ;;  %v27_v24 = vld [vmem:[%s6110_s0 + $0x10] sm:$0xff] }
 0x206   :  { %3646 = vmatmul.mubr.msk.f32.vlgmr.msra.gmra.mrb[0].mxu1 %vm1582_vm6, %v1556_v2  ;;  %v28_v2 = vld [vmem:[%s6110_s0 + $0x18] sm:$0xff] }
 0x207   :  { %3670 = vmatpush3.msra.mxu1 %v5057_v57  ;;  %3648 = vmatprep.mubr.msk.f32.mxu1 %vm1582_vm6, %v1557_v0 }
 0x208   :  { %v1481_v14 = vpop.permute.xlu1 %1480  ;;  %v1483_v47 = vpop.permute.xlu0 %1482 }
 0x209   :  { %v1558_v45 = vsel %vm1538_vm5, %v44_v12, %v1481_v14  ;;  %v1559_v20 = vsel %vm1538_vm5, %v45_v6, %v1483_v47  ;;  %v29_v12 = vld [vmem:[%s6110_s0 + $0x20] sm:$0xff] }
 0x20a   :  { %3649 = vmatmul.mubr.msk.f32.gmra.mrb[2].mxu1 %vm1582_vm6, %v1558_v45  ;;  %v31_v45 = vld [vmem:[%s6110_s0 + $0x30] sm:$0xff] }
 0x20b   :  { %3651 = vmatprep.mubr.msk.f32.mxu1 %vm1582_vm6, %v1559_v20 }
 0x20c   :  { %v1485_v57 = vpop.permute.xlu1 %1484  ;;  %v1487_v29 = vpop.permute.xlu0 %1486 }
 0x20d   :  { %v1560_v27 = vsel %vm1538_vm5, %v46_v7, %v1485_v57  ;;  %v1561_v60 = vsel %vm1538_vm5, %v47_v1, %v1487_v29  ;;  %v33_v57 = vld [vmem:[%s6110_s0 + $0x40] sm:$0xff] }
 0x20e   :  { %3652 = vmatmul.mubr.msk.f32.gmra.mrb[4].mxu1 %vm1582_vm6, %v1560_v27 }
 0x20f   :  { %3654 = vmatprep.mubr.msk.f32.mxu1 %vm1582_vm6, %v1561_v60 }
 0x210   :  { %v1489_v56 = vpop.permute.xlu1 %1488  ;;  %v1491_v19 = vpop.permute.xlu0 %1490 }
 0x211   :  { %v1562_v52 = vsel %vm1538_vm5, %v48_v22, %v1489_v56  ;;  %v1563_v58 = vsel %vm1538_vm5, %v49_v23, %v1491_v19  ;;  %v35_v22 = vld [vmem:[%s6110_s0 + $0x50] sm:$0xff]  ;;  %v37_v19 = vld [vmem:[%s6110_s0 + $0x60] sm:$0xff] }
 0x212   :  { %3655 = vmatmul.mubr.msk.f32.gmra.mrb[6].mxu1 %vm1582_vm6, %v1562_v52 }
 0x213   :  { %3657 = vmatprep.mubr.msk.f32.mxu1 %vm1582_vm6, %v1563_v58 }
 0x214   :  { %v1493_v15 = vpop.permute.xlu1 %1492 }
 0x215   :  { %v1564_v54 = vsel %vm1538_vm5, %v50_v11, %v1493_v15 }
 0x216   :  { %3658 = vmatmul.mubr.msk.f32.gmra.mrb[8].mxu1 %vm1582_vm6, %v1564_v54 }
 0x217   :  { %v1495_v5 = vpop.permute.xlu0 %1494 }
 0x218   :  { %v1565_v3 = vsel %vm1538_vm5, %v51_v62, %v1495_v5  ;;  %v1497_v9 = vpop.permute.xlu1 %1496  ;;  %v39_v62 = vld [vmem:[%s6110_s0 + $0x70] sm:$0xff] }
 0x219   :  { %3660 = vmatprep.mubr.msk.f32.mxu1 %vm1582_vm6, %v1565_v3  ;;  %v1566_v26 = vsel %vm1538_vm5, %v52_v51, %v1497_v9  ;;  %v40_v51 = vld [vmem:[%s6110_s0 + $0x78] sm:$0xff]  ;;  %v6279_v3 = vld [vmem:[#allocation4_spill] sm:$0xff] }
 0x21a   :  { %3661 = vmatmul.mubr.msk.f32.gmra.mrb[10].mxu1 %vm1582_vm6, %v1566_v26  ;;  %v6280_v26 = vld [vmem:[#allocation3_spill] sm:$0xff] }
 0x21b   :  { %v1499_v59 = vpop.permute.xlu0 %1498 }
 0x21c   :  { %v1567_v63 = vsel %vm1538_vm5, %v53_v50, %v1499_v59  ;;  %v1501_v61 = vpop.permute.xlu1 %1500  ;;  %v6281_v59 = vld [vmem:[#allocation6_spill] sm:$0xff] }
 0x21d   :  { %3663 = vmatprep.mubr.msk.f32.mxu1 %vm1582_vm6, %v1567_v63  ;;  %v1568_v10 = vsel %vm1538_vm5, %v54_v55, %v1501_v61  ;;  %v6282_v55 = vld [vmem:[#allocation5_spill] sm:$0xff]  ;;  %v6283_v63 = vld [vmem:[#allocation8_spill] sm:$0xff]  ;;  %v6284_v61 = vld [vmem:[#allocation7_spill] sm:$0xff] }
 0x21e   :  { %3664 = vmatmul.mubr.msk.f32.gmra.mrb[12].mxu1 %vm1582_vm6, %v1568_v10  ;;  %v6286_v10 = vld [vmem:[#allocation9_spill] sm:$0xff] }
 0x21f   :  { %v1503_v21 = vpop.permute.xlu0 %1502 }
 0x220   :  { %v1569_v53 = vsel %vm1538_vm5, %v55_v30, %v1503_v21  ;;  %v1505_v4 = vpop.permute.xlu1 %1504  ;;  %v6285_v30 = vld [vmem:[#allocation10_spill] sm:$0xff]  ;;  %v6287_v21 = vld [vmem:[#allocation12_spill] sm:$0xff] }
 0x221   :  { %3666 = vmatprep.mubr.msk.f32.mxu1 %vm1582_vm6, %v1569_v53  ;;  %v1570_v49 = vsel %vm1538_vm5, %v56_v32, %v1505_v4  ;;  %v6288_v32 = vld [vmem:[#allocation11_spill] sm:$0xff]  ;;  %v6289_v53 = vld [vmem:[#allocation14_spill] sm:$0xff]  ;;  %v6290_v4 = vld [vmem:[#allocation13_spill] sm:$0xff] }
 0x222   :  { %3667 = vmatmul.mubr.msk.f32.gmra.mrb[14].mxu1 %vm1582_vm6, %v1570_v49  ;;  %v6292_v49 = vld [vmem:[#allocation15_spill] sm:$0xff] }
 0x223   :  { %v1443_v16 = vpop.permute.xlu0 %1442  ;;  %3671 = vmatprep.mubr.msk.f32.mxu1 %vm1909_vm7, %v4326_v34 }
 0x224   :  { %v1539_v31 = vsel %vm1538_vm5, %v25_v8, %v1443_v16  ;;  %v1445_v17 = vpop.permute.xlu1 %1444  ;;  %v6291_v8 = vld [vmem:[#allocation16_spill] sm:$0xff]  ;;  %v6293_v16 = vld [vmem:[#allocation18_spill] sm:$0xff] }
 0x225   :  { %3621 = vmatprep.mubr.msk.f32.mxu0 %vm1582_vm6, %v1539_v31  ;;  %v1540_v48 = vsel %vm1538_vm5, %v26_v13, %v1445_v17  ;;  %v6294_v13 = vld [vmem:[#allocation17_spill] sm:$0xff]  ;;  %v6295_v31 = vld [vmem:[#allocation20_spill] sm:$0xff]  ;;  %v6296_v17 = vld [vmem:[#allocation19_spill] sm:$0xff] }
 0x226   :  { %3622 = vmatmul.mubr.msk.f32.vlgmr.msra.gmra.mrb[96].mxu0 %vm1582_vm6, %v1540_v48  ;;  %3672 = vmatmul.mubr.msk.f32.vlgmr.msra.gmra.mrb[16].mxu1 %vm1909_vm7, %v4324_v33  ;;  %v30_v33 = vld [vmem:[%s6110_s0 + $0x28] sm:$0xff]  ;;  %v6298_v48 = vld [vmem:[#allocation21_spill] sm:$0xff] }
 0x227   :  { %v1447_v28 = vpop.permute.xlu0 %1446  ;;  %3674 = vmatprep.mubr.msk.f32.mxu1 %vm1909_vm7, %v4330_v36 }
 0x228   :  { %v1541_v34 = vsel %vm1538_vm5, %v27_v24, %v1447_v28  ;;  %v1449_v0 = vpop.permute.xlu1 %1448  ;;  %v6297_v24 = vld [vmem:[#allocation22_spill] sm:$0xff]  ;;  %v6299_v28 = vld [vmem:[#allocation24_spill] sm:$0xff] }
 0x229   :  { %3624 = vmatprep.mubr.msk.f32.mxu0 %vm1582_vm6, %v1541_v34  ;;  %v1542_v6 = vsel %vm1538_vm5, %v28_v2, %v1449_v0  ;;  %v6300_v2 = vld [vmem:[#allocation23_spill] sm:$0xff]  ;;  %v6301_v34 = vld [vmem:[#allocation26_spill] sm:$0xff]  ;;  %v6302_v0 = vld [vmem:[#allocation25_spill] sm:$0xff] }
 0x22a   :  { %3625 = vmatmul.mubr.msk.f32.gmra.mrb[98].mxu0 %vm1582_vm6, %v1542_v6  ;;  %3675 = vmatmul.mubr.msk.f32.gmra.mrb[18].mxu1 %vm1909_vm7, %v4328_v35  ;;  %v32_v35 = vld [vmem:[%s6110_s0 + $0x38] sm:$0xff]  ;;  %v6304_v6 = vld [vmem:[#allocation27_spill] sm:$0xff] }
 0x22b   :  { %v1451_v14 = vpop.permute.xlu0 %1450  ;;  %3677 = vmatprep.mubr.msk.f32.mxu1 %vm1909_vm7, %v4334_v38 }
 0x22c   :  { %v1543_v36 = vsel %vm1538_vm5, %v29_v12, %v1451_v14  ;;  %v1453_v47 = vpop.permute.xlu1 %1452  ;;  %v6303_v12 = vld [vmem:[#allocation28_spill] sm:$0xff]  ;;  %v6305_v14 = vld [vmem:[#allocation30_spill] sm:$0xff] }
 0x22d   :  { %3627 = vmatprep.mubr.msk.f32.mxu0 %vm1582_vm6, %v1543_v36  ;;  %v1544_v20 = vsel %vm1538_vm5, %v30_v33, %v1453_v47  ;;  %v6306_v33 = vld [vmem:[#allocation29_spill] sm:$0xff]  ;;  %v6307_v36 = vld [vmem:[#allocation32_spill] sm:$0xff]  ;;  %v6308_v47 = vld [vmem:[#allocation31_spill] sm:$0xff] }
 0x22e   :  { %3628 = vmatmul.mubr.msk.f32.gmra.mrb[100].mxu0 %vm1582_vm6, %v1544_v20  ;;  %3678 = vmatmul.mubr.msk.f32.gmra.mrb[20].mxu1 %vm1909_vm7, %v4332_v37  ;;  %v34_v37 = vld [vmem:[%s6110_s0 + $0x48] sm:$0xff]  ;;  %v6310_v20 = vld [vmem:[#allocation33_spill] sm:$0xff] }
 0x22f   :  { %v1455_v7 = vpop.permute.xlu0 %1454  ;;  %3680 = vmatprep.mubr.msk.f32.mxu1 %vm1909_vm7, %v4338_v40 }
 0x230   :  { %v1545_v38 = vsel %vm1538_vm5, %v31_v45, %v1455_v7  ;;  %v1457_v1 = vpop.permute.xlu1 %1456  ;;  %v6309_v45 = vld [vmem:[#allocation34_spill] sm:$0xff]  ;;  %v6311_v7 = vld [vmem:[#allocation36_spill] sm:$0xff] }
 0x231   :  { %3630 = vmatprep.mubr.msk.f32.mxu0 %vm1582_vm6, %v1545_v38  ;;  %v1546_v29 = vsel %vm1538_vm5, %v32_v35, %v1457_v1  ;;  %v6312_v35 = vld [vmem:[#allocation35_spill] sm:$0xff]  ;;  %v6313_v38 = vld [vmem:[#allocation38_spill] sm:$0xff]  ;;  %v6314_v1 = vld [vmem:[#allocation37_spill] sm:$0xff] }
 0x232   :  { %3631 = vmatmul.mubr.msk.f32.gmra.mrb[102].mxu0 %vm1582_vm6, %v1546_v29  ;;  %3681 = vmatmul.mubr.msk.f32.gmra.mrb[22].mxu1 %vm1909_vm7, %v4336_v39  ;;  %v36_v39 = vld [vmem:[%s6110_s0 + $0x58] sm:$0xff]  ;;  %v6316_v29 = vld [vmem:[#allocation39_spill] sm:$0xff] }
 0x233   :  { %v1459_v27 = vpop.permute.xlu0 %1458  ;;  %3683 = vmatprep.mubr.msk.f32.mxu1 %vm1909_vm7, %v4342_v42 }
 0x234   :  { %v1547_v40 = vsel %vm1538_vm5, %v33_v57, %v1459_v27  ;;  %v1461_v60 = vpop.permute.xlu1 %1460  ;;  %v6315_v57 = vld [vmem:[#allocation40_spill] sm:$0xff]  ;;  %v6317_v27 = vld [vmem:[#allocation42_spill] sm:$0xff] }
 0x235   :  { %3633 = vmatprep.mubr.msk.f32.mxu0 %vm1582_vm6, %v1547_v40  ;;  %v1548_v56 = vsel %vm1538_vm5, %v34_v37, %v1461_v60  ;;  %v6318_v37 = vld [vmem:[#allocation41_spill] sm:$0xff]  ;;  %v6319_v40 = vld [vmem:[#allocation44_spill] sm:$0xff]  ;;  %v6320_v60 = vld [vmem:[#allocation43_spill] sm:$0xff] }
 0x236   :  { %3634 = vmatmul.mubr.msk.f32.gmra.mrb[104].mxu0 %vm1582_vm6, %v1548_v56  ;;  %3684 = vmatmul.mubr.msk.f32.gmra.mrb[24].mxu1 %vm1909_vm7, %v4340_v41  ;;  %v38_v41 = vld [vmem:[%s6110_s0 + $0x68] sm:$0xff]  ;;  %v6322_v56 = vld [vmem:[#allocation45_spill] sm:$0xff] }
 0x237   :  { %v1463_v52 = vpop.permute.xlu0 %1462  ;;  %3686 = vmatprep.mubr.msk.f32.mxu1 %vm1909_vm7, %v4346_v44 }
 0x238   :  { %v1549_v42 = vsel %vm1538_vm5, %v35_v22, %v1463_v52  ;;  %v1465_v23 = vpop.permute.xlu1 %1464  ;;  %v6321_v22 = vld [vmem:[#allocation46_spill] sm:$0xff]  ;;  %v6323_v52 = vld [vmem:[#allocation48_spill] sm:$0xff] }
 0x239   :  { %3636 = vmatprep.mubr.msk.f32.mxu0 %vm1582_vm6, %v1549_v42  ;;  %v1550_v58 = vsel %vm1538_vm5, %v36_v39, %v1465_v23  ;;  %v6324_v39 = vld [vmem:[#allocation47_spill] sm:$0xff]  ;;  %v6325_v42 = vld [vmem:[#allocation50_spill] sm:$0xff]  ;;  %v6326_v23 = vld [vmem:[#allocation49_spill] sm:$0xff] }
 0x23a   :  { %3637 = vmatmul.mubr.msk.f32.gmra.mrb[106].mxu0 %vm1582_vm6, %v1550_v58  ;;  %3687 = vmatmul.mubr.msk.f32.gmra.mrb[26].mxu1 %vm1909_vm7, %v4344_v43  ;;  %v6278_v43 = vld [vmem:[#allocation2_spill] sm:$0xff]  ;;  %v6328_v58 = vld [vmem:[#allocation51_spill] sm:$0xff] }
 0x23b   :  { %v1467_v11 = vpop.permute.xlu0 %1466  ;;  %3689 = vmatprep.mubr.msk.f32.mxu1 %vm1909_vm7, %v4350_v46 }
 0x23c   :  { %v1551_v44 = vsel %vm1538_vm5, %v37_v19, %v1467_v11  ;;  %v1469_v15 = vpop.permute.xlu1 %1468  ;;  %v6327_v19 = vld [vmem:[#allocation52_spill] sm:$0xff]  ;;  %v6329_v11 = vld [vmem:[#allocation54_spill] sm:$0xff] }
 0x23d   :  { %3639 = vmatprep.mubr.msk.f32.mxu0 %vm1582_vm6, %v1551_v44  ;;  %v1552_v54 = vsel %vm1538_vm5, %v38_v41, %v1469_v15  ;;  %v6330_v41 = vld [vmem:[#allocation53_spill] sm:$0xff]  ;;  %v6331_v44 = vld [vmem:[#allocation56_spill] sm:$0xff]  ;;  %v6332_v15 = vld [vmem:[#allocation55_spill] sm:$0xff] }
 0x23e   :  { %3640 = vmatmul.mubr.msk.f32.gmra.mrb[108].mxu0 %vm1582_vm6, %v1552_v54  ;;  %3690 = vmatmul.mubr.msk.f32.gmra.mrb[28].mxu1 %vm1909_vm7, %v6278_v43  ;;  %v6334_v54 = vld [vmem:[#allocation57_spill] sm:$0xff]  ;;  %v6336_v43 = vld [vmem:[#allocation59_spill] sm:$0xff] }
 0x23f   :  { %v1471_v5 = vpop.permute.xlu0 %1470  ;;  %3692 = vmatprep.mubr.msk.f32.mxu1 %vm1909_vm7, %v6279_v3  ;;  %v6339_v3 = vld [vmem:[#allocation64_spill] sm:$0xff] }
 0x240   :  { %v1553_v46 = vsel %vm1538_vm5, %v39_v62, %v1471_v5  ;;  %v1473_v9 = vpop.permute.xlu1 %1472  ;;  %v6333_v62 = vld [vmem:[#allocation58_spill] sm:$0xff]  ;;  %v6335_v5 = vld [vmem:[#allocation60_spill] sm:$0xff] }
 0x241   :  { %3642 = vmatprep.mubr.msk.f32.mxu0 %vm1582_vm6, %v1553_v46  ;;  %v1554_v50 = vsel %vm1538_vm5, %v40_v51, %v1473_v9  ;;  %v6337_v51 = vld [vmem:[#allocation62_spill] sm:$0xff]  ;;  %v6338_v46 = vld [vmem:[#allocation61_spill] sm:$0xff]  ;;  %v6340_v9 = vld [vmem:[#allocation63_spill] sm:$0xff] }
 0x242   :  { %3643 = vmatmul.mubr.msk.f32.gmra.mrb[110].mxu0 %vm1582_vm6, %v1554_v50  ;;  %3693 = vmatmul.mubr.msk.f32.gmra.mrb[30].mxu1 %vm1909_vm7, %v6280_v26  ;;  %v6341_v50 = vld [vmem:[#allocation66_spill] sm:$0xff]  ;;  %v6342_v26 = vld [vmem:[#allocation65_spill] sm:$0xff] }
 0x243   :  { %3695 = vmatprep.mubr.msk.f32.mxu1 %vm1909_vm7, %v6281_v59  ;;  %v6343_v59 = vld [vmem:[#allocation68_spill] sm:$0xff] }
 0x246   :  { %3696 = vmatmul.mubr.msk.f32.gmra.mrb[32].mxu1 %vm1909_vm7, %v6282_v55  ;;  %v6344_v55 = vld [vmem:[#allocation67_spill] sm:$0xff] }
 0x247   :  { %3698 = vmatprep.mubr.msk.f32.mxu1 %vm1909_vm7, %v6283_v63  ;;  %v6345_v63 = vld [vmem:[#allocation70_spill] sm:$0xff] }
 0x24a   :  { %3699 = vmatmul.mubr.msk.f32.gmra.mrb[34].mxu1 %vm1909_vm7, %v6284_v61  ;;  %v6346_v61 = vld [vmem:[#allocation69_spill] sm:$0xff] }
 0x24b   :  { %3701 = vmatprep.mubr.msk.f32.mxu1 %vm1909_vm7, %v6285_v30  ;;  %v6347_v30 = vld [vmem:[#allocation72_spill] sm:$0xff] }
 0x24e   :  { %3702 = vmatmul.mubr.msk.f32.gmra.mrb[36].mxu1 %vm1909_vm7, %v6286_v10  ;;  %v6348_v10 = vld [vmem:[#allocation71_spill] sm:$0xff] }
 0x24f   :  { %3704 = vmatprep.mubr.msk.f32.mxu1 %vm1909_vm7, %v6287_v21  ;;  %v6349_v21 = vld [vmem:[#allocation74_spill] sm:$0xff] }
 0x252   :  { %3705 = vmatmul.mubr.msk.f32.gmra.mrb[38].mxu1 %vm1909_vm7, %v6288_v32  ;;  %v6350_v32 = vld [vmem:[#allocation73_spill] sm:$0xff] }
 0x253   :  { %3707 = vmatprep.mubr.msk.f32.mxu1 %vm1909_vm7, %v6289_v53  ;;  %v6351_v53 = vld [vmem:[#allocation76_spill] sm:$0xff] }
 0x256   :  { %3708 = vmatmul.mubr.msk.f32.gmra.mrb[40].mxu1 %vm1909_vm7, %v6290_v4  ;;  %v6352_v4 = vld [vmem:[#allocation75_spill] sm:$0xff] }
 0x257   :  { %3710 = vmatprep.mubr.msk.f32.mxu1 %vm1909_vm7, %v6291_v8  ;;  %v6353_v8 = vld [vmem:[#allocation78_spill] sm:$0xff] }
 0x25a   :  { %3711 = vmatmul.mubr.msk.f32.gmra.mrb[42].mxu1 %vm1909_vm7, %v6292_v49  ;;  %v5546_v49 = vld [vmem:[%s6111_s5] ss:$0 sm:$0xff] }
 0x25b   :  { %3713 = vmatprep.mubr.msk.f32.mxu1 %vm1909_vm7, %v6293_v16  ;;  %v6354_v16 = vld [vmem:[#allocation77_spill] sm:$0xff] }
 0x25e   :  { %3714 = vmatmul.mubr.msk.f32.gmra.mrb[44].mxu1 %vm1909_vm7, %v6294_v13 }
 0x25f   :  { %3716 = vmatprep.mubr.msk.f32.mxu1 %vm1909_vm7, %v6295_v31  ;;  %v6355_v31 = vld [vmem:[#allocation80_spill] sm:$0xff] }
 0x262   :  { %3717 = vmatmul.mubr.msk.f32.gmra.mrb[46].mxu1 %vm1909_vm7, %v6296_v17 }
 0x263   :  { %3719 = vmatprep.mubr.msk.f32.mxu1 %vm1909_vm7, %v6297_v24 }
 0x266   :  { %3720 = vmatmul.mubr.msk.f32.gmra.mrb[48].mxu1 %vm1909_vm7, %v6298_v48 }
 0x267   :  { %3722 = vmatprep.mubr.msk.f32.mxu1 %vm1909_vm7, %v6299_v28  ;;  %v6356_v28 = vld [vmem:[#allocation79_spill] sm:$0xff] }
 0x26a   :  { %3723 = vmatmul.mubr.msk.f32.gmra.mrb[50].mxu1 %vm1909_vm7, %v6300_v2 }
 0x26b   :  { %3725 = vmatprep.mubr.msk.f32.mxu1 %vm1909_vm7, %v6301_v34  ;;  %v6357_v34 = vld [vmem:[#allocation82_spill] sm:$0xff] }
 0x26e   :  { %3726 = vmatmul.mubr.msk.f32.gmra.mrb[52].mxu1 %vm1909_vm7, %v6302_v0 }
 0x26f   :  { %3728 = vmatprep.mubr.msk.f32.mxu1 %vm1909_vm7, %v6303_v12 }
 0x272   :  { %3729 = vmatmul.mubr.msk.f32.gmra.mrb[54].mxu1 %vm1909_vm7, %v6304_v6 }
 0x273   :  { %3731 = vmatprep.mubr.msk.f32.mxu1 %vm1909_vm7, %v6305_v14  ;;  %v6358_v14 = vld [vmem:[#allocation81_spill] sm:$0xff] }
 0x276   :  { %3732 = vmatmul.mubr.msk.f32.gmra.mrb[56].mxu1 %vm1909_vm7, %v6306_v33 }
 0x277   :  { %3734 = vmatprep.mubr.msk.f32.mxu1 %vm1909_vm7, %v6307_v36 }
 0x27a   :  { %3735 = vmatmul.mubr.msk.f32.gmra.mrb[58].mxu1 %vm1909_vm7, %v6308_v47 }
 0x27b   :  { %3737 = vmatprep.mubr.msk.f32.mxu1 %vm1909_vm7, %v6309_v45 }
 0x27e   :  { %3738 = vmatmul.mubr.msk.f32.gmra.mrb[60].mxu1 %vm1909_vm7, %v6310_v20 }
 0x27f   :  { %3740 = vmatprep.mubr.msk.f32.mxu1 %vm1909_vm7, %v6311_v7 }
 0x282   :  { %3741 = vmatmul.mubr.msk.f32.gmra.mrb[62].mxu1 %vm1909_vm7, %v6312_v35 }
 0x283   :  { %3743 = vmatprep.mubr.msk.f32.mxu1 %vm1909_vm7, %v6313_v38 }
 0x286   :  { %3744 = vmatmul.mubr.msk.f32.gmra.mrb[64].mxu1 %vm1909_vm7, %v6314_v1 }
 0x287   :  { %3746 = vmatprep.mubr.msk.f32.mxu1 %vm1909_vm7, %v6315_v57 }
 0x28a   :  { %3747 = vmatmul.mubr.msk.f32.gmra.mrb[66].mxu1 %vm1909_vm7, %v6316_v29 }
 0x28b   :  { %3749 = vmatprep.mubr.msk.f32.mxu1 %vm1909_vm7, %v6317_v27 }
 0x28e   :  { %3750 = vmatmul.mubr.msk.f32.gmra.mrb[68].mxu1 %vm1909_vm7, %v6318_v37 }
 0x28f   :  { %3752 = vmatprep.mubr.msk.f32.mxu1 %vm1909_vm7, %v6319_v40 }
 0x292   :  { %3753 = vmatmul.mubr.msk.f32.gmra.mrb[70].mxu1 %vm1909_vm7, %v6320_v60 }
 0x293   :  { %3755 = vmatprep.mubr.msk.f32.mxu1 %vm1909_vm7, %v6321_v22 }
 0x296   :  { %3756 = vmatmul.mubr.msk.f32.gmra.mrb[72].mxu1 %vm1909_vm7, %v6322_v56 }
 0x297   :  { %3758 = vmatprep.mubr.msk.f32.mxu1 %vm1909_vm7, %v6323_v52 }
 0x29a   :  { %3759 = vmatmul.mubr.msk.f32.gmra.mrb[74].mxu1 %vm1909_vm7, %v6324_v39 }
 0x29b   :  { %3761 = vmatprep.mubr.msk.f32.mxu1 %vm1909_vm7, %v6325_v42 }
 0x29e   :  { %3762 = vmatmul.mubr.msk.f32.gmra.mrb[76].mxu1 %vm1909_vm7, %v6326_v23 }
 0x29f   :  { %3764 = vmatprep.mubr.msk.f32.mxu1 %vm1909_vm7, %v6327_v19 }
 0x2a2   :  { %3765 = vmatmul.mubr.msk.f32.gmra.mrb[78].mxu1 %vm1909_vm7, %v6328_v58 }
 0x2a3   :  { %3767 = vmatprep.mubr.msk.f32.mxu1 %vm1909_vm7, %v6329_v11 }
 0x2a6   :  { %3768 = vmatmul.mubr.msk.f32.gmra.mrb[80].mxu1 %vm1909_vm7, %v6330_v41 }
 0x2a7   :  { %3770 = vmatprep.mubr.msk.f32.mxu1 %vm1909_vm7, %v6331_v44 }
 0x2aa   :  { %3771 = vmatmul.mubr.msk.f32.gmra.mrb[82].mxu1 %vm1909_vm7, %v6332_v15 }
 0x2ab   :  { %3773 = vmatprep.mubr.msk.f32.mxu1 %vm1909_vm7, %v6333_v62 }
 0x2ae   :  { %3774 = vmatmul.mubr.msk.f32.gmra.mrb[84].mxu1 %vm1909_vm7, %v6334_v54 }
 0x2af   :  { %3776 = vmatprep.mubr.msk.f32.mxu1 %vm1909_vm7, %v6335_v5 }
 0x2b2   :  { %3777 = vmatmul.mubr.msk.f32.gmra.mrb[86].mxu1 %vm1909_vm7, %v6336_v43 }
 0x2b3   :  { %3779 = vmatprep.mubr.msk.f32.mxu1 %vm1909_vm7, %v6337_v51 }
 0x2b6   :  { %3780 = vmatmul.mubr.msk.f32.gmra.mrb[88].mxu1 %vm1909_vm7, %v6338_v46 }
 0x2b7   :  { %3782 = vmatprep.mubr.msk.f32.mxu1 %vm1909_vm7, %v6339_v3 }
 0x2ba   :  { %3783 = vmatmul.mubr.msk.f32.gmra.mrb[90].mxu1 %vm1909_vm7, %v6340_v9 }
 0x2bb   :  { %3785 = vmatprep.mubr.msk.f32.mxu1 %vm1909_vm7, %v6341_v50 }
 0x2be   :  { %3786 = vmatmul.mubr.msk.f32.gmra.mrb[92].mxu1 %vm1909_vm7, %v6342_v26 }
 0x2bf   :  { %3788 = vmatprep.mubr.msk.f32.mxu1 %vm1909_vm7, %v6343_v59 }
 0x2c2   :  { %3789 = vmatmul.mubr.msk.f32.gmra.mrb[94].mxu1 %vm1909_vm7, %v6344_v55 }
 0x2c3   :  { %3791 = vmatprep.mubr.msk.f32.mxu1 %vm1909_vm7, %v6345_v63 }
 0x2c6   :  { %3792 = vmatmul.mubr.msk.f32.gmra.mrb[96].mxu1 %vm1909_vm7, %v6346_v61 }
 0x2c7   :  { %3794 = vmatprep.mubr.msk.f32.mxu1 %vm1909_vm7, %v6347_v30 }
 0x2ca   :  { %3795 = vmatmul.mubr.msk.f32.gmra.mrb[98].mxu1 %vm1909_vm7, %v6348_v10 }
 0x2cb   :  { %3797 = vmatprep.mubr.msk.f32.mxu1 %vm1909_vm7, %v6349_v21 }
 0x2ce   :  { %3798 = vmatmul.mubr.msk.f32.gmra.mrb[100].mxu1 %vm1909_vm7, %v6350_v32 }
 0x2cf   :  { %3800 = vmatprep.mubr.msk.f32.mxu1 %vm1909_vm7, %v6351_v53 }
 0x2d2   :  { %3801 = vmatmul.mubr.msk.f32.gmra.mrb[102].mxu1 %vm1909_vm7, %v6352_v4 }
 0x2d3   :  { %3803 = vmatprep.mubr.msk.f32.mxu1 %vm1909_vm7, %v6353_v8 }
 0x2d6   :  { %3804 = vmatmul.mubr.msk.f32.gmra.mrb[104].mxu1 %vm1909_vm7, %v6354_v16 }
 0x2d7   :  { %3806 = vmatprep.mubr.msk.f32.mxu1 %vm1909_vm7, %v6355_v31 }
 0x2d9   :  { %v3647_v13 = vpop.f32.mrb[0].mxu1 }
 0x2da   :  { %v1835_v17 = vadd.f32 %v3647_v13, %v5546_v49  ;;  %v1829_v24 = vpop.f32.mrb[1].mxu1  ;;  %3807 = vmatmul.mubr.msk.f32.gmra.mrb[106].mxu1 %vm1909_vm7, %v6356_v28 }
 0x2db   :  { %v1830_v48 = vadd.f32 %v5546_v49, %v1829_v24  ;;  %3809 = vmatprep.mubr.msk.f32.mxu1 %vm1909_vm7, %v6357_v34 }
 0x2dc   :  { %2761 = vst.msk [vmem:[%s6112_s6 + $0x88] sm:$0xff] %vm2743_vm8, %v1835_v17 }
 0x2dd   :  { %2760 = vst.msk [vmem:[%s6112_s6 + $0x80] sm:$0xff] %vm2743_vm8, %v1830_v48  ;;  %v3650_v2 = vpop.f32.mrb[2].mxu1 }
 0x2de   :  { %v1845_v0 = vadd.f32 %v3650_v2, %v5546_v49  ;;  %v1839_v12 = vpop.f32.mrb[3].mxu1  ;;  %3810 = vmatmul.mubr.msk.f32.gmra.mrb[108].mxu1 %vm1909_vm7, %v6358_v14 }
 0x2df   :  { %v1840_v6 = vadd.f32 %v5546_v49, %v1839_v12  ;;  %3812 = vmatprep.mubr.msk.f32.mxu1 %vm1909_vm7, %v4926_v25 }
 0x2e0   :  { %2763 = vst.msk [vmem:[%s6112_s6 + $0x98] sm:$0xff] %vm2743_vm8, %v1845_v0 }
 0x2e1   :  { %2762 = vst.msk [vmem:[%s6112_s6 + $0x90] sm:$0xff] %vm2743_vm8, %v1840_v6  ;;  %v3653_v33 = vpop.f32.mrb[4].mxu1 }
 0x2e2   :  { %v1855_v36 = vadd.f32 %v3653_v33, %v5546_v49  ;;  %v1849_v47 = vpop.f32.mrb[5].mxu1  ;;  %3813 = vmatmul.mubr.msk.f32.gmra.mrb[110].mxu1 %vm1909_vm7, %v4915_v18 }
 0x2e3   :  { %v1850_v45 = vadd.f32 %v5546_v49, %v1849_v47 }
 0x2e4   :  { %2765 = vst.msk [vmem:[%s6112_s6 + $0xa8] sm:$0xff] %vm2743_vm8, %v1855_v36 }
 0x2e5   :  { %2764 = vst.msk [vmem:[%s6112_s6 + $0xa0] sm:$0xff] %vm2743_vm8, %v1850_v45  ;;  %v3656_v20 = vpop.f32.mrb[6].mxu1 }
 0x2e6   :  { %v1865_v25 = vadd.f32 %v3656_v20, %v5546_v49  ;;  %v1859_v7 = vpop.f32.mrb[7].mxu1 }
 0x2e7   :  { %v1860_v35 = vadd.f32 %v5546_v49, %v1859_v7 }
 0x2e8   :  { %2767 = vst.msk [vmem:[%s6112_s6 + $0xb8] sm:$0xff] %vm2743_vm8, %v1865_v25 }
 0x2e9   :  { %2766 = vst.msk [vmem:[%s6112_s6 + $0xb0] sm:$0xff] %vm2743_vm8, %v1860_v35  ;;  %v3659_v38 = vpop.f32.mrb[8].mxu1 }
 0x2ea   :  { %v1875_v1 = vadd.f32 %v3659_v38, %v5546_v49  ;;  %v1869_v18 = vpop.f32.mrb[9].mxu1 }
 0x2eb   :  { %v1870_v57 = vadd.f32 %v5546_v49, %v1869_v18 }
 0x2ec   :  { %2769 = vst.msk [vmem:[%s6112_s6 + $0xc8] sm:$0xff] %vm2743_vm8, %v1875_v1 }
 0x2ed   :  { %2768 = vst.msk [vmem:[%s6112_s6 + $0xc0] sm:$0xff] %vm2743_vm8, %v1870_v57  ;;  %v3662_v29 = vpop.f32.mrb[10].mxu1 }
 0x2ee   :  { %v1885_v27 = vadd.f32 %v3662_v29, %v5546_v49  ;;  %v1879_v37 = vpop.f32.mrb[11].mxu1 }
 0x2ef   :  { %v1880_v40 = vadd.f32 %v5546_v49, %v1879_v37 }
 0x2f0   :  { %2771 = vst.msk [vmem:[%s6112_s6 + $0xd8] sm:$0xff] %vm2743_vm8, %v1885_v27 }
 0x2f1   :  { %2770 = vst.msk [vmem:[%s6112_s6 + $0xd0] sm:$0xff] %vm2743_vm8, %v1880_v40  ;;  %v3665_v60 = vpop.f32.mrb[12].mxu1 }
 0x2f2   :  { %v1895_v22 = vadd.f32 %v3665_v60, %v5546_v49  ;;  %v1889_v56 = vpop.f32.mrb[13].mxu1 }
 0x2f3   :  { %v1890_v52 = vadd.f32 %v5546_v49, %v1889_v56 }
 0x2f4   :  { %2773 = vst.msk [vmem:[%s6112_s6 + $0xe8] sm:$0xff] %vm2743_vm8, %v1895_v22 }
 0x2f5   :  { %2772 = vst.msk [vmem:[%s6112_s6 + $0xe0] sm:$0xff] %vm2743_vm8, %v1890_v52  ;;  %v3668_v39 = vpop.f32.mrb[14].mxu1 }
 0x2f6   :  { %v1905_v42 = vadd.f32 %v3668_v39, %v5546_v49  ;;  %v1899_v23 = vpop.f32.mrb[15].mxu1 }
 0x2f7   :  { %v1900_v19 = vadd.f32 %v5546_v49, %v1899_v23 }
 0x2f8   :  { %2775 = vst.msk [vmem:[%s6112_s6 + $0xf8] sm:$0xff] %vm2743_vm8, %v1905_v42 }
 0x2f9   :  { %2774 = vst.msk [vmem:[%s6112_s6 + $0xf0] sm:$0xff] %vm2743_vm8, %v1900_v19  ;;  %v3623_v58 = vpop.f32.mrb[96].mxu0  ;;  %v3673_v11 = vpop.f32.mrb[16].mxu1 }
 0x2fa   :  { %v1755_v41 = vadd.f32 %v3623_v58, %v5546_v49  ;;  %2777 = vst.msk [vmem:[%s6113_s7 + $0x8] sm:$0xff] %vm1909_vm7, %v3673_v11  ;;  %v1749_v44 = vpop.f32.mrb[97].mxu0  ;;  %v2264_v15 = vpop.f32.mrb[17].mxu1 }
 0x2fb   :  { %v1750_v62 = vadd.f32 %v5546_v49, %v1749_v44  ;;  %2776 = vst.msk [vmem:[%s6113_s7] sm:$0xff] %vm1909_vm7, %v2264_v15 }
 0x2fc   :  { %2745 = vst.msk [vmem:[%s6112_s6 + $0x8] sm:$0xff] %vm2743_vm8, %v1755_v41 }
 0x2fd   :  { %2744 = vst.msk [vmem:[%s6112_s6] sm:$0xff] %vm2743_vm8, %v1750_v62  ;;  %v3626_v54 = vpop.f32.mrb[98].mxu0  ;;  %v3676_v5 = vpop.f32.mrb[18].mxu1 }
 0x2fe   :  { %v1765_v43 = vadd.f32 %v3626_v54, %v5546_v49  ;;  %2779 = vst.msk [vmem:[%s6113_s7 + $0x18] sm:$0xff] %vm1909_vm7, %v3676_v5  ;;  %v1759_v51 = vpop.f32.mrb[99].mxu0  ;;  %v2274_v46 = vpop.f32.mrb[19].mxu1 }
 0x2ff   :  { %v1760_v3 = vadd.f32 %v5546_v49, %v1759_v51  ;;  %2778 = vst.msk [vmem:[%s6113_s7 + $0x10] sm:$0xff] %vm1909_vm7, %v2274_v46 }
 0x300   :  { %2747 = vst.msk [vmem:[%s6112_s6 + $0x18] sm:$0xff] %vm2743_vm8, %v1765_v43 }
 0x301   :  { %2746 = vst.msk [vmem:[%s6112_s6 + $0x10] sm:$0xff] %vm2743_vm8, %v1760_v3  ;;  %v3629_v9 = vpop.f32.mrb[100].mxu0  ;;  %v3679_v50 = vpop.f32.mrb[20].mxu1 }
 0x302   :  { %v1775_v26 = vadd.f32 %v3629_v9, %v5546_v49  ;;  %2781 = vst.msk [vmem:[%s6113_s7 + $0x28] sm:$0xff] %vm1909_vm7, %v3679_v50  ;;  %v1769_v59 = vpop.f32.mrb[101].mxu0  ;;  %v2284_v55 = vpop.f32.mrb[21].mxu1 }
 0x303   :  { %v1770_v63 = vadd.f32 %v5546_v49, %v1769_v59  ;;  %2780 = vst.msk [vmem:[%s6113_s7 + $0x20] sm:$0xff] %vm1909_vm7, %v2284_v55 }
 0x304   :  { %2749 = vst.msk [vmem:[%s6112_s6 + $0x28] sm:$0xff] %vm2743_vm8, %v1775_v26 }
 0x305   :  { %2748 = vst.msk [vmem:[%s6112_s6 + $0x20] sm:$0xff] %vm2743_vm8, %v1770_v63  ;;  %v3632_v61 = vpop.f32.mrb[102].mxu0  ;;  %v3682_v30 = vpop.f32.mrb[22].mxu1 }
 0x306   :  { %v1785_v10 = vadd.f32 %v3632_v61, %v5546_v49  ;;  %2783 = vst.msk [vmem:[%s6113_s7 + $0x38] sm:$0xff] %vm1909_vm7, %v3682_v30  ;;  %v1779_v21 = vpop.f32.mrb[103].mxu0  ;;  %v2294_v32 = vpop.f32.mrb[23].mxu1 }
 0x307   :  { %v1780_v53 = vadd.f32 %v5546_v49, %v1779_v21  ;;  %2782 = vst.msk [vmem:[%s6113_s7 + $0x30] sm:$0xff] %vm1909_vm7, %v2294_v32 }
 0x308   :  { %2751 = vst.msk [vmem:[%s6112_s6 + $0x38] sm:$0xff] %vm2743_vm8, %v1785_v10 }
 0x309   :  { %2750 = vst.msk [vmem:[%s6112_s6 + $0x30] sm:$0xff] %vm2743_vm8, %v1780_v53  ;;  %v3635_v4 = vpop.f32.mrb[104].mxu0  ;;  %v3685_v8 = vpop.f32.mrb[24].mxu1 }
 0x30a   :  { %v1795_v16 = vadd.f32 %v3635_v4, %v5546_v49  ;;  %2785 = vst.msk [vmem:[%s6113_s7 + $0x48] sm:$0xff] %vm1909_vm7, %v3685_v8  ;;  %v1789_v13 = vpop.f32.mrb[105].mxu0  ;;  %v2304_v31 = vpop.f32.mrb[25].mxu1 }
 0x30b   :  { %v1790_v17 = vadd.f32 %v5546_v49, %v1789_v13  ;;  %2784 = vst.msk [vmem:[%s6113_s7 + $0x40] sm:$0xff] %vm1909_vm7, %v2304_v31 }
 0x30c   :  { %2753 = vst.msk [vmem:[%s6112_s6 + $0x48] sm:$0xff] %vm2743_vm8, %v1795_v16 }
 0x30d   :  { %2752 = vst.msk [vmem:[%s6112_s6 + $0x40] sm:$0xff] %vm2743_vm8, %v1790_v17  ;;  %v3638_v24 = vpop.f32.mrb[106].mxu0  ;;  %v3688_v48 = vpop.f32.mrb[26].mxu1 }
 0x30e   :  { %v1805_v28 = vadd.f32 %v3638_v24, %v5546_v49  ;;  %2787 = vst.msk [vmem:[%s6113_s7 + $0x58] sm:$0xff] %vm1909_vm7, %v3688_v48  ;;  %v1799_v2 = vpop.f32.mrb[107].mxu0  ;;  %v2314_v34 = vpop.f32.mrb[27].mxu1 }
 0x30f   :  { %v1800_v0 = vadd.f32 %v5546_v49, %v1799_v2  ;;  %2786 = vst.msk [vmem:[%s6113_s7 + $0x50] sm:$0xff] %vm1909_vm7, %v2314_v34 }
 0x310   :  { %2755 = vst.msk [vmem:[%s6112_s6 + $0x58] sm:$0xff] %vm2743_vm8, %v1805_v28 }
 0x311   :  { %2754 = vst.msk [vmem:[%s6112_s6 + $0x50] sm:$0xff] %vm2743_vm8, %v1800_v0  ;;  %v3641_v12 = vpop.f32.mrb[108].mxu0  ;;  %v3691_v6 = vpop.f32.mrb[28].mxu1 }
 0x312   :  { %v1815_v14 = vadd.f32 %v3641_v12, %v5546_v49  ;;  %2789 = vst.msk [vmem:[%s6113_s7 + $0x68] sm:$0xff] %vm1909_vm7, %v3691_v6  ;;  %v1809_v33 = vpop.f32.mrb[109].mxu0  ;;  %v2324_v36 = vpop.f32.mrb[29].mxu1 }
 0x313   :  { %v1810_v47 = vadd.f32 %v5546_v49, %v1809_v33  ;;  %2788 = vst.msk [vmem:[%s6113_s7 + $0x60] sm:$0xff] %vm1909_vm7, %v2324_v36 }
 0x314   :  { %2757 = vst.msk [vmem:[%s6112_s6 + $0x68] sm:$0xff] %vm2743_vm8, %v1815_v14 }
 0x315   :  { %2756 = vst.msk [vmem:[%s6112_s6 + $0x60] sm:$0xff] %vm2743_vm8, %v1810_v47  ;;  %v3644_v45 = vpop.f32.mrb[110].mxu0  ;;  %v3694_v20 = vpop.f32.mrb[30].mxu1 }
 0x316   :  { %v1825_v25 = vadd.f32 %v3644_v45, %v5546_v49  ;;  %2791 = vst.msk [vmem:[%s6113_s7 + $0x78] sm:$0xff] %vm1909_vm7, %v3694_v20  ;;  %v1819_v7 = vpop.f32.mrb[111].mxu0  ;;  %v2334_v35 = vpop.f32.mrb[31].mxu1 }
 0x317   :  { %v1820_v38 = vadd.f32 %v5546_v49, %v1819_v7  ;;  %2790 = vst.msk [vmem:[%s6113_s7 + $0x70] sm:$0xff] %vm1909_vm7, %v2334_v35 }
 0x318   :  { %2759 = vst.msk [vmem:[%s6112_s6 + $0x78] sm:$0xff] %vm2743_vm8, %v1825_v25 }
 0x319   :  { %2758 = vst.msk [vmem:[%s6112_s6 + $0x70] sm:$0xff] %vm2743_vm8, %v1820_v38  ;;  %v3697_v1 = vpop.f32.mrb[32].mxu1 }
 0x31a   :  { %2793 = vst.msk [vmem:[%s6113_s7 + $0x88] sm:$0xff] %vm1909_vm7, %v3697_v1  ;;  %v2344_v49 = vpop.f32.mrb[33].mxu1 }
 0x31b   :  { %2792 = vst.msk [vmem:[%s6113_s7 + $0x80] sm:$0xff] %vm1909_vm7, %v2344_v49 }
 0x31d   :  { %v3700_v18 = vpop.f32.mrb[34].mxu1 }
 0x31e   :  { %2795 = vst.msk [vmem:[%s6113_s7 + $0x98] sm:$0xff] %vm1909_vm7, %v3700_v18  ;;  %v2354_v57 = vpop.f32.mrb[35].mxu1 }
 0x31f   :  { %2794 = vst.msk [vmem:[%s6113_s7 + $0x90] sm:$0xff] %vm1909_vm7, %v2354_v57 }
 0x321   :  { %v3703_v29 = vpop.f32.mrb[36].mxu1 }
 0x322   :  { %2797 = vst.msk [vmem:[%s6113_s7 + $0xa8] sm:$0xff] %vm1909_vm7, %v3703_v29  ;;  %v2364_v27 = vpop.f32.mrb[37].mxu1 }
 0x323   :  { %2796 = vst.msk [vmem:[%s6113_s7 + $0xa0] sm:$0xff] %vm1909_vm7, %v2364_v27 }
 0x325   :  { %v3706_v37 = vpop.f32.mrb[38].mxu1 }
 0x326   :  { %2799 = vst.msk [vmem:[%s6113_s7 + $0xb8] sm:$0xff] %vm1909_vm7, %v3706_v37  ;;  %v2374_v40 = vpop.f32.mrb[39].mxu1 }
 0x327   :  { %2798 = vst.msk [vmem:[%s6113_s7 + $0xb0] sm:$0xff] %vm1909_vm7, %v2374_v40 }
 0x329   :  { %v3709_v60 = vpop.f32.mrb[40].mxu1 }
 0x32a   :  { %2801 = vst.msk [vmem:[%s6113_s7 + $0xc8] sm:$0xff] %vm1909_vm7, %v3709_v60  ;;  %v2384_v22 = vpop.f32.mrb[41].mxu1 }
 0x32b   :  { %2800 = vst.msk [vmem:[%s6113_s7 + $0xc0] sm:$0xff] %vm1909_vm7, %v2384_v22 }
 0x32d   :  { %v3712_v56 = vpop.f32.mrb[42].mxu1 }
 0x32e   :  { %2803 = vst.msk [vmem:[%s6113_s7 + $0xd8] sm:$0xff] %vm1909_vm7, %v3712_v56  ;;  %v2394_v52 = vpop.f32.mrb[43].mxu1 }
 0x32f   :  { %2802 = vst.msk [vmem:[%s6113_s7 + $0xd0] sm:$0xff] %vm1909_vm7, %v2394_v52 }
 0x331   :  { %v3715_v39 = vpop.f32.mrb[44].mxu1 }
 0x332   :  { %2805 = vst.msk [vmem:[%s6113_s7 + $0xe8] sm:$0xff] %vm1909_vm7, %v3715_v39  ;;  %v2404_v42 = vpop.f32.mrb[45].mxu1 }
 0x333   :  { %2804 = vst.msk [vmem:[%s6113_s7 + $0xe0] sm:$0xff] %vm1909_vm7, %v2404_v42 }
 0x335   :  { %v3718_v23 = vpop.f32.mrb[46].mxu1 }
 0x336   :  { %2807 = vst.msk [vmem:[%s6113_s7 + $0xf8] sm:$0xff] %vm1909_vm7, %v3718_v23  ;;  %v2414_v19 = vpop.f32.mrb[47].mxu1 }
 0x337   :  { %2806 = vst.msk [vmem:[%s6113_s7 + $0xf0] sm:$0xff] %vm1909_vm7, %v2414_v19 }
 0x339   :  { %v3721_v58 = vpop.f32.mrb[48].mxu1 }
 0x33a   :  { %3174 = vst.msk [vmem:[%s6113_s7 + $0x108] sm:$0xff] %vm1909_vm7, %v3721_v58  ;;  %v2424_v11 = vpop.f32.mrb[49].mxu1 }
 0x33b   :  { %3173 = vst.msk [vmem:[%s6113_s7 + $0x100] sm:$0xff] %vm1909_vm7, %v2424_v11 }
 0x33d   :  { %v3724_v41 = vpop.f32.mrb[50].mxu1 }
 0x33e   :  { %3176 = vst.msk [vmem:[%s6113_s7 + $0x118] sm:$0xff] %vm1909_vm7, %v3724_v41  ;;  %v2434_v44 = vpop.f32.mrb[51].mxu1 }
 0x33f   :  { %3175 = vst.msk [vmem:[%s6113_s7 + $0x110] sm:$0xff] %vm1909_vm7, %v2434_v44 }
 0x341   :  { %v3727_v15 = vpop.f32.mrb[52].mxu1 }
 0x342   :  { %3178 = vst.msk [vmem:[%s6113_s7 + $0x128] sm:$0xff] %vm1909_vm7, %v3727_v15  ;;  %v2444_v62 = vpop.f32.mrb[53].mxu1 }
 0x343   :  { %3177 = vst.msk [vmem:[%s6113_s7 + $0x120] sm:$0xff] %vm1909_vm7, %v2444_v62 }
 0x345   :  { %v3730_v54 = vpop.f32.mrb[54].mxu1 }
 0x346   :  { %3180 = vst.msk [vmem:[%s6113_s7 + $0x138] sm:$0xff] %vm1909_vm7, %v3730_v54  ;;  %v2454_v5 = vpop.f32.mrb[55].mxu1 }
 0x347   :  { %3179 = vst.msk [vmem:[%s6113_s7 + $0x130] sm:$0xff] %vm1909_vm7, %v2454_v5 }
 0x349   :  { %v3733_v43 = vpop.f32.mrb[56].mxu1 }
 0x34a   :  { %3182 = vst.msk [vmem:[%s6113_s7 + $0x148] sm:$0xff] %vm1909_vm7, %v3733_v43  ;;  %v2464_v51 = vpop.f32.mrb[57].mxu1 }
 0x34b   :  { %3181 = vst.msk [vmem:[%s6113_s7 + $0x140] sm:$0xff] %vm1909_vm7, %v2464_v51 }
 0x34d   :  { %v3736_v46 = vpop.f32.mrb[58].mxu1 }
 0x34e   :  { %3184 = vst.msk [vmem:[%s6113_s7 + $0x158] sm:$0xff] %vm1909_vm7, %v3736_v46  ;;  %v2474_v3 = vpop.f32.mrb[59].mxu1 }
 0x34f   :  { %3183 = vst.msk [vmem:[%s6113_s7 + $0x150] sm:$0xff] %vm1909_vm7, %v2474_v3 }
 0x351   :  { %v3739_v9 = vpop.f32.mrb[60].mxu1 }
 0x352   :  { %3186 = vst.msk [vmem:[%s6113_s7 + $0x168] sm:$0xff] %vm1909_vm7, %v3739_v9  ;;  %v2484_v50 = vpop.f32.mrb[61].mxu1 }
 0x353   :  { %3185 = vst.msk [vmem:[%s6113_s7 + $0x160] sm:$0xff] %vm1909_vm7, %v2484_v50 }
 0x355   :  { %v3742_v26 = vpop.f32.mrb[62].mxu1 }
 0x356   :  { %3188 = vst.msk [vmem:[%s6113_s7 + $0x178] sm:$0xff] %vm1909_vm7, %v3742_v26  ;;  %v2494_v59 = vpop.f32.mrb[63].mxu1 }
 0x357   :  { %3187 = vst.msk [vmem:[%s6113_s7 + $0x170] sm:$0xff] %vm1909_vm7, %v2494_v59 }
 0x359   :  { %v3745_v55 = vpop.f32.mrb[64].mxu1 }
 0x35a   :  { %3190 = vst.msk [vmem:[%s6113_s7 + $0x188] sm:$0xff] %vm1909_vm7, %v3745_v55  ;;  %v2504_v63 = vpop.f32.mrb[65].mxu1 }
 0x35b   :  { %3189 = vst.msk [vmem:[%s6113_s7 + $0x180] sm:$0xff] %vm1909_vm7, %v2504_v63 }
 0x35d   :  { %v3748_v61 = vpop.f32.mrb[66].mxu1 }
 0x35e   :  { %3192 = vst.msk [vmem:[%s6113_s7 + $0x198] sm:$0xff] %vm1909_vm7, %v3748_v61  ;;  %v2514_v30 = vpop.f32.mrb[67].mxu1 }
 0x35f   :  { %3191 = vst.msk [vmem:[%s6113_s7 + $0x190] sm:$0xff] %vm1909_vm7, %v2514_v30 }
 0x361   :  { %v3751_v10 = vpop.f32.mrb[68].mxu1 }
 0x362   :  { %3194 = vst.msk [vmem:[%s6113_s7 + $0x1a8] sm:$0xff] %vm1909_vm7, %v3751_v10  ;;  %v2524_v21 = vpop.f32.mrb[69].mxu1 }
 0x363   :  { %3193 = vst.msk [vmem:[%s6113_s7 + $0x1a0] sm:$0xff] %vm1909_vm7, %v2524_v21 }
 0x365   :  { %v3754_v32 = vpop.f32.mrb[70].mxu1 }
 0x366   :  { %3196 = vst.msk [vmem:[%s6113_s7 + $0x1b8] sm:$0xff] %vm1909_vm7, %v3754_v32  ;;  %v2534_v53 = vpop.f32.mrb[71].mxu1 }
 0x367   :  { %3195 = vst.msk [vmem:[%s6113_s7 + $0x1b0] sm:$0xff] %vm1909_vm7, %v2534_v53 }
 0x369   :  { %v3757_v4 = vpop.f32.mrb[72].mxu1 }
 0x36a   :  { %3198 = vst.msk [vmem:[%s6113_s7 + $0x1c8] sm:$0xff] %vm1909_vm7, %v3757_v4  ;;  %v2544_v8 = vpop.f32.mrb[73].mxu1 }
 0x36b   :  { %3197 = vst.msk [vmem:[%s6113_s7 + $0x1c0] sm:$0xff] %vm1909_vm7, %v2544_v8 }
 0x36d   :  { %v3760_v16 = vpop.f32.mrb[74].mxu1 }
 0x36e   :  { %3200 = vst.msk [vmem:[%s6113_s7 + $0x1d8] sm:$0xff] %vm1909_vm7, %v3760_v16  ;;  %v2554_v13 = vpop.f32.mrb[75].mxu1 }
 0x36f   :  { %3199 = vst.msk [vmem:[%s6113_s7 + $0x1d0] sm:$0xff] %vm1909_vm7, %v2554_v13 }
 0x371   :  { %v3763_v31 = vpop.f32.mrb[76].mxu1 }
 0x372   :  { %3202 = vst.msk [vmem:[%s6113_s7 + $0x1e8] sm:$0xff] %vm1909_vm7, %v3763_v31  ;;  %v2564_v17 = vpop.f32.mrb[77].mxu1 }
 0x373   :  { %3201 = vst.msk [vmem:[%s6113_s7 + $0x1e0] sm:$0xff] %vm1909_vm7, %v2564_v17 }
 0x375   :  { %v3766_v24 = vpop.f32.mrb[78].mxu1 }
 0x376   :  { %3204 = vst.msk [vmem:[%s6113_s7 + $0x1f8] sm:$0xff] %vm1909_vm7, %v3766_v24  ;;  %v2574_v48 = vpop.f32.mrb[79].mxu1 }
 0x377   :  { %3203 = vst.msk [vmem:[%s6113_s7 + $0x1f0] sm:$0xff] %vm1909_vm7, %v2574_v48 }
 0x379   :  { %v3769_v28 = vpop.f32.mrb[80].mxu1 }
 0x37a   :  { %3206 = vst.msk [vmem:[%s6113_s7 + $0x208] sm:$0xff] %vm1909_vm7, %v3769_v28  ;;  %v2584_v2 = vpop.f32.mrb[81].mxu1 }
 0x37b   :  { %3205 = vst.msk [vmem:[%s6113_s7 + $0x200] sm:$0xff] %vm1909_vm7, %v2584_v2 }
 0x37d   :  { %v3772_v34 = vpop.f32.mrb[82].mxu1 }
 0x37e   :  { %3208 = vst.msk [vmem:[%s6113_s7 + $0x218] sm:$0xff] %vm1909_vm7, %v3772_v34  ;;  %v2594_v0 = vpop.f32.mrb[83].mxu1 }
 0x37f   :  { %3207 = vst.msk [vmem:[%s6113_s7 + $0x210] sm:$0xff] %vm1909_vm7, %v2594_v0 }
 0x381   :  { %v3775_v12 = vpop.f32.mrb[84].mxu1 }
 0x382   :  { %3210 = vst.msk [vmem:[%s6113_s7 + $0x228] sm:$0xff] %vm1909_vm7, %v3775_v12  ;;  %v2604_v6 = vpop.f32.mrb[85].mxu1 }
 0x383   :  { %3209 = vst.msk [vmem:[%s6113_s7 + $0x220] sm:$0xff] %vm1909_vm7, %v2604_v6 }
 0x385   :  { %v3778_v14 = vpop.f32.mrb[86].mxu1 }
 0x386   :  { %3212 = vst.msk [vmem:[%s6113_s7 + $0x238] sm:$0xff] %vm1909_vm7, %v3778_v14  ;;  %v2614_v33 = vpop.f32.mrb[87].mxu1 }
 0x387   :  { %3211 = vst.msk [vmem:[%s6113_s7 + $0x230] sm:$0xff] %vm1909_vm7, %v2614_v33 }
 0x389   :  { %v3781_v36 = vpop.f32.mrb[88].mxu1 }
 0x38a   :  { %3214 = vst.msk [vmem:[%s6113_s7 + $0x248] sm:$0xff] %vm1909_vm7, %v3781_v36  ;;  %v2624_v47 = vpop.f32.mrb[89].mxu1 }
 0x38b   :  { %3213 = vst.msk [vmem:[%s6113_s7 + $0x240] sm:$0xff] %vm1909_vm7, %v2624_v47 }
 0x38d   :  { %v3784_v45 = vpop.f32.mrb[90].mxu1 }
 0x38e   :  { %3216 = vst.msk [vmem:[%s6113_s7 + $0x258] sm:$0xff] %vm1909_vm7, %v3784_v45  ;;  %v2634_v20 = vpop.f32.mrb[91].mxu1 }
 0x38f   :  { %3215 = vst.msk [vmem:[%s6113_s7 + $0x250] sm:$0xff] %vm1909_vm7, %v2634_v20 }
 0x391   :  { %v3787_v25 = vpop.f32.mrb[92].mxu1 }
 0x392   :  { %3218 = vst.msk [vmem:[%s6113_s7 + $0x268] sm:$0xff] %vm1909_vm7, %v3787_v25  ;;  %v2644_v7 = vpop.f32.mrb[93].mxu1 }
 0x393   :  { %3217 = vst.msk [vmem:[%s6113_s7 + $0x260] sm:$0xff] %vm1909_vm7, %v2644_v7 }
 0x395   :  { %v3790_v35 = vpop.f32.mrb[94].mxu1 }
 0x396   :  { %3220 = vst.msk [vmem:[%s6113_s7 + $0x278] sm:$0xff] %vm1909_vm7, %v3790_v35  ;;  %v2654_v38 = vpop.f32.mrb[95].mxu1 }
 0x397   :  { %3219 = vst.msk [vmem:[%s6113_s7 + $0x270] sm:$0xff] %vm1909_vm7, %v2654_v38 }
 0x399   :  { %v3793_v1 = vpop.f32.mrb[96].mxu1 }
 0x39a   :  { %3222 = vst.msk [vmem:[%s6113_s7 + $0x288] sm:$0xff] %vm1909_vm7, %v3793_v1  ;;  %v2664_v49 = vpop.f32.mrb[97].mxu1 }
 0x39b   :  { %3221 = vst.msk [vmem:[%s6113_s7 + $0x280] sm:$0xff] %vm1909_vm7, %v2664_v49 }
 0x39d   :  { %v3796_v18 = vpop.f32.mrb[98].mxu1 }
 0x39e   :  { %3224 = vst.msk [vmem:[%s6113_s7 + $0x298] sm:$0xff] %vm1909_vm7, %v3796_v18  ;;  %v2674_v57 = vpop.f32.mrb[99].mxu1 }
 0x39f   :  { %3223 = vst.msk [vmem:[%s6113_s7 + $0x290] sm:$0xff] %vm1909_vm7, %v2674_v57 }
 0x3a1   :  { %v3799_v29 = vpop.f32.mrb[100].mxu1 }
 0x3a2   :  { %3226 = vst.msk [vmem:[%s6113_s7 + $0x2a8] sm:$0xff] %vm1909_vm7, %v3799_v29  ;;  %v2684_v27 = vpop.f32.mrb[101].mxu1 }
 0x3a3   :  { %3225 = vst.msk [vmem:[%s6113_s7 + $0x2a0] sm:$0xff] %vm1909_vm7, %v2684_v27 }
 0x3a5   :  { %v3802_v37 = vpop.f32.mrb[102].mxu1 }
 0x3a6   :  { %3228 = vst.msk [vmem:[%s6113_s7 + $0x2b8] sm:$0xff] %vm1909_vm7, %v3802_v37  ;;  %v2694_v40 = vpop.f32.mrb[103].mxu1 }
 0x3a7   :  { %3227 = vst.msk [vmem:[%s6113_s7 + $0x2b0] sm:$0xff] %vm1909_vm7, %v2694_v40 }
 0x3a9   :  { %v3805_v60 = vpop.f32.mrb[104].mxu1 }
 0x3aa   :  { %3230 = vst.msk [vmem:[%s6113_s7 + $0x2c8] sm:$0xff] %vm1909_vm7, %v3805_v60  ;;  %v2704_v22 = vpop.f32.mrb[105].mxu1 }
 0x3ab   :  { %3229 = vst.msk [vmem:[%s6113_s7 + $0x2c0] sm:$0xff] %vm1909_vm7, %v2704_v22 }
 0x3ad   :  { %v3808_v56 = vpop.f32.mrb[106].mxu1 }
 0x3ae   :  { %3232 = vst.msk [vmem:[%s6113_s7 + $0x2d8] sm:$0xff] %vm1909_vm7, %v3808_v56  ;;  %v2714_v52 = vpop.f32.mrb[107].mxu1 }
 0x3af   :  { %3231 = vst.msk [vmem:[%s6113_s7 + $0x2d0] sm:$0xff] %vm1909_vm7, %v2714_v52 }
 0x3b1   :  { %v3811_v39 = vpop.f32.mrb[108].mxu1 }
 0x3b2   :  { %3234 = vst.msk [vmem:[%s6113_s7 + $0x2e8] sm:$0xff] %vm1909_vm7, %v3811_v39  ;;  %v2724_v42 = vpop.f32.mrb[109].mxu1 }
 0x3b3   :  { %3233 = vst.msk [vmem:[%s6113_s7 + $0x2e0] sm:$0xff] %vm1909_vm7, %v2724_v42 }
 0x3b5   :  { %v3814_v23 = vpop.f32.mrb[110].mxu1 }
 0x3b6   :  { %3236 = vst.msk [vmem:[%s6113_s7 + $0x2f8] sm:$0xff] %vm1909_vm7, %v3814_v23  ;;  %v2734_v19 = vpop.f32.mrb[111].mxu1 }
 0x3b7   :  { %3235 = vst.msk [vmem:[%s6113_s7 + $0x2f0] sm:$0xff] %vm1909_vm7, %v2734_v19 }

// kernel: flood_block.34
= control target key start
LH: loop header
LB: loop body
LE: loop exit
PB: predicated region body
PF: predicated region fallthrough
CT: control target
= control target key end

     0   :  { %vm156_vm0 = vcmask 64512   ;;  %s7927_s2 = inlined_call_operand.vmem [shape: f32[8,8], index: 2, kind: input, shape index: {}]   ;;  %s7928_s1 = inlined_call_operand.vmem [shape: f32[3,256,8], index: 1, kind: input, shape index: {}]   ;;  %s7929_s4 = inlined_call_operand.vmem [shape: f32[24,16], index: 4, kind: input, shape index: {}]   ;;  %s7930_s3 = inlined_call_operand.vmem [shape: f32[8,8], index: 3, kind: input, shape index: {}]   ;;  %s7931_s0 = inlined_call_operand.vmem [shape: f32[256,16], index: 0, kind: input, shape index: {}]   ;;  %s7932_s5 = inlined_call_operand.vmem [shape: f32[1,16], index: 5, kind: input, shape index: {}]   ;;  %s7933_s6 = inlined_call_operand.vmem [shape: f32[256,16], index: 6, kind: output, shape index: {0}]   ;;  %s7934_s7 = inlined_call_operand.vmem [shape: f32[3,256,8], index: 7, kind: output, shape index: {1}]  }
   0x1   :  { %v155_v0 = vld [vmem:[%s7927_s2] sm:$0xff]  ;;  %v58_v2 = vld [vmem:[%s7928_s1 + $0x8] sm:$0xff]  ;;  %v59_v3 = vld [vmem:[%s7928_s1 + $0x10] sm:$0xff] }
   0x2   :  { %v57_v1 = vld [vmem:[%s7928_s1] sm:$0xff]  ;;  %4221 = vmatprep.subr.mxu0 %v155_v0  ;;  %v60_v4 = vld [vmem:[%s7928_s1 + $0x18] sm:$0xff]  ;;  %v62_v6 = vld [vmem:[%s7928_s1 + $0x28] sm:$0xff] }
   0x3   :  { %4223 = vmatprep.mubr.msk.f32.mxu0 %vm156_vm0, %v57_v1  ;;  %4222 = vmatpush3.msra.mxu0 %v155_v0  ;;  %v61_v5 = vld [vmem:[%s7928_s1 + $0x20] sm:$0xff]  ;;  %v63_v7 = vld [vmem:[%s7928_s1 + $0x30] sm:$0xff]  ;;  %v64_v8 = vld [vmem:[%s7928_s1 + $0x38] sm:$0xff] }
   0x4   :  { %4224 = vmatmul.mubr.msk.f32.vlgmr.msra.gmra.mrb[0].mxu0 %vm156_vm0, %v58_v2  ;;  %v65_v9 = vld [vmem:[%s7928_s1 + $0x40] sm:$0xff]  ;;  %v66_v10 = vld [vmem:[%s7928_s1 + $0x48] sm:$0xff]  ;;  %v67_v11 = vld [vmem:[%s7928_s1 + $0x50] sm:$0xff] }
   0x5   :  { %4226 = vmatprep.mubr.msk.f32.mxu0 %vm156_vm0, %v59_v3  ;;  %v68_v12 = vld [vmem:[%s7928_s1 + $0x58] sm:$0xff]  ;;  %v69_v13 = vld [vmem:[%s7928_s1 + $0x60] sm:$0xff]  ;;  %v70_v14 = vld [vmem:[%s7928_s1 + $0x68] sm:$0xff] }
   0x6   :  { %v71_v15 = vld [vmem:[%s7928_s1 + $0x70] sm:$0xff]  ;;  %v72_v16 = vld [vmem:[%s7928_s1 + $0x78] sm:$0xff]  ;;  %v73_v17 = vld [vmem:[%s7928_s1 + $0x80] sm:$0xff] }
   0x7   :  { %v74_v18 = vld [vmem:[%s7928_s1 + $0x88] sm:$0xff]  ;;  %v75_v19 = vld [vmem:[%s7928_s1 + $0x90] sm:$0xff]  ;;  %v76_v20 = vld [vmem:[%s7928_s1 + $0x98] sm:$0xff] }
   0x8   :  { %4227 = vmatmul.mubr.msk.f32.gmra.mrb[2].mxu0 %vm156_vm0, %v60_v4  ;;  %v77_v21 = vld [vmem:[%s7928_s1 + $0xa0] sm:$0xff]  ;;  %v78_v22 = vld [vmem:[%s7928_s1 + $0xa8] sm:$0xff]  ;;  %v79_v23 = vld [vmem:[%s7928_s1 + $0xb0] sm:$0xff] }
   0x9   :  { %4229 = vmatprep.mubr.msk.f32.mxu0 %vm156_vm0, %v61_v5  ;;  %v80_v24 = vld [vmem:[%s7928_s1 + $0xb8] sm:$0xff]  ;;  %v81_v25 = vld [vmem:[%s7928_s1 + $0xc0] sm:$0xff]  ;;  %v82_v26 = vld [vmem:[%s7928_s1 + $0xc8] sm:$0xff] }
   0xa   :  { %v83_v27 = vld [vmem:[%s7928_s1 + $0xd0] sm:$0xff]  ;;  %v84_v28 = vld [vmem:[%s7928_s1 + $0xd8] sm:$0xff]  ;;  %v85_v29 = vld [vmem:[%s7928_s1 + $0xe0] sm:$0xff] }
   0xb   :  { %v86_v30 = vld [vmem:[%s7928_s1 + $0xe8] sm:$0xff]  ;;  %v87_v31 = vld [vmem:[%s7928_s1 + $0xf0] sm:$0xff]  ;;  %v88_v32 = vld [vmem:[%s7928_s1 + $0xf8] sm:$0xff] }
   0xc   :  { %4230 = vmatmul.mubr.msk.f32.gmra.mrb[4].mxu0 %vm156_vm0, %v62_v6  ;;  %v3607_v33 = vld [vmem:[%s7928_s1 + $0x100] sm:$0xff]  ;;  %v3608_v34 = vld [vmem:[%s7928_s1 + $0x108] sm:$0xff]  ;;  %v3609_v35 = vld [vmem:[%s7928_s1 + $0x110] sm:$0xff] }
   0xd   :  { %4232 = vmatprep.mubr.msk.f32.mxu0 %vm156_vm0, %v63_v7  ;;  %v3610_v36 = vld [vmem:[%s7928_s1 + $0x118] sm:$0xff]  ;;  %v3611_v37 = vld [vmem:[%s7928_s1 + $0x120] sm:$0xff]  ;;  %v3612_v38 = vld [vmem:[%s7928_s1 + $0x128] sm:$0xff] }
   0xe   :  { %v3613_v39 = vld [vmem:[%s7928_s1 + $0x130] sm:$0xff]  ;;  %v3614_v40 = vld [vmem:[%s7928_s1 + $0x138] sm:$0xff]  ;;  %v3615_v41 = vld [vmem:[%s7928_s1 + $0x140] sm:$0xff] }
   0xf   :  { %v3616_v42 = vld [vmem:[%s7928_s1 + $0x148] sm:$0xff]  ;;  %v3617_v43 = vld [vmem:[%s7928_s1 + $0x150] sm:$0xff]  ;;  %v3618_v44 = vld [vmem:[%s7928_s1 + $0x158] sm:$0xff] }
  0x10   :  { %4233 = vmatmul.mubr.msk.f32.gmra.mrb[6].mxu0 %vm156_vm0, %v64_v8  ;;  %v3619_v45 = vld [vmem:[%s7928_s1 + $0x160] sm:$0xff]  ;;  %v3620_v46 = vld [vmem:[%s7928_s1 + $0x168] sm:$0xff]  ;;  %v3621_v47 = vld [vmem:[%s7928_s1 + $0x170] sm:$0xff] }
  0x11   :  { %4235 = vmatprep.mubr.msk.f32.mxu0 %vm156_vm0, %v65_v9  ;;  %v3622_v48 = vld [vmem:[%s7928_s1 + $0x178] sm:$0xff]  ;;  %v3623_v49 = vld [vmem:[%s7928_s1 + $0x180] sm:$0xff]  ;;  %v3624_v50 = vld [vmem:[%s7928_s1 + $0x188] sm:$0xff] }
  0x12   :  { %v3625_v51 = vld [vmem:[%s7928_s1 + $0x190] sm:$0xff]  ;;  %v3626_v52 = vld [vmem:[%s7928_s1 + $0x198] sm:$0xff]  ;;  %v3627_v53 = vld [vmem:[%s7928_s1 + $0x1a0] sm:$0xff] }
  0x13   :  { %v3628_v54 = vld [vmem:[%s7928_s1 + $0x1a8] sm:$0xff]  ;;  %v3629_v55 = vld [vmem:[%s7928_s1 + $0x1b0] sm:$0xff]  ;;  %v3630_v56 = vld [vmem:[%s7928_s1 + $0x1b8] sm:$0xff] }
  0x14   :  { %4236 = vmatmul.mubr.msk.f32.gmra.mrb[8].mxu0 %vm156_vm0, %v66_v10  ;;  %v3631_v57 = vld [vmem:[%s7928_s1 + $0x1c0] sm:$0xff]  ;;  %v3632_v58 = vld [vmem:[%s7928_s1 + $0x1c8] sm:$0xff]  ;;  %v3633_v59 = vld [vmem:[%s7928_s1 + $0x1d0] sm:$0xff] }
  0x15   :  { %4238 = vmatprep.mubr.msk.f32.mxu0 %vm156_vm0, %v67_v11  ;;  %v3634_v60 = vld [vmem:[%s7928_s1 + $0x1d8] sm:$0xff]  ;;  %v3635_v61 = vld [vmem:[%s7928_s1 + $0x1e0] sm:$0xff]  ;;  %v3636_v62 = vld [vmem:[%s7928_s1 + $0x1e8] sm:$0xff] }
  0x16   :  { %v3637_v63 = vld [vmem:[%s7928_s1 + $0x1f0] sm:$0xff]  ;;  %v3638_v0 = vld [vmem:[%s7928_s1 + $0x1f8] sm:$0xff]  ;;  %v3639_v1 = vld [vmem:[%s7928_s1 + $0x200] sm:$0xff] }
  0x17   :  { %v3640_v2 = vld [vmem:[%s7928_s1 + $0x208] sm:$0xff]  ;;  %v3641_v3 = vld [vmem:[%s7928_s1 + $0x210] sm:$0xff]  ;;  %v3642_v4 = vld [vmem:[%s7928_s1 + $0x218] sm:$0xff] }
  0x18   :  { %4239 = vmatmul.mubr.msk.f32.gmra.mrb[10].mxu0 %vm156_vm0, %v68_v12  ;;  %v3643_v5 = vld [vmem:[%s7928_s1 + $0x220] sm:$0xff]  ;;  %v3644_v6 = vld [vmem:[%s7928_s1 + $0x228] sm:$0xff]  ;;  %v3645_v7 = vld [vmem:[%s7928_s1 + $0x230] sm:$0xff] }
  0x19   :  { %4241 = vmatprep.mubr.msk.f32.mxu0 %vm156_vm0, %v69_v13  ;;  %v3646_v8 = vld [vmem:[%s7928_s1 + $0x238] sm:$0xff]  ;;  %v3647_v9 = vld [vmem:[%s7928_s1 + $0x240] sm:$0xff]  ;;  %v3648_v10 = vld [vmem:[%s7928_s1 + $0x248] sm:$0xff] }
  0x1a   :  { %v3649_v11 = vld [vmem:[%s7928_s1 + $0x250] sm:$0xff]  ;;  %v3650_v12 = vld [vmem:[%s7928_s1 + $0x258] sm:$0xff]  ;;  %v3651_v13 = vld [vmem:[%s7928_s1 + $0x260] sm:$0xff] }
  0x1c   :  { %4242 = vmatmul.mubr.msk.f32.gmra.mrb[12].mxu0 %vm156_vm0, %v70_v14  ;;  %v3652_v14 = vld [vmem:[%s7928_s1 + $0x268] sm:$0xff] }
  0x1d   :  { %4244 = vmatprep.mubr.msk.f32.mxu0 %vm156_vm0, %v71_v15  ;;  %v3653_v15 = vld [vmem:[%s7928_s1 + $0x270] sm:$0xff] }
  0x20   :  { %4245 = vmatmul.mubr.msk.f32.gmra.mrb[14].mxu0 %vm156_vm0, %v72_v16  ;;  %v3654_v16 = vld [vmem:[%s7928_s1 + $0x278] sm:$0xff] }
  0x21   :  { %4247 = vmatprep.mubr.msk.f32.mxu0 %vm156_vm0, %v73_v17  ;;  %v3655_v17 = vld [vmem:[%s7928_s1 + $0x280] sm:$0xff] }
  0x24   :  { %4248 = vmatmul.mubr.msk.f32.gmra.mrb[16].mxu0 %vm156_vm0, %v74_v18  ;;  %v3656_v18 = vld [vmem:[%s7928_s1 + $0x288] sm:$0xff] }
  0x25   :  { %4250 = vmatprep.mubr.msk.f32.mxu0 %vm156_vm0, %v75_v19  ;;  %v3657_v19 = vld [vmem:[%s7928_s1 + $0x290] sm:$0xff] }
  0x28   :  { %4251 = vmatmul.mubr.msk.f32.gmra.mrb[18].mxu0 %vm156_vm0, %v76_v20  ;;  %v3658_v20 = vld [vmem:[%s7928_s1 + $0x298] sm:$0xff] }
  0x29   :  { %4253 = vmatprep.mubr.msk.f32.mxu0 %vm156_vm0, %v77_v21  ;;  %v3659_v21 = vld [vmem:[%s7928_s1 + $0x2a0] sm:$0xff] }
  0x2c   :  { %4254 = vmatmul.mubr.msk.f32.gmra.mrb[20].mxu0 %vm156_vm0, %v78_v22  ;;  %v3660_v22 = vld [vmem:[%s7928_s1 + $0x2a8] sm:$0xff] }
  0x2d   :  { %4256 = vmatprep.mubr.msk.f32.mxu0 %vm156_vm0, %v79_v23  ;;  %v3661_v23 = vld [vmem:[%s7928_s1 + $0x2b0] sm:$0xff] }
  0x30   :  { %4257 = vmatmul.mubr.msk.f32.gmra.mrb[22].mxu0 %vm156_vm0, %v80_v24  ;;  %v3662_v24 = vld [vmem:[%s7928_s1 + $0x2b8] sm:$0xff] }
  0x31   :  { %4259 = vmatprep.mubr.msk.f32.mxu0 %vm156_vm0, %v81_v25  ;;  %v3663_v25 = vld [vmem:[%s7928_s1 + $0x2c0] sm:$0xff] }
  0x34   :  { %4260 = vmatmul.mubr.msk.f32.gmra.mrb[24].mxu0 %vm156_vm0, %v82_v26  ;;  %v3664_v26 = vld [vmem:[%s7928_s1 + $0x2c8] sm:$0xff] }
  0x35   :  { %4262 = vmatprep.mubr.msk.f32.mxu0 %vm156_vm0, %v83_v27  ;;  %v3665_v27 = vld [vmem:[%s7928_s1 + $0x2d0] sm:$0xff] }
  0x38   :  { %4263 = vmatmul.mubr.msk.f32.gmra.mrb[26].mxu0 %vm156_vm0, %v84_v28  ;;  %v3666_v28 = vld [vmem:[%s7928_s1 + $0x2d8] sm:$0xff] }
  0x39   :  { %4265 = vmatprep.mubr.msk.f32.mxu0 %vm156_vm0, %v85_v29  ;;  %v3667_v29 = vld [vmem:[%s7928_s1 + $0x2e0] sm:$0xff] }
  0x3c   :  { %4266 = vmatmul.mubr.msk.f32.gmra.mrb[28].mxu0 %vm156_vm0, %v86_v30  ;;  %v3668_v30 = vld [vmem:[%s7928_s1 + $0x2e8] sm:$0xff] }
  0x3d   :  { %4268 = vmatprep.mubr.msk.f32.mxu0 %vm156_vm0, %v87_v31  ;;  %v3669_v31 = vld [vmem:[%s7928_s1 + $0x2f0] sm:$0xff] }
  0x40   :  { %4269 = vmatmul.mubr.msk.f32.gmra.mrb[30].mxu0 %vm156_vm0, %v88_v32  ;;  %v3670_v32 = vld [vmem:[%s7928_s1 + $0x2f8] sm:$0xff] }
  0x41   :  { %4271 = vmatprep.mubr.msk.f32.mxu0 %vm156_vm0, %v3607_v33 }
  0x44   :  { %4272 = vmatmul.mubr.msk.f32.gmra.mrb[32].mxu0 %vm156_vm0, %v3608_v34 }
  0x45   :  { %4274 = vmatprep.mubr.msk.f32.mxu0 %vm156_vm0, %v3609_v35 }
  0x48   :  { %4275 = vmatmul.mubr.msk.f32.gmra.mrb[34].mxu0 %vm156_vm0, %v3610_v36 }
  0x49   :  { %4277 = vmatprep.mubr.msk.f32.mxu0 %vm156_vm0, %v3611_v37 }
  0x4c   :  { %4278 = vmatmul.mubr.msk.f32.gmra.mrb[36].mxu0 %vm156_vm0, %v3612_v38 }
  0x4d   :  { %4280 = vmatprep.mubr.msk.f32.mxu0 %vm156_vm0, %v3613_v39 }
  0x50   :  { %4281 = vmatmul.mubr.msk.f32.gmra.mrb[38].mxu0 %vm156_vm0, %v3614_v40 }
  0x51   :  { %4283 = vmatprep.mubr.msk.f32.mxu0 %vm156_vm0, %v3615_v41 }
  0x54   :  { %4284 = vmatmul.mubr.msk.f32.gmra.mrb[40].mxu0 %vm156_vm0, %v3616_v42 }
  0x55   :  { %4286 = vmatprep.mubr.msk.f32.mxu0 %vm156_vm0, %v3617_v43 }
  0x58   :  { %4287 = vmatmul.mubr.msk.f32.gmra.mrb[42].mxu0 %vm156_vm0, %v3618_v44 }
  0x59   :  { %4289 = vmatprep.mubr.msk.f32.mxu0 %vm156_vm0, %v3619_v45 }
  0x5c   :  { %4290 = vmatmul.mubr.msk.f32.gmra.mrb[44].mxu0 %vm156_vm0, %v3620_v46 }
  0x5d   :  { %4292 = vmatprep.mubr.msk.f32.mxu0 %vm156_vm0, %v3621_v47 }
  0x60   :  { %4293 = vmatmul.mubr.msk.f32.gmra.mrb[46].mxu0 %vm156_vm0, %v3622_v48 }
  0x61   :  { %4295 = vmatprep.mubr.msk.f32.mxu0 %vm156_vm0, %v3623_v49 }
  0x64   :  { %4296 = vmatmul.mubr.msk.f32.gmra.mrb[48].mxu0 %vm156_vm0, %v3624_v50 }
  0x65   :  { %4298 = vmatprep.mubr.msk.f32.mxu0 %vm156_vm0, %v3625_v51 }
  0x68   :  { %4299 = vmatmul.mubr.msk.f32.gmra.mrb[50].mxu0 %vm156_vm0, %v3626_v52 }
  0x69   :  { %4301 = vmatprep.mubr.msk.f32.mxu0 %vm156_vm0, %v3627_v53 }
  0x6c   :  { %4302 = vmatmul.mubr.msk.f32.gmra.mrb[52].mxu0 %vm156_vm0, %v3628_v54 }
  0x6d   :  { %4304 = vmatprep.mubr.msk.f32.mxu0 %vm156_vm0, %v3629_v55 }
  0x70   :  { %4305 = vmatmul.mubr.msk.f32.gmra.mrb[54].mxu0 %vm156_vm0, %v3630_v56 }
  0x71   :  { %4307 = vmatprep.mubr.msk.f32.mxu0 %vm156_vm0, %v3631_v57 }
  0x74   :  { %4308 = vmatmul.mubr.msk.f32.gmra.mrb[56].mxu0 %vm156_vm0, %v3632_v58 }
  0x75   :  { %4310 = vmatprep.mubr.msk.f32.mxu0 %vm156_vm0, %v3633_v59 }
  0x78   :  { %4311 = vmatmul.mubr.msk.f32.gmra.mrb[58].mxu0 %vm156_vm0, %v3634_v60 }
  0x79   :  { %4313 = vmatprep.mubr.msk.f32.mxu0 %vm156_vm0, %v3635_v61 }
  0x7c   :  { %4314 = vmatmul.mubr.msk.f32.gmra.mrb[60].mxu0 %vm156_vm0, %v3636_v62 }
  0x7d   :  { %4316 = vmatprep.mubr.msk.f32.mxu0 %vm156_vm0, %v3637_v63 }
  0x80   :  { %4317 = vmatmul.mubr.msk.f32.gmra.mrb[62].mxu0 %vm156_vm0, %v3638_v0 }
  0x81   :  { %4319 = vmatprep.mubr.msk.f32.mxu0 %vm156_vm0, %v3639_v1 }
  0x84   :  { %4320 = vmatmul.mubr.msk.f32.gmra.mrb[64].mxu0 %vm156_vm0, %v3640_v2 }
  0x85   :  { %4322 = vmatprep.mubr.msk.f32.mxu0 %vm156_vm0, %v3641_v3 }
  0x88   :  { %4323 = vmatmul.mubr.msk.f32.gmra.mrb[66].mxu0 %vm156_vm0, %v3642_v4 }
  0x89   :  { %4325 = vmatprep.mubr.msk.f32.mxu0 %vm156_vm0, %v3643_v5 }
  0x8c   :  { %4326 = vmatmul.mubr.msk.f32.gmra.mrb[68].mxu0 %vm156_vm0, %v3644_v6 }
  0x8d   :  { %4328 = vmatprep.mubr.msk.f32.mxu0 %vm156_vm0, %v3645_v7 }
  0x90   :  { %4329 = vmatmul.mubr.msk.f32.gmra.mrb[70].mxu0 %vm156_vm0, %v3646_v8 }
  0x91   :  { %4331 = vmatprep.mubr.msk.f32.mxu0 %vm156_vm0, %v3647_v9 }
  0x94   :  { %4332 = vmatmul.mubr.msk.f32.gmra.mrb[72].mxu0 %vm156_vm0, %v3648_v10 }
  0x95   :  { %4334 = vmatprep.mubr.msk.f32.mxu0 %vm156_vm0, %v3649_v11 }
  0x98   :  { %4335 = vmatmul.mubr.msk.f32.gmra.mrb[74].mxu0 %vm156_vm0, %v3650_v12 }
  0x99   :  { %4337 = vmatprep.mubr.msk.f32.mxu0 %vm156_vm0, %v3651_v13 }
  0x9c   :  { %4338 = vmatmul.mubr.msk.f32.gmra.mrb[76].mxu0 %vm156_vm0, %v3652_v14 }
  0x9d   :  { %4340 = vmatprep.mubr.msk.f32.mxu0 %vm156_vm0, %v3653_v15 }
  0xa0   :  { %4341 = vmatmul.mubr.msk.f32.gmra.mrb[78].mxu0 %vm156_vm0, %v3654_v16 }
  0xa1   :  { %4343 = vmatprep.mubr.msk.f32.mxu0 %vm156_vm0, %v3655_v17 }
  0xa4   :  { %4344 = vmatmul.mubr.msk.f32.gmra.mrb[80].mxu0 %vm156_vm0, %v3656_v18 }
  0xa5   :  { %4346 = vmatprep.mubr.msk.f32.mxu0 %vm156_vm0, %v3657_v19 }
  0xa8   :  { %4347 = vmatmul.mubr.msk.f32.gmra.mrb[82].mxu0 %vm156_vm0, %v3658_v20 }
  0xa9   :  { %4349 = vmatprep.mubr.msk.f32.mxu0 %vm156_vm0, %v3659_v21 }
  0xac   :  { %4350 = vmatmul.mubr.msk.f32.gmra.mrb[84].mxu0 %vm156_vm0, %v3660_v22 }
  0xad   :  { %4352 = vmatprep.mubr.msk.f32.mxu0 %vm156_vm0, %v3661_v23 }
  0xb0   :  { %4353 = vmatmul.mubr.msk.f32.gmra.mrb[86].mxu0 %vm156_vm0, %v3662_v24 }
  0xb1   :  { %4355 = vmatprep.mubr.msk.f32.mxu0 %vm156_vm0, %v3663_v25 }
  0xb4   :  { %4356 = vmatmul.mubr.msk.f32.gmra.mrb[88].mxu0 %vm156_vm0, %v3664_v26 }
  0xb5   :  { %4358 = vmatprep.mubr.msk.f32.mxu0 %vm156_vm0, %v3665_v27 }
  0xb8   :  { %4359 = vmatmul.mubr.msk.f32.gmra.mrb[90].mxu0 %vm156_vm0, %v3666_v28 }
  0xb9   :  { %4361 = vmatprep.mubr.msk.f32.mxu0 %vm156_vm0, %v3667_v29 }
  0xbc   :  { %4362 = vmatmul.mubr.msk.f32.gmra.mrb[92].mxu0 %vm156_vm0, %v3668_v30 }
  0xbd   :  { %4364 = vmatprep.mubr.msk.f32.mxu0 %vm156_vm0, %v3669_v31 }
  0xc0   :  { %4365 = vmatmul.mubr.msk.f32.gmra.mrb[94].mxu0 %vm156_vm0, %v3670_v32 }
  0xd7   :  { %v5260_v33 = vpop.f32.mrb[0].mxu0 }
  0xd8   :  { %v5262_v34 = vpop.f32.mrb[1].mxu0  ;;  %v991_v2 = vmul.f32 %v5260_v33, %v5260_v33 }
  0xd9   :  { %v990_v5 = vmul.f32 %v5262_v34, %v5262_v34 }
  0xdb   :  { %v5264_v35 = vpop.f32.mrb[2].mxu0 }
  0xdc   :  { %v5266_v36 = vpop.f32.mrb[3].mxu0  ;;  %v993_v10 = vmul.f32 %v5264_v35, %v5264_v35 }
  0xdd   :  { %v992_v13 = vmul.f32 %v5266_v36, %v5266_v36 }
  0xdf   :  { %v5268_v37 = vpop.f32.mrb[4].mxu0 }
  0xe0   :  { %v5270_v38 = vpop.f32.mrb[5].mxu0  ;;  %v995_v18 = vmul.f32 %v5268_v37, %v5268_v37 }
  0xe1   :  { %v994_v21 = vmul.f32 %v5270_v38, %v5270_v38 }
  0xe3   :  { %v5272_v39 = vpop.f32.mrb[6].mxu0 }
  0xe4   :  { %v5274_v40 = vpop.f32.mrb[7].mxu0  ;;  %v997_v26 = vmul.f32 %v5272_v39, %v5272_v39 }
  0xe5   :  { %v996_v29 = vmul.f32 %v5274_v40, %v5274_v40 }
  0xe7   :  { %v5276_v41 = vpop.f32.mrb[8].mxu0 }
  0xe8   :  { %v5278_v42 = vpop.f32.mrb[9].mxu0 }
  0xeb   :  { %v5280_v43 = vpop.f32.mrb[10].mxu0 }
  0xec   :  { %v5282_v44 = vpop.f32.mrb[11].mxu0 }
  0xef   :  { %v5284_v45 = vpop.f32.mrb[12].mxu0 }
  0xf0   :  { %v5286_v46 = vpop.f32.mrb[13].mxu0 }
  0xf3   :  { %v5288_v47 = vpop.f32.mrb[14].mxu0 }
  0xf4   :  { %8064 = vst [vmem:[#allocation2_spill] sm:$0xff] %v5288_v47  ;;  %v5290_v48 = vpop.f32.mrb[15].mxu0 }
  0xf5   :  { %8065 = vst [vmem:[#allocation3_spill] sm:$0xff] %v5290_v48 }
  0xf7   :  { %v5292_v49 = vpop.f32.mrb[16].mxu0 }
  0xf8   :  { %8066 = vst [vmem:[#allocation4_spill] sm:$0xff] %v5292_v49  ;;  %v5294_v50 = vpop.f32.mrb[17].mxu0 }
  0xf9   :  { %8067 = vst [vmem:[#allocation5_spill] sm:$0xff] %v5294_v50 }
  0xfb   :  { %v5296_v51 = vpop.f32.mrb[18].mxu0 }
  0xfc   :  { %8068 = vst [vmem:[#allocation6_spill] sm:$0xff] %v5296_v51  ;;  %v5298_v52 = vpop.f32.mrb[19].mxu0 }
  0xfd   :  { %8069 = vst [vmem:[#allocation7_spill] sm:$0xff] %v5298_v52 }
  0xff   :  { %v5300_v53 = vpop.f32.mrb[20].mxu0 }
 0x100   :  { %8070 = vst [vmem:[#allocation8_spill] sm:$0xff] %v5300_v53  ;;  %v5302_v54 = vpop.f32.mrb[21].mxu0 }
 0x101   :  { %8071 = vst [vmem:[#allocation9_spill] sm:$0xff] %v5302_v54 }
 0x103   :  { %v5304_v55 = vpop.f32.mrb[22].mxu0 }
 0x104   :  { %8072 = vst [vmem:[#allocation10_spill] sm:$0xff] %v5304_v55  ;;  %v5306_v56 = vpop.f32.mrb[23].mxu0 }
 0x105   :  { %8073 = vst [vmem:[#allocation11_spill] sm:$0xff] %v5306_v56 }
 0x107   :  { %v5308_v57 = vpop.f32.mrb[24].mxu0 }
 0x108   :  { %8074 = vst [vmem:[#allocation12_spill] sm:$0xff] %v5308_v57  ;;  %v5310_v58 = vpop.f32.mrb[25].mxu0 }
 0x109   :  { %8075 = vst [vmem:[#allocation13_spill] sm:$0xff] %v5310_v58 }
 0x10b   :  { %v5312_v59 = vpop.f32.mrb[26].mxu0 }
 0x10c   :  { %8076 = vst [vmem:[#allocation14_spill] sm:$0xff] %v5312_v59  ;;  %v5314_v60 = vpop.f32.mrb[27].mxu0 }
 0x10d   :  { %8077 = vst [vmem:[#allocation15_spill] sm:$0xff] %v5314_v60 }
 0x10f   :  { %v5316_v61 = vpop.f32.mrb[28].mxu0 }
 0x110   :  { %8078 = vst [vmem:[#allocation16_spill] sm:$0xff] %v5316_v61  ;;  %v5318_v62 = vpop.f32.mrb[29].mxu0 }
 0x111   :  { %8079 = vst [vmem:[#allocation17_spill] sm:$0xff] %v5318_v62 }
 0x113   :  { %v5320_v63 = vpop.f32.mrb[30].mxu0 }
 0x114   :  { %8080 = vst [vmem:[#allocation18_spill] sm:$0xff] %v5320_v63  ;;  %v5322_v0 = vpop.f32.mrb[31].mxu0 }
 0x115   :  { %8081 = vst [vmem:[#allocation19_spill] sm:$0xff] %v5322_v0 }
 0x117   :  { %v5324_v1 = vpop.f32.mrb[32].mxu0 }
 0x118   :  { %8082 = vst [vmem:[#allocation20_spill] sm:$0xff] %v5324_v1  ;;  %v1023_v3 = vmul.f32 %v5324_v1, %v5324_v1  ;;  %v5330_v4 = vpop.f32.mrb[33].mxu0 }
 0x119   :  { %8083 = vst [vmem:[#allocation21_spill] sm:$0xff] %v5330_v4  ;;  %v1022_v6 = vmul.f32 %v5330_v4, %v5330_v4  ;;  %v1012_v4 = vmul.f32 %v5306_v56, %v5306_v56  ;;  %v1014_v56 = vmul.f32 %v5310_v58, %v5310_v58  ;;  %v1016_v58 = vmul.f32 %v5314_v60, %v5314_v60 }
 0x11a   :  { %v5336_v7 = vadd.f32 %v1023_v3, %v991_v2  ;;  %v999_v3 = vmul.f32 %v5276_v41, %v5276_v41  ;;  %v1018_v60 = vmul.f32 %v5318_v62, %v5318_v62  ;;  %v1021_v62 = vmul.f32 %v5320_v63, %v5320_v63 }
 0x11b   :  { %v5338_v8 = vadd.f32 %v1022_v6, %v990_v5  ;;  %v5340_v9 = vpop.f32.mrb[34].mxu0 }
 0x11c   :  { %8084 = vst [vmem:[#allocation22_spill] sm:$0xff] %v5340_v9  ;;  %v1025_v11 = vmul.f32 %v5340_v9, %v5340_v9  ;;  %v5346_v12 = vpop.f32.mrb[35].mxu0 }
 0x11d   :  { %8085 = vst [vmem:[#allocation23_spill] sm:$0xff] %v5346_v12  ;;  %v1024_v14 = vmul.f32 %v5346_v12, %v5346_v12  ;;  %v1010_v12 = vmul.f32 %v5302_v54, %v5302_v54 }
 0x11e   :  { %v5352_v15 = vadd.f32 %v1025_v11, %v993_v10  ;;  %v998_v10 = vmul.f32 %v5278_v42, %v5278_v42 }
 0x11f   :  { %v5354_v16 = vadd.f32 %v1024_v14, %v992_v13  ;;  %v5356_v17 = vpop.f32.mrb[36].mxu0 }
 0x120   :  { %8086 = vst [vmem:[#allocation24_spill] sm:$0xff] %v5356_v17  ;;  %v1027_v19 = vmul.f32 %v5356_v17, %v5356_v17  ;;  %v5362_v20 = vpop.f32.mrb[37].mxu0 }
 0x121   :  { %8087 = vst [vmem:[#allocation25_spill] sm:$0xff] %v5362_v20  ;;  %v1026_v22 = vmul.f32 %v5362_v20, %v5362_v20  ;;  %v1008_v20 = vmul.f32 %v5298_v52, %v5298_v52 }
 0x122   :  { %v5368_v23 = vadd.f32 %v1027_v19, %v995_v18  ;;  %v1001_v19 = vmul.f32 %v5280_v43, %v5280_v43 }
 0x123   :  { %v5370_v24 = vadd.f32 %v1026_v22, %v994_v21  ;;  %v5372_v25 = vpop.f32.mrb[38].mxu0 }
 0x124   :  { %8088 = vst [vmem:[#allocation26_spill] sm:$0xff] %v5372_v25  ;;  %v1029_v27 = vmul.f32 %v5372_v25, %v5372_v25  ;;  %v5378_v28 = vpop.f32.mrb[39].mxu0 }
 0x125   :  { %8089 = vst [vmem:[#allocation27_spill] sm:$0xff] %v5378_v28  ;;  %v1028_v30 = vmul.f32 %v5378_v28, %v5378_v28  ;;  %v1006_v28 = vmul.f32 %v5294_v50, %v5294_v50 }
 0x126   :  { %v5384_v31 = vadd.f32 %v1029_v27, %v997_v26  ;;  %v1000_v26 = vmul.f32 %v5282_v44, %v5282_v44 }
 0x127   :  { %v5386_v32 = vadd.f32 %v1028_v30, %v996_v29  ;;  %v5388_v2 = vpop.f32.mrb[40].mxu0 }
 0x128   :  { %8090 = vst [vmem:[#allocation28_spill] sm:$0xff] %v5388_v2  ;;  %v1031_v5 = vmul.f32 %v5388_v2, %v5388_v2  ;;  %v5394_v6 = vpop.f32.mrb[41].mxu0 }
 0x129   :  { %8091 = vst [vmem:[#allocation29_spill] sm:$0xff] %v5394_v6  ;;  %v1030_v11 = vmul.f32 %v5394_v6, %v5394_v6  ;;  %v1004_v6 = vmul.f32 %v5290_v48, %v5290_v48 }
 0x12a   :  { %v5400_v13 = vadd.f32 %v1031_v5, %v999_v3  ;;  %v1003_v5 = vmul.f32 %v5284_v45, %v5284_v45 }
 0x12b   :  { %v5402_v14 = vadd.f32 %v1030_v11, %v998_v10  ;;  %v5404_v18 = vpop.f32.mrb[42].mxu0 }
 0x12c   :  { %8092 = vst [vmem:[#allocation30_spill] sm:$0xff] %v5404_v18  ;;  %v1033_v21 = vmul.f32 %v5404_v18, %v5404_v18  ;;  %v5410_v22 = vpop.f32.mrb[43].mxu0  ;;  %v1002_v18 = vmul.f32 %v5286_v46, %v5286_v46 }
 0x12d   :  { %8093 = vst [vmem:[#allocation31_spill] sm:$0xff] %v5410_v22  ;;  %v1032_v27 = vmul.f32 %v5410_v22, %v5410_v22 }
 0x12e   :  { %v5416_v29 = vadd.f32 %v1033_v21, %v1001_v19 }
 0x12f   :  { %v5418_v30 = vadd.f32 %v1032_v27, %v1000_v26  ;;  %v5420_v3 = vpop.f32.mrb[44].mxu0  ;;  %v1005_v27 = vmul.f32 %v5288_v47, %v5288_v47 }
 0x130   :  { %8094 = vst [vmem:[#allocation32_spill] sm:$0xff] %v5420_v3  ;;  %v1035_v10 = vmul.f32 %v5420_v3, %v5420_v3  ;;  %v5426_v11 = vpop.f32.mrb[45].mxu0 }
 0x131   :  { %8095 = vst [vmem:[#allocation33_spill] sm:$0xff] %v5426_v11  ;;  %v1034_v22 = vmul.f32 %v5426_v11, %v5426_v11 }
 0x132   :  { %v5432_v19 = vadd.f32 %v1035_v10, %v1003_v5  ;;  %v1007_v10 = vmul.f32 %v5292_v49, %v5292_v49 }
 0x133   :  { %v5434_v21 = vadd.f32 %v1034_v22, %v1002_v18  ;;  %v5436_v26 = vpop.f32.mrb[46].mxu0 }
 0x134   :  { %8096 = vst [vmem:[#allocation34_spill] sm:$0xff] %v5436_v26  ;;  %v1037_v3 = vmul.f32 %v5436_v26, %v5436_v26  ;;  %v5442_v2 = vpop.f32.mrb[47].mxu0 }
 0x135   :  { %8097 = vst [vmem:[#allocation35_spill] sm:$0xff] %v5442_v2  ;;  %v1036_v11 = vmul.f32 %v5442_v2, %v5442_v2 }
 0x136   :  { %v5448_v5 = vadd.f32 %v1037_v3, %v1005_v27  ;;  %v1009_v27 = vmul.f32 %v5296_v51, %v5296_v51 }
 0x137   :  { %v5450_v18 = vadd.f32 %v1036_v11, %v1004_v6  ;;  %v5452_v22 = vpop.f32.mrb[48].mxu0 }
 0x138   :  { %8098 = vst [vmem:[#allocation36_spill] sm:$0xff] %v5452_v22  ;;  %v1039_v26 = vmul.f32 %v5452_v22, %v5452_v22  ;;  %v5458_v25 = vpop.f32.mrb[49].mxu0 }
 0x139   :  { %8099 = vst [vmem:[#allocation37_spill] sm:$0xff] %v5458_v25  ;;  %v1038_v2 = vmul.f32 %v5458_v25, %v5458_v25 }
 0x13a   :  { %v5464_v3 = vadd.f32 %v1039_v26, %v1007_v10  ;;  %v1011_v10 = vmul.f32 %v5300_v53, %v5300_v53 }
 0x13b   :  { %v5466_v6 = vadd.f32 %v1038_v2, %v1006_v28  ;;  %v5468_v11 = vpop.f32.mrb[50].mxu0 }
 0x13c   :  { %8100 = vst [vmem:[#allocation38_spill] sm:$0xff] %v5468_v11  ;;  %v1041_v22 = vmul.f32 %v5468_v11, %v5468_v11  ;;  %v5474_v17 = vpop.f32.mrb[51].mxu0 }
 0x13d   :  { %8101 = vst [vmem:[#allocation39_spill] sm:$0xff] %v5474_v17  ;;  %v1040_v25 = vmul.f32 %v5474_v17, %v5474_v17 }
 0x13e   :  { %v5480_v26 = vadd.f32 %v1041_v22, %v1009_v27  ;;  %v1013_v27 = vmul.f32 %v5304_v55, %v5304_v55 }
 0x13f   :  { %v5482_v28 = vadd.f32 %v1040_v25, %v1008_v20  ;;  %v5484_v2 = vpop.f32.mrb[52].mxu0 }
 0x140   :  { %8102 = vst [vmem:[#allocation40_spill] sm:$0xff] %v5484_v2  ;;  %v1043_v11 = vmul.f32 %v5484_v2, %v5484_v2  ;;  %v5490_v9 = vpop.f32.mrb[53].mxu0 }
 0x141   :  { %8103 = vst [vmem:[#allocation41_spill] sm:$0xff] %v5490_v9  ;;  %v1042_v17 = vmul.f32 %v5490_v9, %v5490_v9 }
 0x142   :  { %v5496_v22 = vadd.f32 %v1043_v11, %v1011_v10  ;;  %v1015_v10 = vmul.f32 %v5308_v57, %v5308_v57 }
 0x143   :  { %v5498_v20 = vadd.f32 %v1042_v17, %v1010_v12  ;;  %v5500_v25 = vpop.f32.mrb[54].mxu0 }
 0x144   :  { %8104 = vst [vmem:[#allocation42_spill] sm:$0xff] %v5500_v25  ;;  %v1045_v2 = vmul.f32 %v5500_v25, %v5500_v25  ;;  %v5506_v1 = vpop.f32.mrb[55].mxu0 }
 0x145   :  { %8105 = vst [vmem:[#allocation43_spill] sm:$0xff] %v5506_v1  ;;  %v1044_v9 = vmul.f32 %v5506_v1, %v5506_v1 }
 0x146   :  { %v5512_v11 = vadd.f32 %v1045_v2, %v1013_v27  ;;  %v1017_v27 = vmul.f32 %v5312_v59, %v5312_v59 }
 0x147   :  { %v5514_v12 = vadd.f32 %v1044_v9, %v1012_v4  ;;  %v5516_v17 = vpop.f32.mrb[56].mxu0 }
 0x148   :  { %8106 = vst [vmem:[#allocation44_spill] sm:$0xff] %v5516_v17  ;;  %v1047_v25 = vmul.f32 %v5516_v17, %v5516_v17  ;;  %v5522_v55 = vpop.f32.mrb[57].mxu0 }
 0x149   :  { %8107 = vst [vmem:[#allocation45_spill] sm:$0xff] %v5522_v55  ;;  %v1046_v1 = vmul.f32 %v5522_v55, %v5522_v55 }
 0x14a   :  { %v5528_v2 = vadd.f32 %v1047_v25, %v1015_v10  ;;  %v1019_v10 = vmul.f32 %v5316_v61, %v5316_v61 }
 0x14b   :  { %v5530_v4 = vadd.f32 %v1046_v1, %v1014_v56  ;;  %v5532_v9 = vpop.f32.mrb[58].mxu0 }
 0x14c   :  { %8108 = vst [vmem:[#allocation46_spill] sm:$0xff] %v5532_v9  ;;  %v1049_v17 = vmul.f32 %v5532_v9, %v5532_v9  ;;  %v5538_v57 = vpop.f32.mrb[59].mxu0 }
 0x14d   :  { %8109 = vst [vmem:[#allocation47_spill] sm:$0xff] %v5538_v57  ;;  %v1048_v55 = vmul.f32 %v5538_v57, %v5538_v57 }
 0x14e   :  { %v5544_v25 = vadd.f32 %v1049_v17, %v1017_v27 }
 0x14f   :  { %v5546_v56 = vadd.f32 %v1048_v55, %v1016_v58  ;;  %v5548_v1 = vpop.f32.mrb[60].mxu0  ;;  %v1567_v55 = vld [vmem:[%s7929_s4] sm:$0xff]  ;;  %v1568_v58 = vld [vmem:[%s7929_s4 + $0x8] sm:$0xff] }
 0x150   :  { %8110 = vst [vmem:[#allocation48_spill] sm:$0xff] %v5548_v1  ;;  %v1051_v9 = vmul.f32 %v5548_v1, %v5548_v1  ;;  %v5554_v59 = vpop.f32.mrb[61].mxu0  ;;  %v4567_v61 = vpack.c.bf16 %v1568_v58, %v1567_v55 }
 0x151   :  { %8111 = vst [vmem:[#allocation49_spill] sm:$0xff] %v5554_v59  ;;  %v1050_v57 = vmul.f32 %v5554_v59, %v5554_v59  ;;  %v1020_v59 = vmul.f32 %v5322_v0, %v5322_v0 }
 0x152   :  { %v5560_v17 = vadd.f32 %v1051_v9, %v1019_v10  ;;  %4571 = vmatprep.subr.bf16.mxu1 %v4567_v61  ;;  %4568 = vmatprep.subr.bf16.mxu0 %v4567_v61 }
 0x153   :  { %v5568_v27 = vadd.f32 %v1050_v57, %v1018_v60  ;;  %v5570_v1 = vpop.f32.mrb[62].mxu0  ;;  %4573 = vmatpush3.bf16.msra.mxu1 %v4567_v61  ;;  %4570 = vmatpush3.bf16.msra.mxu0 %v4567_v61 }
 0x154   :  { %8112 = vst [vmem:[#allocation50_spill] sm:$0xff] %v5570_v1  ;;  %v1053_v9 = vmul.f32 %v5570_v1, %v5570_v1  ;;  %v5576_v10 = vpop.f32.mrb[63].mxu0 }
 0x155   :  { %8113 = vst [vmem:[#allocation51_spill] sm:$0xff] %v5576_v10  ;;  %v1052_v53 = vmul.f32 %v5576_v10, %v5576_v10 }
 0x156   :  { %v5582_v57 = vadd.f32 %v1053_v9, %v1021_v62 }
 0x157   :  { %v5584_v60 = vadd.f32 %v1052_v53, %v1020_v59  ;;  %v5586_v55 = vpop.f32.mrb[64].mxu0 }
 0x158   :  { %8114 = vst [vmem:[#allocation52_spill] sm:$0xff] %v5586_v55  ;;  %v1087_v58 = vmul.f32 %v5586_v55, %v5586_v55  ;;  %v5590_v1 = vpop.f32.mrb[65].mxu0 }
 0x159   :  { %8115 = vst [vmem:[#allocation53_spill] sm:$0xff] %v5590_v1  ;;  %v1086_v63 = vmul.f32 %v5590_v1, %v5590_v1 }
 0x15a   :  { %v1119_v10 = vadd.f32 %v1087_v58, %v5336_v7 }
 0x15b   :  { %v5596_v0 = vadd.f32 %v1086_v63, %v5338_v8  ;;  %v5598_v62 = vpop.f32.mrb[66].mxu0 }
 0x15c   :  { %8116 = vst [vmem:[#allocation54_spill] sm:$0xff] %v5598_v62  ;;  %v1089_v53 = vmul.f32 %v5598_v62, %v5598_v62  ;;  %v5602_v59 = vpop.f32.mrb[67].mxu0 }
 0x15d   :  { %8117 = vst [vmem:[#allocation55_spill] sm:$0xff] %v5602_v59  ;;  %v1088_v61 = vmul.f32 %v5602_v59, %v5602_v59 }
 0x15e   :  { %v5607_v9 = vadd.f32 %v1089_v53, %v5352_v15 }
 0x15f   :  { %v5610_v55 = vadd.f32 %v1088_v61, %v5354_v16  ;;  %v5612_v7 = vpop.f32.mrb[68].mxu0 }
 0x160   :  { %8118 = vst [vmem:[#allocation56_spill] sm:$0xff] %v5612_v7  ;;  %v1091_v63 = vmul.f32 %v5612_v7, %v5612_v7  ;;  %v5616_v8 = vpop.f32.mrb[69].mxu0 }
 0x161   :  { %8119 = vst [vmem:[#allocation57_spill] sm:$0xff] %v5616_v8  ;;  %v1090_v58 = vmul.f32 %v5616_v8, %v5616_v8 }
 0x162   :  { %v5621_v62 = vadd.f32 %v1091_v63, %v5368_v23 }
 0x163   :  { %v5624_v59 = vadd.f32 %v1090_v58, %v5370_v24  ;;  %v5626_v15 = vpop.f32.mrb[70].mxu0 }
 0x164   :  { %8120 = vst [vmem:[#allocation58_spill] sm:$0xff] %v5626_v15  ;;  %v1093_v16 = vmul.f32 %v5626_v15, %v5626_v15  ;;  %v5630_v53 = vpop.f32.mrb[71].mxu0 }
 0x165   :  { %8121 = vst [vmem:[#allocation59_spill] sm:$0xff] %v5630_v53  ;;  %v1092_v61 = vmul.f32 %v5630_v53, %v5630_v53 }
 0x166   :  { %v5635_v7 = vadd.f32 %v1093_v16, %v5384_v31 }
 0x167   :  { %v5638_v8 = vadd.f32 %v1092_v61, %v5386_v32  ;;  %v5640_v23 = vpop.f32.mrb[72].mxu0 }
 0x168   :  { %8122 = vst [vmem:[#allocation60_spill] sm:$0xff] %v5640_v23  ;;  %v1095_v24 = vmul.f32 %v5640_v23, %v5640_v23  ;;  %v5644_v63 = vpop.f32.mrb[73].mxu0 }
 0x169   :  { %8123 = vst [vmem:[#allocation61_spill] sm:$0xff] %v5644_v63  ;;  %v1094_v58 = vmul.f32 %v5644_v63, %v5644_v63 }
 0x16a   :  { %v5649_v15 = vadd.f32 %v1095_v24, %v5400_v13 }
 0x16b   :  { %v5652_v53 = vadd.f32 %v1094_v58, %v5402_v14  ;;  %v5654_v31 = vpop.f32.mrb[74].mxu0 }
 0x16c   :  { %8124 = vst [vmem:[#allocation62_spill] sm:$0xff] %v5654_v31  ;;  %v1097_v32 = vmul.f32 %v5654_v31, %v5654_v31  ;;  %v5658_v16 = vpop.f32.mrb[75].mxu0 }
 0x16d   :  { %8125 = vst [vmem:[#allocation63_spill] sm:$0xff] %v5658_v16  ;;  %v1096_v61 = vmul.f32 %v5658_v16, %v5658_v16 }
 0x16e   :  { %v5663_v23 = vadd.f32 %v1097_v32, %v5416_v29 }
 0x16f   :  { %v5666_v63 = vadd.f32 %v1096_v61, %v5418_v30  ;;  %v5668_v13 = vpop.f32.mrb[76].mxu0 }
 0x170   :  { %8126 = vst [vmem:[#allocation64_spill] sm:$0xff] %v5668_v13  ;;  %v1099_v14 = vmul.f32 %v5668_v13, %v5668_v13  ;;  %v5672_v24 = vpop.f32.mrb[77].mxu0 }
 0x171   :  { %8127 = vst [vmem:[#allocation65_spill] sm:$0xff] %v5672_v24  ;;  %v1098_v58 = vmul.f32 %v5672_v24, %v5672_v24 }
 0x172   :  { %v5677_v31 = vadd.f32 %v1099_v14, %v5432_v19 }
 0x173   :  { %v5680_v16 = vadd.f32 %v1098_v58, %v5434_v21  ;;  %v5682_v29 = vpop.f32.mrb[78].mxu0 }
 0x174   :  { %8128 = vst [vmem:[#allocation66_spill] sm:$0xff] %v5682_v29  ;;  %v1101_v30 = vmul.f32 %v5682_v29, %v5682_v29  ;;  %v5686_v32 = vpop.f32.mrb[79].mxu0 }
 0x175   :  { %8129 = vst [vmem:[#allocation67_spill] sm:$0xff] %v5686_v32  ;;  %v1100_v61 = vmul.f32 %v5686_v32, %v5686_v32 }
 0x176   :  { %v5691_v13 = vadd.f32 %v1101_v30, %v5448_v5 }
 0x177   :  { %v5694_v24 = vadd.f32 %v1100_v61, %v5450_v18  ;;  %v5696_v19 = vpop.f32.mrb[80].mxu0 }
 0x178   :  { %8130 = vst [vmem:[#allocation68_spill] sm:$0xff] %v5696_v19  ;;  %v1103_v21 = vmul.f32 %v5696_v19, %v5696_v19  ;;  %v5700_v14 = vpop.f32.mrb[81].mxu0 }
 0x179   :  { %8131 = vst [vmem:[#allocation69_spill] sm:$0xff] %v5700_v14  ;;  %v1102_v58 = vmul.f32 %v5700_v14, %v5700_v14 }
 0x17a   :  { %v1135_v29 = vadd.f32 %v1103_v21, %v5464_v3 }
 0x17b   :  { %v1134_v32 = vadd.f32 %v1102_v58, %v5466_v6  ;;  %v5706_v1 = vpop.f32.mrb[82].mxu0 }
 0x17c   :  { %8132 = vst [vmem:[#allocation70_spill] sm:$0xff] %v5706_v1  ;;  %v5708_v5 = vmax.f32 %v1135_v29, 1e-08  ;;  %v1105_v18 = vmul.f32 %v5706_v1, %v5706_v1  ;;  %v5712_v30 = vpop.f32.mrb[83].mxu0  ;;  %v5724_v29 = vmax.f32 %v1119_v10, 1e-08 }
 0x17d   :  { %8133 = vst [vmem:[#allocation71_spill] sm:$0xff] %v5712_v30  ;;  %v5714_v61 = vmax.f32 %v1134_v32, 1e-08  ;;  %v1104_v19 = vmul.f32 %v5712_v30, %v5712_v30  ;;  %v5733_v1 = vmax.f32 %v5596_v0, 1e-08  ;;  %v1569_v10 = vld [vmem:[%s7929_s4 + $0x10] sm:$0xff] }
 0x17e   :  { %v1137_v14 = vadd.f32 %v1105_v18, %v5480_v26  ;;  %4576 = vrsqrt.f32 %v5708_v5  ;;  %4572 = vmatprep.subr.mxu1 %v1569_v10  ;;  %4371 = vmatprep.subr.mxu0 %v1569_v10  ;;  %vm1303_vm1 = vcmp.eq.f32.partialorder %v5708_v5, inf  ;;  %vm1305_vm3 = vcmp.eq.f32.partialorder %v5708_v5, 0.0 }
 0x17f   :  { %v1136_v3 = vadd.f32 %v1104_v19, %v5482_v28  ;;  %v5721_v6 = vpop.f32.mrb[84].mxu0  ;;  %4578 = vrsqrt.f32 %v5714_v61  ;;  %4574 = vmatpush3.msra.mxu1 %v1569_v10  ;;  %4372 = vmatpush3.msra.mxu0 %v1569_v10  ;;  %vm1296_vm2 = vcmp.eq.f32.partialorder %v5714_v61, inf  ;;  %vm1298_vm4 = vcmp.eq.f32.partialorder %v5714_v61, 0.0 }
 0x180   :  { %8134 = vst [vmem:[#allocation72_spill] sm:$0xff] %v5721_v6  ;;  %v5726_v21 = vmax.f32 %v1137_v14, 1e-08  ;;  %v1107_v32 = vmul.f32 %v5721_v6, %v5721_v6  ;;  %v5730_v58 = vpop.f32.mrb[85].mxu0  ;;  %v1299_v30 = vand.u32 2147483648, %v5714_v61 }
 0x181   :  { %8135 = vst [vmem:[#allocation73_spill] sm:$0xff] %v5730_v58  ;;  %v5735_v26 = vmax.f32 %v1136_v3, 1e-08  ;;  %v1106_v28 = vmul.f32 %v5730_v58, %v5730_v58 }
 0x182   :  { %v1139_v19 = vadd.f32 %v1107_v32, %v5496_v22  ;;  %4580 = vrsqrt.f32 %v5726_v21  ;;  %vm1317_vm5 = vcmp.eq.f32.partialorder %v5726_v21, inf  ;;  %vm1319_vm7 = vcmp.eq.f32.partialorder %v5726_v21, 0.0 }
 0x183   :  { %v1138_v14 = vadd.f32 %v1106_v28, %v5498_v20  ;;  %v5745_v18 = vpop.f32.mrb[86].mxu0  ;;  %4582 = vrsqrt.f32 %v5735_v26  ;;  %vm1310_vm6 = vcmp.eq.f32.partialorder %v5735_v26, inf  ;;  %vm1312_vm8 = vcmp.eq.f32.partialorder %v5735_v26, 0.0 }
 0x184   :  { %8136 = vst [vmem:[#allocation74_spill] sm:$0xff] %v5745_v18  ;;  %v5748_v0 = vmax.f32 %v1139_v19, 1e-08  ;;  %v1109_v3 = vmul.f32 %v5745_v18, %v5745_v18  ;;  %v5752_v22 = vpop.f32.mrb[87].mxu0  ;;  %4584 = vrsqrt.f32 %v5724_v29  ;;  %v5765_v19 = vld [vmem:[%s7930_s3] sm:$0xff]  ;;  %s4832_s3 = smov 16  }
 0x185   :  { %8137 = vst [vmem:[#allocation75_spill] sm:$0xff] %v5752_v22  ;;  %v5755_v32 = vmax.f32 %v1138_v14, 1e-08  ;;  %v1108_v20 = vmul.f32 %v5752_v22, %v5752_v22  ;;  %4586 = vrsqrt.f32 %v5733_v1  ;;  %4421 = vmatprep.subr.mxu1 %v5765_v19  ;;  %v1313_v50 = vand.u32 2147483648, %v5735_v26 }
 0x186   :  { %v1141_v28 = vadd.f32 %v1109_v3, %v5512_v11  ;;  %4588 = vrsqrt.f32 %v5748_v0  ;;  %vm1331_vm9 = vcmp.eq.f32.partialorder %v5748_v0, inf  ;;  %vm1333_vm11 = vcmp.eq.f32.partialorder %v5748_v0, 0.0 }
 0x187   :  { %v1140_v18 = vadd.f32 %v1108_v20, %v5514_v12  ;;  %v5768_v6 = vpop.f32.mrb[88].mxu0  ;;  %4590 = vrsqrt.f32 %v5755_v32  ;;  %vm1324_vm10 = vcmp.eq.f32.partialorder %v5755_v32, inf  ;;  %vm1326_vm12 = vcmp.eq.f32.partialorder %v5755_v32, 0.0 }
 0x188   :  { %8138 = vst [vmem:[#allocation76_spill] sm:$0xff] %v5768_v6  ;;  %v4577_v10 = vpop.eup %4576  ;;  %v5773_v14 = vmax.f32 %v1141_v28, 1e-08  ;;  %v1111_v11 = vmul.f32 %v5768_v6, %v5768_v6  ;;  %v5777_v3 = vpop.f32.mrb[89].mxu0 }
 0x189   :  { %8139 = vst [vmem:[#allocation77_spill] sm:$0xff] %v5777_v3  ;;  %v4579_v12 = vpop.eup %4578  ;;  %v5781_v20 = vmax.f32 %v1140_v18, 1e-08  ;;  %v1110_v22 = vmul.f32 %v5777_v3, %v5777_v3  ;;  %v1302_v28 = vmul.f32 %v4577_v10, %v5708_v5  ;;  %v1306_v18 = vand.u32 2147483648, %v5708_v5 }
 0x18a   :  { %v1143_v58 = vadd.f32 %v1111_v11, %v5528_v2  ;;  %v1295_v6 = vmul.f32 %v4579_v12, %v5714_v61  ;;  %4592 = vrsqrt.f32 %v5773_v14  ;;  %vm1345_vm15 = vcmp.eq.f32.partialorder %v5773_v14, inf }
 0x18b   :  { %v1142_v54 = vadd.f32 %v1110_v22, %v5530_v4  ;;  %v5792_v51 = vpop.f32.mrb[90].mxu0  ;;  %4594 = vrsqrt.f32 %v5781_v20  ;;  %vm1338_vm13 = vcmp.eq.f32.partialorder %v5781_v20, inf  ;;  %vm1340_vm14 = vcmp.eq.f32.partialorder %v5781_v20, 0.0 }
 0x18c   :  { %8140 = vst [vmem:[#allocation78_spill] sm:$0xff] %v5792_v51  ;;  %v4581_v3 = vpop.eup %4580  ;;  %v1113_v2 = vmul.f32 %v5792_v51, %v5792_v51  ;;  %v5799_v10 = vpop.f32.mrb[91].mxu0  ;;  %v1297_v11 = vsel %vm1296_vm2, %v5714_v61, %v1295_v6  ;;  %v1304_v51 = vsel %vm1303_vm1, %v5708_v5, %v1302_v28  ;;  %vm1347_vm1 = vcmp.eq.f32.partialorder %v5773_v14, 0.0 }
 0x18d   :  { %8141 = vst [vmem:[#allocation79_spill] sm:$0xff] %v5799_v10  ;;  %v4583_v4 = vpop.eup %4582  ;;  %v1112_v22 = vmul.f32 %v5799_v10, %v5799_v10  ;;  %v1300_v12 = vsel %vm1298_vm4, %v1299_v30, %v1297_v11  ;;  %v5816_v6 = vmax.f32 %v1142_v54, 1e-08  ;;  %v1316_v61 = vmul.f32 %v4581_v3, %v5726_v21 }
 0x18e   :  { %v5814_v52 = vpop.eup %4584  ;;  %v1145_v49 = vadd.f32 %v1113_v2, %v5544_v25  ;;  %1470 = vrot.lane.b32.xlu0 %v1300_v12, %s4832_s3  ;;  %v1309_v10 = vmul.f32 %v4583_v4, %v5735_v26  ;;  %v1320_v54 = vand.u32 2147483648, %v5726_v21  ;;  %v5830_v2 = vmax.f32 %v1143_v58, 1e-08 }
 0x18f   :  { %v5822_v30 = vpop.eup %4586  ;;  %v1144_v11 = vadd.f32 %v1112_v22, %v5546_v56  ;;  %v5825_v28 = vpop.f32.mrb[92].mxu0  ;;  %v1307_v58 = vsel %vm1305_vm3, %v1306_v18, %v1304_v51  ;;  %4596 = vrsqrt.f32 %v5816_v6  ;;  %vm1352_vm2 = vcmp.eq.f32.partialorder %v5816_v6, inf }
 0x190   :  { %8142 = vst [vmem:[#allocation80_spill] sm:$0xff] %v5825_v28  ;;  %v4589_v25 = vpop.eup %4588  ;;  %v1115_v4 = vmul.f32 %v5825_v28, %v5825_v28  ;;  %v5834_v12 = vpop.f32.mrb[93].mxu0  ;;  %v1311_v56 = vsel %vm1310_vm6, %v5735_v26, %v1309_v10  ;;  %v1318_v10 = vsel %vm1317_vm5, %v5726_v21, %v1316_v61  ;;  %v5862_v18 = vmax.f32 %v1145_v49, 1e-08 }
 0x191   :  { %8143 = vst [vmem:[#allocation81_spill] sm:$0xff] %v5834_v12  ;;  %v4591_v3 = vpop.eup %4590  ;;  %v1114_v22 = vmul.f32 %v5834_v12, %v5834_v12  ;;  %v1314_v28 = vsel %vm1312_vm8, %v1313_v50, %v1311_v56  ;;  %v1330_v47 = vmul.f32 %v4589_v25, %v5748_v0  ;;  %v1327_v50 = vand.u32 2147483648, %v5755_v32 }
 0x192   :  { %v1147_v48 = vadd.f32 %v1115_v4, %v5560_v17  ;;  %1472 = vrot.lane.b32.xlu0 %v1307_v58, %s4832_s3  ;;  %1474 = vrot.lane.b32.xlu1 %v1314_v28, %s4832_s3  ;;  %v1323_v12 = vmul.f32 %v4591_v3, %v5755_v32  ;;  %v1334_v17 = vand.u32 2147483648, %v5748_v0  ;;  %v5864_v28 = vmax.f32 %v1144_v11, 1e-08 }
 0x193   :  { %v1146_v51 = vadd.f32 %v1114_v22, %v5568_v27  ;;  %v5857_v5 = vpop.f32.mrb[94].mxu0  ;;  %v1321_v3 = vsel %vm1319_vm7, %v1320_v54, %v1318_v10  ;;  %v1332_v11 = vsel %vm1331_vm9, %v5748_v0, %v1330_v47  ;;  %4598 = vrsqrt.f32 %v5830_v2 }
 0x194   :  { %v4593_v26 = vpop.eup %4592  ;;  %v1117_v61 = vmul.f32 %v5857_v5, %v5857_v5  ;;  %v5868_v25 = vpop.f32.mrb[95].mxu0  ;;  %v1325_v27 = vsel %vm1324_vm10, %v5755_v32, %v1323_v12  ;;  %v1341_v47 = vand.u32 2147483648, %v5781_v20  ;;  %v5891_v54 = vmax.f32 %v1147_v48, 1e-08 }
 0x195   :  { %v4595_v4 = vpop.eup %4594  ;;  %v1116_v56 = vmul.f32 %v5868_v25, %v5868_v25  ;;  %v1328_v49 = vsel %vm1326_vm12, %v1327_v50, %v1325_v27  ;;  %v1344_v12 = vmul.f32 %v4593_v26, %v5773_v14  ;;  %v5886_v58 = vmax.f32 %v1146_v51, 1e-08 }
 0x196   :  { %v1149_v22 = vadd.f32 %v1117_v61, %v5582_v57  ;;  %1476 = vrot.lane.b32.xlu1 %v1321_v3, %s4832_s3  ;;  %1478 = vrot.lane.b32.xlu0 %v1328_v49, %s4832_s3  ;;  %v1337_v32 = vmul.f32 %v4595_v4, %v5781_v20  ;;  %4600 = vrsqrt.f32 %v5864_v28  ;;  %v1335_v51 = vsel %vm1333_vm11, %v1334_v17, %v1332_v11 }
 0x197   :  { %v1148_v21 = vadd.f32 %v1116_v56, %v5584_v60  ;;  %v1346_v48 = vsel %vm1345_vm15, %v5773_v14, %v1344_v12  ;;  %4602 = vrsqrt.f32 %v5862_v18  ;;  %v1348_v26 = vand.u32 2147483648, %v5773_v14 }
 0x198   :  { %v1339_v57 = vsel %vm1338_vm13, %v5781_v20, %v1337_v32  ;;  %v5901_v60 = vmax.f32 %v1149_v22, 1e-08  ;;  %v5908_v20 = vmax.f32 %v5607_v9, 1e-08  ;;  %4604 = vrsqrt.f32 %v5886_v58 }
 0x199   :  { %v5896_v10 = vmax.f32 %v1148_v21, 1e-08  ;;  %v1342_v50 = vsel %vm1340_vm14, %v1341_v47, %v1339_v57  ;;  %v4597_v0 = vpop.eup %4596  ;;  %v5913_v17 = vmax.f32 %v5610_v55, 1e-08  ;;  %4606 = vrsqrt.f32 %v5891_v54 }
 0x19a   :  { %1480 = vrot.lane.b32.xlu1 %v1335_v51, %s4832_s3  ;;  %1482 = vrot.lane.b32.xlu0 %v1342_v50, %s4832_s3  ;;  %v5918_v61 = vmax.f32 %v5621_v62, 1e-08  ;;  %v1349_v27 = vsel %vm1347_vm1, %v1348_v26, %v1346_v48  ;;  %v1351_v4 = vmul.f32 %v4597_v0, %v5816_v6  ;;  %v5923_v9 = vmax.f32 %v5624_v59, 1e-08 }
 0x19b   :  { %4608 = vrsqrt.f32 %v5896_v10  ;;  %v1355_v55 = vand.u32 2147483648, %v5816_v6  ;;  %v5930_v14 = vmax.f32 %v5638_v8, 1e-08  ;;  %vm1354_vm3 = vcmp.eq.f32.partialorder %v5816_v6, 0.0 }
 0x19c   :  { %4610 = vrsqrt.f32 %v5901_v60  ;;  %v1353_v62 = vsel %vm1352_vm2, %v5816_v6, %v1351_v4  ;;  %v5940_v8 = vmax.f32 %v5635_v7, 1e-08  ;;  %vm1359_vm4 = vcmp.eq.f32.partialorder %v5830_v2, inf }
 0x19d   :  { %4612 = vrsqrt.f32 %v5908_v20  ;;  %v4599_v56 = vpop.eup %4598  ;;  %v1356_v59 = vsel %vm1354_vm3, %v1355_v55, %v1353_v62  ;;  %v1362_v6 = vand.u32 2147483648, %v5830_v2  ;;  %vm1361_vm5 = vcmp.eq.f32.partialorder %v5830_v2, 0.0 }
 0x19e   :  { %1484 = vrot.lane.b32.xlu1 %v1349_v27, %s4832_s3  ;;  %4614 = vrsqrt.f32 %v5913_v17  ;;  %1486 = vrot.lane.b32.xlu0 %v1356_v59, %s4832_s3  ;;  %v1358_v3 = vmul.f32 %v4599_v56, %v5830_v2  ;;  %vm1366_vm6 = vcmp.eq.f32.partialorder %v5864_v28, inf  ;;  %vm1368_vm7 = vcmp.eq.f32.partialorder %v5864_v28, 0.0 }
 0x19f   :  { %4616 = vrsqrt.f32 %v5918_v61  ;;  %v1369_v7 = vand.u32 2147483648, %v5864_v28  ;;  %vm1373_vm8 = vcmp.eq.f32.partialorder %v5862_v18, inf  ;;  %vm1375_vm9 = vcmp.eq.f32.partialorder %v5862_v18, 0.0 }
 0x1a0   :  { %v4601_v49 = vpop.eup %4600  ;;  %4618 = vrsqrt.f32 %v5923_v9  ;;  %v1360_v11 = vsel %vm1359_vm4, %v5830_v2, %v1358_v3  ;;  %v1376_v50 = vand.u32 2147483648, %v5862_v18  ;;  %vm1380_vm10 = vcmp.eq.f32.partialorder %v5886_v58, inf }
 0x1a1   :  { %v1365_v22 = vmul.f32 %v4601_v49, %v5864_v28  ;;  %4620 = vrsqrt.f32 %v5930_v14  ;;  %v4603_v32 = vpop.eup %4602  ;;  %v1363_v12 = vsel %vm1361_vm5, %v1362_v6, %v1360_v11  ;;  %vm1382_vm11 = vcmp.eq.f32.partialorder %v5886_v58, 0.0 }
 0x1a2   :  { %v4605_v21 = vpop.eup %4604  ;;  %1488 = vrot.lane.b32.xlu1 %v1363_v12, %s4832_s3  ;;  %v1372_v57 = vmul.f32 %v4603_v32, %v5862_v18  ;;  %vm1387_vm12 = vcmp.eq.f32.partialorder %v5891_v54, inf  ;;  %vm1394_vm13 = vcmp.eq.f32.partialorder %v5896_v10, inf  ;;  %v5973_v11 = vmax.f32 %v5652_v53, 1e-08 }
 0x1a3   :  { %v1367_v47 = vsel %vm1366_vm6, %v5864_v28, %v1365_v22  ;;  %v4607_v2 = vpop.eup %4606  ;;  %v1379_v48 = vmul.f32 %v4605_v21, %v5886_v58  ;;  %v1383_v28 = vand.u32 2147483648, %v5886_v58  ;;  %v1397_v32 = vand.u32 2147483648, %v5896_v10 }
 0x1a4   :  { %v1370_v51 = vsel %vm1368_vm7, %v1369_v7, %v1367_v47  ;;  %v1374_v0 = vsel %vm1373_vm8, %v5862_v18, %v1372_v57  ;;  %v1386_v27 = vmul.f32 %v4607_v2, %v5891_v54  ;;  %vm1389_vm14 = vcmp.eq.f32.partialorder %v5891_v54, 0.0 }
 0x1a5   :  { %v4609_v26 = vpop.eup %4608  ;;  %1490 = vrot.lane.b32.xlu0 %v1370_v51, %s4832_s3  ;;  %v1377_v55 = vsel %vm1375_vm9, %v1376_v50, %v1374_v0  ;;  %v1381_v62 = vsel %vm1380_vm10, %v5886_v58, %v1379_v48  ;;  %v1390_v58 = vand.u32 2147483648, %v5891_v54  ;;  %vm1396_vm15 = vcmp.eq.f32.partialorder %v5896_v10, 0.0 }
 0x1a6   :  { %v4611_v4 = vpop.eup %4610  ;;  %v1393_v56 = vmul.f32 %v4609_v26, %v5896_v10  ;;  %1492 = vrot.lane.b32.xlu1 %v1377_v55, %s4832_s3  ;;  %v1384_v3 = vsel %vm1382_vm11, %v1383_v28, %v1381_v62  ;;  %v1388_v18 = vsel %vm1387_vm12, %v5891_v54, %v1386_v27  ;;  %v1183_v7 = vmul.f32 %v5822_v30, %v5733_v1 }
 0x1a7   :  { %v4613_v59 = vpop.eup %4612  ;;  %v1400_v49 = vmul.f32 %v4611_v4, %v5901_v60  ;;  %4622 = vrsqrt.f32 %v5940_v8  ;;  %v5985_v21 = vmax.f32 %v5649_v15, 1e-08  ;;  %v1391_v47 = vsel %vm1389_vm14, %v1390_v58, %v1388_v18 }
 0x1a8   :  { %v4615_v6 = vpop.eup %4614  ;;  %v1395_v22 = vsel %vm1394_vm13, %v5896_v10, %v1393_v56  ;;  %vm1401_vm1 = vcmp.eq.f32.partialorder %v5901_v60, inf  ;;  %v1190_v10 = vmul.f32 %v5814_v52, %v5724_v29  ;;  %v5993_v30 = vmax.f32 %v5666_v63, 1e-08 }
 0x1a9   :  { %v4617_v12 = vpop.eup %4616  ;;  %1494 = vrot.lane.b32.xlu0 %v1384_v3, %s4832_s3  ;;  %v1398_v57 = vsel %vm1396_vm15, %v1397_v32, %v1395_v22  ;;  %v1402_v54 = vsel %vm1401_vm1, %v5901_v60, %v1400_v49  ;;  %v1404_v51 = vand.u32 2147483648, %v5901_v60  ;;  %vm1184_vm2 = vcmp.eq.f32.partialorder %v5733_v1, inf }
 0x1aa   :  { %v4619_v53 = vpop.eup %4618  ;;  %1496 = vrot.lane.b32.xlu1 %v1391_v47, %s4832_s3  ;;  %4624 = vrsqrt.f32 %v5973_v11  ;;  %vm1403_vm3 = vcmp.eq.f32.partialorder %v5901_v60, 0.0  ;;  %v1185_v15 = vsel %vm1184_vm2, %v5733_v1, %v1183_v7  ;;  %vm1191_vm4 = vcmp.eq.f32.partialorder %v5724_v29, inf }
 0x1ab   :  { %v4621_v2 = vpop.eup %4620  ;;  %v1197_v50 = vmul.f32 %v4615_v6, %v5913_v17  ;;  %v6004_v52 = vmax.f32 %v5663_v23, 1e-08  ;;  %v1405_v63 = vsel %vm1403_vm3, %v1404_v51, %v1402_v54  ;;  %v1187_v48 = vand.u32 2147483648, %v5733_v1 }
 0x1ac   :  { %4626 = vrsqrt.f32 %v5985_v21  ;;  %vm1186_vm5 = vcmp.eq.f32.partialorder %v5733_v1, 0.0  ;;  %v1192_v60 = vsel %vm1191_vm4, %v5724_v29, %v1190_v10  ;;  %v1194_v26 = vand.u32 2147483648, %v5724_v29 }
 0x1ad   :  { %1498 = vrot.lane.b32.xlu0 %v1398_v57, %s4832_s3  ;;  %v1204_v0 = vmul.f32 %v4613_v59, %v5908_v20  ;;  %v6014_v28 = vmax.f32 %v5680_v16, 1e-08  ;;  %v1188_v23 = vsel %vm1186_vm5, %v1187_v48, %v1185_v15  ;;  %vm1198_vm6 = vcmp.eq.f32.partialorder %v5913_v17, inf }
 0x1ae   :  { %1500 = vrot.lane.b32.xlu1 %v1405_v63, %s4832_s3  ;;  %4628 = vrsqrt.f32 %v5993_v30  ;;  %vm1193_vm7 = vcmp.eq.f32.partialorder %v5724_v29, 0.0  ;;  %v1199_v1 = vsel %vm1198_vm6, %v5913_v17, %v1197_v50  ;;  %vm1205_vm8 = vcmp.eq.f32.partialorder %v5908_v20, inf }
 0x1af   :  { %v1211_v27 = vmul.f32 %v4619_v53, %v5923_v9  ;;  %v6024_v4 = vmax.f32 %v5677_v31, 1e-08  ;;  %v1195_v16 = vsel %vm1193_vm7, %v1194_v26, %v1192_v60  ;;  %v1201_v55 = vand.u32 2147483648, %v5913_v17 }
 0x1b0   :  { %4630 = vrsqrt.f32 %v6004_v52  ;;  %vm1200_vm9 = vcmp.eq.f32.partialorder %v5913_v17, 0.0  ;;  %v1206_v29 = vsel %vm1205_vm8, %v5908_v20, %v1204_v0  ;;  %v1208_v56 = vand.u32 2147483648, %v5908_v20 }
 0x1b1   :  { %1438 = vrot.lane.b32.xlu0 %v1188_v23, %s4832_s3  ;;  %v4623_v62 = vpop.eup %4622  ;;  %v1218_v59 = vmul.f32 %v4617_v12, %v5918_v61  ;;  %v6034_v3 = vmax.f32 %v5694_v24, 1e-08  ;;  %v1202_v31 = vsel %vm1200_vm9, %v1201_v55, %v1199_v1  ;;  %vm1212_vm10 = vcmp.eq.f32.partialorder %v5923_v9, inf }
 0x1b2   :  { %1440 = vrot.lane.b32.xlu1 %v1195_v16, %s4832_s3  ;;  %4632 = vrsqrt.f32 %v6014_v28  ;;  %vm1207_vm11 = vcmp.eq.f32.partialorder %v5908_v20, 0.0  ;;  %v1213_v17 = vsel %vm1212_vm10, %v5923_v9, %v1211_v27  ;;  %vm1219_vm12 = vcmp.eq.f32.partialorder %v5918_v61, inf }
 0x1b3   :  { %v1225_v18 = vmul.f32 %v4621_v2, %v5930_v14  ;;  %v6044_v6 = vmax.f32 %v5691_v13, 1e-08  ;;  %v1209_v24 = vsel %vm1207_vm11, %v1208_v56, %v1206_v29  ;;  %v1215_v58 = vand.u32 2147483648, %v5923_v9 }
 0x1b4   :  { %v4625_v49 = vpop.eup %4624  ;;  %4634 = vrsqrt.f32 %v6024_v4  ;;  %vm1214_vm13 = vcmp.eq.f32.partialorder %v5923_v9, 0.0  ;;  %v1220_v20 = vsel %vm1219_vm12, %v5918_v61, %v1218_v59  ;;  %v1232_v22 = vmul.f32 %v4623_v62, %v5940_v8 }
 0x1b5   :  { %1442 = vrot.lane.b32.xlu0 %v1202_v31, %s4832_s3  ;;  %v1216_v12 = vsel %vm1214_vm13, %v1215_v58, %v1213_v17  ;;  %v1222_v7 = vand.u32 2147483648, %v5918_v61  ;;  %vm1226_vm14 = vcmp.eq.f32.partialorder %v5930_v14, inf  ;;  %4636 = vrsqrt.f32 %v6034_v3 }
 0x1b6   :  { %1444 = vrot.lane.b32.xlu1 %v1209_v24, %s4832_s3  ;;  %v4627_v32 = vpop.eup %4626  ;;  %vm1221_vm15 = vcmp.eq.f32.partialorder %v5918_v61, 0.0  ;;  %v1227_v13 = vsel %vm1226_vm14, %v5930_v14, %v1225_v18  ;;  %v1239_v9 = vmul.f32 %v4625_v49, %v5973_v11  ;;  %v1229_v57 = vand.u32 2147483648, %v5930_v14 }
 0x1b7   :  { %v1223_v47 = vsel %vm1221_vm15, %v1222_v7, %v1220_v20  ;;  %vm1233_vm1 = vcmp.eq.f32.partialorder %v5940_v8, inf  ;;  %4638 = vrsqrt.f32 %v6044_v6  ;;  %vm1228_vm2 = vcmp.eq.f32.partialorder %v5930_v14, 0.0 }
 0x1b8   :  { %v4629_v53 = vpop.eup %4628  ;;  %v1234_v2 = vsel %vm1233_vm1, %v5940_v8, %v1232_v22  ;;  %v1246_v61 = vmul.f32 %v4627_v32, %v5985_v21  ;;  %v1230_v10 = vsel %vm1228_vm2, %v1229_v57, %v1227_v13  ;;  %v1236_v51 = vand.u32 2147483648, %v5940_v8  ;;  %v41_v13 = vld [vmem:[%s7931_s0 + $0x80] sm:$0xff] }
 0x1b9   :  { %1446 = vrot.lane.b32.xlu0 %v1216_v12, %s4832_s3  ;;  %vm1240_vm3 = vcmp.eq.f32.partialorder %v5973_v11, inf  ;;  %vm1235_vm4 = vcmp.eq.f32.partialorder %v5940_v8, 0.0  ;;  %v1253_v50 = vmul.f32 %v4629_v53, %v5993_v30  ;;  %v1243_v48 = vand.u32 2147483648, %v5973_v11  ;;  %v42_v53 = vld [vmem:[%s7931_s0 + $0x88] sm:$0xff] }
 0x1ba   :  { %1448 = vrot.lane.b32.xlu1 %v1223_v47, %s4832_s3  ;;  %v4631_v54 = vpop.eup %4630  ;;  %v1241_v15 = vsel %vm1240_vm3, %v5973_v11, %v1239_v9  ;;  %v1237_v14 = vsel %vm1235_vm4, %v1236_v51, %v1234_v2  ;;  %vm1247_vm5 = vcmp.eq.f32.partialorder %v5985_v21, inf  ;;  %vm1242_vm6 = vcmp.eq.f32.partialorder %v5973_v11, 0.0 }
 0x1bb   :  { %v1248_v60 = vsel %vm1247_vm5, %v5985_v21, %v1246_v61  ;;  %v1260_v26 = vmul.f32 %v4631_v54, %v6004_v52  ;;  %v1244_v8 = vsel %vm1242_vm6, %v1243_v48, %v1241_v15  ;;  %v1250_v23 = vand.u32 2147483648, %v5985_v21  ;;  %v44_v54 = vld [vmem:[%s7931_s0 + $0x98] sm:$0xff]  ;;  %v47_v48 = vld [vmem:[%s7931_s0 + $0xb0] sm:$0xff] }
 0x1bc   :  { %v4633_v63 = vpop.eup %4632  ;;  %vm1254_vm7 = vcmp.eq.f32.partialorder %v5993_v30, inf  ;;  %vm1249_vm8 = vcmp.eq.f32.partialorder %v5985_v21, 0.0  ;;  %v1257_v55 = vand.u32 2147483648, %v5993_v30  ;;  %vm1261_vm9 = vcmp.eq.f32.partialorder %v6004_v52, inf }
 0x1bd   :  { %1450 = vrot.lane.b32.xlu0 %v1230_v10, %s4832_s3  ;;  %v1255_v1 = vsel %vm1254_vm7, %v5993_v30, %v1253_v50  ;;  %v1267_v27 = vmul.f32 %v4633_v63, %v6014_v28  ;;  %v1251_v11 = vsel %vm1249_vm8, %v1250_v23, %v1248_v60  ;;  %vm1256_vm10 = vcmp.eq.f32.partialorder %v5993_v30, 0.0  ;;  %v45_v10 = vld [vmem:[%s7931_s0 + $0xa0] sm:$0xff] }
 0x1be   :  { %1452 = vrot.lane.b32.xlu1 %v1237_v14, %s4832_s3  ;;  %v4635_v0 = vpop.eup %4634  ;;  %v1262_v62 = vsel %vm1261_vm9, %v6004_v52, %v1260_v26  ;;  %v1258_v21 = vsel %vm1256_vm10, %v1257_v55, %v1255_v1  ;;  %v1264_v59 = vand.u32 2147483648, %v6004_v52  ;;  %vm1268_vm11 = vcmp.eq.f32.partialorder %v6014_v28, inf  ;;  %v46_v14 = vld [vmem:[%s7931_s0 + $0xa8] sm:$0xff] }
 0x1bf   :  { %v4637_v16 = vpop.eup %4636  ;;  %v1274_v29 = vmul.f32 %v4635_v0, %v6024_v4  ;;  %vm1263_vm12 = vcmp.eq.f32.partialorder %v6004_v52, 0.0  ;;  %v1269_v31 = vsel %vm1268_vm11, %v6014_v28, %v1267_v27  ;;  %v1271_v30 = vand.u32 2147483648, %v6014_v28  ;;  %v49_v27 = vld [vmem:[%s7931_s0 + $0xc0] sm:$0xff]  ;;  %v50_v55 = vld [vmem:[%s7931_s0 + $0xc8] sm:$0xff] }
 0x1c0   :  { %v1281_v17 = vmul.f32 %v4637_v16, %v6034_v3  ;;  %v1265_v18 = vsel %vm1263_vm12, %v1264_v59, %v1262_v62  ;;  %vm1275_vm13 = vcmp.eq.f32.partialorder %v6024_v4, inf  ;;  %vm1270_vm14 = vcmp.eq.f32.partialorder %v6014_v28, 0.0  ;;  %v52_v59 = vld [vmem:[%s7931_s0 + $0xd8] sm:$0xff] }
 0x1c1   :  { %1454 = vrot.lane.b32.xlu0 %v1244_v8, %s4832_s3  ;;  %v4639_v56 = vpop.eup %4638  ;;  %v1276_v49 = vsel %vm1275_vm13, %v6024_v4, %v1274_v29  ;;  %v1272_v58 = vsel %vm1270_vm14, %v1271_v30, %v1269_v31  ;;  %v1278_v52 = vand.u32 2147483648, %v6024_v4  ;;  %vm1282_vm15 = vcmp.eq.f32.partialorder %v6034_v3, inf  ;;  %v48_v8 = vld [vmem:[%s7931_s0 + $0xb8] sm:$0xff]  ;;  %v51_v29 = vld [vmem:[%s7931_s0 + $0xd0] sm:$0xff] }
 0x1c2   :  { %1456 = vrot.lane.b32.xlu1 %v1251_v11, %s4832_s3  ;;  %v1288_v24 = vmul.f32 %v4639_v56, %v6044_v6  ;;  %vm1277_vm1 = vcmp.eq.f32.partialorder %v6024_v4, 0.0  ;;  %v1283_v20 = vsel %vm1282_vm15, %v6034_v3, %v1281_v17  ;;  %v1285_v32 = vand.u32 2147483648, %v6034_v3 }
 0x1c3   :  { %v1279_v22 = vsel %vm1277_vm1, %v1278_v52, %v1276_v49  ;;  %vm1289_vm2 = vcmp.eq.f32.partialorder %v6044_v6, inf  ;;  %vm1284_vm3 = vcmp.eq.f32.partialorder %v6034_v3, 0.0  ;;  %v1292_v7 = vand.u32 2147483648, %v6044_v6 }
 0x1c4   :  { %v1290_v28 = vsel %vm1289_vm2, %v6044_v6, %v1288_v24  ;;  %v1286_v12 = vsel %vm1284_vm3, %v1285_v32, %v1283_v20  ;;  %vm1291_vm4 = vcmp.eq.f32.partialorder %v6044_v6, 0.0  ;;  %vm1534_vm5 = vcmask 130048   ;;  %v43_v6 = vld [vmem:[%s7931_s0 + $0x90] sm:$0xff]  ;;  %v54_v24 = vld [vmem:[%s7931_s0 + $0xe8] sm:$0xff] }
 0x1c5   :  { %1458 = vrot.lane.b32.xlu0 %v1258_v21, %s4832_s3  ;;  %v1293_v4 = vsel %vm1291_vm4, %v1292_v7, %v1290_v28  ;;  %vm1577_vm6 = vcmask 195584   ;;  %v55_v20 = vld [vmem:[%s7931_s0 + $0xf0] sm:$0xff]  ;;  %v56_v28 = vld [vmem:[%s7931_s0 + $0xf8] sm:$0xff] }
 0x1c6   :  { %1460 = vrot.lane.b32.xlu1 %v1265_v18, %s4832_s3  ;;  %v53_v18 = vld [vmem:[%s7931_s0 + $0xe0] sm:$0xff] }
 0x1c9   :  { %1462 = vrot.lane.b32.xlu0 %v1272_v58, %s4832_s3 }
 0x1ca   :  { %1464 = vrot.lane.b32.xlu1 %v1279_v22, %s4832_s3 }
 0x1cd   :  { %1466 = vrot.lane.b32.xlu0 %v1286_v12, %s4832_s3 }
 0x1ce   :  { %1468 = vrot.lane.b32.xlu1 %v1293_v4, %s4832_s3  ;;  %v25_v4 = vld [vmem:[%s7931_s0] sm:$0xff] }
 0x200   :  { %v1471_v9 = vpop.permute.xlu0 %1470 }
 0x201   :  { %v1551_v3 = vsel %vm1534_vm5, %v41_v13, %v1471_v9 }
 0x202   :  { %4397 = vmatprep.mubr.msk.f32.mxu1 %vm1577_vm6, %v1551_v3  ;;  %v26_v3 = vld [vmem:[%s7931_s0 + $0x8] sm:$0xff] }
 0x204   :  { %v1473_v47 = vpop.permute.xlu0 %1472  ;;  %v1475_v57 = vpop.permute.xlu1 %1474 }
 0x205   :  { %v1552_v2 = vsel %vm1534_vm5, %v42_v53, %v1473_v47  ;;  %v1553_v61 = vsel %vm1534_vm5, %v43_v6, %v1475_v57  ;;  %v27_v47 = vld [vmem:[%s7931_s0 + $0x10] sm:$0xff] }
 0x206   :  { %4398 = vmatmul.mubr.msk.f32.vlgmr.msra.gmra.mrb[0].mxu1 %vm1577_vm6, %v1552_v2 }
 0x207   :  { %4422 = vmatpush3.msra.mxu1 %v5765_v19  ;;  %4400 = vmatprep.mubr.msk.f32.mxu1 %vm1577_vm6, %v1553_v61  ;;  %v28_v61 = vld [vmem:[%s7931_s0 + $0x18] sm:$0xff] }
 0x208   :  { %v1477_v51 = vpop.permute.xlu1 %1476  ;;  %v1479_v15 = vpop.permute.xlu0 %1478 }
 0x209   :  { %v1554_v50 = vsel %vm1534_vm5, %v44_v54, %v1477_v51  ;;  %v1555_v63 = vsel %vm1534_vm5, %v45_v10, %v1479_v15  ;;  %v29_v10 = vld [vmem:[%s7931_s0 + $0x20] sm:$0xff] }
 0x20a   :  { %4401 = vmatmul.mubr.msk.f32.gmra.mrb[2].mxu1 %vm1577_vm6, %v1554_v50 }
 0x20b   :  { %4403 = vmatprep.mubr.msk.f32.mxu1 %vm1577_vm6, %v1555_v63  ;;  %v31_v63 = vld [vmem:[%s7931_s0 + $0x30] sm:$0xff] }
 0x20c   :  { %v1481_v19 = vpop.permute.xlu1 %1480  ;;  %v1483_v60 = vpop.permute.xlu0 %1482 }
 0x20d   :  { %v1556_v26 = vsel %vm1534_vm5, %v46_v14, %v1481_v19  ;;  %v1557_v0 = vsel %vm1534_vm5, %v47_v48, %v1483_v60  ;;  %v33_v60 = vld [vmem:[%s7931_s0 + $0x40] sm:$0xff] }
 0x20e   :  { %4404 = vmatmul.mubr.msk.f32.gmra.mrb[4].mxu1 %vm1577_vm6, %v1556_v26 }
 0x20f   :  { %4406 = vmatprep.mubr.msk.f32.mxu1 %vm1577_vm6, %v1557_v0 }
 0x210   :  { %v1485_v23 = vpop.permute.xlu1 %1484  ;;  %v1487_v16 = vpop.permute.xlu0 %1486 }
 0x211   :  { %v1558_v1 = vsel %vm1534_vm5, %v48_v8, %v1485_v23  ;;  %v1559_v11 = vsel %vm1534_vm5, %v49_v27, %v1487_v16  ;;  %v35_v23 = vld [vmem:[%s7931_s0 + $0x50] sm:$0xff] }
 0x212   :  { %4407 = vmatmul.mubr.msk.f32.gmra.mrb[6].mxu1 %vm1577_vm6, %v1558_v1 }
 0x213   :  { %4409 = vmatprep.mubr.msk.f32.mxu1 %vm1577_vm6, %v1559_v11  ;;  %v37_v11 = vld [vmem:[%s7931_s0 + $0x60] sm:$0xff] }
 0x214   :  { %v1489_v62 = vpop.permute.xlu1 %1488 }
 0x215   :  { %v1560_v56 = vsel %vm1534_vm5, %v50_v55, %v1489_v62 }
 0x216   :  { %4410 = vmatmul.mubr.msk.f32.gmra.mrb[8].mxu1 %vm1577_vm6, %v1560_v56  ;;  %v39_v56 = vld [vmem:[%s7931_s0 + $0x70] sm:$0xff] }
 0x217   :  { %v1491_v21 = vpop.permute.xlu0 %1490 }
 0x218   :  { %v1561_v31 = vsel %vm1534_vm5, %v51_v29, %v1491_v21  ;;  %v1493_v17 = vpop.permute.xlu1 %1492 }
 0x219   :  { %4412 = vmatprep.mubr.msk.f32.mxu1 %vm1577_vm6, %v1561_v31  ;;  %v1562_v30 = vsel %vm1534_vm5, %v52_v59, %v1493_v17  ;;  %v8144_v31 = vld [vmem:[#allocation3_spill] sm:$0xff] }
 0x21a   :  { %4413 = vmatmul.mubr.msk.f32.gmra.mrb[10].mxu1 %vm1577_vm6, %v1562_v30  ;;  %v8145_v30 = vld [vmem:[#allocation2_spill] sm:$0xff] }
 0x21b   :  { %v1495_v49 = vpop.permute.xlu0 %1494 }
 0x21c   :  { %v1563_v58 = vsel %vm1534_vm5, %v53_v18, %v1495_v49  ;;  %v1497_v52 = vpop.permute.xlu1 %1496  ;;  %v8147_v49 = vld [vmem:[#allocation4_spill] sm:$0xff] }
 0x21d   :  { %4415 = vmatprep.mubr.msk.f32.mxu1 %vm1577_vm6, %v1563_v58  ;;  %v1564_v22 = vsel %vm1534_vm5, %v54_v24, %v1497_v52  ;;  %v8148_v24 = vld [vmem:[#allocation7_spill] sm:$0xff]  ;;  %v8149_v58 = vld [vmem:[#allocation6_spill] sm:$0xff]  ;;  %v8150_v52 = vld [vmem:[#allocation9_spill] sm:$0xff] }
 0x21e   :  { %4416 = vmatmul.mubr.msk.f32.gmra.mrb[12].mxu1 %vm1577_vm6, %v1564_v22  ;;  %v8152_v22 = vld [vmem:[#allocation11_spill] sm:$0xff] }
 0x21f   :  { %v1499_v32 = vpop.permute.xlu0 %1498 }
 0x220   :  { %v1565_v12 = vsel %vm1534_vm5, %v55_v20, %v1499_v32  ;;  %v1501_v7 = vpop.permute.xlu1 %1500  ;;  %v8151_v20 = vld [vmem:[#allocation8_spill] sm:$0xff]  ;;  %v8153_v32 = vld [vmem:[#allocation10_spill] sm:$0xff] }
 0x221   :  { %4418 = vmatprep.mubr.msk.f32.mxu1 %vm1577_vm6, %v1565_v12  ;;  %v1566_v13 = vsel %vm1534_vm5, %v56_v28, %v1501_v7  ;;  %v8154_v28 = vld [vmem:[#allocation13_spill] sm:$0xff]  ;;  %v8155_v12 = vld [vmem:[#allocation12_spill] sm:$0xff]  ;;  %v8156_v7 = vld [vmem:[#allocation15_spill] sm:$0xff] }
 0x222   :  { %4419 = vmatmul.mubr.msk.f32.gmra.mrb[14].mxu1 %vm1577_vm6, %v1566_v13  ;;  %v8158_v13 = vld [vmem:[#allocation17_spill] sm:$0xff] }
 0x223   :  { %v1439_v9 = vpop.permute.xlu0 %1438  ;;  %4423 = vmatprep.mubr.msk.f32.mxu1 %vm156_vm0, %v5262_v34 }
 0x224   :  { %v1535_v53 = vsel %vm1534_vm5, %v25_v4, %v1439_v9  ;;  %v1441_v6 = vpop.permute.xlu1 %1440  ;;  %v8157_v4 = vld [vmem:[#allocation14_spill] sm:$0xff]  ;;  %v8159_v9 = vld [vmem:[#allocation16_spill] sm:$0xff] }
 0x225   :  { %4373 = vmatprep.mubr.msk.f32.mxu0 %vm1577_vm6, %v1535_v53  ;;  %v1536_v57 = vsel %vm1534_vm5, %v26_v3, %v1441_v6  ;;  %v8160_v3 = vld [vmem:[#allocation19_spill] sm:$0xff]  ;;  %v8161_v53 = vld [vmem:[#allocation18_spill] sm:$0xff]  ;;  %v8162_v6 = vld [vmem:[#allocation21_spill] sm:$0xff] }
 0x226   :  { %4374 = vmatmul.mubr.msk.f32.vlgmr.msra.gmra.mrb[96].mxu0 %vm1577_vm6, %v1536_v57  ;;  %4424 = vmatmul.mubr.msk.f32.vlgmr.msra.gmra.mrb[16].mxu1 %vm156_vm0, %v5260_v33  ;;  %v30_v33 = vld [vmem:[%s7931_s0 + $0x28] sm:$0xff] }
 0x227   :  { %v1443_v2 = vpop.permute.xlu0 %1442  ;;  %4426 = vmatprep.mubr.msk.f32.mxu1 %vm156_vm0, %v5266_v36  ;;  %v8164_v57 = vld [vmem:[#allocation23_spill] sm:$0xff] }
 0x228   :  { %v1537_v34 = vsel %vm1534_vm5, %v27_v47, %v1443_v2  ;;  %v1445_v54 = vpop.permute.xlu1 %1444  ;;  %v8163_v47 = vld [vmem:[#allocation20_spill] sm:$0xff]  ;;  %v8165_v2 = vld [vmem:[#allocation22_spill] sm:$0xff] }
 0x229   :  { %4376 = vmatprep.mubr.msk.f32.mxu0 %vm1577_vm6, %v1537_v34  ;;  %v1538_v51 = vsel %vm1534_vm5, %v28_v61, %v1445_v54  ;;  %v8166_v61 = vld [vmem:[#allocation25_spill] sm:$0xff]  ;;  %v8167_v34 = vld [vmem:[#allocation24_spill] sm:$0xff]  ;;  %v8168_v54 = vld [vmem:[#allocation27_spill] sm:$0xff] }
 0x22a   :  { %4377 = vmatmul.mubr.msk.f32.gmra.mrb[98].mxu0 %vm1577_vm6, %v1538_v51  ;;  %4427 = vmatmul.mubr.msk.f32.gmra.mrb[18].mxu1 %vm156_vm0, %v5264_v35  ;;  %v32_v35 = vld [vmem:[%s7931_s0 + $0x38] sm:$0xff] }
 0x22b   :  { %v1447_v15 = vpop.permute.xlu0 %1446  ;;  %4429 = vmatprep.mubr.msk.f32.mxu1 %vm156_vm0, %v5270_v38  ;;  %v8170_v51 = vld [vmem:[#allocation29_spill] sm:$0xff] }
 0x22c   :  { %v1539_v36 = vsel %vm1534_vm5, %v29_v10, %v1447_v15  ;;  %v1449_v50 = vpop.permute.xlu1 %1448  ;;  %v8169_v10 = vld [vmem:[#allocation26_spill] sm:$0xff]  ;;  %v8171_v15 = vld [vmem:[#allocation28_spill] sm:$0xff] }
 0x22d   :  { %4379 = vmatprep.mubr.msk.f32.mxu0 %vm1577_vm6, %v1539_v36  ;;  %v1540_v14 = vsel %vm1534_vm5, %v30_v33, %v1449_v50  ;;  %v8172_v33 = vld [vmem:[#allocation31_spill] sm:$0xff]  ;;  %v8173_v36 = vld [vmem:[#allocation30_spill] sm:$0xff]  ;;  %v8174_v50 = vld [vmem:[#allocation33_spill] sm:$0xff] }
 0x22e   :  { %4380 = vmatmul.mubr.msk.f32.gmra.mrb[100].mxu0 %vm1577_vm6, %v1540_v14  ;;  %4430 = vmatmul.mubr.msk.f32.gmra.mrb[20].mxu1 %vm156_vm0, %v5268_v37  ;;  %v34_v37 = vld [vmem:[%s7931_s0 + $0x48] sm:$0xff] }
 0x22f   :  { %v1451_v48 = vpop.permute.xlu0 %1450  ;;  %4432 = vmatprep.mubr.msk.f32.mxu1 %vm156_vm0, %v5274_v40  ;;  %v8176_v14 = vld [vmem:[#allocation35_spill] sm:$0xff] }
 0x230   :  { %v1541_v38 = vsel %vm1534_vm5, %v31_v63, %v1451_v48  ;;  %v1453_v19 = vpop.permute.xlu1 %1452  ;;  %v8175_v63 = vld [vmem:[#allocation32_spill] sm:$0xff]  ;;  %v8177_v48 = vld [vmem:[#allocation34_spill] sm:$0xff] }
 0x231   :  { %4382 = vmatprep.mubr.msk.f32.mxu0 %vm1577_vm6, %v1541_v38  ;;  %v1542_v26 = vsel %vm1534_vm5, %v32_v35, %v1453_v19  ;;  %v8178_v35 = vld [vmem:[#allocation37_spill] sm:$0xff]  ;;  %v8179_v38 = vld [vmem:[#allocation36_spill] sm:$0xff]  ;;  %v8180_v19 = vld [vmem:[#allocation39_spill] sm:$0xff] }
 0x232   :  { %4383 = vmatmul.mubr.msk.f32.gmra.mrb[102].mxu0 %vm1577_vm6, %v1542_v26  ;;  %4433 = vmatmul.mubr.msk.f32.gmra.mrb[22].mxu1 %vm156_vm0, %v5272_v39  ;;  %v36_v39 = vld [vmem:[%s7931_s0 + $0x58] sm:$0xff] }
 0x233   :  { %v1455_v0 = vpop.permute.xlu0 %1454  ;;  %4435 = vmatprep.mubr.msk.f32.mxu1 %vm156_vm0, %v5278_v42  ;;  %v8182_v26 = vld [vmem:[#allocation41_spill] sm:$0xff] }
 0x234   :  { %v1543_v40 = vsel %vm1534_vm5, %v33_v60, %v1455_v0  ;;  %v1457_v8 = vpop.permute.xlu1 %1456  ;;  %v8181_v60 = vld [vmem:[#allocation38_spill] sm:$0xff]  ;;  %v8183_v0 = vld [vmem:[#allocation40_spill] sm:$0xff] }
 0x235   :  { %4385 = vmatprep.mubr.msk.f32.mxu0 %vm1577_vm6, %v1543_v40  ;;  %v1544_v1 = vsel %vm1534_vm5, %v34_v37, %v1457_v8  ;;  %v8184_v37 = vld [vmem:[#allocation43_spill] sm:$0xff]  ;;  %v8185_v40 = vld [vmem:[#allocation42_spill] sm:$0xff]  ;;  %v8186_v8 = vld [vmem:[#allocation45_spill] sm:$0xff] }
 0x236   :  { %4386 = vmatmul.mubr.msk.f32.gmra.mrb[104].mxu0 %vm1577_vm6, %v1544_v1  ;;  %4436 = vmatmul.mubr.msk.f32.gmra.mrb[24].mxu1 %vm156_vm0, %v5276_v41  ;;  %v38_v41 = vld [vmem:[%s7931_s0 + $0x68] sm:$0xff] }
 0x237   :  { %v1459_v27 = vpop.permute.xlu0 %1458  ;;  %4438 = vmatprep.mubr.msk.f32.mxu1 %vm156_vm0, %v5282_v44  ;;  %v8188_v1 = vld [vmem:[#allocation47_spill] sm:$0xff] }
 0x238   :  { %v1545_v42 = vsel %vm1534_vm5, %v35_v23, %v1459_v27  ;;  %v1461_v16 = vpop.permute.xlu1 %1460  ;;  %v8187_v23 = vld [vmem:[#allocation44_spill] sm:$0xff]  ;;  %v8189_v27 = vld [vmem:[#allocation46_spill] sm:$0xff] }
 0x239   :  { %4388 = vmatprep.mubr.msk.f32.mxu0 %vm1577_vm6, %v1545_v42  ;;  %v1546_v55 = vsel %vm1534_vm5, %v36_v39, %v1461_v16  ;;  %v8190_v39 = vld [vmem:[#allocation49_spill] sm:$0xff]  ;;  %v8191_v42 = vld [vmem:[#allocation48_spill] sm:$0xff]  ;;  %v8192_v16 = vld [vmem:[#allocation51_spill] sm:$0xff] }
 0x23a   :  { %4389 = vmatmul.mubr.msk.f32.gmra.mrb[106].mxu0 %vm1577_vm6, %v1546_v55  ;;  %4439 = vmatmul.mubr.msk.f32.gmra.mrb[26].mxu1 %vm156_vm0, %v5280_v43  ;;  %v40_v43 = vld [vmem:[%s7931_s0 + $0x78] sm:$0xff] }
 0x23b   :  { %v1463_v62 = vpop.permute.xlu0 %1462  ;;  %4441 = vmatprep.mubr.msk.f32.mxu1 %vm156_vm0, %v5286_v46  ;;  %v8194_v55 = vld [vmem:[#allocation53_spill] sm:$0xff] }
 0x23c   :  { %v1547_v44 = vsel %vm1534_vm5, %v37_v11, %v1463_v62  ;;  %v1465_v29 = vpop.permute.xlu1 %1464  ;;  %v8193_v11 = vld [vmem:[#allocation50_spill] sm:$0xff]  ;;  %v8195_v62 = vld [vmem:[#allocation52_spill] sm:$0xff] }
 0x23d   :  { %4391 = vmatprep.mubr.msk.f32.mxu0 %vm1577_vm6, %v1547_v44  ;;  %v1548_v21 = vsel %vm1534_vm5, %v38_v41, %v1465_v29  ;;  %v8196_v41 = vld [vmem:[#allocation55_spill] sm:$0xff]  ;;  %v8197_v44 = vld [vmem:[#allocation54_spill] sm:$0xff]  ;;  %v8198_v29 = vld [vmem:[#allocation57_spill] sm:$0xff] }
 0x23e   :  { %4392 = vmatmul.mubr.msk.f32.gmra.mrb[108].mxu0 %vm1577_vm6, %v1548_v21  ;;  %4442 = vmatmul.mubr.msk.f32.gmra.mrb[28].mxu1 %vm156_vm0, %v5284_v45  ;;  %v8146_v45 = vld [vmem:[#allocation5_spill] sm:$0xff]  ;;  %v8200_v21 = vld [vmem:[#allocation59_spill] sm:$0xff] }
 0x23f   :  { %v1467_v59 = vpop.permute.xlu0 %1466  ;;  %4444 = vmatprep.mubr.msk.f32.mxu1 %vm156_vm0, %v8144_v31  ;;  %v8204_v31 = vld [vmem:[#allocation63_spill] sm:$0xff] }
 0x240   :  { %v1549_v46 = vsel %vm1534_vm5, %v39_v56, %v1467_v59  ;;  %v1469_v17 = vpop.permute.xlu1 %1468  ;;  %v8199_v56 = vld [vmem:[#allocation56_spill] sm:$0xff]  ;;  %v8201_v59 = vld [vmem:[#allocation58_spill] sm:$0xff] }
 0x241   :  { %4394 = vmatprep.mubr.msk.f32.mxu0 %vm1577_vm6, %v1549_v46  ;;  %v1550_v18 = vsel %vm1534_vm5, %v40_v43, %v1469_v17  ;;  %v8202_v43 = vld [vmem:[#allocation61_spill] sm:$0xff]  ;;  %v8203_v46 = vld [vmem:[#allocation60_spill] sm:$0xff]  ;;  %v8205_v17 = vld [vmem:[#allocation62_spill] sm:$0xff] }
 0x242   :  { %4395 = vmatmul.mubr.msk.f32.gmra.mrb[110].mxu0 %vm1577_vm6, %v1550_v18  ;;  %4445 = vmatmul.mubr.msk.f32.gmra.mrb[30].mxu1 %vm156_vm0, %v8145_v30  ;;  %v8206_v18 = vld [vmem:[#allocation65_spill] sm:$0xff]  ;;  %v8207_v30 = vld [vmem:[#allocation64_spill] sm:$0xff] }
 0x243   :  { %4447 = vmatprep.mubr.msk.f32.mxu1 %vm156_vm0, %v8146_v45  ;;  %v8208_v45 = vld [vmem:[#allocation67_spill] sm:$0xff] }
 0x246   :  { %4448 = vmatmul.mubr.msk.f32.gmra.mrb[32].mxu1 %vm156_vm0, %v8147_v49  ;;  %v8209_v49 = vld [vmem:[#allocation66_spill] sm:$0xff] }
 0x247   :  { %4450 = vmatprep.mubr.msk.f32.mxu1 %vm156_vm0, %v8148_v24  ;;  %v8210_v24 = vld [vmem:[#allocation69_spill] sm:$0xff] }
 0x24a   :  { %4451 = vmatmul.mubr.msk.f32.gmra.mrb[34].mxu1 %vm156_vm0, %v8149_v58  ;;  %v8211_v58 = vld [vmem:[#allocation68_spill] sm:$0xff] }
 0x24b   :  { %4453 = vmatprep.mubr.msk.f32.mxu1 %vm156_vm0, %v8150_v52  ;;  %v8212_v52 = vld [vmem:[#allocation71_spill] sm:$0xff] }
 0x24e   :  { %4454 = vmatmul.mubr.msk.f32.gmra.mrb[36].mxu1 %vm156_vm0, %v8151_v20  ;;  %v8213_v20 = vld [vmem:[#allocation70_spill] sm:$0xff] }
 0x24f   :  { %4456 = vmatprep.mubr.msk.f32.mxu1 %vm156_vm0, %v8152_v22  ;;  %v8214_v22 = vld [vmem:[#allocation73_spill] sm:$0xff] }
 0x252   :  { %4457 = vmatmul.mubr.msk.f32.gmra.mrb[38].mxu1 %vm156_vm0, %v8153_v32  ;;  %v8215_v32 = vld [vmem:[#allocation72_spill] sm:$0xff] }
 0x253   :  { %4459 = vmatprep.mubr.msk.f32.mxu1 %vm156_vm0, %v8154_v28  ;;  %v8216_v28 = vld [vmem:[#allocation75_spill] sm:$0xff] }
 0x256   :  { %4460 = vmatmul.mubr.msk.f32.gmra.mrb[40].mxu1 %vm156_vm0, %v8155_v12  ;;  %v8217_v12 = vld [vmem:[#allocation74_spill] sm:$0xff] }
 0x257   :  { %4462 = vmatprep.mubr.msk.f32.mxu1 %vm156_vm0, %v8156_v7  ;;  %v8218_v7 = vld [vmem:[#allocation77_spill] sm:$0xff] }
 0x25a   :  { %4463 = vmatmul.mubr.msk.f32.gmra.mrb[42].mxu1 %vm156_vm0, %v8157_v4  ;;  %v6458_v4 = vld [vmem:[%s7932_s5] ss:$0 sm:$0xff] }
 0x25b   :  { %4465 = vmatprep.mubr.msk.f32.mxu1 %vm156_vm0, %v8158_v13  ;;  %v8219_v13 = vld [vmem:[#allocation76_spill] sm:$0xff] }
 0x25e   :  { %4466 = vmatmul.mubr.msk.f32.gmra.mrb[44].mxu1 %vm156_vm0, %v8159_v9 }
 0x25f   :  { %4468 = vmatprep.mubr.msk.f32.mxu1 %vm156_vm0, %v8160_v3  ;;  %v8220_v3 = vld [vmem:[#allocation79_spill] sm:$0xff] }
 0x262   :  { %4469 = vmatmul.mubr.msk.f32.gmra.mrb[46].mxu1 %vm156_vm0, %v8161_v53 }
 0x263   :  { %4471 = vmatprep.mubr.msk.f32.mxu1 %vm156_vm0, %v8162_v6 }
 0x266   :  { %4472 = vmatmul.mubr.msk.f32.gmra.mrb[48].mxu1 %vm156_vm0, %v8163_v47 }
 0x267   :  { %4474 = vmatprep.mubr.msk.f32.mxu1 %vm156_vm0, %v8164_v57 }
 0x26a   :  { %4475 = vmatmul.mubr.msk.f32.gmra.mrb[50].mxu1 %vm156_vm0, %v8165_v2 }
 0x26b   :  { %4477 = vmatprep.mubr.msk.f32.mxu1 %vm156_vm0, %v8166_v61  ;;  %v8221_v61 = vld [vmem:[#allocation78_spill] sm:$0xff] }
 0x26e   :  { %4478 = vmatmul.mubr.msk.f32.gmra.mrb[52].mxu1 %vm156_vm0, %v8167_v34 }
 0x26f   :  { %4480 = vmatprep.mubr.msk.f32.mxu1 %vm156_vm0, %v8168_v54  ;;  %v8222_v54 = vld [vmem:[#allocation81_spill] sm:$0xff] }
 0x272   :  { %4481 = vmatmul.mubr.msk.f32.gmra.mrb[54].mxu1 %vm156_vm0, %v8169_v10 }
 0x273   :  { %4483 = vmatprep.mubr.msk.f32.mxu1 %vm156_vm0, %v8170_v51 }
 0x276   :  { %4484 = vmatmul.mubr.msk.f32.gmra.mrb[56].mxu1 %vm156_vm0, %v8171_v15 }
 0x277   :  { %4486 = vmatprep.mubr.msk.f32.mxu1 %vm156_vm0, %v8172_v33 }
 0x27a   :  { %4487 = vmatmul.mubr.msk.f32.gmra.mrb[58].mxu1 %vm156_vm0, %v8173_v36 }
 0x27b   :  { %4489 = vmatprep.mubr.msk.f32.mxu1 %vm156_vm0, %v8174_v50  ;;  %v8223_v50 = vld [vmem:[#allocation80_spill] sm:$0xff] }
 0x27e   :  { %4490 = vmatmul.mubr.msk.f32.gmra.mrb[60].mxu1 %vm156_vm0, %v8175_v63 }
 0x27f   :  { %4492 = vmatprep.mubr.msk.f32.mxu1 %vm156_vm0, %v8176_v14 }
 0x282   :  { %4493 = vmatmul.mubr.msk.f32.gmra.mrb[62].mxu1 %vm156_vm0, %v8177_v48 }
 0x283   :  { %4495 = vmatprep.mubr.msk.f32.mxu1 %vm156_vm0, %v8178_v35 }
 0x286   :  { %4496 = vmatmul.mubr.msk.f32.gmra.mrb[64].mxu1 %vm156_vm0, %v8179_v38 }
 0x287   :  { %4498 = vmatprep.mubr.msk.f32.mxu1 %vm156_vm0, %v8180_v19 }
 0x28a   :  { %4499 = vmatmul.mubr.msk.f32.gmra.mrb[66].mxu1 %vm156_vm0, %v8181_v60 }
 0x28b   :  { %4501 = vmatprep.mubr.msk.f32.mxu1 %vm156_vm0, %v8182_v26 }
 0x28e   :  { %4502 = vmatmul.mubr.msk.f32.gmra.mrb[68].mxu1 %vm156_vm0, %v8183_v0 }
 0x28f   :  { %4504 = vmatprep.mubr.msk.f32.mxu1 %vm156_vm0, %v8184_v37 }
 0x292   :  { %4505 = vmatmul.mubr.msk.f32.gmra.mrb[70].mxu1 %vm156_vm0, %v8185_v40 }
 0x293   :  { %4507 = vmatprep.mubr.msk.f32.mxu1 %vm156_vm0, %v8186_v8 }
 0x296   :  { %4508 = vmatmul.mubr.msk.f32.gmra.mrb[72].mxu1 %vm156_vm0, %v8187_v23 }
 0x297   :  { %4510 = vmatprep.mubr.msk.f32.mxu1 %vm156_vm0, %v8188_v1 }
 0x29a   :  { %4511 = vmatmul.mubr.msk.f32.gmra.mrb[74].mxu1 %vm156_vm0, %v8189_v27 }
 0x29b   :  { %4513 = vmatprep.mubr.msk.f32.mxu1 %vm156_vm0, %v8190_v39 }
 0x29e   :  { %4514 = vmatmul.mubr.msk.f32.gmra.mrb[76].mxu1 %vm156_vm0, %v8191_v42 }
 0x29f   :  { %4516 = vmatprep.mubr.msk.f32.mxu1 %vm156_vm0, %v8192_v16 }
 0x2a2   :  { %4517 = vmatmul.mubr.msk.f32.gmra.mrb[78].mxu1 %vm156_vm0, %v8193_v11 }
 0x2a3   :  { %4519 = vmatprep.mubr.msk.f32.mxu1 %vm156_vm0, %v8194_v55 }
 0x2a6   :  { %4520 = vmatmul.mubr.msk.f32.gmra.mrb[80].mxu1 %vm156_vm0, %v8195_v62 }
 0x2a7   :  { %4522 = vmatprep.mubr.msk.f32.mxu1 %vm156_vm0, %v8196_v41 }
 0x2aa   :  { %4523 = vmatmul.mubr.msk.f32.gmra.mrb[82].mxu1 %vm156_vm0, %v8197_v44 }
 0x2ab   :  { %4525 = vmatprep.mubr.msk.f32.mxu1 %vm156_vm0, %v8198_v29 }
 0x2ae   :  { %4526 = vmatmul.mubr.msk.f32.gmra.mrb[84].mxu1 %vm156_vm0, %v8199_v56 }
 0x2af   :  { %4528 = vmatprep.mubr.msk.f32.mxu1 %vm156_vm0, %v8200_v21 }
 0x2b2   :  { %4529 = vmatmul.mubr.msk.f32.gmra.mrb[86].mxu1 %vm156_vm0, %v8201_v59 }
 0x2b3   :  { %4531 = vmatprep.mubr.msk.f32.mxu1 %vm156_vm0, %v8202_v43 }
 0x2b6   :  { %4532 = vmatmul.mubr.msk.f32.gmra.mrb[88].mxu1 %vm156_vm0, %v8203_v46 }
 0x2b7   :  { %4534 = vmatprep.mubr.msk.f32.mxu1 %vm156_vm0, %v8204_v31 }
 0x2ba   :  { %4535 = vmatmul.mubr.msk.f32.gmra.mrb[90].mxu1 %vm156_vm0, %v8205_v17 }
 0x2bb   :  { %4537 = vmatprep.mubr.msk.f32.mxu1 %vm156_vm0, %v8206_v18 }
 0x2be   :  { %4538 = vmatmul.mubr.msk.f32.gmra.mrb[92].mxu1 %vm156_vm0, %v8207_v30 }
 0x2bf   :  { %4540 = vmatprep.mubr.msk.f32.mxu1 %vm156_vm0, %v8208_v45 }
 0x2c2   :  { %4541 = vmatmul.mubr.msk.f32.gmra.mrb[94].mxu1 %vm156_vm0, %v8209_v49 }
 0x2c3   :  { %4543 = vmatprep.mubr.msk.f32.mxu1 %vm156_vm0, %v8210_v24 }
 0x2c6   :  { %4544 = vmatmul.mubr.msk.f32.gmra.mrb[96].mxu1 %vm156_vm0, %v8211_v58 }
 0x2c7   :  { %4546 = vmatprep.mubr.msk.f32.mxu1 %vm156_vm0, %v8212_v52 }
 0x2ca   :  { %4547 = vmatmul.mubr.msk.f32.gmra.mrb[98].mxu1 %vm156_vm0, %v8213_v20 }
 0x2cb   :  { %4549 = vmatprep.mubr.msk.f32.mxu1 %vm156_vm0, %v8214_v22 }
 0x2ce   :  { %4550 = vmatmul.mubr.msk.f32.gmra.mrb[100].mxu1 %vm156_vm0, %v8215_v32 }
 0x2cf   :  { %4552 = vmatprep.mubr.msk.f32.mxu1 %vm156_vm0, %v8216_v28 }
 0x2d2   :  { %4553 = vmatmul.mubr.msk.f32.gmra.mrb[102].mxu1 %vm156_vm0, %v8217_v12 }
 0x2d3   :  { %4555 = vmatprep.mubr.msk.f32.mxu1 %vm156_vm0, %v8218_v7 }
 0x2d6   :  { %4556 = vmatmul.mubr.msk.f32.gmra.mrb[104].mxu1 %vm156_vm0, %v8219_v13 }
 0x2d7   :  { %4558 = vmatprep.mubr.msk.f32.mxu1 %vm156_vm0, %v8220_v3 }
 0x2d9   :  { %v4399_v9 = vpop.f32.mrb[0].mxu1 }
 0x2da   :  { %v1826_v53 = vadd.f32 %v4399_v9, %v6458_v4  ;;  %v1820_v6 = vpop.f32.mrb[1].mxu1  ;;  %4559 = vmatmul.mubr.msk.f32.gmra.mrb[106].mxu1 %vm156_vm0, %v8221_v61 }
 0x2db   :  { %v1821_v47 = vadd.f32 %v6458_v4, %v1820_v6  ;;  %4561 = vmatprep.mubr.msk.f32.mxu1 %vm156_vm0, %v8222_v54 }
 0x2dc   :  { %v3454_v57 = vmax.f32 %v1826_v53, 0.0 }
 0x2dd   :  { %v3453_v2 = vmax.f32 %v1821_v47, 0.0  ;;  %v4402_v34 = vpop.f32.mrb[2].mxu1 }
 0x2de   :  { %3486 = vst.msk [vmem:[%s7933_s6 + $0x88] sm:$0xff] %vm1534_vm5, %v3454_v57  ;;  %v1836_v10 = vadd.f32 %v4402_v34, %v6458_v4  ;;  %v1830_v51 = vpop.f32.mrb[3].mxu1  ;;  %4562 = vmatmul.mubr.msk.f32.gmra.mrb[108].mxu1 %vm156_vm0, %v8223_v50 }
 0x2df   :  { %3485 = vst.msk [vmem:[%s7933_s6 + $0x80] sm:$0xff] %vm1534_vm5, %v3453_v2  ;;  %v1831_v15 = vadd.f32 %v6458_v4, %v1830_v51  ;;  %4564 = vmatprep.mubr.msk.f32.mxu1 %vm156_vm0, %v5868_v25 }
 0x2e0   :  { %v3456_v33 = vmax.f32 %v1836_v10, 0.0 }
 0x2e1   :  { %v3455_v36 = vmax.f32 %v1831_v15, 0.0  ;;  %v4405_v63 = vpop.f32.mrb[4].mxu1 }
 0x2e2   :  { %3488 = vst.msk [vmem:[%s7933_s6 + $0x98] sm:$0xff] %vm1534_vm5, %v3456_v33  ;;  %v1846_v14 = vadd.f32 %v4405_v63, %v6458_v4  ;;  %v1840_v48 = vpop.f32.mrb[5].mxu1  ;;  %4565 = vmatmul.mubr.msk.f32.gmra.mrb[110].mxu1 %vm156_vm0, %v5857_v5 }
 0x2e3   :  { %3487 = vst.msk [vmem:[%s7933_s6 + $0x90] sm:$0xff] %vm1534_vm5, %v3455_v36  ;;  %v1841_v35 = vadd.f32 %v6458_v4, %v1840_v48 }
 0x2e4   :  { %v3458_v38 = vmax.f32 %v1846_v14, 0.0 }
 0x2e5   :  { %v3457_v19 = vmax.f32 %v1841_v35, 0.0  ;;  %v4408_v60 = vpop.f32.mrb[6].mxu1 }
 0x2e6   :  { %3490 = vst.msk [vmem:[%s7933_s6 + $0xa8] sm:$0xff] %vm1534_vm5, %v3458_v38  ;;  %v1856_v25 = vadd.f32 %v4408_v60, %v6458_v4  ;;  %v1850_v26 = vpop.f32.mrb[7].mxu1 }
 0x2e7   :  { %3489 = vst.msk [vmem:[%s7933_s6 + $0xa0] sm:$0xff] %vm1534_vm5, %v3457_v19  ;;  %v1851_v0 = vadd.f32 %v6458_v4, %v1850_v26 }
 0x2e8   :  { %v3460_v37 = vmax.f32 %v1856_v25, 0.0 }
 0x2e9   :  { %v3459_v40 = vmax.f32 %v1851_v0, 0.0  ;;  %v4411_v5 = vpop.f32.mrb[8].mxu1 }
 0x2ea   :  { %3492 = vst.msk [vmem:[%s7933_s6 + $0xb8] sm:$0xff] %vm1534_vm5, %v3460_v37  ;;  %v1866_v8 = vadd.f32 %v4411_v5, %v6458_v4  ;;  %v1860_v23 = vpop.f32.mrb[9].mxu1 }
 0x2eb   :  { %3491 = vst.msk [vmem:[%s7933_s6 + $0xb0] sm:$0xff] %vm1534_vm5, %v3459_v40  ;;  %v1861_v1 = vadd.f32 %v6458_v4, %v1860_v23 }
 0x2ec   :  { %v3462_v27 = vmax.f32 %v1866_v8, 0.0 }
 0x2ed   :  { %v3461_v39 = vmax.f32 %v1861_v1, 0.0  ;;  %v4414_v42 = vpop.f32.mrb[10].mxu1 }
 0x2ee   :  { %3494 = vst.msk [vmem:[%s7933_s6 + $0xc8] sm:$0xff] %vm1534_vm5, %v3462_v27  ;;  %v1876_v16 = vadd.f32 %v4414_v42, %v6458_v4  ;;  %v1870_v11 = vpop.f32.mrb[11].mxu1 }
 0x2ef   :  { %3493 = vst.msk [vmem:[%s7933_s6 + $0xc0] sm:$0xff] %vm1534_vm5, %v3461_v39  ;;  %v1871_v55 = vadd.f32 %v6458_v4, %v1870_v11 }
 0x2f0   :  { %v3464_v62 = vmax.f32 %v1876_v16, 0.0 }
 0x2f1   :  { %v3463_v41 = vmax.f32 %v1871_v55, 0.0  ;;  %v4417_v44 = vpop.f32.mrb[12].mxu1 }
 0x2f2   :  { %3496 = vst.msk [vmem:[%s7933_s6 + $0xd8] sm:$0xff] %vm1534_vm5, %v3464_v62  ;;  %v1886_v29 = vadd.f32 %v4417_v44, %v6458_v4  ;;  %v1880_v56 = vpop.f32.mrb[13].mxu1 }
 0x2f3   :  { %3495 = vst.msk [vmem:[%s7933_s6 + $0xd0] sm:$0xff] %vm1534_vm5, %v3463_v41  ;;  %v1881_v21 = vadd.f32 %v6458_v4, %v1880_v56 }
 0x2f4   :  { %v3466_v59 = vmax.f32 %v1886_v29, 0.0 }
 0x2f5   :  { %v3465_v43 = vmax.f32 %v1881_v21, 0.0  ;;  %v4420_v46 = vpop.f32.mrb[14].mxu1 }
 0x2f6   :  { %3498 = vst.msk [vmem:[%s7933_s6 + $0xe8] sm:$0xff] %vm1534_vm5, %v3466_v59  ;;  %v1896_v31 = vadd.f32 %v4420_v46, %v6458_v4  ;;  %v1890_v17 = vpop.f32.mrb[15].mxu1 }
 0x2f7   :  { %3497 = vst.msk [vmem:[%s7933_s6 + $0xe0] sm:$0xff] %vm1534_vm5, %v3465_v43  ;;  %v1891_v18 = vadd.f32 %v6458_v4, %v1890_v17 }
 0x2f8   :  { %v3468_v30 = vmax.f32 %v1896_v31, 0.0 }
 0x2f9   :  { %v3467_v45 = vmax.f32 %v1891_v18, 0.0  ;;  %v4375_v49 = vpop.f32.mrb[96].mxu0  ;;  %v6546_v24 = vpop.f32.mrb[16].mxu1 }
 0x2fa   :  { %3500 = vst.msk [vmem:[%s7933_s6 + $0xf8] sm:$0xff] %vm1534_vm5, %v3468_v30  ;;  %v1746_v58 = vadd.f32 %v4375_v49, %v6458_v4  ;;  %v1740_v52 = vpop.f32.mrb[97].mxu0  ;;  %v6553_v20 = vpop.f32.mrb[17].mxu1 }
 0x2fb   :  { %3499 = vst.msk [vmem:[%s7933_s6 + $0xf0] sm:$0xff] %vm1534_vm5, %v3467_v45  ;;  %v1741_v22 = vadd.f32 %v6458_v4, %v1740_v52 }
 0x2fc   :  { %v3438_v32 = vmax.f32 %v1746_v58, 0.0 }
 0x2fd   :  { %v3437_v28 = vmax.f32 %v1741_v22, 0.0  ;;  %v4378_v12 = vpop.f32.mrb[98].mxu0  ;;  %v6560_v7 = vpop.f32.mrb[18].mxu1 }
 0x2fe   :  { %3470 = vst.msk [vmem:[%s7933_s6 + $0x8] sm:$0xff] %vm1534_vm5, %v3438_v32  ;;  %v1756_v13 = vadd.f32 %v4378_v12, %v6458_v4  ;;  %v1750_v9 = vpop.f32.mrb[99].mxu0  ;;  %v6567_v3 = vpop.f32.mrb[19].mxu1 }
 0x2ff   :  { %3469 = vst.msk [vmem:[%s7933_s6] sm:$0xff] %vm1534_vm5, %v3437_v28  ;;  %v1751_v53 = vadd.f32 %v6458_v4, %v1750_v9 }
 0x300   :  { %v3440_v6 = vmax.f32 %v1756_v13, 0.0 }
 0x301   :  { %v3439_v47 = vmax.f32 %v1751_v53, 0.0  ;;  %v4381_v57 = vpop.f32.mrb[100].mxu0  ;;  %v6574_v2 = vpop.f32.mrb[20].mxu1 }
 0x302   :  { %3472 = vst.msk [vmem:[%s7933_s6 + $0x18] sm:$0xff] %vm1534_vm5, %v3440_v6  ;;  %v1766_v61 = vadd.f32 %v4381_v57, %v6458_v4  ;;  %v1760_v34 = vpop.f32.mrb[101].mxu0  ;;  %v6581_v54 = vpop.f32.mrb[21].mxu1 }
 0x303   :  { %3471 = vst.msk [vmem:[%s7933_s6 + $0x10] sm:$0xff] %vm1534_vm5, %v3439_v47  ;;  %v1761_v10 = vadd.f32 %v6458_v4, %v1760_v34 }
 0x304   :  { %v3442_v51 = vmax.f32 %v1766_v61, 0.0 }
 0x305   :  { %v3441_v15 = vmax.f32 %v1761_v10, 0.0  ;;  %v4384_v33 = vpop.f32.mrb[102].mxu0  ;;  %v6588_v36 = vpop.f32.mrb[22].mxu1 }
 0x306   :  { %3474 = vst.msk [vmem:[%s7933_s6 + $0x28] sm:$0xff] %vm1534_vm5, %v3442_v51  ;;  %v1776_v50 = vadd.f32 %v4384_v33, %v6458_v4  ;;  %v1770_v63 = vpop.f32.mrb[103].mxu0  ;;  %v6595_v14 = vpop.f32.mrb[23].mxu1 }
 0x307   :  { %3473 = vst.msk [vmem:[%s7933_s6 + $0x20] sm:$0xff] %vm1534_vm5, %v3441_v15  ;;  %v1771_v48 = vadd.f32 %v6458_v4, %v1770_v63  ;;  %v2734_v15 = vmul.f32 %v6546_v24, %v6546_v24  ;;  %v2733_v63 = vmul.f32 %v6553_v20, %v6553_v20 }
 0x308   :  { %v3444_v35 = vmax.f32 %v1776_v50, 0.0 }
 0x309   :  { %v3443_v38 = vmax.f32 %v1771_v48, 0.0  ;;  %v4387_v19 = vpop.f32.mrb[104].mxu0  ;;  %v6602_v60 = vpop.f32.mrb[24].mxu1 }
 0x30a   :  { %3476 = vst.msk [vmem:[%s7933_s6 + $0x38] sm:$0xff] %vm1534_vm5, %v3444_v35  ;;  %v1786_v25 = vadd.f32 %v4387_v19, %v6458_v4  ;;  %v1780_v26 = vpop.f32.mrb[105].mxu0  ;;  %v6609_v0 = vpop.f32.mrb[25].mxu1 }
 0x30b   :  { %8224 = vst [vmem:[#allocation3_spill] sm:$0xff] %v6609_v0  ;;  %3475 = vst.msk [vmem:[%s7933_s6 + $0x30] sm:$0xff] %vm1534_vm5, %v3443_v38  ;;  %v1781_v37 = vadd.f32 %v6458_v4, %v1780_v26 }
 0x30c   :  { %v3446_v40 = vmax.f32 %v1786_v25, 0.0  ;;  %v2736_v25 = vmul.f32 %v6560_v7, %v6560_v7 }
 0x30d   :  { %v3445_v5 = vmax.f32 %v1781_v37, 0.0  ;;  %v4390_v8 = vpop.f32.mrb[106].mxu0  ;;  %v6616_v23 = vpop.f32.mrb[26].mxu1 }
 0x30e   :  { %8225 = vst [vmem:[#allocation2_spill] sm:$0xff] %v6616_v23  ;;  %3478 = vst.msk [vmem:[%s7933_s6 + $0x48] sm:$0xff] %vm1534_vm5, %v3446_v40  ;;  %v1796_v1 = vadd.f32 %v4390_v8, %v6458_v4  ;;  %v1790_v27 = vpop.f32.mrb[107].mxu0  ;;  %v6623_v39 = vpop.f32.mrb[27].mxu1  ;;  %v2735_v40 = vmul.f32 %v6567_v3, %v6567_v3 }
 0x30f   :  { %8226 = vst [vmem:[#allocation5_spill] sm:$0xff] %v6623_v39  ;;  %3477 = vst.msk [vmem:[%s7933_s6 + $0x40] sm:$0xff] %vm1534_vm5, %v3445_v5  ;;  %v1791_v42 = vadd.f32 %v6458_v4, %v1790_v27 }
 0x310   :  { %v3448_v16 = vmax.f32 %v1796_v1, 0.0 }
 0x311   :  { %v3447_v11 = vmax.f32 %v1791_v42, 0.0  ;;  %v4393_v55 = vpop.f32.mrb[108].mxu0  ;;  %v6630_v62 = vpop.f32.mrb[28].mxu1  ;;  %v2738_v42 = vmul.f32 %v6574_v2, %v6574_v2 }
 0x312   :  { %8227 = vst [vmem:[#allocation4_spill] sm:$0xff] %v6630_v62  ;;  %3480 = vst.msk [vmem:[%s7933_s6 + $0x58] sm:$0xff] %vm1534_vm5, %v3448_v16  ;;  %v1806_v41 = vadd.f32 %v4393_v55, %v6458_v4  ;;  %v1800_v44 = vpop.f32.mrb[109].mxu0  ;;  %v6637_v29 = vpop.f32.mrb[29].mxu1  ;;  %v2737_v55 = vmul.f32 %v6581_v54, %v6581_v54 }
 0x313   :  { %8228 = vst [vmem:[#allocation7_spill] sm:$0xff] %v6637_v29  ;;  %3479 = vst.msk [vmem:[%s7933_s6 + $0x50] sm:$0xff] %vm1534_vm5, %v3447_v11  ;;  %v1801_v56 = vadd.f32 %v6458_v4, %v1800_v44 }
 0x314   :  { %v3450_v21 = vmax.f32 %v1806_v41, 0.0 }
 0x315   :  { %v3449_v59 = vmax.f32 %v1801_v56, 0.0  ;;  %v4396_v43 = vpop.f32.mrb[110].mxu0  ;;  %v6644_v46 = vpop.f32.mrb[30].mxu1 }
 0x316   :  { %8229 = vst [vmem:[#allocation6_spill] sm:$0xff] %v6644_v46  ;;  %3482 = vst.msk [vmem:[%s7933_s6 + $0x68] sm:$0xff] %vm1534_vm5, %v3450_v21  ;;  %v1816_v31 = vadd.f32 %v4396_v43, %v6458_v4  ;;  %v1810_v17 = vpop.f32.mrb[111].mxu0  ;;  %v6651_v18 = vpop.f32.mrb[31].mxu1 }
 0x317   :  { %8230 = vst [vmem:[#allocation9_spill] sm:$0xff] %v6651_v18  ;;  %3481 = vst.msk [vmem:[%s7933_s6 + $0x60] sm:$0xff] %vm1534_vm5, %v3449_v59  ;;  %v1811_v30 = vadd.f32 %v6458_v4, %v1810_v17  ;;  %v2740_v59 = vmul.f32 %v6588_v36, %v6588_v36  ;;  %v2739_v17 = vmul.f32 %v6595_v14, %v6595_v14 }
 0x318   :  { %v3452_v45 = vmax.f32 %v1816_v31, 0.0 }
 0x319   :  { %v3451_v49 = vmax.f32 %v1811_v30, 0.0  ;;  %v6658_v58 = vpop.f32.mrb[32].mxu1 }
 0x31a   :  { %8231 = vst [vmem:[#allocation8_spill] sm:$0xff] %v6658_v58  ;;  %3484 = vst.msk [vmem:[%s7933_s6 + $0x78] sm:$0xff] %vm1534_vm5, %v3452_v45  ;;  %v6664_v52 = vpop.f32.mrb[33].mxu1 }
 0x31b   :  { %8232 = vst [vmem:[#allocation11_spill] sm:$0xff] %v6664_v52  ;;  %3483 = vst.msk [vmem:[%s7933_s6 + $0x70] sm:$0xff] %vm1534_vm5, %v3451_v49 }
 0x31d   :  { %v6670_v22 = vpop.f32.mrb[34].mxu1 }
 0x31e   :  { %8233 = vst [vmem:[#allocation10_spill] sm:$0xff] %v6670_v22  ;;  %v6672_v32 = vpop.f32.mrb[35].mxu1 }
 0x31f   :  { %8234 = vst [vmem:[#allocation13_spill] sm:$0xff] %v6672_v32 }
 0x321   :  { %v6674_v4 = vpop.f32.mrb[36].mxu1 }
 0x322   :  { %8235 = vst [vmem:[#allocation12_spill] sm:$0xff] %v6674_v4  ;;  %v6676_v28 = vpop.f32.mrb[37].mxu1 }
 0x323   :  { %8236 = vst [vmem:[#allocation15_spill] sm:$0xff] %v6676_v28 }
 0x325   :  { %v6678_v12 = vpop.f32.mrb[38].mxu1 }
 0x326   :  { %8237 = vst [vmem:[#allocation14_spill] sm:$0xff] %v6678_v12  ;;  %v6680_v13 = vpop.f32.mrb[39].mxu1 }
 0x327   :  { %8238 = vst [vmem:[#allocation17_spill] sm:$0xff] %v6680_v13 }
 0x329   :  { %v6682_v9 = vpop.f32.mrb[40].mxu1 }
 0x32a   :  { %8239 = vst [vmem:[#allocation16_spill] sm:$0xff] %v6682_v9  ;;  %v6684_v53 = vpop.f32.mrb[41].mxu1 }
 0x32b   :  { %8240 = vst [vmem:[#allocation19_spill] sm:$0xff] %v6684_v53 }
 0x32d   :  { %v6686_v6 = vpop.f32.mrb[42].mxu1 }
 0x32e   :  { %8241 = vst [vmem:[#allocation18_spill] sm:$0xff] %v6686_v6  ;;  %v6688_v47 = vpop.f32.mrb[43].mxu1 }
 0x32f   :  { %8242 = vst [vmem:[#allocation21_spill] sm:$0xff] %v6688_v47 }
 0x331   :  { %v6690_v57 = vpop.f32.mrb[44].mxu1 }
 0x332   :  { %8243 = vst [vmem:[#allocation20_spill] sm:$0xff] %v6690_v57  ;;  %v6692_v61 = vpop.f32.mrb[45].mxu1 }
 0x333   :  { %8244 = vst [vmem:[#allocation23_spill] sm:$0xff] %v6692_v61 }
 0x335   :  { %v6694_v34 = vpop.f32.mrb[46].mxu1 }
 0x336   :  { %8245 = vst [vmem:[#allocation22_spill] sm:$0xff] %v6694_v34  ;;  %v6696_v10 = vpop.f32.mrb[47].mxu1 }
 0x337   :  { %8246 = vst [vmem:[#allocation25_spill] sm:$0xff] %v6696_v10 }
 0x339   :  { %v6698_v51 = vpop.f32.mrb[48].mxu1 }
 0x33a   :  { %v2766_v33 = vmul.f32 %v6698_v51, %v6698_v51  ;;  %v6704_v50 = vpop.f32.mrb[49].mxu1 }
 0x33b   :  { %v2765_v48 = vmul.f32 %v6704_v50, %v6704_v50 }
 0x33c   :  { %v6710_v35 = vadd.f32 %v2766_v33, %v2734_v15  ;;  %v2742_v33 = vmul.f32 %v6602_v60, %v6602_v60 }
 0x33d   :  { %v6712_v38 = vadd.f32 %v2765_v48, %v2733_v63  ;;  %v6714_v19 = vpop.f32.mrb[50].mxu1 }
 0x33e   :  { %v2768_v26 = vmul.f32 %v6714_v19, %v6714_v19  ;;  %v6720_v37 = vpop.f32.mrb[51].mxu1 }
 0x33f   :  { %v2767_v5 = vmul.f32 %v6720_v37, %v6720_v37 }
 0x340   :  { %v6726_v8 = vadd.f32 %v2768_v26, %v2736_v25  ;;  %v2741_v25 = vmul.f32 %v6609_v0, %v6609_v0 }
 0x341   :  { %v6728_v1 = vadd.f32 %v2767_v5, %v2735_v40  ;;  %v6730_v27 = vpop.f32.mrb[52].mxu1 }
 0x342   :  { %v2770_v16 = vmul.f32 %v6730_v27, %v6730_v27  ;;  %v6736_v11 = vpop.f32.mrb[53].mxu1 }
 0x343   :  { %v2769_v41 = vmul.f32 %v6736_v11, %v6736_v11 }
 0x344   :  { %v6742_v44 = vadd.f32 %v2770_v16, %v2738_v42  ;;  %v2744_v16 = vmul.f32 %v6616_v23, %v6616_v23 }
 0x345   :  { %v6744_v56 = vadd.f32 %v2769_v41, %v2737_v55  ;;  %v6746_v21 = vpop.f32.mrb[54].mxu1 }
 0x346   :  { %v2772_v43 = vmul.f32 %v6746_v21, %v6746_v21  ;;  %v6752_v31 = vpop.f32.mrb[55].mxu1 }
 0x347   :  { %v2771_v30 = vmul.f32 %v6752_v31, %v6752_v31 }
 0x348   :  { %v6758_v45 = vadd.f32 %v2772_v43, %v2740_v59  ;;  %v2743_v59 = vmul.f32 %v6623_v39, %v6623_v39  ;;  %v2745_v39 = vmul.f32 %v6637_v29, %v6637_v29  ;;  %v2747_v29 = vmul.f32 %v6651_v18, %v6651_v18 }
 0x349   :  { %v6760_v49 = vadd.f32 %v2771_v30, %v2739_v17  ;;  %v6762_v15 = vpop.f32.mrb[56].mxu1  ;;  %v2749_v18 = vmul.f32 %v6664_v52, %v6664_v52  ;;  %v2751_v52 = vmul.f32 %v6672_v32, %v6672_v32  ;;  %v2753_v32 = vmul.f32 %v6676_v28, %v6676_v28 }
 0x34a   :  { %v2774_v63 = vmul.f32 %v6762_v15, %v6762_v15  ;;  %v6768_v48 = vpop.f32.mrb[57].mxu1  ;;  %v2755_v28 = vmul.f32 %v6680_v13, %v6680_v13  ;;  %v2757_v13 = vmul.f32 %v6684_v53, %v6684_v53  ;;  %v2759_v53 = vmul.f32 %v6688_v47, %v6688_v47 }
 0x34b   :  { %8247 = vst [vmem:[#allocation24_spill] sm:$0xff] %v6768_v48  ;;  %v2773_v26 = vmul.f32 %v6768_v48, %v6768_v48  ;;  %v2761_v47 = vmul.f32 %v6692_v61, %v6692_v61  ;;  %v2763_v61 = vmul.f32 %v6696_v10, %v6696_v10 }
 0x34c   :  { %v6774_v40 = vadd.f32 %v2774_v63, %v2742_v33  ;;  %v2746_v63 = vmul.f32 %v6630_v62, %v6630_v62 }
 0x34d   :  { %v6776_v5 = vadd.f32 %v2773_v26, %v2741_v25  ;;  %v6778_v42 = vpop.f32.mrb[58].mxu1 }
 0x34e   :  { %8248 = vst [vmem:[#allocation27_spill] sm:$0xff] %v6778_v42  ;;  %v2776_v55 = vmul.f32 %v6778_v42, %v6778_v42  ;;  %v6784_v41 = vpop.f32.mrb[59].mxu1 }
 0x34f   :  { %8249 = vst [vmem:[#allocation26_spill] sm:$0xff] %v6784_v41  ;;  %v2775_v43 = vmul.f32 %v6784_v41, %v6784_v41 }
 0x350   :  { %v6790_v17 = vadd.f32 %v2776_v55, %v2744_v16 }
 0x351   :  { %v6792_v30 = vadd.f32 %v2775_v43, %v2743_v59  ;;  %v6794_v33 = vpop.f32.mrb[60].mxu1  ;;  %v2748_v43 = vmul.f32 %v6644_v46, %v6644_v46 }
 0x352   :  { %8250 = vst [vmem:[#allocation29_spill] sm:$0xff] %v6794_v33  ;;  %v2778_v25 = vmul.f32 %v6794_v33, %v6794_v33  ;;  %v6800_v26 = vpop.f32.mrb[61].mxu1 }
 0x353   :  { %8251 = vst [vmem:[#allocation28_spill] sm:$0xff] %v6800_v26  ;;  %v2777_v41 = vmul.f32 %v6800_v26, %v6800_v26 }
 0x354   :  { %v6806_v16 = vadd.f32 %v2778_v25, %v2746_v63  ;;  %v2750_v25 = vmul.f32 %v6658_v58, %v6658_v58 }
 0x355   :  { %v6808_v55 = vadd.f32 %v2777_v41, %v2745_v39  ;;  %v6810_v59 = vpop.f32.mrb[62].mxu1 }
 0x356   :  { %8252 = vst [vmem:[#allocation31_spill] sm:$0xff] %v6810_v59  ;;  %v2780_v33 = vmul.f32 %v6810_v59, %v6810_v59  ;;  %v6816_v62 = vpop.f32.mrb[63].mxu1 }
 0x357   :  { %8253 = vst [vmem:[#allocation30_spill] sm:$0xff] %v6816_v62  ;;  %v2779_v26 = vmul.f32 %v6816_v62, %v6816_v62 }
 0x358   :  { %v6822_v63 = vadd.f32 %v2780_v33, %v2748_v43  ;;  %v2752_v43 = vmul.f32 %v6670_v22, %v6670_v22 }
 0x359   :  { %v6824_v39 = vadd.f32 %v2779_v26, %v2747_v29  ;;  %v6826_v41 = vpop.f32.mrb[64].mxu1 }
 0x35a   :  { %8254 = vst [vmem:[#allocation33_spill] sm:$0xff] %v6826_v41  ;;  %v2782_v59 = vmul.f32 %v6826_v41, %v6826_v41  ;;  %v6832_v46 = vpop.f32.mrb[65].mxu1 }
 0x35b   :  { %8255 = vst [vmem:[#allocation32_spill] sm:$0xff] %v6832_v46  ;;  %v2781_v62 = vmul.f32 %v6832_v46, %v6832_v46 }
 0x35c   :  { %v6838_v33 = vadd.f32 %v2782_v59, %v2750_v25  ;;  %v2754_v25 = vmul.f32 %v6674_v4, %v6674_v4 }
 0x35d   :  { %v6840_v29 = vadd.f32 %v2781_v62, %v2749_v18  ;;  %v6842_v26 = vpop.f32.mrb[66].mxu1 }
 0x35e   :  { %8256 = vst [vmem:[#allocation35_spill] sm:$0xff] %v6842_v26  ;;  %v2784_v41 = vmul.f32 %v6842_v26, %v6842_v26  ;;  %v6848_v58 = vpop.f32.mrb[67].mxu1 }
 0x35f   :  { %8257 = vst [vmem:[#allocation34_spill] sm:$0xff] %v6848_v58  ;;  %v2783_v46 = vmul.f32 %v6848_v58, %v6848_v58 }
 0x360   :  { %v6854_v59 = vadd.f32 %v2784_v41, %v2752_v43  ;;  %v2756_v43 = vmul.f32 %v6678_v12, %v6678_v12 }
 0x361   :  { %v6856_v62 = vadd.f32 %v2783_v46, %v2751_v52  ;;  %v6858_v18 = vpop.f32.mrb[68].mxu1 }
 0x362   :  { %8259 = vst [vmem:[#allocation36_spill] sm:$0xff] %v6858_v18  ;;  %v2786_v26 = vmul.f32 %v6858_v18, %v6858_v18  ;;  %v6864_v22 = vpop.f32.mrb[69].mxu1 }
 0x363   :  { %8258 = vst [vmem:[#allocation37_spill] sm:$0xff] %v6856_v62  ;;  %8260 = vst [vmem:[#allocation39_spill] sm:$0xff] %v6864_v22  ;;  %v2785_v58 = vmul.f32 %v6864_v22, %v6864_v22 }
 0x364   :  { %v6870_v41 = vadd.f32 %v2786_v26, %v2754_v25  ;;  %v2758_v25 = vmul.f32 %v6682_v9, %v6682_v9 }
 0x365   :  { %v6872_v46 = vadd.f32 %v2785_v58, %v2753_v32  ;;  %v6874_v52 = vpop.f32.mrb[70].mxu1 }
 0x366   :  { %8261 = vst [vmem:[#allocation38_spill] sm:$0xff] %v6870_v41  ;;  %8263 = vst [vmem:[#allocation40_spill] sm:$0xff] %v6874_v52  ;;  %v2788_v18 = vmul.f32 %v6874_v52, %v6874_v52  ;;  %v6880_v4 = vpop.f32.mrb[71].mxu1 }
 0x367   :  { %8262 = vst [vmem:[#allocation41_spill] sm:$0xff] %v6872_v46  ;;  %8264 = vst [vmem:[#allocation43_spill] sm:$0xff] %v6880_v4  ;;  %v2787_v22 = vmul.f32 %v6880_v4, %v6880_v4 }
 0x368   :  { %v6886_v26 = vadd.f32 %v2788_v18, %v2756_v43  ;;  %v2760_v43 = vmul.f32 %v6686_v6, %v6686_v6 }
 0x369   :  { %v6888_v58 = vadd.f32 %v2787_v22, %v2755_v28  ;;  %v6890_v32 = vpop.f32.mrb[72].mxu1 }
 0x36a   :  { %8265 = vst [vmem:[#allocation42_spill] sm:$0xff] %v6886_v26  ;;  %8267 = vst [vmem:[#allocation44_spill] sm:$0xff] %v6890_v32  ;;  %v2790_v52 = vmul.f32 %v6890_v32, %v6890_v32  ;;  %v6896_v12 = vpop.f32.mrb[73].mxu1 }
 0x36b   :  { %8266 = vst [vmem:[#allocation45_spill] sm:$0xff] %v6888_v58  ;;  %8268 = vst [vmem:[#allocation47_spill] sm:$0xff] %v6896_v12  ;;  %v2789_v4 = vmul.f32 %v6896_v12, %v6896_v12 }
 0x36c   :  { %v6902_v18 = vadd.f32 %v2790_v52, %v2758_v25  ;;  %v2762_v25 = vmul.f32 %v6690_v57, %v6690_v57 }
 0x36d   :  { %v6904_v22 = vadd.f32 %v2789_v4, %v2757_v13  ;;  %v6906_v28 = vpop.f32.mrb[74].mxu1 }
 0x36e   :  { %8269 = vst [vmem:[#allocation46_spill] sm:$0xff] %v6902_v18  ;;  %8271 = vst [vmem:[#allocation48_spill] sm:$0xff] %v6906_v28  ;;  %v2792_v32 = vmul.f32 %v6906_v28, %v6906_v28  ;;  %v6912_v9 = vpop.f32.mrb[75].mxu1 }
 0x36f   :  { %8270 = vst [vmem:[#allocation49_spill] sm:$0xff] %v6904_v22  ;;  %8272 = vst [vmem:[#allocation51_spill] sm:$0xff] %v6912_v9  ;;  %v2791_v12 = vmul.f32 %v6912_v9, %v6912_v9 }
 0x370   :  { %v6918_v52 = vadd.f32 %v2792_v32, %v2760_v43  ;;  %v2764_v43 = vmul.f32 %v6694_v34, %v6694_v34 }
 0x371   :  { %v6920_v4 = vadd.f32 %v2791_v12, %v2759_v53  ;;  %v6922_v13 = vpop.f32.mrb[76].mxu1 }
 0x372   :  { %8273 = vst [vmem:[#allocation50_spill] sm:$0xff] %v6918_v52  ;;  %8275 = vst [vmem:[#allocation52_spill] sm:$0xff] %v6922_v13  ;;  %v2794_v28 = vmul.f32 %v6922_v13, %v6922_v13  ;;  %v6928_v6 = vpop.f32.mrb[77].mxu1 }
 0x373   :  { %8274 = vst [vmem:[#allocation53_spill] sm:$0xff] %v6920_v4  ;;  %8276 = vst [vmem:[#allocation55_spill] sm:$0xff] %v6928_v6  ;;  %v2793_v9 = vmul.f32 %v6928_v6, %v6928_v6 }
 0x374   :  { %v6934_v32 = vadd.f32 %v2794_v28, %v2762_v25 }
 0x375   :  { %v6936_v12 = vadd.f32 %v2793_v9, %v2761_v47  ;;  %v6938_v53 = vpop.f32.mrb[78].mxu1 }
 0x376   :  { %8277 = vst [vmem:[#allocation54_spill] sm:$0xff] %v6934_v32  ;;  %8279 = vst [vmem:[#allocation56_spill] sm:$0xff] %v6938_v53  ;;  %v2796_v13 = vmul.f32 %v6938_v53, %v6938_v53  ;;  %v6944_v57 = vpop.f32.mrb[79].mxu1 }
 0x377   :  { %8278 = vst [vmem:[#allocation57_spill] sm:$0xff] %v6936_v12  ;;  %8280 = vst [vmem:[#allocation59_spill] sm:$0xff] %v6944_v57  ;;  %v2795_v6 = vmul.f32 %v6944_v57, %v6944_v57 }
 0x378   :  { %v6950_v28 = vadd.f32 %v2796_v13, %v2764_v43 }
 0x379   :  { %v6952_v9 = vadd.f32 %v2795_v6, %v2763_v61  ;;  %v6954_v47 = vpop.f32.mrb[80].mxu1 }
 0x37a   :  { %8281 = vst [vmem:[#allocation58_spill] sm:$0xff] %v6950_v28  ;;  %v2830_v25 = vmul.f32 %v6954_v47, %v6954_v47  ;;  %v6958_v34 = vpop.f32.mrb[81].mxu1 }
 0x37b   :  { %8282 = vst [vmem:[#allocation61_spill] sm:$0xff] %v6952_v9  ;;  %v2829_v53 = vmul.f32 %v6958_v34, %v6958_v34 }
 0x37c   :  { %v2862_v12 = vadd.f32 %v2830_v25, %v6710_v35 }
 0x37d   :  { %v2861_v10 = vadd.f32 %v2829_v53, %v6712_v38  ;;  %v6964_v32 = vpop.f32.mrb[82].mxu1 }
 0x37e   :  { %v2894_v13 = vmax.f32 %v2862_v12, 1e-08  ;;  %v2832_v6 = vmul.f32 %v6964_v32, %v6964_v32  ;;  %v6968_v61 = vpop.f32.mrb[83].mxu1 }
 0x37f   :  { %v2893_v43 = vmax.f32 %v2861_v10, 1e-08  ;;  %v2831_v57 = vmul.f32 %v6968_v61, %v6968_v61 }
 0x380   :  { %4640 = vrsqrt.f32 %v2894_v13  ;;  %v2864_v35 = vadd.f32 %v2832_v6, %v6726_v8  ;;  %vm2934_vm7 = vcmp.eq.f32.partialorder %v2894_v13, inf  ;;  %vm2936_vm8 = vcmp.eq.f32.partialorder %v2894_v13, 0.0 }
 0x381   :  { %4642 = vrsqrt.f32 %v2893_v43  ;;  %v6972_v9 = vpop.f32.mrb[84].mxu1  ;;  %v2863_v38 = vadd.f32 %v2831_v57, %v6728_v1  ;;  %vm2927_vm9 = vcmp.eq.f32.partialorder %v2893_v43, inf  ;;  %vm2929_vm10 = vcmp.eq.f32.partialorder %v2893_v43, 0.0 }
 0x382   :  { %v2834_v12 = vmul.f32 %v6972_v9, %v6972_v9  ;;  %v6978_v53 = vpop.f32.mrb[85].mxu1  ;;  %v6982_v10 = vmax.f32 %v2864_v35, 1e-08 }
 0x383   :  { %v2833_v25 = vmul.f32 %v6978_v53, %v6978_v53  ;;  %v6984_v28 = vmax.f32 %v2863_v38, 1e-08  ;;  %v2937_v38 = vand.u32 2147483648, %v2894_v13 }
 0x384   :  { %v2866_v4 = vadd.f32 %v2834_v12, %v6742_v44  ;;  %4644 = vrsqrt.f32 %v6982_v10  ;;  %vm2948_vm11 = vcmp.eq.f32.partialorder %v6982_v10, inf  ;;  %vm2950_vm12 = vcmp.eq.f32.partialorder %v6982_v10, 0.0 }
 0x385   :  { %v2865_v52 = vadd.f32 %v2833_v25, %v6744_v56  ;;  %v6988_v22 = vpop.f32.mrb[86].mxu1  ;;  %4646 = vrsqrt.f32 %v6984_v28  ;;  %v2930_v25 = vand.u32 2147483648, %v2893_v43  ;;  %v2951_v26 = vand.u32 2147483648, %v6982_v10 }
 0x386   :  { %v6991_v57 = vpop.f32.mrb[87].mxu1  ;;  %v6994_v8 = vmax.f32 %v2866_v4, 1e-08  ;;  %v2836_v6 = vmul.f32 %v6988_v22, %v6988_v22  ;;  %vm2941_vm13 = vcmp.eq.f32.partialorder %v6984_v28, inf  ;;  %vm2943_vm14 = vcmp.eq.f32.partialorder %v6984_v28, 0.0 }
 0x387   :  { %v6996_v1 = vmax.f32 %v2865_v52, 1e-08  ;;  %v2835_v44 = vmul.f32 %v6991_v57, %v6991_v57 }
 0x388   :  { %4648 = vrsqrt.f32 %v6994_v8  ;;  %v2868_v58 = vadd.f32 %v2836_v6, %v6758_v45  ;;  %vm2962_vm15 = vcmp.eq.f32.partialorder %v6994_v8, inf  ;;  %vm2964_vm1 = vcmp.eq.f32.partialorder %v6994_v8, 0.0 }
 0x389   :  { %v7002_v56 = vpop.f32.mrb[88].mxu1  ;;  %4650 = vrsqrt.f32 %v6996_v1  ;;  %v2867_v42 = vadd.f32 %v2835_v44, %v6760_v49  ;;  %vm2955_vm2 = vcmp.eq.f32.partialorder %v6996_v1, inf  ;;  %vm2957_vm3 = vcmp.eq.f32.partialorder %v6996_v1, 0.0 }
 0x38a   :  { %8283 = vst [vmem:[#allocation60_spill] sm:$0xff] %v7002_v56  ;;  %v4641_v35 = vpop.eup %4640  ;;  %v7005_v4 = vpop.f32.mrb[89].mxu1  ;;  %v2838_v46 = vmul.f32 %v7002_v56, %v7002_v56  ;;  %v7022_v48 = vmax.f32 %v2868_v58, 1e-08  ;;  %v2944_v58 = vand.u32 2147483648, %v6984_v28 }
 0x38b   :  { %8284 = vst [vmem:[#allocation63_spill] sm:$0xff] %v7005_v4  ;;  %v4643_v52 = vpop.eup %4642  ;;  %v2933_v12 = vmul.f32 %v4641_v35, %v2894_v13  ;;  %v2837_v35 = vmul.f32 %v7005_v4, %v7005_v4  ;;  %v7024_v45 = vmax.f32 %v2867_v42, 1e-08 }
 0x38c   :  { %v2926_v18 = vmul.f32 %v4643_v52, %v2893_v43  ;;  %4652 = vrsqrt.f32 %v7022_v48  ;;  %vm2976_vm4 = vcmp.eq.f32.partialorder %v7022_v48, inf  ;;  %vm2978_vm5 = vcmp.eq.f32.partialorder %v7022_v48, 0.0 }
 0x38d   :  { %v2935_v23 = vsel %vm2934_vm7, %v2894_v13, %v2933_v12  ;;  %v7018_v41 = vpop.f32.mrb[90].mxu1  ;;  %v2870_v12 = vadd.f32 %v2838_v46, %v6774_v40  ;;  %v2869_v0 = vadd.f32 %v2837_v35, %v6776_v5  ;;  %v2965_v5 = vand.u32 2147483648, %v6994_v8 }
 0x38e   :  { %v2938_v52 = vsel %vm2936_vm8, %v2937_v38, %v2935_v23  ;;  %v2928_v62 = vsel %vm2927_vm9, %v2893_v43, %v2926_v18  ;;  %v7026_v49 = vpop.f32.mrb[91].mxu1  ;;  %v4645_v4 = vpop.eup %4644  ;;  %vm2969_vm6 = vcmp.eq.f32.partialorder %v7024_v45, inf  ;;  %vm2971_vm7 = vcmp.eq.f32.partialorder %v7024_v45, 0.0 }
 0x38f   :  { %v3897_v6 = vmul.f32 -1.442695, %v2938_v52  ;;  %v2931_v44 = vsel %vm2929_vm10, %v2930_v25, %v2928_v62  ;;  %v4647_v23 = vpop.eup %4646  ;;  %v2947_v42 = vmul.f32 %v4645_v4, %v6982_v10  ;;  %v7049_v13 = vmax.f32 %v2870_v12, 1e-08 }
 0x390   :  { %v3896_v56 = vmul.f32 -1.442695, %v2931_v44  ;;  %v2940_v40 = vmul.f32 %v4647_v23, %v6984_v28  ;;  %v7057_v4 = vmax.f32 %v2869_v0, 1e-08  ;;  %v2840_v12 = vmul.f32 %v7018_v41, %v7018_v41 }
 0x391   :  { %4654 = vpow2.f32 %v3897_v6  ;;  %v7037_v62 = vpop.f32.mrb[92].mxu1  ;;  %v2949_v18 = vsel %vm2948_vm11, %v6982_v10, %v2947_v42  ;;  %v2839_v0 = vmul.f32 %v7026_v49, %v7026_v49  ;;  %v2958_v42 = vand.u32 2147483648, %v6996_v1 }
 0x392   :  { %4656 = vpow2.f32 %v3896_v56  ;;  %v7042_v46 = vpop.f32.mrb[93].mxu1  ;;  %v4649_v43 = vpop.eup %4648  ;;  %v2952_v56 = vsel %vm2950_vm12, %v2951_v26, %v2949_v18  ;;  %v2942_v38 = vsel %vm2941_vm13, %v6984_v28, %v2940_v40  ;;  %vm2990_vm8 = vcmp.eq.f32.partialorder %v7049_v13, inf }
 0x393   :  { %4658 = vrsqrt.f32 %v7024_v45  ;;  %v4651_v25 = vpop.eup %4650  ;;  %v3899_v35 = vmul.f32 -1.442695, %v2952_v56  ;;  %v2945_v52 = vsel %vm2943_vm14, %v2944_v58, %v2942_v38  ;;  %v2961_v6 = vmul.f32 %v4649_v43, %v6994_v8 }
 0x394   :  { %4660 = vrsqrt.f32 %v7049_v13  ;;  %v3898_v26 = vmul.f32 -1.442695, %v2945_v52  ;;  %v2954_v10 = vmul.f32 %v4651_v25, %v6996_v1  ;;  %v2979_v56 = vand.u32 2147483648, %v7022_v48 }
 0x395   :  { %v7063_v44 = vpop.f32.mrb[94].mxu1  ;;  %4662 = vpow2.f32 %v3899_v35  ;;  %v2963_v28 = vsel %vm2962_vm15, %v6994_v8, %v2961_v6  ;;  %v2872_v8 = vadd.f32 %v2840_v12, %v6790_v17  ;;  %v2842_v52 = vmul.f32 %v7037_v62, %v7037_v62 }
 0x396   :  { %8285 = vst [vmem:[#allocation62_spill] sm:$0xff] %v7063_v44  ;;  %v7070_v23 = vpop.f32.mrb[95].mxu1  ;;  %4664 = vpow2.f32 %v3898_v26  ;;  %v2966_v58 = vsel %vm2964_vm1, %v2965_v5, %v2963_v28  ;;  %v2956_v40 = vsel %vm2955_vm2, %v6996_v1, %v2954_v10  ;;  %v4653_v25 = vpop.eup %4652  ;;  %v2871_v5 = vadd.f32 %v2839_v0, %v6792_v30 }
 0x397   :  { %v3901_v18 = vmul.f32 -1.442695, %v2966_v58  ;;  %v2959_v43 = vsel %vm2957_vm3, %v2958_v42, %v2956_v40  ;;  %4666 = vrsqrt.f32 %v7057_v4  ;;  %v2975_v1 = vmul.f32 %v4653_v25, %v7022_v48 }
 0x398   :  { %v3900_v35 = vmul.f32 -1.442695, %v2959_v43  ;;  %v2841_v10 = vmul.f32 %v7042_v46, %v7042_v46  ;;  %v7100_v17 = vmax.f32 %v2872_v8, 1e-08  ;;  %v2874_v58 = vadd.f32 %v2842_v52, %v6806_v16 }
 0x399   :  { %v7087_v38 = vpop.f32.mrb[96].mxu1  ;;  %4668 = vpow2.f32 %v3901_v18  ;;  %v2977_v0 = vsel %vm2976_vm4, %v7022_v48, %v2975_v1  ;;  %v2972_v1 = vand.u32 2147483648, %v7024_v45  ;;  %vm2992_vm9 = vcmp.eq.f32.partialorder %v7049_v13, 0.0 }
 0x39a   :  { %v7093_v6 = vpop.f32.mrb[97].mxu1  ;;  %4670 = vpow2.f32 %v3900_v35  ;;  %v2873_v40 = vadd.f32 %v2841_v10, %v6808_v55  ;;  %v2980_v43 = vsel %vm2978_vm5, %v2979_v56, %v2977_v0  ;;  %v7112_v35 = vmax.f32 %v2871_v5, 1e-08 }
 0x39b   :  { %v4655_v26 = vpop.eup %4654  ;;  %v2844_v55 = vmul.f32 %v7063_v44, %v7063_v44  ;;  %v2993_v52 = vand.u32 2147483648, %v7049_v13  ;;  %vm2983_vm10 = vcmp.eq.f32.partialorder %v7057_v4, inf  ;;  %vm2985_vm11 = vcmp.eq.f32.partialorder %v7057_v4, 0.0 }
 0x39c   :  { %v4657_v28 = vpop.eup %4656  ;;  %v3246_v42 = vadd.f32 1.0, %v4655_v26  ;;  %vm3004_vm12 = vcmp.eq.f32.partialorder %v7100_v17, inf  ;;  %vm3006_vm13 = vcmp.eq.f32.partialorder %v7100_v17, 0.0  ;;  %vm2997_vm14 = vcmp.eq.f32.partialorder %v7112_v35, inf }
 0x39d   :  { %v4659_v30 = vpop.eup %4658  ;;  %v3245_v12 = vadd.f32 1.0, %v4657_v28  ;;  %v7107_v18 = vpop.f32.mrb[98].mxu1  ;;  %v3903_v28 = vmul.f32 -1.442695, %v2980_v43  ;;  %vm2999_vm15 = vcmp.eq.f32.partialorder %v7112_v35, 0.0 }
 0x39e   :  { %4672 = vrcp.f32 %v3246_v42  ;;  %v2968_v25 = vmul.f32 %v4659_v30, %v7024_v45  ;;  %v7114_v8 = vpop.f32.mrb[99].mxu1  ;;  %v4661_v26 = vpop.eup %4660 }
 0x39f   :  { %4674 = vrcp.f32 %v3245_v12  ;;  %v2989_v48 = vmul.f32 %v4661_v26, %v7049_v13  ;;  %v4663_v56 = vpop.eup %4662 }
 0x3a0   :  { %v2970_v16 = vsel %vm2969_vm6, %v7024_v45, %v2968_v25  ;;  %4676 = vrsqrt.f32 %v7100_v17  ;;  %v4665_v42 = vpop.eup %4664  ;;  %v3248_v30 = vadd.f32 1.0, %v4663_v56 }
 0x3a1   :  { %4678 = vpow2.f32 %v3903_v28  ;;  %v2973_v5 = vsel %vm2971_vm7, %v2972_v1, %v2970_v16  ;;  %v7129_v10 = vpop.f32.mrb[100].mxu1  ;;  %v2991_v0 = vsel %vm2990_vm8, %v7049_v13, %v2989_v48  ;;  %v4667_v25 = vpop.eup %4666  ;;  %v3247_v26 = vadd.f32 1.0, %v4665_v42 }
 0x3a2   :  { %v3902_v12 = vmul.f32 -1.442695, %v2973_v5  ;;  %4680 = vrsqrt.f32 %v7112_v35  ;;  %v7133_v43 = vpop.f32.mrb[101].mxu1  ;;  %v2994_v28 = vsel %vm2992_vm9, %v2993_v52, %v2991_v0  ;;  %v2982_v1 = vmul.f32 %v4667_v25, %v7057_v4 }
 0x3a3   :  { %4682 = vrcp.f32 %v3248_v30  ;;  %v3905_v45 = vmul.f32 -1.442695, %v2994_v28  ;;  %v2876_v16 = vadd.f32 %v2844_v55, %v6822_v63  ;;  %v4669_v56 = vpop.eup %4668  ;;  %v2986_v13 = vand.u32 2147483648, %v7057_v4 }
 0x3a4   :  { %4684 = vrcp.f32 %v3247_v26  ;;  %v4671_v5 = vpop.eup %4670  ;;  %v3250_v52 = vadd.f32 1.0, %v4669_v56  ;;  %v2984_v42 = vsel %vm2983_vm10, %v7057_v4, %v2982_v1  ;;  %v3007_v30 = vand.u32 2147483648, %v7100_v17 }
 0x3a5   :  { %v7142_v48 = vpop.f32.mrb[102].mxu1  ;;  %4686 = vpow2.f32 %v3902_v12  ;;  %v3249_v63 = vadd.f32 1.0, %v4671_v5  ;;  %v2987_v55 = vsel %vm2985_vm11, %v2986_v13, %v2984_v42  ;;  %v7151_v25 = vmax.f32 %v2874_v58, 1e-08 }
 0x3a6   :  { %v7146_v0 = vpop.f32.mrb[103].mxu1  ;;  %4688 = vpow2.f32 %v3905_v45  ;;  %v3904_v28 = vmul.f32 -1.442695, %v2987_v55  ;;  %v7153_v56 = vmax.f32 %v2873_v40, 1e-08  ;;  %v2846_v55 = vmul.f32 %v7087_v38, %v7087_v38 }
 0x3a7   :  { %4690 = vrcp.f32 %v3250_v52  ;;  %v7155_v12 = vmax.f32 %v2876_v16, 1e-08  ;;  %vm3018_vm1 = vcmp.eq.f32.partialorder %v7151_v25, inf  ;;  %vm3020_vm2 = vcmp.eq.f32.partialorder %v7151_v25, 0.0 }
 0x3a8   :  { %v4673_v26 = vpop.eup %4672  ;;  %4692 = vrcp.f32 %v3249_v63  ;;  %vm3011_vm3 = vcmp.eq.f32.partialorder %v7153_v56, inf  ;;  %vm3013_vm4 = vcmp.eq.f32.partialorder %v7153_v56, 0.0 }
 0x3a9   :  { %v4675_v1 = vpop.eup %4674  ;;  %v3342_v44 = vmul.f32 %v4673_v26, %v6546_v24  ;;  %v3374_v5 = vmul.f32 %v4673_v26, %v6698_v51  ;;  %v3406_v45 = vmul.f32 %v4673_v26, %v6954_v47  ;;  %v7160_v4 = vpop.f32.mrb[104].mxu1  ;;  %4694 = vpow2.f32 %v3904_v28 }
 0x3aa   :  { %v4677_v13 = vpop.eup %4676  ;;  %v3341_v58 = vmul.f32 %v4675_v1, %v6553_v20  ;;  %v3373_v52 = vmul.f32 %v4675_v1, %v6704_v50  ;;  %v3405_v40 = vmul.f32 %v4675_v1, %v6958_v34  ;;  %v7165_v16 = vpop.f32.mrb[105].mxu1  ;;  %v3000_v20 = vand.u32 2147483648, %v7112_v35 }
 0x3ab   :  { %v4679_v42 = vpop.eup %4678  ;;  %3502 = vst.msk [vmem:[%s7934_s7 + $0x8] sm:$0xff] %vm156_vm0, %v3342_v44  ;;  %3929 = vst.msk [vmem:[%s7934_s7 + $0x108] sm:$0xff] %vm156_vm0, %v3374_v5  ;;  %v3003_v24 = vmul.f32 %v4677_v13, %v7100_v17  ;;  %4696 = vrsqrt.f32 %v7151_v25  ;;  %v3021_v50 = vand.u32 2147483648, %v7151_v25  ;;  %v2843_v47 = vmul.f32 %v7070_v23, %v7070_v23 }
 0x3ac   :  { %3961 = vst.msk [vmem:[%s7934_s7 + $0x208] sm:$0xff] %vm156_vm0, %v3406_v45  ;;  %v4681_v34 = vpop.eup %4680  ;;  %3501 = vst.msk [vmem:[%s7934_s7] sm:$0xff] %vm156_vm0, %v3341_v58  ;;  %v3252_v51 = vadd.f32 1.0, %v4679_v42  ;;  %4698 = vrsqrt.f32 %v7153_v56  ;;  %v2845_v45 = vmul.f32 %v7093_v6, %v7093_v6  ;;  %vm3032_vm5 = vcmp.eq.f32.partialorder %v7155_v12, inf }
 0x3ad   :  { %3928 = vst.msk [vmem:[%s7934_s7 + $0x100] sm:$0xff] %vm156_vm0, %v3373_v52  ;;  %3960 = vst.msk [vmem:[%s7934_s7 + $0x200] sm:$0xff] %vm156_vm0, %v3405_v40  ;;  %v3005_v44 = vsel %vm3004_vm12, %v7100_v17, %v3003_v24  ;;  %v2996_v63 = vmul.f32 %v4681_v34, %v7112_v35  ;;  %4700 = vrsqrt.f32 %v7155_v12  ;;  %v7206_v26 = vpop.f32.mrb[106].mxu1  ;;  %v4683_v28 = vpop.eup %4682  ;;  %v2875_v5 = vadd.f32 %v2843_v47, %v6824_v39 }
 0x3ae   :  { %4702 = vrcp.f32 %v3252_v51  ;;  %v3008_v1 = vsel %vm3006_vm13, %v3007_v30, %v3005_v44  ;;  %v7213_v13 = vpop.f32.mrb[107].mxu1  ;;  %v4685_v58 = vpop.eup %4684  ;;  %v3344_v52 = vmul.f32 %v4683_v28, %v6560_v7  ;;  %v3376_v40 = vmul.f32 %v4683_v28, %v6714_v19 }
 0x3af   :  { %v3408_v42 = vmul.f32 %v4683_v28, %v6964_v32  ;;  %v3907_v24 = vmul.f32 -1.442695, %v3008_v1  ;;  %v4687_v34 = vpop.eup %4686  ;;  %v3343_v17 = vmul.f32 %v4685_v58, %v6567_v3  ;;  %v3375_v39 = vmul.f32 %v4685_v58, %v6720_v37 }
 0x3b0   :  { %v3407_v30 = vmul.f32 %v4685_v58, %v6968_v61  ;;  %v2998_v51 = vsel %vm2997_vm14, %v7112_v35, %v2996_v63  ;;  %v4689_v7 = vpop.eup %4688  ;;  %3504 = vst.msk [vmem:[%s7934_s7 + $0x18] sm:$0xff] %vm156_vm0, %v3344_v52  ;;  %3931 = vst.msk [vmem:[%s7934_s7 + $0x118] sm:$0xff] %vm156_vm0, %v3376_v40  ;;  %v3251_v3 = vadd.f32 1.0, %v4687_v34  ;;  %v7241_v37 = vmax.f32 %v2875_v5, 1e-08 }
 0x3b1   :  { %3963 = vst.msk [vmem:[%s7934_s7 + $0x218] sm:$0xff] %vm156_vm0, %v3408_v42  ;;  %4704 = vpow2.f32 %v3907_v24  ;;  %v3001_v19 = vsel %vm2999_vm15, %v3000_v20, %v2998_v51  ;;  %v7243_v32 = vpop.f32.mrb[108].mxu1  ;;  %v4691_v61 = vpop.eup %4690  ;;  %3503 = vst.msk [vmem:[%s7934_s7 + $0x10] sm:$0xff] %vm156_vm0, %v3343_v17  ;;  %v3254_v35 = vadd.f32 1.0, %v4689_v7  ;;  %v2878_v47 = vadd.f32 %v2846_v55, %v6838_v33 }
 0x3b2   :  { %3930 = vst.msk [vmem:[%s7934_s7 + $0x110] sm:$0xff] %vm156_vm0, %v3375_v39  ;;  %3962 = vst.msk [vmem:[%s7934_s7 + $0x210] sm:$0xff] %vm156_vm0, %v3407_v30  ;;  %v3906_v20 = vmul.f32 -1.442695, %v3001_v19  ;;  %v2877_v44 = vadd.f32 %v2845_v45, %v6840_v29  ;;  %v7259_v63 = vpop.f32.mrb[109].mxu1  ;;  %v4693_v28 = vpop.eup %4692  ;;  %v3346_v1 = vmul.f32 %v4691_v61, %v6574_v2  ;;  %v3378_v5 = vmul.f32 %v4691_v61, %v6730_v27 }
 0x3b3   :  { %v3410_v58 = vmul.f32 %v4691_v61, %v6972_v9  ;;  %4706 = vrcp.f32 %v3251_v3  ;;  %v4695_v52 = vpop.eup %4694  ;;  %v3345_v40 = vmul.f32 %v4693_v28, %v6581_v54  ;;  %v3377_v42 = vmul.f32 %v4693_v28, %v6736_v11 }
 0x3b4   :  { %v3409_v24 = vmul.f32 %v4693_v28, %v6978_v53  ;;  %4708 = vrcp.f32 %v3254_v35  ;;  %3506 = vst.msk [vmem:[%s7934_s7 + $0x28] sm:$0xff] %vm156_vm0, %v3346_v1  ;;  %3933 = vst.msk [vmem:[%s7934_s7 + $0x128] sm:$0xff] %vm156_vm0, %v3378_v5  ;;  %v3253_v2 = vadd.f32 1.0, %v4695_v52  ;;  %v3014_v54 = vand.u32 2147483648, %v7153_v56 }
 0x3b5   :  { %v4697_v33 = vpop.eup %4696  ;;  %3965 = vst.msk [vmem:[%s7934_s7 + $0x228] sm:$0xff] %vm156_vm0, %v3410_v58  ;;  %4710 = vpow2.f32 %v3906_v20  ;;  %v7281_v27 = vpop.f32.mrb[110].mxu1  ;;  %3505 = vst.msk [vmem:[%s7934_s7 + $0x20] sm:$0xff] %vm156_vm0, %v3345_v40  ;;  %v7298_v9 = vmax.f32 %v2878_v47, 1e-08  ;;  %v3035_v34 = vand.u32 2147483648, %v7155_v12  ;;  %v2848_v7 = vmul.f32 %v7107_v18, %v7107_v18 }
 0x3b6   :  { %v4699_v11 = vpop.eup %4698  ;;  %3932 = vst.msk [vmem:[%s7934_s7 + $0x120] sm:$0xff] %vm156_vm0, %v3377_v42  ;;  %3964 = vst.msk [vmem:[%s7934_s7 + $0x220] sm:$0xff] %vm156_vm0, %v3409_v24  ;;  %v3017_v29 = vmul.f32 %v4697_v33, %v7151_v25  ;;  %4712 = vrsqrt.f32 %v7241_v37  ;;  %v7300_v53 = vpop.f32.mrb[111].mxu1  ;;  %v7304_v17 = vmax.f32 %v2877_v44, 1e-08  ;;  %vm3034_vm6 = vcmp.eq.f32.partialorder %v7155_v12, 0.0 }
 0x3b7   :  { %v4701_v55 = vpop.eup %4700  ;;  %4714 = vrcp.f32 %v3253_v2  ;;  %v3010_v45 = vmul.f32 %v4699_v11, %v7153_v56  ;;  %vm3025_vm7 = vcmp.eq.f32.partialorder %v7241_v37, inf  ;;  %vm3027_vm8 = vcmp.eq.f32.partialorder %v7241_v37, 0.0  ;;  %v8286_v2 = vld [vmem:[#allocation60_spill] sm:$0xff] }
 0x3b8   :  { %v4703_v39 = vpop.eup %4702  ;;  %v3019_v30 = vsel %vm3018_vm1, %v7151_v25, %v3017_v29  ;;  %v3031_v51 = vmul.f32 %v4701_v55, %v7155_v12  ;;  %4716 = vrsqrt.f32 %v7298_v9  ;;  %v3028_v1 = vand.u32 2147483648, %v7241_v37 }
 0x3b9   :  { %v3348_v3 = vmul.f32 %v4703_v39, %v6588_v36  ;;  %v3380_v19 = vmul.f32 %v4703_v39, %v6746_v21  ;;  %v3412_v61 = vmul.f32 %v4703_v39, %v6988_v22  ;;  %v3022_v35 = vsel %vm3020_vm2, %v3021_v50, %v3019_v30  ;;  %v8288_v30 = vld [vmem:[#allocation24_spill] sm:$0xff] }
 0x3ba   :  { %v3909_v20 = vmul.f32 -1.442695, %v3022_v35  ;;  %v3012_v47 = vsel %vm3011_vm3, %v7153_v56, %v3010_v45  ;;  %v3033_v44 = vsel %vm3032_vm5, %v7155_v12, %v3031_v51  ;;  %4718 = vrsqrt.f32 %v7304_v17 }
 0x3bb   :  { %v4705_v36 = vpop.eup %4704  ;;  %3508 = vst.msk [vmem:[%s7934_s7 + $0x38] sm:$0xff] %vm156_vm0, %v3348_v3  ;;  %3935 = vst.msk [vmem:[%s7934_s7 + $0x138] sm:$0xff] %vm156_vm0, %v3380_v19  ;;  %v3015_v21 = vsel %vm3013_vm4, %v3014_v54, %v3012_v47  ;;  %v3036_v22 = vsel %vm3034_vm6, %v3035_v34, %v3033_v44  ;;  %vm3046_vm9 = vcmp.eq.f32.partialorder %v7298_v9, inf  ;;  %v2880_v5 = vadd.f32 %v2848_v7, %v6854_v59  ;;  %v8287_v34 = vld [vmem:[#allocation3_spill] sm:$0xff]  ;;  %v8290_v47 = vld [vmem:[#allocation37_spill] sm:$0xff] }
 0x3bc   :  { %3967 = vst.msk [vmem:[%s7934_s7 + $0x238] sm:$0xff] %vm156_vm0, %v3412_v61  ;;  %v3256_v25 = vadd.f32 1.0, %v4705_v36  ;;  %4720 = vpow2.f32 %v3909_v20  ;;  %v3908_v12 = vmul.f32 -1.442695, %v3015_v21  ;;  %v3911_v50 = vmul.f32 -1.442695, %v3036_v22 }
 0x3bd   :  { %v4707_v28 = vpop.eup %4706  ;;  %v2849_v29 = vmul.f32 %v7133_v43, %v7133_v43  ;;  %v2852_v55 = vmul.f32 %v7142_v48, %v7142_v48  ;;  %v8289_v7 = vld [vmem:[#allocation63_spill] sm:$0xff]  ;;  %vm3048_vm10 = vcmp.eq.f32.partialorder %v7298_v9, 0.0  ;;  %v3049_v20 = vand.u32 2147483648, %v7298_v9 }
 0x3be   :  { %v4709_v56 = vpop.eup %4708  ;;  %v3347_v58 = vmul.f32 %v4707_v28, %v6595_v14  ;;  %v3379_v52 = vmul.f32 %v4707_v28, %v6752_v31  ;;  %v3411_v40 = vmul.f32 %v4707_v28, %v6991_v57  ;;  %4722 = vrcp.f32 %v3256_v25  ;;  %v8291_v25 = vld [vmem:[#allocation38_spill] sm:$0xff] }
 0x3bf   :  { %v4711_v42 = vpop.eup %4710  ;;  %v3350_v24 = vmul.f32 %v4709_v56, %v6602_v60  ;;  %v3382_v33 = vmul.f32 %v4709_v56, %v6762_v15  ;;  %v3414_v54 = vmul.f32 %v4709_v56, %v8286_v2  ;;  %4724 = vpow2.f32 %v3908_v12 }
 0x3c0   :  { %v4713_v11 = vpop.eup %4712  ;;  %3507 = vst.msk [vmem:[%s7934_s7 + $0x30] sm:$0xff] %vm156_vm0, %v3347_v58  ;;  %3934 = vst.msk [vmem:[%s7934_s7 + $0x130] sm:$0xff] %vm156_vm0, %v3379_v52  ;;  %v3255_v14 = vadd.f32 1.0, %v4711_v42  ;;  %4726 = vpow2.f32 %v3911_v50  ;;  %v7365_v60 = vmax.f32 %v2880_v5, 1e-08  ;;  %v2847_v31 = vmul.f32 %v7114_v8, %v7114_v8  ;;  %v8292_v50 = vld [vmem:[#allocation41_spill] sm:$0xff] }
 0x3c1   :  { %3966 = vst.msk [vmem:[%s7934_s7 + $0x230] sm:$0xff] %vm156_vm0, %v3411_v40  ;;  %v4715_v15 = vpop.eup %4714  ;;  %3510 = vst.msk [vmem:[%s7934_s7 + $0x48] sm:$0xff] %vm156_vm0, %v3350_v24  ;;  %v3024_v59 = vmul.f32 %v4713_v11, %v7241_v37  ;;  %v2850_v57 = vmul.f32 %v7129_v10, %v7129_v10  ;;  %vm3039_vm11 = vcmp.eq.f32.partialorder %v7304_v17, inf  ;;  %v2881_v28 = vadd.f32 %v2849_v29, %v8292_v50  ;;  %v8293_v58 = vld [vmem:[#allocation42_spill] sm:$0xff] }
 0x3c2   :  { %3937 = vst.msk [vmem:[%s7934_s7 + $0x148] sm:$0xff] %vm156_vm0, %v3382_v33  ;;  %3969 = vst.msk [vmem:[%s7934_s7 + $0x248] sm:$0xff] %vm156_vm0, %v3414_v54  ;;  %v4717_v45 = vpop.eup %4716  ;;  %v3349_v39 = vmul.f32 %v4715_v15, %v8287_v34  ;;  %v3381_v51 = vmul.f32 %v4715_v15, %v8288_v30  ;;  %v3413_v3 = vmul.f32 %v4715_v15, %v8289_v7  ;;  %4728 = vrcp.f32 %v3255_v14  ;;  %v8294_v11 = vld [vmem:[#allocation2_spill] sm:$0xff] }
 0x3c3   :  { %v3026_v19 = vsel %vm3025_vm7, %v7241_v37, %v3024_v59  ;;  %v3045_v61 = vmul.f32 %v4717_v45, %v7298_v9  ;;  %4730 = vrsqrt.f32 %v7365_v60  ;;  %v2879_v44 = vadd.f32 %v2847_v31, %v8290_v47  ;;  %v8295_v31 = vld [vmem:[#allocation27_spill] sm:$0xff] }
 0x3c4   :  { %3509 = vst.msk [vmem:[%s7934_s7 + $0x40] sm:$0xff] %vm156_vm0, %v3349_v39  ;;  %3936 = vst.msk [vmem:[%s7934_s7 + $0x140] sm:$0xff] %vm156_vm0, %v3381_v51  ;;  %v3029_v35 = vsel %vm3027_vm8, %v3028_v1, %v3026_v19  ;;  %v4719_v36 = vpop.eup %4718  ;;  %v2882_v12 = vadd.f32 %v2850_v57, %v8291_v25  ;;  %v2884_v52 = vadd.f32 %v2852_v55, %v8293_v58  ;;  %vm3041_vm12 = vcmp.eq.f32.partialorder %v7304_v17, 0.0  ;;  %v8296_v51 = vld [vmem:[#allocation5_spill] sm:$0xff] }
 0x3c5   :  { %3968 = vst.msk [vmem:[%s7934_s7 + $0x240] sm:$0xff] %vm156_vm0, %v3413_v3  ;;  %v3910_v21 = vmul.f32 -1.442695, %v3029_v35  ;;  %v3047_v22 = vsel %vm3046_vm9, %v7298_v9, %v3045_v61  ;;  %v3038_v37 = vmul.f32 %v4719_v36, %v7304_v17  ;;  %v7420_v1 = vmax.f32 %v2879_v44, 1e-08  ;;  %v8297_v3 = vld [vmem:[#allocation26_spill] sm:$0xff] }
 0x3c6   :  { %v4721_v5 = vpop.eup %4720  ;;  %v3050_v56 = vsel %vm3048_vm10, %v3049_v20, %v3047_v22  ;;  %v7423_v24 = vmax.f32 %v2882_v12, 1e-08  ;;  %v3042_v2 = vand.u32 2147483648, %v7304_v17  ;;  %vm3060_vm13 = vcmp.eq.f32.partialorder %v7365_v60, inf }
 0x3c7   :  { %v3258_v40 = vadd.f32 1.0, %v4721_v5  ;;  %4732 = vpow2.f32 %v3910_v21  ;;  %v3913_v42 = vmul.f32 -1.442695, %v3050_v56  ;;  %v3040_v9 = vsel %vm3039_vm11, %v7304_v17, %v3038_v37  ;;  %v8298_v37 = vld [vmem:[#allocation45_spill] sm:$0xff] }
 0x3c8   :  { %v4723_v33 = vpop.eup %4722  ;;  %4734 = vrsqrt.f32 %v7420_v1  ;;  %v3043_v55 = vsel %vm3041_vm12, %v3042_v2, %v3040_v9  ;;  %vm3062_vm14 = vcmp.eq.f32.partialorder %v7365_v60, 0.0  ;;  %v3063_v34 = vand.u32 2147483648, %v7365_v60  ;;  %v8301_v2 = vld [vmem:[#allocation50_spill] sm:$0xff] }
 0x3c9   :  { %v4725_v54 = vpop.eup %4724  ;;  %v3352_v14 = vmul.f32 %v4723_v33, %v8294_v11  ;;  %v3384_v15 = vmul.f32 %v4723_v33, %v8295_v31  ;;  %v3416_v59 = vmul.f32 %v4723_v33, %v7018_v41  ;;  %4736 = vrcp.f32 %v3258_v40 }
 0x3ca   :  { %v4727_v57 = vpop.eup %4726  ;;  %v3257_v29 = vadd.f32 1.0, %v4725_v54  ;;  %4738 = vpow2.f32 %v3913_v42  ;;  %v3912_v17 = vmul.f32 -1.442695, %v3043_v55  ;;  %v7450_v39 = vmax.f32 %v2881_v28, 1e-08  ;;  %v8299_v42 = vld [vmem:[#allocation46_spill] sm:$0xff] }
 0x3cb   :  { %3512 = vst.msk [vmem:[%s7934_s7 + $0x58] sm:$0xff] %vm156_vm0, %v3352_v14  ;;  %3939 = vst.msk [vmem:[%s7934_s7 + $0x158] sm:$0xff] %vm156_vm0, %v3384_v15  ;;  %v3260_v41 = vadd.f32 1.0, %v4727_v57  ;;  %4740 = vrsqrt.f32 %v7423_v24  ;;  %vm3053_vm15 = vcmp.eq.f32.partialorder %v7420_v1, inf  ;;  %vm3055_vm1 = vcmp.eq.f32.partialorder %v7420_v1, 0.0  ;;  %v8302_v14 = vld [vmem:[#allocation4_spill] sm:$0xff] }
 0x3cc   :  { %3971 = vst.msk [vmem:[%s7934_s7 + $0x258] sm:$0xff] %vm156_vm0, %v3416_v59  ;;  %v4729_v45 = vpop.eup %4728  ;;  %4742 = vrcp.f32 %v3257_v29  ;;  %v7472_v20 = vmax.f32 %v2884_v52, 1e-08  ;;  %v2851_v47 = vmul.f32 %v7146_v0, %v7146_v0  ;;  %v2854_v36 = vmul.f32 %v7160_v4, %v7160_v4  ;;  %v8303_v15 = vld [vmem:[#allocation29_spill] sm:$0xff] }
 0x3cd   :  { %v4731_v30 = vpop.eup %4730  ;;  %v3351_v7 = vmul.f32 %v4729_v45, %v8296_v51  ;;  %v3383_v19 = vmul.f32 %v4729_v45, %v8297_v3  ;;  %v3415_v61 = vmul.f32 %v4729_v45, %v7026_v49  ;;  %4744 = vrcp.f32 %v3260_v41 }
 0x3ce   :  { %4746 = vpow2.f32 %v3912_v17  ;;  %v3059_v35 = vmul.f32 %v4731_v30, %v7365_v60  ;;  %v3056_v49 = vand.u32 2147483648, %v7420_v1  ;;  %v2853_v21 = vmul.f32 %v7165_v16, %v7165_v16 }
 0x3cf   :  { %3511 = vst.msk [vmem:[%s7934_s7 + $0x50] sm:$0xff] %vm156_vm0, %v3351_v7  ;;  %3938 = vst.msk [vmem:[%s7934_s7 + $0x150] sm:$0xff] %vm156_vm0, %v3383_v19  ;;  %4748 = vrsqrt.f32 %v7450_v39  ;;  %v2856_v22 = vmul.f32 %v7206_v26, %v7206_v26  ;;  %vm3074_vm2 = vcmp.eq.f32.partialorder %v7423_v24, inf  ;;  %vm3076_vm3 = vcmp.eq.f32.partialorder %v7423_v24, 0.0  ;;  %v8304_v7 = vld [vmem:[#allocation7_spill] sm:$0xff]  ;;  %v8305_v19 = vld [vmem:[#allocation28_spill] sm:$0xff] }
 0x3d0   :  { %3970 = vst.msk [vmem:[%s7934_s7 + $0x250] sm:$0xff] %vm156_vm0, %v3415_v61  ;;  %v3061_v44 = vsel %vm3060_vm13, %v7365_v60, %v3059_v35  ;;  %4750 = vrsqrt.f32 %v7472_v20  ;;  %v3077_v56 = vand.u32 2147483648, %v7423_v24  ;;  %v2883_v58 = vadd.f32 %v2851_v47, %v8298_v37  ;;  %v8300_v60 = vld [vmem:[#allocation49_spill] sm:$0xff] }
 0x3d1   :  { %v4733_v25 = vpop.eup %4732  ;;  %v3064_v12 = vsel %vm3062_vm14, %v3063_v34, %v3061_v44  ;;  %v2886_v33 = vadd.f32 %v2854_v36, %v8299_v42  ;;  %v2885_v9 = vadd.f32 %v2853_v21, %v8300_v60  ;;  %v7496_v54 = vadd.f32 %v2856_v22, %v8301_v2  ;;  %v8306_v44 = vld [vmem:[#allocation6_spill] sm:$0xff]  ;;  %v8307_v21 = vld [vmem:[#allocation31_spill] sm:$0xff] }
 0x3d2   :  { %v4735_v50 = vpop.eup %4734  ;;  %v3259_v28 = vadd.f32 1.0, %v4733_v25  ;;  %v3915_v5 = vmul.f32 -1.442695, %v3064_v12  ;;  %v7504_v17 = vmax.f32 %v2883_v58, 1e-08  ;;  %vm3067_vm4 = vcmp.eq.f32.partialorder %v7450_v39, inf }
 0x3d3   :  { %v4737_v52 = vpop.eup %4736  ;;  %v3052_v40 = vmul.f32 %v4735_v50, %v7420_v1  ;;  %v7522_v30 = vmax.f32 %v2886_v33, 1e-08  ;;  %vm3069_vm5 = vcmp.eq.f32.partialorder %v7450_v39, 0.0  ;;  %v7562_v37 = vmax.f32 %v2885_v9, 1e-08 }
 0x3d4   :  { %v4739_v11 = vpop.eup %4738  ;;  %v3354_v31 = vmul.f32 %v4737_v52, %v8302_v14  ;;  %v3386_v59 = vmul.f32 %v4737_v52, %v8303_v15  ;;  %v3418_v57 = vmul.f32 %v4737_v52, %v7037_v62  ;;  %4752 = vrcp.f32 %v3259_v28  ;;  %v8309_v14 = vld [vmem:[#allocation9_spill] sm:$0xff]  ;;  %v8310_v15 = vld [vmem:[#allocation30_spill] sm:$0xff] }
 0x3d5   :  { %v4741_v29 = vpop.eup %4740  ;;  %v3262_v55 = vadd.f32 1.0, %v4739_v11  ;;  %4754 = vpow2.f32 %v3915_v5  ;;  %v3054_v41 = vsel %vm3053_vm15, %v7420_v1, %v3052_v40  ;;  %v3070_v40 = vand.u32 2147483648, %v7450_v39 }
 0x3d6   :  { %v4743_v45 = vpop.eup %4742  ;;  %3514 = vst.msk [vmem:[%s7934_s7 + $0x68] sm:$0xff] %vm156_vm0, %v3354_v31  ;;  %3941 = vst.msk [vmem:[%s7934_s7 + $0x168] sm:$0xff] %vm156_vm0, %v3386_v59  ;;  %v3057_v62 = vsel %vm3055_vm1, %v3056_v49, %v3054_v41  ;;  %v3073_v34 = vmul.f32 %v4741_v29, %v7423_v24  ;;  %v8308_v49 = vld [vmem:[#allocation62_spill] sm:$0xff]  ;;  %vm3088_vm6 = vcmp.eq.f32.partialorder %v7472_v20, inf  ;;  %vm3090_vm7 = vcmp.eq.f32.partialorder %v7472_v20, 0.0 }
 0x3d7   :  { %3973 = vst.msk [vmem:[%s7934_s7 + $0x268] sm:$0xff] %vm156_vm0, %v3418_v57  ;;  %v4745_v51 = vpop.eup %4744  ;;  %v3353_v3 = vmul.f32 %v4743_v45, %v8304_v7  ;;  %v3385_v61 = vmul.f32 %v4743_v45, %v8305_v19  ;;  %v3417_v35 = vmul.f32 %v4743_v45, %v7042_v46  ;;  %4756 = vrcp.f32 %v3262_v55 }
 0x3d8   :  { %v4747_v47 = vpop.eup %4746  ;;  %v3356_v36 = vmul.f32 %v4745_v51, %v8306_v44  ;;  %v3388_v1 = vmul.f32 %v4745_v51, %v8307_v21  ;;  %v3420_v22 = vmul.f32 %v4745_v51, %v8308_v49  ;;  %v3914_v25 = vmul.f32 -1.442695, %v3057_v62  ;;  %v8311_v51 = vld [vmem:[#allocation8_spill] sm:$0xff]  ;;  %v8313_v44 = vld [vmem:[#allocation53_spill] sm:$0xff]  ;;  %v8314_v21 = vld [vmem:[#allocation54_spill] sm:$0xff] }
 0x3d9   :  { %v4749_v12 = vpop.eup %4748  ;;  %3513 = vst.msk [vmem:[%s7934_s7 + $0x60] sm:$0xff] %vm156_vm0, %v3353_v3  ;;  %3940 = vst.msk [vmem:[%s7934_s7 + $0x160] sm:$0xff] %vm156_vm0, %v3385_v61  ;;  %v3261_v46 = vadd.f32 1.0, %v4747_v47  ;;  %v3075_v50 = vsel %vm3074_vm2, %v7423_v24, %v3073_v34  ;;  %4758 = vrsqrt.f32 %v7504_v17  ;;  %vm3081_vm8 = vcmp.eq.f32.partialorder %v7504_v17, inf  ;;  %v8312_v3 = vld [vmem:[#allocation33_spill] sm:$0xff] }
 0x3da   :  { %3972 = vst.msk [vmem:[%s7934_s7 + $0x260] sm:$0xff] %vm156_vm0, %v3417_v35  ;;  %3516 = vst.msk [vmem:[%s7934_s7 + $0x78] sm:$0xff] %vm156_vm0, %v3356_v36  ;;  %4760 = vpow2.f32 %v3914_v25  ;;  %v3078_v28 = vsel %vm3076_vm3, %v3077_v56, %v3075_v50  ;;  %v3066_v5 = vmul.f32 %v4749_v12, %v7450_v39  ;;  %v4751_v58 = vpop.eup %4750  ;;  %v3091_v56 = vand.u32 2147483648, %v7472_v20  ;;  %v8315_v25 = vld [vmem:[#allocation57_spill] sm:$0xff] }
 0x3db   :  { %3943 = vst.msk [vmem:[%s7934_s7 + $0x178] sm:$0xff] %vm156_vm0, %v3388_v1  ;;  %3975 = vst.msk [vmem:[%s7934_s7 + $0x278] sm:$0xff] %vm156_vm0, %v3420_v22  ;;  %4762 = vrcp.f32 %v3261_v46  ;;  %v3917_v52 = vmul.f32 -1.442695, %v3078_v28  ;;  %v3087_v33 = vmul.f32 %v4751_v58, %v7472_v20  ;;  %vm3083_vm9 = vcmp.eq.f32.partialorder %v7504_v17, 0.0  ;;  %v8316_v28 = vld [vmem:[#allocation11_spill] sm:$0xff] }
 0x3dc   :  { %v3068_v42 = vsel %vm3067_vm4, %v7450_v39, %v3066_v5  ;;  %4764 = vrsqrt.f32 %v7522_v30  ;;  %v3084_v41 = vand.u32 2147483648, %v7504_v17  ;;  %v2858_v62 = vmul.f32 %v7243_v32, %v7243_v32  ;;  %v8317_v58 = vld [vmem:[#allocation32_spill] sm:$0xff] }
 0x3dd   :  { %4766 = vpow2.f32 %v3917_v52  ;;  %v3071_v24 = vsel %vm3069_vm5, %v3070_v40, %v3068_v42  ;;  %v3089_v2 = vsel %vm3088_vm6, %v7472_v20, %v3087_v33  ;;  %v2855_v20 = vmul.f32 %v7213_v13, %v7213_v13 }
 0x3de   :  { %v4753_v60 = vpop.eup %4752  ;;  %v3916_v9 = vmul.f32 -1.442695, %v3071_v24  ;;  %4768 = vrsqrt.f32 %v7562_v37  ;;  %v3092_v57 = vsel %vm3090_vm7, %v3091_v56, %v3089_v2  ;;  %v2857_v34 = vmul.f32 %v7259_v63, %v7259_v63 }
 0x3df   :  { %v4755_v11 = vpop.eup %4754  ;;  %v3355_v31 = vmul.f32 %v4753_v60, %v8309_v14  ;;  %v3387_v59 = vmul.f32 %v4753_v60, %v8310_v15  ;;  %v3419_v39 = vmul.f32 %v4753_v60, %v7070_v23  ;;  %v3919_v55 = vmul.f32 -1.442695, %v3092_v57 }
 0x3e0   :  { %v3264_v29 = vadd.f32 1.0, %v4755_v11  ;;  %4770 = vpow2.f32 %v3916_v9  ;;  %v7596_v23 = vmax.f32 %v7496_v54, 1e-08  ;;  %vm3102_vm10 = vcmp.eq.f32.partialorder %v7522_v30, inf  ;;  %v8318_v11 = vld [vmem:[#allocation58_spill] sm:$0xff] }
 0x3e1   :  { %v4757_v45 = vpop.eup %4756  ;;  %3515 = vst.msk [vmem:[%s7934_s7 + $0x70] sm:$0xff] %vm156_vm0, %v3355_v31  ;;  %3942 = vst.msk [vmem:[%s7934_s7 + $0x170] sm:$0xff] %vm156_vm0, %v3387_v59  ;;  %vm3104_vm11 = vcmp.eq.f32.partialorder %v7522_v30, 0.0  ;;  %v3105_v54 = vand.u32 2147483648, %v7522_v30  ;;  %v2887_v36 = vadd.f32 %v2855_v20, %v8313_v44  ;;  %v2890_v1 = vadd.f32 %v2858_v62, %v8314_v21 }
 0x3e2   :  { %3974 = vst.msk [vmem:[%s7934_s7 + $0x270] sm:$0xff] %vm156_vm0, %v3419_v39  ;;  %v3358_v7 = vmul.f32 %v4757_v45, %v8311_v51  ;;  %v3390_v19 = vmul.f32 %v4757_v45, %v8312_v3  ;;  %v3422_v61 = vmul.f32 %v4757_v45, %v7087_v38  ;;  %4772 = vrcp.f32 %v3264_v29  ;;  %v8319_v51 = vld [vmem:[#allocation10_spill] sm:$0xff] }
 0x3e3   :  { %v4759_v35 = vpop.eup %4758  ;;  %4774 = vpow2.f32 %v3919_v55  ;;  %vm3095_vm12 = vcmp.eq.f32.partialorder %v7562_v37, inf  ;;  %v2889_v12 = vadd.f32 %v2857_v34, %v8315_v25  ;;  %v2860_v46 = vmul.f32 %v7281_v27, %v7281_v27  ;;  %v8323_v25 = vld [vmem:[#allocation34_spill] sm:$0xff] }
 0x3e4   :  { %v4761_v47 = vpop.eup %4760  ;;  %3518 = vst.msk [vmem:[%s7934_s7 + $0x88] sm:$0xff] %vm156_vm0, %v3358_v7  ;;  %3945 = vst.msk [vmem:[%s7934_s7 + $0x188] sm:$0xff] %vm156_vm0, %v3390_v19  ;;  %v3080_v38 = vmul.f32 %v4759_v35, %v7504_v17  ;;  %4776 = vrsqrt.f32 %v7596_v23  ;;  %v7639_v60 = vmax.f32 %v2887_v36, 1e-08  ;;  %v7653_v2 = vmax.f32 %v2890_v1, 1e-08 }
 0x3e5   :  { %3977 = vst.msk [vmem:[%s7934_s7 + $0x288] sm:$0xff] %vm156_vm0, %v3422_v61  ;;  %v4763_v49 = vpop.eup %4762  ;;  %v3263_v22 = vadd.f32 1.0, %v4761_v47  ;;  %v2892_v14 = vadd.f32 %v2860_v46, %v8318_v11  ;;  %vm3097_vm13 = vcmp.eq.f32.partialorder %v7562_v37, 0.0  ;;  %v3098_v57 = vand.u32 2147483648, %v7562_v37  ;;  %v8320_v7 = vld [vmem:[#allocation35_spill] sm:$0xff]  ;;  %v8321_v47 = vld [vmem:[#allocation61_spill] sm:$0xff] }
 0x3e6   :  { %v4765_v50 = vpop.eup %4764  ;;  %v3357_v5 = vmul.f32 %v4763_v49, %v8316_v28  ;;  %v3389_v52 = vmul.f32 %v4763_v49, %v8317_v58  ;;  %v3421_v40 = vmul.f32 %v4763_v49, %v7093_v6  ;;  %v3082_v42 = vsel %vm3081_vm8, %v7504_v17, %v3080_v38  ;;  %v8322_v49 = vld [vmem:[#allocation13_spill] sm:$0xff] }
 0x3e7   :  { %v4767_v33 = vpop.eup %4766  ;;  %4778 = vrcp.f32 %v3263_v22  ;;  %v3085_v24 = vsel %vm3083_vm9, %v3084_v41, %v3082_v42  ;;  %v3101_v56 = vmul.f32 %v4765_v50, %v7522_v30  ;;  %v2859_v29 = vmul.f32 %v7300_v53, %v7300_v53 }
 0x3e8   :  { %v4769_v9 = vpop.eup %4768  ;;  %3517 = vst.msk [vmem:[%s7934_s7 + $0x80] sm:$0xff] %vm156_vm0, %v3357_v5  ;;  %3944 = vst.msk [vmem:[%s7934_s7 + $0x180] sm:$0xff] %vm156_vm0, %v3389_v52  ;;  %v3266_v6 = vadd.f32 1.0, %v4767_v33  ;;  %v3918_v17 = vmul.f32 -1.442695, %v3085_v24  ;;  %4780 = vrsqrt.f32 %v7639_v60  ;;  %vm3116_vm14 = vcmp.eq.f32.partialorder %v7596_v23, inf }
 0x3e9   :  { %3976 = vst.msk [vmem:[%s7934_s7 + $0x280] sm:$0xff] %vm156_vm0, %v3421_v40  ;;  %v3103_v31 = vsel %vm3102_vm10, %v7522_v30, %v3101_v56  ;;  %v3094_v15 = vmul.f32 %v4769_v9, %v7562_v37  ;;  %v2891_v38 = vadd.f32 %v2859_v29, %v8321_v47  ;;  %v3119_v44 = vand.u32 2147483648, %v7596_v23  ;;  %v8324_v40 = vld [vmem:[#allocation12_spill] sm:$0xff]  ;;  %v8327_v29 = vld [vmem:[#allocation39_spill] sm:$0xff] }
 0x3ea   :  { %v4771_v59 = vpop.eup %4770  ;;  %4782 = vrcp.f32 %v3266_v6  ;;  %v3106_v39 = vsel %vm3104_vm11, %v3105_v54, %v3103_v31  ;;  %v7692_v36 = vmax.f32 %v2892_v14, 1e-08  ;;  %vm3118_vm15 = vcmp.eq.f32.partialorder %v7596_v23, 0.0  ;;  %v8325_v33 = vld [vmem:[#allocation36_spill] sm:$0xff] }
 0x3eb   :  { %v3265_v55 = vadd.f32 1.0, %v4771_v59  ;;  %4784 = vpow2.f32 %v3918_v17  ;;  %v3921_v41 = vmul.f32 -1.442695, %v3106_v39  ;;  %v3096_v45 = vsel %vm3095_vm12, %v7562_v37, %v3094_v15  ;;  %v8326_v39 = vld [vmem:[#allocation15_spill] sm:$0xff] }
 0x3ec   :  { %v4773_v20 = vpop.eup %4772  ;;  %v3099_v62 = vsel %vm3097_vm13, %v3098_v57, %v3096_v45  ;;  %4786 = vrsqrt.f32 %v7653_v2  ;;  %v7687_v37 = vmax.f32 %v2889_v12, 1e-08  ;;  %vm3109_vm1 = vcmp.eq.f32.partialorder %v7639_v60, inf }
 0x3ed   :  { %v4775_v34 = vpop.eup %4774  ;;  %v3360_v30 = vmul.f32 %v4773_v20, %v8319_v51  ;;  %v3392_v3 = vmul.f32 %v4773_v20, %v8320_v7  ;;  %v3424_v19 = vmul.f32 %v4773_v20, %v7107_v18  ;;  %4788 = vrcp.f32 %v3265_v55 }
 0x3ee   :  { %v4777_v61 = vpop.eup %4776  ;;  %v3268_v35 = vadd.f32 1.0, %v4775_v34  ;;  %4790 = vpow2.f32 %v3921_v41  ;;  %v3920_v54 = vmul.f32 -1.442695, %v3099_v62  ;;  %vm3111_vm2 = vcmp.eq.f32.partialorder %v7639_v60, 0.0  ;;  %v8328_v34 = vld [vmem:[#allocation14_spill] sm:$0xff] }
 0x3ef   :  { %3520 = vst.msk [vmem:[%s7934_s7 + $0x98] sm:$0xff] %vm156_vm0, %v3360_v30  ;;  %3947 = vst.msk [vmem:[%s7934_s7 + $0x198] sm:$0xff] %vm156_vm0, %v3392_v3  ;;  %v3115_v18 = vmul.f32 %v4777_v61, %v7596_v23  ;;  %vm3130_vm3 = vcmp.eq.f32.partialorder %v7653_v2, inf  ;;  %v7724_v11 = vmax.f32 %v2891_v38, 1e-08  ;;  %vm3132_vm4 = vcmp.eq.f32.partialorder %v7653_v2, 0.0 }
 0x3f0   :  { %3979 = vst.msk [vmem:[%s7934_s7 + $0x298] sm:$0xff] %vm156_vm0, %v3424_v19  ;;  %4792 = vrcp.f32 %v3268_v35  ;;  %v3133_v15 = vand.u32 2147483648, %v7653_v2  ;;  %v8329_v30 = vld [vmem:[#allocation40_spill] sm:$0xff]  ;;  %vm3123_vm5 = vcmp.eq.f32.partialorder %v7687_v37, inf  ;;  %vm3125_vm6 = vcmp.eq.f32.partialorder %v7687_v37, 0.0 }
 0x3f1   :  { %v4779_v21 = vpop.eup %4778  ;;  %4794 = vpow2.f32 %v3920_v54  ;;  %v3117_v1 = vsel %vm3116_vm14, %v7596_v23, %v3115_v18  ;;  %v3112_v23 = vand.u32 2147483648, %v7639_v60  ;;  %v3126_v47 = vand.u32 2147483648, %v7687_v37 }
 0x3f2   :  { %v3359_v22 = vmul.f32 %v4779_v21, %v8322_v49  ;;  %v3391_v12 = vmul.f32 %v4779_v21, %v8323_v25  ;;  %v3423_v46 = vmul.f32 %v4779_v21, %v7114_v8  ;;  %v3120_v50 = vsel %vm3118_vm15, %v3119_v44, %v3117_v1  ;;  %v4781_v28 = vpop.eup %4780 }
 0x3f3   :  { %v3923_v5 = vmul.f32 -1.442695, %v3120_v50  ;;  %4796 = vrsqrt.f32 %v7687_v37  ;;  %v3108_v8 = vmul.f32 %v4781_v28, %v7639_v60  ;;  %vm3144_vm7 = vcmp.eq.f32.partialorder %v7692_v36, inf  ;;  %v8330_v28 = vld [vmem:[#allocation17_spill] sm:$0xff] }
 0x3f4   :  { %v4783_v58 = vpop.eup %4782  ;;  %3519 = vst.msk [vmem:[%s7934_s7 + $0x90] sm:$0xff] %vm156_vm0, %v3359_v22  ;;  %3946 = vst.msk [vmem:[%s7934_s7 + $0x190] sm:$0xff] %vm156_vm0, %v3391_v12  ;;  %4798 = vrsqrt.f32 %v7692_v36  ;;  %v3147_v1 = vand.u32 2147483648, %v7692_v36  ;;  %vm3146_vm8 = vcmp.eq.f32.partialorder %v7692_v36, 0.0  ;;  %vm3137_vm9 = vcmp.eq.f32.partialorder %v7724_v11, inf }
 0x3f5   :  { %3978 = vst.msk [vmem:[%s7934_s7 + $0x290] sm:$0xff] %vm156_vm0, %v3423_v46  ;;  %v4785_v52 = vpop.eup %4784  ;;  %v3362_v42 = vmul.f32 %v4783_v58, %v8324_v40  ;;  %v3394_v24 = vmul.f32 %v4783_v58, %v8325_v33  ;;  %v3426_v56 = vmul.f32 %v4783_v58, %v7129_v10  ;;  %4800 = vpow2.f32 %v3923_v5  ;;  %v8331_v58 = vld [vmem:[#allocation43_spill] sm:$0xff] }
 0x3f6   :  { %v4787_v9 = vpop.eup %4786  ;;  %v3267_v6 = vadd.f32 1.0, %v4785_v52  ;;  %v3110_v17 = vsel %vm3109_vm1, %v7639_v60, %v3108_v8  ;;  %vm3139_vm10 = vcmp.eq.f32.partialorder %v7724_v11, 0.0 }
 0x3f7   :  { %v4789_v14 = vpop.eup %4788  ;;  %3522 = vst.msk [vmem:[%s7934_s7 + $0xa8] sm:$0xff] %vm156_vm0, %v3362_v42  ;;  %3949 = vst.msk [vmem:[%s7934_s7 + $0x1a8] sm:$0xff] %vm156_vm0, %v3394_v24  ;;  %v3113_v10 = vsel %vm3111_vm2, %v3112_v23, %v3110_v17  ;;  %v3129_v31 = vmul.f32 %v4787_v9, %v7653_v2  ;;  %v8332_v42 = vld [vmem:[#allocation16_spill] sm:$0xff] }
 0x3f8   :  { %3981 = vst.msk [vmem:[%s7934_s7 + $0x2a8] sm:$0xff] %vm156_vm0, %v3426_v56  ;;  %v4791_v59 = vpop.eup %4790  ;;  %v3361_v57 = vmul.f32 %v4789_v14, %v8326_v39  ;;  %v3393_v55 = vmul.f32 %v4789_v14, %v8327_v29  ;;  %v3425_v41 = vmul.f32 %v4789_v14, %v7133_v43  ;;  %4802 = vrcp.f32 %v3267_v6  ;;  %v8333_v24 = vld [vmem:[#allocation44_spill] sm:$0xff] }
 0x3f9   :  { %v3270_v45 = vadd.f32 1.0, %v4791_v59  ;;  %v3922_v20 = vmul.f32 -1.442695, %v3113_v10  ;;  %v3131_v60 = vsel %vm3130_vm3, %v7653_v2, %v3129_v31  ;;  %4804 = vrsqrt.f32 %v7724_v11  ;;  %v8334_v31 = vld [vmem:[#allocation19_spill] sm:$0xff] }
 0x3fa   :  { %v4793_v62 = vpop.eup %4792  ;;  %3521 = vst.msk [vmem:[%s7934_s7 + $0xa0] sm:$0xff] %vm156_vm0, %v3361_v57  ;;  %3948 = vst.msk [vmem:[%s7934_s7 + $0x1a0] sm:$0xff] %vm156_vm0, %v3393_v55  ;;  %v3134_v43 = vsel %vm3132_vm4, %v3133_v15, %v3131_v60  ;;  %v8335_v59 = vld [vmem:[#allocation47_spill] sm:$0xff] }
 0x3fb   :  { %3980 = vst.msk [vmem:[%s7934_s7 + $0x2a0] sm:$0xff] %vm156_vm0, %v3425_v41  ;;  %v4795_v2 = vpop.eup %4794  ;;  %v3364_v51 = vmul.f32 %v4793_v62, %v8328_v34  ;;  %v3396_v7 = vmul.f32 %v4793_v62, %v8329_v30  ;;  %v3428_v3 = vmul.f32 %v4793_v62, %v7142_v48  ;;  %4806 = vrcp.f32 %v3270_v45  ;;  %v8337_v45 = vld [vmem:[#allocation48_spill] sm:$0xff]  ;;  %v8338_v30 = vld [vmem:[#allocation21_spill] sm:$0xff] }
 0x3fc   :  { %v3269_v19 = vadd.f32 1.0, %v4795_v2  ;;  %4808 = vpow2.f32 %v3922_v20  ;;  %v3925_v61 = vmul.f32 -1.442695, %v3134_v43 }
 0x3fd   :  { %v4797_v35 = vpop.eup %4796  ;;  %3524 = vst.msk [vmem:[%s7934_s7 + $0xb8] sm:$0xff] %vm156_vm0, %v3364_v51  ;;  %3951 = vst.msk [vmem:[%s7934_s7 + $0x1b8] sm:$0xff] %vm156_vm0, %v3396_v7 }
 0x3fe   :  { %3983 = vst.msk [vmem:[%s7934_s7 + $0x2b8] sm:$0xff] %vm156_vm0, %v3428_v3  ;;  %v4799_v48 = vpop.eup %4798  ;;  %4810 = vrcp.f32 %v3269_v19  ;;  %v3122_v54 = vmul.f32 %v4797_v35, %v7687_v37  ;;  %v8339_v3 = vld [vmem:[#allocation51_spill] sm:$0xff] }
 0x3ff   :  { %v4801_v18 = vpop.eup %4800  ;;  %4812 = vpow2.f32 %v3925_v61  ;;  %v3143_v38 = vmul.f32 %v4799_v48, %v7692_v36 }
 0x400   :  { %v3272_v44 = vadd.f32 1.0, %v4801_v18  ;;  %v3124_v21 = vsel %vm3123_vm5, %v7687_v37, %v3122_v54  ;;  %v8340_v54 = vld [vmem:[#allocation20_spill] sm:$0xff] }
 0x401   :  { %v3127_v49 = vsel %vm3125_vm6, %v3126_v47, %v3124_v21  ;;  %v3145_v22 = vsel %vm3144_vm7, %v7692_v36, %v3143_v38 }
 0x402   :  { %v4803_v25 = vpop.eup %4802  ;;  %4814 = vrcp.f32 %v3272_v44  ;;  %v3924_v12 = vmul.f32 -1.442695, %v3127_v49  ;;  %v3148_v46 = vsel %vm3146_vm8, %v3147_v1, %v3145_v22  ;;  %v8342_v1 = vld [vmem:[#allocation23_spill] sm:$0xff] }
 0x403   :  { %v4805_v50 = vpop.eup %4804  ;;  %v3363_v5 = vmul.f32 %v4803_v25, %v8330_v28  ;;  %v3395_v8 = vmul.f32 %v4803_v25, %v8331_v58  ;;  %v3427_v37 = vmul.f32 %v4803_v25, %v7146_v0  ;;  %v3927_v23 = vmul.f32 -1.442695, %v3148_v46  ;;  %v8343_v49 = vld [vmem:[#allocation55_spill] sm:$0xff] }
 0x404   :  { %4816 = vpow2.f32 %v3924_v12  ;;  %v3136_v52 = vmul.f32 %v4805_v50, %v7724_v11  ;;  %v3140_v0 = vand.u32 2147483648, %v7724_v11  ;;  %v8344_v12 = vld [vmem:[#allocation22_spill] sm:$0xff]  ;;  %v8345_v50 = vld [vmem:[#allocation56_spill] sm:$0xff] }
 0x405   :  { %v4807_v40 = vpop.eup %4806  ;;  %3523 = vst.msk [vmem:[%s7934_s7 + $0xb0] sm:$0xff] %vm156_vm0, %v3363_v5  ;;  %3950 = vst.msk [vmem:[%s7934_s7 + $0x1b0] sm:$0xff] %vm156_vm0, %v3395_v8  ;;  %4818 = vpow2.f32 %v3927_v23  ;;  %v8347_v8 = vld [vmem:[#allocation59_spill] sm:$0xff] }
 0x406   :  { %3982 = vst.msk [vmem:[%s7934_s7 + $0x2b0] sm:$0xff] %vm156_vm0, %v3427_v37  ;;  %v4809_v36 = vpop.eup %4808  ;;  %v3366_v33 = vmul.f32 %v4807_v40, %v8332_v42  ;;  %v3398_v56 = vmul.f32 %v4807_v40, %v8333_v24  ;;  %v3430_v9 = vmul.f32 %v4807_v40, %v7160_v4  ;;  %v3138_v6 = vsel %vm3137_vm9, %v7724_v11, %v3136_v52 }
 0x407   :  { %v3271_v17 = vadd.f32 1.0, %v4809_v36  ;;  %v3141_v14 = vsel %vm3139_vm10, %v3140_v0, %v3138_v6 }
 0x408   :  { %v4811_v10 = vpop.eup %4810  ;;  %3526 = vst.msk [vmem:[%s7934_s7 + $0xc8] sm:$0xff] %vm156_vm0, %v3366_v33  ;;  %3953 = vst.msk [vmem:[%s7934_s7 + $0x1c8] sm:$0xff] %vm156_vm0, %v3398_v56  ;;  %v3926_v4 = vmul.f32 -1.442695, %v3141_v14 }
 0x409   :  { %3985 = vst.msk [vmem:[%s7934_s7 + $0x2c8] sm:$0xff] %vm156_vm0, %v3430_v9  ;;  %v4813_v11 = vpop.eup %4812  ;;  %v3365_v15 = vmul.f32 %v4811_v10, %v8334_v31  ;;  %v3397_v39 = vmul.f32 %v4811_v10, %v8335_v59  ;;  %v3429_v57 = vmul.f32 %v4811_v10, %v7165_v16  ;;  %4820 = vrcp.f32 %v3271_v17  ;;  %v8336_v16 = vld [vmem:[#allocation18_spill] sm:$0xff] }
 0x40a   :  { %v3274_v29 = vadd.f32 1.0, %v4813_v11  ;;  %4822 = vpow2.f32 %v3926_v4 }
 0x40b   :  { %3525 = vst.msk [vmem:[%s7934_s7 + $0xc0] sm:$0xff] %vm156_vm0, %v3365_v15  ;;  %3952 = vst.msk [vmem:[%s7934_s7 + $0x1c0] sm:$0xff] %vm156_vm0, %v3397_v39 }
 0x40c   :  { %3984 = vst.msk [vmem:[%s7934_s7 + $0x2c0] sm:$0xff] %vm156_vm0, %v3429_v57  ;;  %v4815_v55 = vpop.eup %4814  ;;  %4824 = vrcp.f32 %v3274_v29 }
 0x40d   :  { %v3368_v41 = vmul.f32 %v4815_v55, %v8336_v16  ;;  %v3400_v20 = vmul.f32 %v4815_v55, %v8337_v45  ;;  %v3432_v60 = vmul.f32 %v4815_v55, %v7206_v26 }
 0x40e   :  { %v4817_v62 = vpop.eup %4816 }
 0x40f   :  { %v4819_v43 = vpop.eup %4818  ;;  %3528 = vst.msk [vmem:[%s7934_s7 + $0xd8] sm:$0xff] %vm156_vm0, %v3368_v41  ;;  %3955 = vst.msk [vmem:[%s7934_s7 + $0x1d8] sm:$0xff] %vm156_vm0, %v3400_v20  ;;  %v3273_v2 = vadd.f32 1.0, %v4817_v62 }
 0x410   :  { %3987 = vst.msk [vmem:[%s7934_s7 + $0x2d8] sm:$0xff] %vm156_vm0, %v3432_v60  ;;  %v3276_v34 = vadd.f32 1.0, %v4819_v43 }
 0x411   :  { %4826 = vrcp.f32 %v3273_v2 }
 0x412   :  { %4828 = vrcp.f32 %v3276_v34 }
 0x413   :  { %v4821_v26 = vpop.eup %4820 }
 0x414   :  { %v4823_v51 = vpop.eup %4822  ;;  %v3367_v7 = vmul.f32 %v4821_v26, %v8338_v30  ;;  %v3399_v19 = vmul.f32 %v4821_v26, %v8339_v3  ;;  %v3431_v61 = vmul.f32 %v4821_v26, %v7213_v13  ;;  %v8341_v13 = vld [vmem:[#allocation52_spill] sm:$0xff] }
 0x415   :  { %v3275_v35 = vadd.f32 1.0, %v4823_v51 }
 0x416   :  { %v4825_v48 = vpop.eup %4824  ;;  %3527 = vst.msk [vmem:[%s7934_s7 + $0xd0] sm:$0xff] %vm156_vm0, %v3367_v7  ;;  %3954 = vst.msk [vmem:[%s7934_s7 + $0x1d0] sm:$0xff] %vm156_vm0, %v3399_v19 }
 0x417   :  { %3986 = vst.msk [vmem:[%s7934_s7 + $0x2d0] sm:$0xff] %vm156_vm0, %v3431_v61  ;;  %v3370_v18 = vmul.f32 %v4825_v48, %v8340_v54  ;;  %v3402_v47 = vmul.f32 %v4825_v48, %v8341_v13  ;;  %v3434_v38 = vmul.f32 %v4825_v48, %v7243_v32  ;;  %4830 = vrcp.f32 %v3275_v35 }
 0x419   :  { %3530 = vst.msk [vmem:[%s7934_s7 + $0xe8] sm:$0xff] %vm156_vm0, %v3370_v18  ;;  %3957 = vst.msk [vmem:[%s7934_s7 + $0x1e8] sm:$0xff] %vm156_vm0, %v3402_v47 }
 0x41a   :  { %3989 = vst.msk [vmem:[%s7934_s7 + $0x2e8] sm:$0xff] %vm156_vm0, %v3434_v38 }
 0x41b   :  { %v4827_v44 = vpop.eup %4826 }
 0x41c   :  { %v4829_v21 = vpop.eup %4828  ;;  %v3369_v32 = vmul.f32 %v4827_v44, %v8342_v1  ;;  %v3401_v22 = vmul.f32 %v4827_v44, %v8343_v49  ;;  %v3433_v25 = vmul.f32 %v4827_v44, %v7259_v63 }
 0x41d   :  { %v3372_v46 = vmul.f32 %v4829_v21, %v8344_v12  ;;  %v3404_v28 = vmul.f32 %v4829_v21, %v8345_v50  ;;  %v3436_v5 = vmul.f32 %v4829_v21, %v7281_v27  ;;  %v8346_v27 = vld [vmem:[#allocation25_spill] sm:$0xff] }
 0x41e   :  { %3529 = vst.msk [vmem:[%s7934_s7 + $0xe0] sm:$0xff] %vm156_vm0, %v3369_v32  ;;  %3956 = vst.msk [vmem:[%s7934_s7 + $0x1e0] sm:$0xff] %vm156_vm0, %v3401_v22 }
 0x41f   :  { %3988 = vst.msk [vmem:[%s7934_s7 + $0x2e0] sm:$0xff] %vm156_vm0, %v3433_v25  ;;  %3532 = vst.msk [vmem:[%s7934_s7 + $0xf8] sm:$0xff] %vm156_vm0, %v3372_v46 }
 0x420   :  { %3959 = vst.msk [vmem:[%s7934_s7 + $0x1f8] sm:$0xff] %vm156_vm0, %v3404_v28  ;;  %3991 = vst.msk [vmem:[%s7934_s7 + $0x2f8] sm:$0xff] %vm156_vm0, %v3436_v5 }
 0x421   :  { %v4831_v63 = vpop.eup %4830 }
 0x422   :  { %v3371_v58 = vmul.f32 %v4831_v63, %v8346_v27  ;;  %v3403_v37 = vmul.f32 %v4831_v63, %v8347_v8  ;;  %v3435_v23 = vmul.f32 %v4831_v63, %v7300_v53 }
 0x424   :  { %3531 = vst.msk [vmem:[%s7934_s7 + $0xf0] sm:$0xff] %vm156_vm0, %v3371_v58  ;;  %3958 = vst.msk [vmem:[%s7934_s7 + $0x1f0] sm:$0xff] %vm156_vm0, %v3403_v37 }
 0x425   :  { %3990 = vst.msk [vmem:[%s7934_s7 + $0x2f0] sm:$0xff] %vm156_vm0, %v3435_v23 }

// kernel: flood_block.40
= control target key start
LH: loop header
LB: loop body
LE: loop exit
PB: predicated region body
PF: predicated region fallthrough
CT: control target
= control target key end

     0   :  { %v953_v0 = vmov 0   ;;  %vm689_vm0 = vcmask 130048   ;;  %s1660_s3 = inlined_call_operand.vmem [shape: f32[256,1], index: 3, kind: input, shape index: {}]   ;;  %s1661_s0 = inlined_call_operand.vmem [shape: f32[256,16], index: 0, kind: input, shape index: {}]   ;;  %s1662_s1 = inlined_call_operand.vmem [shape: f32[256,16], index: 1, kind: input, shape index: {}]   ;;  %s1663_s2 = inlined_call_operand.vmem [shape: f32[256,16], index: 2, kind: input, shape index: {}]   ;;  %s1664_s4 = inlined_call_operand.vmem [shape: f32[256,16], index: 4, kind: output, shape index: {}]  }
   0x1   :  { %760 = vset.pattern.permute.xlu1 %v953_v0  ;;  %759 = vset.pattern.permute.xlu0 %v953_v0  ;;  %v243_v1 = vld [vmem:[%s1660_s3 + $0x10] sm:$0xff]  ;;  %v241_v2 = vld [vmem:[%s1660_s3] sm:$0xff]  ;;  %v244_v3 = vld [vmem:[%s1660_s3 + $0x18] sm:$0xff] }
   0x2   :  { %509 = vperm.xlu1 %760, %v243_v1   ;;  %499 = vperm.xlu0 %759, %v241_v2   ;;  %v242_v4 = vld [vmem:[%s1660_s3 + $0x8] sm:$0xff]  ;;  %v245_v6 = vld [vmem:[%s1660_s3 + $0x20] sm:$0xff]  ;;  %v248_v7 = vld [vmem:[%s1660_s3 + $0x38] sm:$0xff] }
   0x3   :  { %v246_v5 = vld [vmem:[%s1660_s3 + $0x28] sm:$0xff]  ;;  %v247_v8 = vld [vmem:[%s1660_s3 + $0x30] sm:$0xff]  ;;  %v249_v10 = vld [vmem:[%s1660_s3 + $0x40] sm:$0xff] }
   0x4   :  { %v250_v9 = vld [vmem:[%s1660_s3 + $0x48] sm:$0xff]  ;;  %v252_v11 = vld [vmem:[%s1660_s3 + $0x58] sm:$0xff]  ;;  %v251_v12 = vld [vmem:[%s1660_s3 + $0x50] sm:$0xff] }
   0x5   :  { %v254_v13 = vld [vmem:[%s1660_s3 + $0x68] sm:$0xff]  ;;  %v253_v14 = vld [vmem:[%s1660_s3 + $0x60] sm:$0xff]  ;;  %v256_v15 = vld [vmem:[%s1660_s3 + $0x78] sm:$0xff] }
   0x6   :  { %514 = vperm.xlu1 %760, %v244_v3   ;;  %504 = vperm.xlu0 %759, %v242_v4   ;;  %v255_v16 = vld [vmem:[%s1660_s3 + $0x70] sm:$0xff]  ;;  %v258_v17 = vld [vmem:[%s1660_s3 + $0x88] sm:$0xff]  ;;  %v257_v18 = vld [vmem:[%s1660_s3 + $0x80] sm:$0xff] }
   0x7   :  { %v260_v19 = vld [vmem:[%s1660_s3 + $0x98] sm:$0xff]  ;;  %v259_v20 = vld [vmem:[%s1660_s3 + $0x90] sm:$0xff]  ;;  %v262_v21 = vld [vmem:[%s1660_s3 + $0xa8] sm:$0xff] }
   0x8   :  { %v261_v22 = vld [vmem:[%s1660_s3 + $0xa0] sm:$0xff]  ;;  %v264_v23 = vld [vmem:[%s1660_s3 + $0xb8] sm:$0xff]  ;;  %v263_v24 = vld [vmem:[%s1660_s3 + $0xb0] sm:$0xff] }
   0x9   :  { %v266_v25 = vld [vmem:[%s1660_s3 + $0xc8] sm:$0xff]  ;;  %v265_v26 = vld [vmem:[%s1660_s3 + $0xc0] sm:$0xff]  ;;  %v268_v27 = vld [vmem:[%s1660_s3 + $0xd8] sm:$0xff] }
   0xa   :  { %524 = vperm.xlu1 %760, %v246_v5   ;;  %519 = vperm.xlu0 %759, %v245_v6   ;;  %v267_v28 = vld [vmem:[%s1660_s3 + $0xd0] sm:$0xff]  ;;  %v270_v29 = vld [vmem:[%s1660_s3 + $0xe8] sm:$0xff]  ;;  %v269_v30 = vld [vmem:[%s1660_s3 + $0xe0] sm:$0xff] }
   0xb   :  { %v272_v31 = vld [vmem:[%s1660_s3 + $0xf8] sm:$0xff]  ;;  %v271_v32 = vld [vmem:[%s1660_s3 + $0xf0] sm:$0xff]  ;;  %v17_v34 = vld [vmem:[%s1661_s0] sm:$0xff] }
   0xc   :  { %v19_v33 = vld [vmem:[%s1661_s0 + $0x10] sm:$0xff]  ;;  %v20_v36 = vld [vmem:[%s1661_s0 + $0x18] sm:$0xff]  ;;  %v726_v37 = vmul.f32 -1.442695, %v17_v34  ;;  %v18_v39 = vld [vmem:[%s1661_s0 + $0x8] sm:$0xff] }
   0xd   :  { %v728_v35 = vmul.f32 -1.442695, %v19_v33  ;;  %v729_v38 = vmul.f32 -1.442695, %v20_v36  ;;  %v22_v40 = vld [vmem:[%s1661_s0 + $0x28] sm:$0xff]  ;;  %v371_v41 = vld [vmem:[%s1662_s1 + $0x10] sm:$0xff] }
   0xe   :  { %534 = vperm.xlu1 %760, %v248_v7   ;;  %529 = vperm.xlu0 %759, %v247_v8   ;;  %v369_v42 = vld [vmem:[%s1662_s1] sm:$0xff]  ;;  %v727_v43 = vmul.f32 -1.442695, %v18_v39  ;;  %v731_v44 = vmul.f32 -1.442695, %v22_v40  ;;  %v24_v46 = vld [vmem:[%s1661_s0 + $0x38] sm:$0xff] }
   0xf   :  { %761 = vpow2.f32 %v728_v35  ;;  %v21_v45 = vld [vmem:[%s1661_s0 + $0x20] sm:$0xff]  ;;  %v372_v47 = vld [vmem:[%s1662_s1 + $0x18] sm:$0xff]  ;;  %v370_v48 = vld [vmem:[%s1662_s1 + $0x8] sm:$0xff]  ;;  %v733_v50 = vmul.f32 -1.442695, %v24_v46 }
  0x10   :  { %763 = vpow2.f32 %v726_v37  ;;  %v730_v49 = vmul.f32 -1.442695, %v21_v45  ;;  %v23_v51 = vld [vmem:[%s1661_s0 + $0x30] sm:$0xff]  ;;  %v374_v52 = vld [vmem:[%s1662_s1 + $0x28] sm:$0xff]  ;;  %v373_v55 = vld [vmem:[%s1662_s1 + $0x20] sm:$0xff] }
  0x11   :  { %765 = vpow2.f32 %v729_v38  ;;  %v26_v53 = vld [vmem:[%s1661_s0 + $0x48] sm:$0xff]  ;;  %v376_v57 = vld [vmem:[%s1662_s1 + $0x38] sm:$0xff]  ;;  %v732_v58 = vmul.f32 -1.442695, %v23_v51  ;;  %v25_v60 = vld [vmem:[%s1661_s0 + $0x40] sm:$0xff] }
  0x12   :  { %544 = vperm.xlu1 %760, %v250_v9   ;;  %539 = vperm.xlu0 %759, %v249_v10   ;;  %767 = vtanh.f32 %v371_v41  ;;  %v735_v59 = vmul.f32 -1.442695, %v26_v53  ;;  %v734_v2 = vmul.f32 -1.442695, %v25_v60  ;;  %v28_v3 = vld [vmem:[%s1661_s0 + $0x58] sm:$0xff]  ;;  %v375_v8 = vld [vmem:[%s1662_s1 + $0x30] sm:$0xff] }
  0x13   :  { %769 = vtanh.f32 %v369_v42  ;;  %v737_v9 = vmul.f32 -1.442695, %v28_v3  ;;  %v27_v10 = vld [vmem:[%s1661_s0 + $0x50] sm:$0xff]  ;;  %v32_v38 = vld [vmem:[%s1661_s0 + $0x78] sm:$0xff] }
  0x14   :  { %771 = vpow2.f32 %v727_v43  ;;  %v379_v41 = vld [vmem:[%s1662_s1 + $0x50] sm:$0xff]  ;;  %v741_v45 = vmul.f32 -1.442695, %v32_v38 }
  0x15   :  { %773 = vpow2.f32 %v731_v44  ;;  %v382_v44 = vld [vmem:[%s1662_s1 + $0x68] sm:$0xff]  ;;  %v31_v46 = vld [vmem:[%s1661_s0 + $0x70] sm:$0xff] }
  0x16   :  { %554 = vperm.xlu1 %760, %v252_v11   ;;  %549 = vperm.xlu0 %759, %v251_v12   ;;  %775 = vtanh.f32 %v372_v47  ;;  %v740_v53 = vmul.f32 -1.442695, %v31_v46  ;;  %v43_v46 = vld [vmem:[%s1661_s0 + $0xd0] sm:$0xff] }
  0x17   :  { %777 = vtanh.f32 %v370_v48 }
  0x18   :  { %779 = vpow2.f32 %v730_v49 }
  0x19   :  { %v762_v54 = vpop.eup %761  ;;  %781 = vpow2.f32 %v733_v50  ;;  %v34_v50 = vld [vmem:[%s1661_s0 + $0x88] sm:$0xff] }
  0x1a   :  { %564 = vperm.xlu1 %760, %v254_v13   ;;  %559 = vperm.xlu0 %759, %v253_v14   ;;  %v764_v56 = vpop.eup %763  ;;  %783 = vtanh.f32 %v374_v52  ;;  %v147_v62 = vadd.f32 1.0, %v762_v54  ;;  %v381_v52 = vld [vmem:[%s1662_s1 + $0x60] sm:$0xff] }
  0x1b   :  { %v766_v61 = vpop.eup %765  ;;  %785 = vtanh.f32 %v373_v55  ;;  %v145_v0 = vadd.f32 1.0, %v764_v56 }
  0x1c   :  { %v1126_v63 = vpop.eup %767  ;;  %787 = vtanh.f32 %v376_v57  ;;  %v148_v5 = vadd.f32 1.0, %v766_v61  ;;  %v743_v57 = vmul.f32 -1.442695, %v34_v50  ;;  %v384_v61 = vld [vmem:[%s1662_s1 + $0x78] sm:$0xff] }
  0x1d   :  { %v1128_v1 = vpop.eup %769  ;;  %789 = vpow2.f32 %v732_v58  ;;  %v33_v58 = vld [vmem:[%s1661_s0 + $0x80] sm:$0xff]  ;;  %v276_v50 = vld [vmem:[%s1663_s2 + $0x18] sm:$0xff] }
  0x1e   :  { %574 = vperm.xlu1 %760, %v256_v15   ;;  %569 = vperm.xlu0 %759, %v255_v16   ;;  %v772_v4 = vpop.eup %771  ;;  %791 = vpow2.f32 %v735_v59  ;;  %v736_v16 = vmul.f32 -1.442695, %v27_v10  ;;  %v38_v10 = vld [vmem:[%s1661_s0 + $0xa8] sm:$0xff] }
  0x1f   :  { %v774_v6 = vpop.eup %773  ;;  %793 = vrcp.f32 %v147_v62  ;;  %v146_v12 = vadd.f32 1.0, %v772_v4  ;;  %v36_v4 = vld [vmem:[%s1661_s0 + $0x98] sm:$0xff] }
  0x20   :  { %v1133_v7 = vpop.eup %775  ;;  %795 = vrcp.f32 %v145_v0  ;;  %v150_v14 = vadd.f32 1.0, %v774_v6  ;;  %v383_v0 = vld [vmem:[%s1662_s1 + $0x70] sm:$0xff] }
  0x21   :  { %v1141_v11 = vpop.eup %777  ;;  %797 = vpow2.f32 %v734_v2  ;;  %v742_v2 = vmul.f32 -1.442695, %v33_v58 }
  0x22   :  { %584 = vperm.xlu1 %760, %v258_v17   ;;  %579 = vperm.xlu0 %759, %v257_v18   ;;  %v780_v13 = vpop.eup %779  ;;  %799 = vrcp.f32 %v148_v5  ;;  %v35_v5 = vld [vmem:[%s1661_s0 + $0x90] sm:$0xff] }
  0x23   :  { %v782_v15 = vpop.eup %781  ;;  %801 = vtanh.f32 %v375_v8 }
  0x24   :  { %v1143_v17 = vpop.eup %783  ;;  %803 = vpow2.f32 %v737_v9  ;;  %v386_v9 = vld [vmem:[%s1662_s1 + $0x88] sm:$0xff] }
  0x25   :  { %v1145_v18 = vpop.eup %785  ;;  %805 = vrcp.f32 %v146_v12 }
  0x26   :  { %594 = vperm.xlu1 %760, %v260_v19   ;;  %589 = vperm.xlu0 %759, %v259_v20   ;;  %v149_v19 = vadd.f32 1.0, %v780_v13  ;;  %v378_v20 = vld [vmem:[%s1662_s1 + $0x48] sm:$0xff]  ;;  %807 = vrcp.f32 %v150_v14  ;;  %v275_v13 = vld [vmem:[%s1663_s2 + $0x10] sm:$0xff]  ;;  %v385_v14 = vld [vmem:[%s1662_s1 + $0x80] sm:$0xff] }
  0x27   :  { %809 = vpow2.f32 %v736_v16  ;;  %v40_v16 = vld [vmem:[%s1661_s0 + $0xb8] sm:$0xff] }
  0x28   :  { %811 = vtanh.f32 %v378_v20  ;;  %v745_v20 = vmul.f32 -1.442695, %v36_v4  ;;  %v1261_v38 = vmul.f32 -1.442695, %v40_v16 }
  0x29   :  { %813 = vrcp.f32 %v149_v19 }
  0x2a   :  { %604 = vperm.xlu1 %760, %v262_v21   ;;  %599 = vperm.xlu0 %759, %v261_v22   ;;  %v1150_v21 = vpop.eup %787  ;;  %v152_v22 = vadd.f32 1.0, %v782_v15  ;;  %v37_v15 = vld [vmem:[%s1661_s0 + $0xa0] sm:$0xff] }
  0x2c   :  { %815 = vrcp.f32 %v152_v22  ;;  %v744_v22 = vmul.f32 -1.442695, %v35_v5  ;;  %v1298_v5 = vmul.f32 -1.442695, %v43_v46 }
  0x2e   :  { %614 = vperm.xlu1 %760, %v264_v23   ;;  %609 = vperm.xlu0 %759, %v263_v24   ;;  %v30_v23 = vld [vmem:[%s1661_s0 + $0x68] sm:$0xff]  ;;  %v790_v24 = vpop.eup %789 }
  0x32   :  { %624 = vperm.xlu1 %760, %v266_v25   ;;  %619 = vperm.xlu0 %759, %v265_v26   ;;  %v792_v25 = vpop.eup %791  ;;  %v377_v26 = vld [vmem:[%s1662_s1 + $0x40] sm:$0xff] }
  0x33   :  { %v154_v34 = vadd.f32 1.0, %v792_v25  ;;  %817 = vtanh.f32 %v377_v26 }
  0x36   :  { %634 = vperm.xlu1 %760, %v268_v27   ;;  %629 = vperm.xlu0 %759, %v267_v28   ;;  %v1158_v27 = vpop.eup %793  ;;  %v380_v28 = vld [vmem:[%s1662_s1 + $0x58] sm:$0xff] }
  0x37   :  { %819 = vtanh.f32 %v380_v28  ;;  %v339_v26 = vsub.f32 1.0, %v1158_v27  ;;  %v273_v28 = vld [vmem:[%s1663_s2] sm:$0xff] }
  0x39   :  { %v435_v58 = vmul.f32 %v1126_v63, %v339_v26  ;;  %v46_v63 = vld [vmem:[%s1661_s0 + $0xe8] sm:$0xff] }
  0x3a   :  { %644 = vperm.xlu1 %760, %v270_v29   ;;  %639 = vperm.xlu0 %759, %v269_v30   ;;  %v739_v29 = vmul.f32 -1.442695, %v30_v23  ;;  %v29_v30 = vld [vmem:[%s1661_s0 + $0x60] sm:$0xff]  ;;  %v39_v23 = vld [vmem:[%s1661_s0 + $0xb0] sm:$0xff] }
  0x3b   :  { %v738_v36 = vmul.f32 -1.442695, %v29_v30  ;;  %v747_v30 = vmul.f32 -1.442695, %v38_v10 }
  0x3c   :  { %821 = vpow2.f32 %v739_v29 }
  0x3e   :  { %654 = vperm.xlu1 %760, %v272_v31   ;;  %649 = vperm.xlu0 %759, %v271_v32   ;;  %v1166_v31 = vpop.eup %795  ;;  %v151_v32 = vadd.f32 1.0, %v790_v24  ;;  %v42_v24 = vld [vmem:[%s1661_s0 + $0xc8] sm:$0xff] }
  0x3f   :  { %v798_v33 = vpop.eup %797 }
  0x40   :  { %v1168_v35 = vpop.eup %799  ;;  %823 = vrcp.f32 %v151_v32  ;;  %v153_v40 = vadd.f32 1.0, %v798_v33  ;;  %v41_v32 = vld [vmem:[%s1661_s0 + $0xc0] sm:$0xff] }
  0x41   :  { %v1170_v37 = vpop.eup %801  ;;  %825 = vrcp.f32 %v154_v34  ;;  %v337_v34 = vsub.f32 1.0, %v1166_v31 }
  0x42   :  { %v804_v39 = vpop.eup %803  ;;  %827 = vpow2.f32 %v738_v36  ;;  %v746_v36 = vmul.f32 -1.442695, %v37_v15  ;;  %v278_v15 = vld [vmem:[%s1663_s2 + $0x28] sm:$0xff] }
  0x43   :  { %v1178_v42 = vpop.eup %805  ;;  %v156_v48 = vadd.f32 1.0, %v804_v39  ;;  %829 = vtanh.f32 %v379_v41  ;;  %v44_v39 = vld [vmem:[%s1661_s0 + $0xd8] sm:$0xff]  ;;  %v340_v41 = vsub.f32 1.0, %v1168_v35  ;;  %v433_v4 = vmul.f32 %v1128_v1, %v337_v34 }
  0x44   :  { %v1180_v43 = vpop.eup %807  ;;  %831 = vrcp.f32 %v153_v40 }
  0x45   :  { %v810_v47 = vpop.eup %809  ;;  %833 = vtanh.f32 %v382_v44  ;;  %v1269_v44 = vmul.f32 -1.442695, %v39_v23  ;;  %v342_v10 = vsub.f32 1.0, %v1180_v43  ;;  %v1322_v23 = vmul.f32 -1.442695, %v46_v63 }
  0x46   :  { %v1188_v49 = vpop.eup %811  ;;  %v155_v55 = vadd.f32 1.0, %v810_v47  ;;  %835 = vpow2.f32 %v741_v45  ;;  %v1271_v45 = vmul.f32 -1.442695, %v42_v24  ;;  %v280_v24 = vld [vmem:[%s1663_s2 + $0x38] sm:$0xff] }
  0x47   :  { %v1193_v51 = vpop.eup %813  ;;  %837 = vrcp.f32 %v156_v48  ;;  %v307_v48 = vmul.f32 %v1158_v27, %v275_v13  ;;  %v274_v27 = vld [vmem:[%s1663_s2 + $0x8] sm:$0xff] }
  0x48   :  { %v1198_v54 = vpop.eup %815  ;;  %839 = vtanh.f32 %v381_v52  ;;  %v338_v52 = vsub.f32 1.0, %v1178_v42  ;;  %v306_v13 = vmul.f32 %v1178_v42, %v274_v27 }
  0x49   :  { %v1200_v56 = vpop.eup %817  ;;  %841 = vpow2.f32 %v740_v53  ;;  %v388_v53 = vld [vmem:[%s1662_s1 + $0x98] sm:$0xff]  ;;  %v467_v16 = vadd.f32 %v435_v58, %v307_v48  ;;  %v344_v26 = vsub.f32 1.0, %v1198_v54  ;;  %v390_v48 = vld [vmem:[%s1662_s1 + $0xa8] sm:$0xff] }
  0x4a   :  { %v1205_v59 = vpop.eup %819  ;;  %843 = vrcp.f32 %v155_v55  ;;  %v1286_v55 = vmul.f32 -1.442695, %v41_v32  ;;  %v310_v32 = vmul.f32 %v1180_v43, %v278_v15  ;;  %v282_v15 = vld [vmem:[%s1663_s2 + $0x48] sm:$0xff] }
  0x4b   :  { %v822_v60 = vpop.eup %821  ;;  %845 = vpow2.f32 %v743_v57 }
  0x4c   :  { %v1210_v62 = vpop.eup %823  ;;  %v158_v8 = vadd.f32 1.0, %v822_v60  ;;  %847 = vtanh.f32 %v384_v61  ;;  %v1292_v61 = vmul.f32 -1.442695, %v44_v39 }
  0x4d   :  { %v1215_v3 = vpop.eup %825  ;;  %849 = vtanh.f32 %v383_v0  ;;  %v343_v46 = vsub.f32 1.0, %v1210_v62 }
  0x4e   :  { %v828_v6 = vpop.eup %827  ;;  %851 = vpow2.f32 %v742_v2  ;;  %v305_v2 = vmul.f32 %v1166_v31, %v273_v28  ;;  %v387_v31 = vld [vmem:[%s1662_s1 + $0x90] sm:$0xff] }
  0x4f   :  { %v1229_v12 = vpop.eup %829  ;;  %v157_v29 = vadd.f32 1.0, %v828_v6  ;;  %853 = vtanh.f32 %v386_v9  ;;  %v436_v9 = vmul.f32 %v1133_v7, %v340_v41 }
  0x50   :  { %v1243_v19 = vpop.eup %831  ;;  %855 = vrcp.f32 %v158_v8  ;;  %v308_v8 = vmul.f32 %v1168_v35, %v276_v50  ;;  %v45_v50 = vld [vmem:[%s1661_s0 + $0xe0] sm:$0xff] }
  0x51   :  { %v1251_v25 = vpop.eup %833  ;;  %857 = vtanh.f32 %v385_v14  ;;  %v434_v14 = vmul.f32 %v1141_v11, %v338_v52  ;;  %v465_v11 = vadd.f32 %v433_v4, %v305_v2  ;;  %v440_v4 = vmul.f32 %v1150_v21, %v344_v26 }
  0x52   :  { %v836_v33 = vpop.eup %835  ;;  %859 = vpow2.f32 %v745_v20  ;;  %v277_v20 = vld [vmem:[%s1663_s2 + $0x20] sm:$0xff] }
  0x53   :  { %v1266_v40 = vpop.eup %837  ;;  %861 = vrcp.f32 %v157_v29  ;;  %v160_v60 = vadd.f32 1.0, %v836_v33  ;;  %v438_v33 = vmul.f32 %v1143_v17, %v342_v10  ;;  %v466_v39 = vadd.f32 %v434_v14, %v306_v13  ;;  %v48_v17 = vld [vmem:[%s1661_s0 + $0xf8] sm:$0xff] }
  0x54   :  { %v1276_v47 = vpop.eup %839  ;;  %863 = vpow2.f32 %v744_v22  ;;  %v341_v22 = vsub.f32 1.0, %v1193_v51  ;;  %v309_v41 = vmul.f32 %v1193_v51, %v277_v20  ;;  %v348_v26 = vsub.f32 1.0, %v1266_v40 }
  0x55   :  { %v842_v57 = vpop.eup %841  ;;  %865 = vtanh.f32 %v388_v53  ;;  %v312_v53 = vmul.f32 %v1198_v54, %v280_v24  ;;  %v1358_v54 = vmul.f32 -1.442695, %v48_v17  ;;  %v284_v24 = vld [vmem:[%s1663_s2 + $0x58] sm:$0xff] }
  0x56   :  { %v1294_v0 = vpop.eup %843  ;;  %v159_v35 = vadd.f32 1.0, %v842_v57  ;;  %867 = vpow2.f32 %v747_v30  ;;  %v468_v30 = vadd.f32 %v436_v9, %v308_v8  ;;  %v437_v51 = vmul.f32 %v1145_v18, %v341_v22  ;;  %v279_v57 = vld [vmem:[%s1663_s2 + $0x30] sm:$0xff] }
  0x57   :  { %v846_v6 = vpop.eup %845  ;;  %869 = vrcp.f32 %v160_v60  ;;  %v1356_v18 = vmul.f32 -1.442695, %v45_v50  ;;  %v311_v21 = vmul.f32 %v1210_v62, %v279_v57  ;;  %v346_v9 = vsub.f32 1.0, %v1215_v3 }
  0x58   :  { %v1309_v1 = vpop.eup %847  ;;  %v162_v28 = vadd.f32 1.0, %v846_v6  ;;  %871 = vtanh.f32 %v387_v31  ;;  %v470_v6 = vadd.f32 %v438_v33, %v310_v32  ;;  %v469_v14 = vadd.f32 %v437_v51, %v309_v41 }
  0x59   :  { %v1316_v7 = vpop.eup %849  ;;  %873 = vpow2.f32 %v746_v36  ;;  %v472_v22 = vadd.f32 %v440_v4, %v312_v53  ;;  %v314_v33 = vmul.f32 %v1215_v3, %v282_v15  ;;  %v47_v3 = vld [vmem:[%s1661_s0 + $0xf0] sm:$0xff]  ;;  %v316_v53 = vmul.f32 %v1266_v40, %v284_v24 }
  0x5a   :  { %v852_v42 = vpop.eup %851  ;;  %875 = vrcp.f32 %v159_v35  ;;  %v345_v35 = vsub.f32 1.0, %v1243_v19 }
  0x5b   :  { %v1328_v29 = vpop.eup %853  ;;  %v161_v58 = vadd.f32 1.0, %v852_v42  ;;  %877 = vpow2.f32 %v1261_v38  ;;  %v439_v38 = vmul.f32 %v1170_v37, %v343_v46  ;;  %v389_v37 = vld [vmem:[%s1662_s1 + $0xa0] sm:$0xff] }
  0x5c   :  { %v1332_v34 = vpop.eup %855  ;;  %879 = vrcp.f32 %v162_v28  ;;  %v281_v42 = vld [vmem:[%s1663_s2 + $0x40] sm:$0xff]  ;;  %v347_v28 = vsub.f32 1.0, %v1294_v0  ;;  %v441_v17 = vmul.f32 %v1200_v56, %v345_v35 }
  0x5d   :  { %v1345_v43 = vpop.eup %857  ;;  %881 = vtanh.f32 %v390_v48  ;;  %v313_v50 = vmul.f32 %v1243_v19, %v281_v42  ;;  %v350_v40 = vsub.f32 1.0, %v1332_v34 }
  0x5e   :  { %v860_v27 = vpop.eup %859  ;;  %883 = vpow2.f32 %v1269_v44  ;;  %v443_v56 = vmul.f32 %v1229_v12, %v347_v28 }
  0x5f   :  { %v1354_v63 = vpop.eup %861  ;;  %885 = vrcp.f32 %v161_v58  ;;  %v444_v58 = vmul.f32 %v1205_v59, %v348_v26  ;;  %v473_v4 = vadd.f32 %v441_v17, %v313_v50 }
  0x60   :  { %v864_v8 = vpop.eup %863  ;;  %887 = vpow2.f32 %v1271_v45  ;;  %v471_v45 = vadd.f32 %v439_v38, %v311_v21 }
  0x61   :  { %v1372_v10 = vpop.eup %865  ;;  %v163_v32 = vadd.f32 1.0, %v864_v8  ;;  %889 = vpow2.f32 %v1286_v55  ;;  %v283_v55 = vld [vmem:[%s1663_s2 + $0x50] sm:$0xff]  ;;  %v349_v8 = vsub.f32 1.0, %v1354_v63  ;;  %v476_v15 = vadd.f32 %v444_v58, %v316_v53  ;;  %v394_v58 = vld [vmem:[%s1662_s1 + $0xc8] sm:$0xff] }
  0x62   :  { %v868_v62 = vpop.eup %867  ;;  %891 = vtanh.f32 %v389_v37  ;;  %v315_v19 = vmul.f32 %v1294_v0, %v283_v55 }
  0x63   :  { %v445_v28 = vmul.f32 %v1276_v47, %v349_v8 }
  0x64   :  { %v475_v35 = vadd.f32 %v443_v56, %v315_v19 }
  0x81   :  { %v510_v36 = vpop.permute.xlu1 %509  ;;  %v500_v52 = vpop.permute.xlu0 %499 }
  0x82   :  { %v659_v60 = vmul.f32 %v510_v36, %v467_v16  ;;  %v657_v2 = vmul.f32 %v500_v52, %v465_v11  ;;  %v164_v16 = vadd.f32 1.0, %v860_v27  ;;  %v1385_v11 = vpop.eup %869  ;;  %v166_v36 = vadd.f32 1.0, %v868_v62 }
  0x83   :  { %v352_v37 = vsub.f32 1.0, %v1385_v11 }
  0x84   :  { %692 = vst.msk [vmem:[%s1664_s4 + $0x10] sm:$0xff] %vm689_vm0, %v659_v60  ;;  %690 = vst.msk [vmem:[%s1664_s4] sm:$0xff] %vm689_vm0, %v657_v2  ;;  %893 = vrcp.f32 %v164_v16  ;;  %v288_v16 = vld [vmem:[%s1663_s2 + $0x78] sm:$0xff] }
  0x85   :  { %v515_v31 = vpop.permute.xlu1 %514  ;;  %v505_v13 = vpop.permute.xlu0 %504  ;;  %895 = vpow2.f32 %v1292_v61  ;;  %v756_v61 = vmul.f32 -1.442695, %v47_v3  ;;  %v448_v55 = vmul.f32 %v1309_v1, %v352_v37 }
  0x86   :  { %v660_v20 = vmul.f32 %v515_v31, %v468_v30  ;;  %v658_v44 = vmul.f32 %v505_v13, %v466_v39  ;;  %v1393_v30 = vpop.eup %871  ;;  %v442_v39 = vmul.f32 %v1188_v49, %v346_v9  ;;  %897 = vrcp.f32 %v163_v32  ;;  %v392_v13 = vld [vmem:[%s1662_s1 + $0xb8] sm:$0xff] }
  0x87   :  { %v874_v41 = vpop.eup %873  ;;  %899 = vpow2.f32 %v1298_v5  ;;  %v285_v5 = vld [vmem:[%s1663_s2 + $0x60] sm:$0xff] }
  0x88   :  { %693 = vst.msk [vmem:[%s1664_s4 + $0x18] sm:$0xff] %vm689_vm0, %v660_v20  ;;  %691 = vst.msk [vmem:[%s1664_s4 + $0x8] sm:$0xff] %vm689_vm0, %v658_v44  ;;  %v1413_v52 = vpop.eup %875  ;;  %v165_v59 = vadd.f32 1.0, %v874_v41  ;;  %v474_v2 = vadd.f32 %v442_v39, %v314_v33  ;;  %901 = vrcp.f32 %v166_v36  ;;  %v446_v20 = vmul.f32 %v1251_v25, %v350_v40  ;;  %v287_v44 = vld [vmem:[%s1663_s2 + $0x70] sm:$0xff] }
  0x89   :  { %v525_v46 = vpop.permute.xlu1 %524  ;;  %v520_v48 = vpop.permute.xlu0 %519  ;;  %903 = vpow2.f32 %v1322_v23  ;;  %v317_v26 = vmul.f32 %v1354_v63, %v285_v5  ;;  %v320_v33 = vmul.f32 %v1385_v11, %v288_v16  ;;  %v319_v41 = vmul.f32 %v1413_v52, %v287_v44  ;;  %v391_v63 = vld [vmem:[%s1662_s1 + $0xb0] sm:$0xff] }
  0x8a   :  { %v662_v49 = vmul.f32 %v525_v46, %v470_v6  ;;  %v661_v51 = vmul.f32 %v520_v48, %v469_v14  ;;  %v878_v57 = vpop.eup %877  ;;  %v286_v6 = vld [vmem:[%s1663_s2 + $0x68] sm:$0xff]  ;;  %905 = vpow2.f32 %v1356_v18  ;;  %v351_v18 = vsub.f32 1.0, %v1413_v52  ;;  %v291_v16 = vld [vmem:[%s1663_s2 + $0x90] sm:$0xff] }
  0x8b   :  { %v1420_v27 = vpop.eup %879  ;;  %v168_v31 = vadd.f32 1.0, %v878_v57  ;;  %v318_v23 = vmul.f32 %v1332_v34, %v286_v6  ;;  %907 = vrcp.f32 %v165_v59  ;;  %v477_v3 = vadd.f32 %v445_v28, %v317_v26  ;;  %v290_v52 = vld [vmem:[%s1663_s2 + $0x88] sm:$0xff]  ;;  %v393_v59 = vld [vmem:[%s1662_s1 + $0xc0] sm:$0xff]  ;;  %v292_v6 = vld [vmem:[%s1663_s2 + $0x98] sm:$0xff] }
  0x8c   :  { %695 = vst.msk [vmem:[%s1664_s4 + $0x28] sm:$0xff] %vm689_vm0, %v662_v49  ;;  %694 = vst.msk [vmem:[%s1664_s4 + $0x20] sm:$0xff] %vm689_vm0, %v661_v51  ;;  %v1432_v12 = vpop.eup %881  ;;  %909 = vtanh.f32 %v392_v13  ;;  %v447_v1 = vmul.f32 %v1316_v7, %v351_v18  ;;  %v354_v11 = vsub.f32 1.0, %v1420_v27  ;;  %v289_v7 = vld [vmem:[%s1663_s2 + $0x80] sm:$0xff]  ;;  %v480_v56 = vadd.f32 %v448_v55, %v320_v33 }
  0x8d   :  { %v535_v0 = vpop.permute.xlu1 %534  ;;  %v530_v60 = vpop.permute.xlu0 %529  ;;  %911 = vrcp.f32 %v168_v31  ;;  %v478_v36 = vadd.f32 %v446_v20, %v318_v23  ;;  %v396_v31 = vld [vmem:[%s1662_s1 + $0xd8] sm:$0xff]  ;;  %v395_v23 = vld [vmem:[%s1662_s1 + $0xd0] sm:$0xff] }
  0x8e   :  { %v884_v21 = vpop.eup %883  ;;  %v664_v38 = vmul.f32 %v535_v0, %v472_v22  ;;  %v663_v9 = vmul.f32 %v530_v60, %v471_v45  ;;  %913 = vpow2.f32 %v1358_v54  ;;  %v479_v60 = vadd.f32 %v447_v1, %v319_v41  ;;  %v293_v41 = vld [vmem:[%s1663_s2 + $0xa0] sm:$0xff] }
  0x8f   :  { %v1445_v14 = vpop.eup %885  ;;  %v167_v32 = vadd.f32 1.0, %v884_v21  ;;  %915 = vpow2.f32 %v756_v61 }
  0x90   :  { %v888_v62 = vpop.eup %887  ;;  %697 = vst.msk [vmem:[%s1664_s4 + $0x38] sm:$0xff] %vm689_vm0, %v664_v38  ;;  %696 = vst.msk [vmem:[%s1664_s4 + $0x30] sm:$0xff] %vm689_vm0, %v663_v9  ;;  %v353_v57 = vsub.f32 1.0, %v1445_v14  ;;  %v321_v9 = vmul.f32 %v1445_v14, %v289_v7 }
  0x91   :  { %v890_v22 = vpop.eup %889  ;;  %v545_v42 = vpop.permute.xlu1 %544  ;;  %v170_v46 = vadd.f32 1.0, %v888_v62  ;;  %917 = vrcp.f32 %v167_v32 }
  0x92   :  { %v540_v24 = vpop.permute.xlu0 %539  ;;  %v1468_v45 = vpop.eup %891  ;;  %v666_v34 = vmul.f32 %v545_v42, %v474_v2  ;;  %v169_v48 = vadd.f32 1.0, %v890_v22  ;;  %919 = vtanh.f32 %v391_v63  ;;  %v322_v2 = vmul.f32 %v1420_v27, %v290_v52 }
  0x93   :  { %v665_v25 = vmul.f32 %v540_v24, %v473_v4  ;;  %v894_v39 = vpop.eup %893  ;;  %921 = vrcp.f32 %v170_v46  ;;  %v450_v4 = vmul.f32 %v1328_v29, %v354_v11 }
  0x94   :  { %v896_v47 = vpop.eup %895  ;;  %699 = vst.msk [vmem:[%s1664_s4 + $0x48] sm:$0xff] %vm689_vm0, %v666_v34  ;;  %v356_v40 = vsub.f32 1.0, %v894_v39  ;;  %923 = vrcp.f32 %v169_v48  ;;  %v324_v62 = vmul.f32 %v894_v39, %v292_v6 }
  0x95   :  { %698 = vst.msk [vmem:[%s1664_s4 + $0x40] sm:$0xff] %vm689_vm0, %v665_v25  ;;  %v898_v50 = vpop.eup %897  ;;  %v555_v17 = vpop.permute.xlu1 %554  ;;  %v172_v61 = vadd.f32 1.0, %v896_v47  ;;  %925 = vtanh.f32 %v394_v58 }
  0x96   :  { %v550_v54 = vpop.permute.xlu0 %549  ;;  %v900_v49 = vpop.eup %899  ;;  %v668_v51 = vmul.f32 %v555_v17, %v476_v15  ;;  %v355_v5 = vsub.f32 1.0, %v898_v50  ;;  %927 = vtanh.f32 %v393_v59  ;;  %v452_v14 = vmul.f32 %v1372_v10, %v356_v40  ;;  %v294_v10 = vld [vmem:[%s1663_s2 + $0xa8] sm:$0xff]  ;;  %v295_v40 = vld [vmem:[%s1663_s2 + $0xb0] sm:$0xff] }
  0x97   :  { %v667_v53 = vmul.f32 %v550_v54, %v475_v35  ;;  %v1497_v19 = vpop.eup %901  ;;  %v171_v13 = vadd.f32 1.0, %v900_v49  ;;  %v449_v35 = vmul.f32 %v1345_v43, %v353_v57  ;;  %929 = vrcp.f32 %v172_v61 }
  0x98   :  { %v904_v0 = vpop.eup %903  ;;  %701 = vst.msk [vmem:[%s1664_s4 + $0x58] sm:$0xff] %vm689_vm0, %v668_v51  ;;  %v482_v43 = vadd.f32 %v450_v4, %v322_v2  ;;  %v358_v18 = vsub.f32 1.0, %v1497_v19  ;;  %931 = vtanh.f32 %v396_v31  ;;  %v323_v28 = vmul.f32 %v898_v50, %v291_v16  ;;  %v397_v50 = vld [vmem:[%s1662_s1 + $0xe0] sm:$0xff] }
  0x99   :  { %700 = vst.msk [vmem:[%s1664_s4 + $0x50] sm:$0xff] %vm689_vm0, %v667_v53  ;;  %v906_v8 = vpop.eup %905  ;;  %v565_v21 = vpop.permute.xlu1 %564  ;;  %v174_v20 = vadd.f32 1.0, %v904_v0  ;;  %v451_v32 = vmul.f32 %v1393_v30, %v355_v5  ;;  %933 = vrcp.f32 %v171_v13  ;;  %v481_v55 = vadd.f32 %v449_v35, %v321_v9  ;;  %v398_v30 = vld [vmem:[%s1662_s1 + $0xe8] sm:$0xff]  ;;  %v296_v53 = vld [vmem:[%s1663_s2 + $0xb8] sm:$0xff]  ;;  %v399_v9 = vld [vmem:[%s1662_s1 + $0xf0] sm:$0xff] }
  0x9a   :  { %v560_v38 = vpop.permute.xlu0 %559  ;;  %v908_v27 = vpop.eup %907  ;;  %v670_v15 = vmul.f32 %v565_v21, %v478_v36  ;;  %v173_v22 = vadd.f32 1.0, %v906_v8  ;;  %935 = vtanh.f32 %v395_v23  ;;  %v484_v46 = vadd.f32 %v452_v14, %v324_v62  ;;  %v297_v35 = vld [vmem:[%s1663_s2 + $0xc0] sm:$0xff] }
  0x9b   :  { %v669_v29 = vmul.f32 %v560_v38, %v477_v3  ;;  %v910_v37 = vpop.eup %909  ;;  %v357_v34 = vsub.f32 1.0, %v908_v27  ;;  %v326_v47 = vmul.f32 %v1497_v19, %v294_v10  ;;  %937 = vrcp.f32 %v174_v20 }
  0x9c   :  { %v912_v44 = vpop.eup %911  ;;  %703 = vst.msk [vmem:[%s1664_s4 + $0x68] sm:$0xff] %vm689_vm0, %v670_v15  ;;  %v454_v11 = vmul.f32 %v1432_v12, %v358_v18  ;;  %939 = vrcp.f32 %v173_v22  ;;  %v483_v52 = vadd.f32 %v451_v32, %v323_v28  ;;  %v325_v49 = vmul.f32 %v908_v27, %v293_v41 }
  0x9d   :  { %702 = vst.msk [vmem:[%s1664_s4 + $0x60] sm:$0xff] %vm689_vm0, %v669_v29  ;;  %v914_v42 = vpop.eup %913  ;;  %v575_v24 = vpop.permute.xlu1 %574  ;;  %v360_v48 = vsub.f32 1.0, %v912_v44  ;;  %v453_v51 = vmul.f32 %v1468_v45, %v357_v34  ;;  %941 = vtanh.f32 %v398_v30  ;;  %v328_v61 = vmul.f32 %v912_v44, %v296_v53  ;;  %v298_v29 = vld [vmem:[%s1663_s2 + $0xc8] sm:$0xff] }
  0x9e   :  { %v570_v26 = vpop.permute.xlu0 %569  ;;  %v916_v25 = vpop.eup %915  ;;  %v672_v33 = vmul.f32 %v575_v24, %v480_v56  ;;  %v176_v17 = vadd.f32 1.0, %v914_v42  ;;  %943 = vtanh.f32 %v397_v50  ;;  %v486_v45 = vadd.f32 %v454_v11, %v326_v47  ;;  %v300_v42 = vld [vmem:[%s1663_s2 + $0xd8] sm:$0xff] }
  0x9f   :  { %v671_v39 = vmul.f32 %v570_v26, %v479_v60  ;;  %v918_v63 = vpop.eup %917  ;;  %v175_v7 = vadd.f32 1.0, %v916_v25  ;;  %v456_v0 = vmul.f32 %v910_v37, %v360_v48  ;;  %v400_v60 = vld [vmem:[%s1662_s1 + $0xf8] sm:$0xff]  ;;  %v485_v8 = vadd.f32 %v453_v51, %v325_v49  ;;  %v299_v25 = vld [vmem:[%s1663_s2 + $0xd0] sm:$0xff] }
  0xa0   :  { %v920_v1 = vpop.eup %919  ;;  %705 = vst.msk [vmem:[%s1664_s4 + $0x78] sm:$0xff] %vm689_vm0, %v672_v33  ;;  %v359_v19 = vsub.f32 1.0, %v918_v63  ;;  %945 = vrcp.f32 %v176_v17  ;;  %v327_v27 = vmul.f32 %v918_v63, %v295_v40 }
  0xa1   :  { %704 = vst.msk [vmem:[%s1664_s4 + $0x70] sm:$0xff] %vm689_vm0, %v671_v39  ;;  %v922_v54 = vpop.eup %921  ;;  %v585_v36 = vpop.permute.xlu1 %584  ;;  %947 = vrcp.f32 %v175_v7  ;;  %v488_v62 = vadd.f32 %v456_v0, %v328_v61 }
  0xa2   :  { %v580_v3 = vpop.permute.xlu0 %579  ;;  %v924_v12 = vpop.eup %923  ;;  %v674_v57 = vmul.f32 %v585_v36, %v482_v43  ;;  %v362_v21 = vsub.f32 1.0, %v922_v54  ;;  %v455_v15 = vmul.f32 %v920_v1, %v359_v19  ;;  %949 = vtanh.f32 %v400_v60  ;;  %v302_v1 = vld [vmem:[%s1663_s2 + $0xe8] sm:$0xff]  ;;  %v304_v60 = vld [vmem:[%s1663_s2 + $0xf8] sm:$0xff] }
  0xa3   :  { %v673_v58 = vmul.f32 %v580_v3, %v481_v55  ;;  %v926_v56 = vpop.eup %925  ;;  %v361_v38 = vsub.f32 1.0, %v924_v12  ;;  %951 = vtanh.f32 %v399_v9  ;;  %v330_v43 = vmul.f32 %v922_v54, %v298_v29 }
  0xa4   :  { %v928_v59 = vpop.eup %927  ;;  %707 = vst.msk [vmem:[%s1664_s4 + $0x88] sm:$0xff] %vm689_vm0, %v674_v57  ;;  %v458_v10 = vmul.f32 %v926_v56, %v362_v21  ;;  %v329_v18 = vmul.f32 %v924_v12, %v297_v35  ;;  %v487_v32 = vadd.f32 %v455_v15, %v327_v27 }
  0xa5   :  { %706 = vst.msk [vmem:[%s1664_s4 + $0x80] sm:$0xff] %vm689_vm0, %v673_v58  ;;  %v930_v2 = vpop.eup %929  ;;  %v595_v4 = vpop.permute.xlu1 %594  ;;  %v457_v22 = vmul.f32 %v928_v59, %v361_v38 }
  0xa6   :  { %v590_v6 = vpop.permute.xlu0 %589  ;;  %v932_v5 = vpop.eup %931  ;;  %v676_v31 = vmul.f32 %v595_v4, %v484_v46  ;;  %v364_v14 = vsub.f32 1.0, %v930_v2  ;;  %v332_v39 = vmul.f32 %v930_v2, %v300_v42  ;;  %v490_v47 = vadd.f32 %v458_v10, %v330_v43  ;;  %v303_v4 = vld [vmem:[%s1663_s2 + $0xf0] sm:$0xff] }
  0xa7   :  { %v675_v13 = vmul.f32 %v590_v6, %v483_v52  ;;  %v934_v16 = vpop.eup %933  ;;  %v489_v30 = vadd.f32 %v457_v22, %v329_v18  ;;  %v301_v52 = vld [vmem:[%s1663_s2 + $0xe0] sm:$0xff] }
  0xa8   :  { %v936_v37 = vpop.eup %935  ;;  %709 = vst.msk [vmem:[%s1664_s4 + $0x98] sm:$0xff] %vm689_vm0, %v676_v31  ;;  %v363_v34 = vsub.f32 1.0, %v934_v16  ;;  %v460_v55 = vmul.f32 %v932_v5, %v364_v14  ;;  %v331_v36 = vmul.f32 %v934_v16, %v299_v25 }
  0xa9   :  { %708 = vst.msk [vmem:[%s1664_s4 + $0x90] sm:$0xff] %vm689_vm0, %v675_v13  ;;  %v938_v23 = vpop.eup %937  ;;  %v605_v20 = vpop.permute.xlu1 %604 }
  0xaa   :  { %v600_v44 = vpop.permute.xlu0 %599  ;;  %v940_v24 = vpop.eup %939  ;;  %v678_v26 = vmul.f32 %v605_v20, %v486_v45  ;;  %v366_v11 = vsub.f32 1.0, %v938_v23  ;;  %v459_v3 = vmul.f32 %v936_v37, %v363_v34  ;;  %v492_v51 = vadd.f32 %v460_v55, %v332_v39 }
  0xab   :  { %v677_v28 = vmul.f32 %v600_v44, %v485_v8  ;;  %v942_v33 = vpop.eup %941  ;;  %v365_v48 = vsub.f32 1.0, %v940_v24  ;;  %v334_v53 = vmul.f32 %v938_v23, %v302_v1  ;;  %v333_v19 = vmul.f32 %v940_v24, %v301_v52 }
  0xac   :  { %711 = vst.msk [vmem:[%s1664_s4 + $0xa8] sm:$0xff] %vm689_vm0, %v678_v26  ;;  %v944_v41 = vpop.eup %943  ;;  %v462_v58 = vmul.f32 %v942_v33, %v366_v11  ;;  %v491_v0 = vadd.f32 %v459_v3, %v331_v36 }
  0xad   :  { %710 = vst.msk [vmem:[%s1664_s4 + $0xa0] sm:$0xff] %vm689_vm0, %v677_v28  ;;  %v615_v63 = vpop.permute.xlu1 %614  ;;  %v946_v50 = vpop.eup %945  ;;  %v461_v56 = vmul.f32 %v944_v41, %v365_v48 }
  0xae   :  { %v610_v46 = vpop.permute.xlu0 %609  ;;  %v680_v17 = vmul.f32 %v615_v63, %v488_v62  ;;  %v948_v49 = vpop.eup %947  ;;  %v368_v40 = vsub.f32 1.0, %v946_v50  ;;  %v494_v21 = vadd.f32 %v462_v58, %v334_v53  ;;  %v336_v9 = vmul.f32 %v946_v50, %v304_v60 }
  0xaf   :  { %v679_v54 = vmul.f32 %v610_v46, %v487_v32  ;;  %v950_v7 = vpop.eup %949  ;;  %v367_v2 = vsub.f32 1.0, %v948_v49  ;;  %v493_v38 = vadd.f32 %v461_v56, %v333_v19  ;;  %v335_v27 = vmul.f32 %v948_v49, %v303_v4 }
  0xb0   :  { %713 = vst.msk [vmem:[%s1664_s4 + $0xb8] sm:$0xff] %vm689_vm0, %v680_v17  ;;  %v952_v59 = vpop.eup %951  ;;  %v464_v5 = vmul.f32 %v950_v7, %v368_v40 }
  0xb1   :  { %712 = vst.msk [vmem:[%s1664_s4 + $0xb0] sm:$0xff] %vm689_vm0, %v679_v54  ;;  %v625_v12 = vpop.permute.xlu1 %624  ;;  %v463_v15 = vmul.f32 %v952_v59, %v367_v2 }
  0xb2   :  { %v620_v57 = vpop.permute.xlu0 %619  ;;  %v682_v45 = vmul.f32 %v625_v12, %v490_v47  ;;  %v496_v62 = vadd.f32 %v464_v5, %v336_v9 }
  0xb3   :  { %v681_v61 = vmul.f32 %v620_v57, %v489_v30  ;;  %v495_v14 = vadd.f32 %v463_v15, %v335_v27 }
  0xb4   :  { %715 = vst.msk [vmem:[%s1664_s4 + $0xc8] sm:$0xff] %vm689_vm0, %v682_v45 }
  0xb5   :  { %714 = vst.msk [vmem:[%s1664_s4 + $0xc0] sm:$0xff] %vm689_vm0, %v681_v61  ;;  %v635_v6 = vpop.permute.xlu1 %634 }
  0xb6   :  { %v630_v8 = vpop.permute.xlu0 %629  ;;  %v684_v31 = vmul.f32 %v635_v6, %v492_v51 }
  0xb7   :  { %v683_v13 = vmul.f32 %v630_v8, %v491_v0 }
  0xb8   :  { %717 = vst.msk [vmem:[%s1664_s4 + $0xd8] sm:$0xff] %vm689_vm0, %v684_v31 }
  0xb9   :  { %716 = vst.msk [vmem:[%s1664_s4 + $0xd0] sm:$0xff] %vm689_vm0, %v683_v13  ;;  %v645_v29 = vpop.permute.xlu1 %644 }
  0xba   :  { %v640_v35 = vpop.permute.xlu0 %639  ;;  %v686_v16 = vmul.f32 %v645_v29, %v494_v21 }
  0xbb   :  { %v685_v37 = vmul.f32 %v640_v35, %v493_v38 }
  0xbc   :  { %719 = vst.msk [vmem:[%s1664_s4 + $0xe8] sm:$0xff] %vm689_vm0, %v686_v16 }
  0xbd   :  { %718 = vst.msk [vmem:[%s1664_s4 + $0xe0] sm:$0xff] %vm689_vm0, %v685_v37  ;;  %v655_v23 = vpop.permute.xlu1 %654 }
  0xbe   :  { %v650_v20 = vpop.permute.xlu0 %649  ;;  %v688_v44 = vmul.f32 %v655_v23, %v496_v62 }
  0xbf   :  { %v687_v43 = vmul.f32 %v650_v20, %v495_v14 }
  0xc0   :  { %721 = vst.msk [vmem:[%s1664_s4 + $0xf8] sm:$0xff] %vm689_vm0, %v688_v44 }
  0xc1   :  { %720 = vst.msk [vmem:[%s1664_s4 + $0xf0] sm:$0xff] %vm689_vm0, %v687_v43 }

// kernel: flood_block.41
= control target key start
LH: loop header
LB: loop body
LE: loop exit
PB: predicated region body
PF: predicated region fallthrough
CT: control target
= control target key end

     0   :  { %v953_v0 = vmov 0   ;;  %vm689_vm0 = vcmask 195584   ;;  %s1660_s3 = inlined_call_operand.vmem [shape: f32[256,1], index: 3, kind: input, shape index: {}]   ;;  %s1661_s0 = inlined_call_operand.vmem [shape: f32[256,24], index: 0, kind: input, shape index: {}]   ;;  %s1662_s1 = inlined_call_operand.vmem [shape: f32[256,24], index: 1, kind: input, shape index: {}]   ;;  %s1663_s2 = inlined_call_operand.vmem [shape: f32[256,24], index: 2, kind: input, shape index: {}]   ;;  %s1664_s4 = inlined_call_operand.vmem [shape: f32[256,24], index: 4, kind: output, shape index: {}]  }
   0x1   :  { %760 = vset.pattern.permute.xlu1 %v953_v0  ;;  %759 = vset.pattern.permute.xlu0 %v953_v0  ;;  %v243_v1 = vld [vmem:[%s1660_s3 + $0x10] sm:$0xff]  ;;  %v241_v2 = vld [vmem:[%s1660_s3] sm:$0xff]  ;;  %v244_v3 = vld [vmem:[%s1660_s3 + $0x18] sm:$0xff] }
   0x2   :  { %509 = vperm.xlu1 %760, %v243_v1   ;;  %499 = vperm.xlu0 %759, %v241_v2   ;;  %v242_v4 = vld [vmem:[%s1660_s3 + $0x8] sm:$0xff]  ;;  %v245_v6 = vld [vmem:[%s1660_s3 + $0x20] sm:$0xff]  ;;  %v248_v7 = vld [vmem:[%s1660_s3 + $0x38] sm:$0xff] }
   0x3   :  { %v246_v5 = vld [vmem:[%s1660_s3 + $0x28] sm:$0xff]  ;;  %v247_v8 = vld [vmem:[%s1660_s3 + $0x30] sm:$0xff]  ;;  %v249_v10 = vld [vmem:[%s1660_s3 + $0x40] sm:$0xff] }
   0x4   :  { %v250_v9 = vld [vmem:[%s1660_s3 + $0x48] sm:$0xff]  ;;  %v252_v11 = vld [vmem:[%s1660_s3 + $0x58] sm:$0xff]  ;;  %v251_v12 = vld [vmem:[%s1660_s3 + $0x50] sm:$0xff] }
   0x5   :  { %v254_v13 = vld [vmem:[%s1660_s3 + $0x68] sm:$0xff]  ;;  %v253_v14 = vld [vmem:[%s1660_s3 + $0x60] sm:$0xff]  ;;  %v256_v15 = vld [vmem:[%s1660_s3 + $0x78] sm:$0xff] }
   0x6   :  { %514 = vperm.xlu1 %760, %v244_v3   ;;  %504 = vperm.xlu0 %759, %v242_v4   ;;  %v255_v16 = vld [vmem:[%s1660_s3 + $0x70] sm:$0xff]  ;;  %v258_v17 = vld [vmem:[%s1660_s3 + $0x88] sm:$0xff]  ;;  %v257_v18 = vld [vmem:[%s1660_s3 + $0x80] sm:$0xff] }
   0x7   :  { %v260_v19 = vld [vmem:[%s1660_s3 + $0x98] sm:$0xff]  ;;  %v259_v20 = vld [vmem:[%s1660_s3 + $0x90] sm:$0xff]  ;;  %v262_v21 = vld [vmem:[%s1660_s3 + $0xa8] sm:$0xff] }
   0x8   :  { %v261_v22 = vld [vmem:[%s1660_s3 + $0xa0] sm:$0xff]  ;;  %v264_v23 = vld [vmem:[%s1660_s3 + $0xb8] sm:$0xff]  ;;  %v263_v24 = vld [vmem:[%s1660_s3 + $0xb0] sm:$0xff] }
   0x9   :  { %v266_v25 = vld [vmem:[%s1660_s3 + $0xc8] sm:$0xff]  ;;  %v265_v26 = vld [vmem:[%s1660_s3 + $0xc0] sm:$0xff]  ;;  %v268_v27 = vld [vmem:[%s1660_s3 + $0xd8] sm:$0xff] }
   0xa   :  { %524 = vperm.xlu1 %760, %v246_v5   ;;  %519 = vperm.xlu0 %759, %v245_v6   ;;  %v267_v28 = vld [vmem:[%s1660_s3 + $0xd0] sm:$0xff]  ;;  %v270_v29 = vld [vmem:[%s1660_s3 + $0xe8] sm:$0xff]  ;;  %v269_v30 = vld [vmem:[%s1660_s3 + $0xe0] sm:$0xff] }
   0xb   :  { %v272_v31 = vld [vmem:[%s1660_s3 + $0xf8] sm:$0xff]  ;;  %v271_v32 = vld [vmem:[%s1660_s3 + $0xf0] sm:$0xff]  ;;  %v17_v34 = vld [vmem:[%s1661_s0] sm:$0xff] }
   0xc   :  { %v19_v33 = vld [vmem:[%s1661_s0 + $0x10] sm:$0xff]  ;;  %v20_v36 = vld [vmem:[%s1661_s0 + $0x18] sm:$0xff]  ;;  %v726_v37 = vmul.f32 -1.442695, %v17_v34  ;;  %v18_v39 = vld [vmem:[%s1661_s0 + $0x8] sm:$0xff] }
   0xd   :  { %v728_v35 = vmul.f32 -1.442695, %v19_v33  ;;  %v729_v38 = vmul.f32 -1.442695, %v20_v36  ;;  %v22_v40 = vld [vmem:[%s1661_s0 + $0x28] sm:$0xff]  ;;  %v371_v41 = vld [vmem:[%s1662_s1 + $0x10] sm:$0xff] }
   0xe   :  { %534 = vperm.xlu1 %760, %v248_v7   ;;  %529 = vperm.xlu0 %759, %v247_v8   ;;  %v369_v42 = vld [vmem:[%s1662_s1] sm:$0xff]  ;;  %v727_v43 = vmul.f32 -1.442695, %v18_v39  ;;  %v731_v44 = vmul.f32 -1.442695, %v22_v40  ;;  %v24_v46 = vld [vmem:[%s1661_s0 + $0x38] sm:$0xff] }
   0xf   :  { %761 = vpow2.f32 %v728_v35  ;;  %v21_v45 = vld [vmem:[%s1661_s0 + $0x20] sm:$0xff]  ;;  %v372_v47 = vld [vmem:[%s1662_s1 + $0x18] sm:$0xff]  ;;  %v370_v48 = vld [vmem:[%s1662_s1 + $0x8] sm:$0xff]  ;;  %v733_v50 = vmul.f32 -1.442695, %v24_v46 }
  0x10   :  { %763 = vpow2.f32 %v726_v37  ;;  %v730_v49 = vmul.f32 -1.442695, %v21_v45  ;;  %v23_v51 = vld [vmem:[%s1661_s0 + $0x30] sm:$0xff]  ;;  %v374_v52 = vld [vmem:[%s1662_s1 + $0x28] sm:$0xff]  ;;  %v373_v55 = vld [vmem:[%s1662_s1 + $0x20] sm:$0xff] }
  0x11   :  { %765 = vpow2.f32 %v729_v38  ;;  %v26_v53 = vld [vmem:[%s1661_s0 + $0x48] sm:$0xff]  ;;  %v376_v57 = vld [vmem:[%s1662_s1 + $0x38] sm:$0xff]  ;;  %v732_v58 = vmul.f32 -1.442695, %v23_v51  ;;  %v25_v60 = vld [vmem:[%s1661_s0 + $0x40] sm:$0xff] }
  0x12   :  { %544 = vperm.xlu1 %760, %v250_v9   ;;  %539 = vperm.xlu0 %759, %v249_v10   ;;  %767 = vtanh.f32 %v371_v41  ;;  %v735_v59 = vmul.f32 -1.442695, %v26_v53  ;;  %v734_v2 = vmul.f32 -1.442695, %v25_v60  ;;  %v28_v3 = vld [vmem:[%s1661_s0 + $0x58] sm:$0xff]  ;;  %v375_v8 = vld [vmem:[%s1662_s1 + $0x30] sm:$0xff] }
  0x13   :  { %769 = vtanh.f32 %v369_v42  ;;  %v737_v9 = vmul.f32 -1.442695, %v28_v3  ;;  %v27_v10 = vld [vmem:[%s1661_s0 + $0x50] sm:$0xff]  ;;  %v32_v38 = vld [vmem:[%s1661_s0 + $0x78] sm:$0xff] }
  0x14   :  { %771 = vpow2.f32 %v727_v43  ;;  %v379_v41 = vld [vmem:[%s1662_s1 + $0x50] sm:$0xff]  ;;  %v741_v45 = vmul.f32 -1.442695, %v32_v38 }
  0x15   :  { %773 = vpow2.f32 %v731_v44  ;;  %v382_v44 = vld [vmem:[%s1662_s1 + $0x68] sm:$0xff]  ;;  %v31_v46 = vld [vmem:[%s1661_s0 + $0x70] sm:$0xff] }
  0x16   :  { %554 = vperm.xlu1 %760, %v252_v11   ;;  %549 = vperm.xlu0 %759, %v251_v12   ;;  %775 = vtanh.f32 %v372_v47  ;;  %v740_v53 = vmul.f32 -1.442695, %v31_v46  ;;  %v43_v46 = vld [vmem:[%s1661_s0 + $0xd0] sm:$0xff] }
  0x17   :  { %777 = vtanh.f32 %v370_v48 }
  0x18   :  { %779 = vpow2.f32 %v730_v49 }
  0x19   :  { %v762_v54 = vpop.eup %761  ;;  %781 = vpow2.f32 %v733_v50  ;;  %v34_v50 = vld [vmem:[%s1661_s0 + $0x88] sm:$0xff] }
  0x1a   :  { %564 = vperm.xlu1 %760, %v254_v13   ;;  %559 = vperm.xlu0 %759, %v253_v14   ;;  %v764_v56 = vpop.eup %763  ;;  %783 = vtanh.f32 %v374_v52  ;;  %v147_v62 = vadd.f32 1.0, %v762_v54  ;;  %v381_v52 = vld [vmem:[%s1662_s1 + $0x60] sm:$0xff] }
  0x1b   :  { %v766_v61 = vpop.eup %765  ;;  %785 = vtanh.f32 %v373_v55  ;;  %v145_v0 = vadd.f32 1.0, %v764_v56 }
  0x1c   :  { %v1126_v63 = vpop.eup %767  ;;  %787 = vtanh.f32 %v376_v57  ;;  %v148_v5 = vadd.f32 1.0, %v766_v61  ;;  %v743_v57 = vmul.f32 -1.442695, %v34_v50  ;;  %v384_v61 = vld [vmem:[%s1662_s1 + $0x78] sm:$0xff] }
  0x1d   :  { %v1128_v1 = vpop.eup %769  ;;  %789 = vpow2.f32 %v732_v58  ;;  %v33_v58 = vld [vmem:[%s1661_s0 + $0x80] sm:$0xff]  ;;  %v276_v50 = vld [vmem:[%s1663_s2 + $0x18] sm:$0xff] }
  0x1e   :  { %574 = vperm.xlu1 %760, %v256_v15   ;;  %569 = vperm.xlu0 %759, %v255_v16   ;;  %v772_v4 = vpop.eup %771  ;;  %791 = vpow2.f32 %v735_v59  ;;  %v736_v16 = vmul.f32 -1.442695, %v27_v10  ;;  %v38_v10 = vld [vmem:[%s1661_s0 + $0xa8] sm:$0xff] }
  0x1f   :  { %v774_v6 = vpop.eup %773  ;;  %793 = vrcp.f32 %v147_v62  ;;  %v146_v12 = vadd.f32 1.0, %v772_v4  ;;  %v36_v4 = vld [vmem:[%s1661_s0 + $0x98] sm:$0xff] }
  0x20   :  { %v1133_v7 = vpop.eup %775  ;;  %795 = vrcp.f32 %v145_v0  ;;  %v150_v14 = vadd.f32 1.0, %v774_v6  ;;  %v383_v0 = vld [vmem:[%s1662_s1 + $0x70] sm:$0xff] }
  0x21   :  { %v1141_v11 = vpop.eup %777  ;;  %797 = vpow2.f32 %v734_v2  ;;  %v742_v2 = vmul.f32 -1.442695, %v33_v58 }
  0x22   :  { %584 = vperm.xlu1 %760, %v258_v17   ;;  %579 = vperm.xlu0 %759, %v257_v18   ;;  %v780_v13 = vpop.eup %779  ;;  %799 = vrcp.f32 %v148_v5  ;;  %v35_v5 = vld [vmem:[%s1661_s0 + $0x90] sm:$0xff] }
  0x23   :  { %v782_v15 = vpop.eup %781  ;;  %801 = vtanh.f32 %v375_v8 }
  0x24   :  { %v1143_v17 = vpop.eup %783  ;;  %803 = vpow2.f32 %v737_v9  ;;  %v386_v9 = vld [vmem:[%s1662_s1 + $0x88] sm:$0xff] }
  0x25   :  { %v1145_v18 = vpop.eup %785  ;;  %805 = vrcp.f32 %v146_v12 }
  0x26   :  { %594 = vperm.xlu1 %760, %v260_v19   ;;  %589 = vperm.xlu0 %759, %v259_v20   ;;  %v149_v19 = vadd.f32 1.0, %v780_v13  ;;  %v378_v20 = vld [vmem:[%s1662_s1 + $0x48] sm:$0xff]  ;;  %807 = vrcp.f32 %v150_v14  ;;  %v275_v13 = vld [vmem:[%s1663_s2 + $0x10] sm:$0xff]  ;;  %v385_v14 = vld [vmem:[%s1662_s1 + $0x80] sm:$0xff] }
  0x27   :  { %809 = vpow2.f32 %v736_v16  ;;  %v40_v16 = vld [vmem:[%s1661_s0 + $0xb8] sm:$0xff] }
  0x28   :  { %811 = vtanh.f32 %v378_v20  ;;  %v745_v20 = vmul.f32 -1.442695, %v36_v4  ;;  %v1261_v38 = vmul.f32 -1.442695, %v40_v16 }
  0x29   :  { %813 = vrcp.f32 %v149_v19 }
  0x2a   :  { %604 = vperm.xlu1 %760, %v262_v21   ;;  %599 = vperm.xlu0 %759, %v261_v22   ;;  %v1150_v21 = vpop.eup %787  ;;  %v152_v22 = vadd.f32 1.0, %v782_v15  ;;  %v37_v15 = vld [vmem:[%s1661_s0 + $0xa0] sm:$0xff] }
  0x2c   :  { %815 = vrcp.f32 %v152_v22  ;;  %v744_v22 = vmul.f32 -1.442695, %v35_v5  ;;  %v1298_v5 = vmul.f32 -1.442695, %v43_v46 }
  0x2e   :  { %614 = vperm.xlu1 %760, %v264_v23   ;;  %609 = vperm.xlu0 %759, %v263_v24   ;;  %v30_v23 = vld [vmem:[%s1661_s0 + $0x68] sm:$0xff]  ;;  %v790_v24 = vpop.eup %789 }
  0x32   :  { %624 = vperm.xlu1 %760, %v266_v25   ;;  %619 = vperm.xlu0 %759, %v265_v26   ;;  %v792_v25 = vpop.eup %791  ;;  %v377_v26 = vld [vmem:[%s1662_s1 + $0x40] sm:$0xff] }
  0x33   :  { %v154_v34 = vadd.f32 1.0, %v792_v25  ;;  %817 = vtanh.f32 %v377_v26 }
  0x36   :  { %634 = vperm.xlu1 %760, %v268_v27   ;;  %629 = vperm.xlu0 %759, %v267_v28   ;;  %v1158_v27 = vpop.eup %793  ;;  %v380_v28 = vld [vmem:[%s1662_s1 + $0x58] sm:$0xff] }
  0x37   :  { %819 = vtanh.f32 %v380_v28  ;;  %v339_v26 = vsub.f32 1.0, %v1158_v27  ;;  %v273_v28 = vld [vmem:[%s1663_s2] sm:$0xff] }
  0x39   :  { %v435_v58 = vmul.f32 %v1126_v63, %v339_v26  ;;  %v46_v63 = vld [vmem:[%s1661_s0 + $0xe8] sm:$0xff] }
  0x3a   :  { %644 = vperm.xlu1 %760, %v270_v29   ;;  %639 = vperm.xlu0 %759, %v269_v30   ;;  %v739_v29 = vmul.f32 -1.442695, %v30_v23  ;;  %v29_v30 = vld [vmem:[%s1661_s0 + $0x60] sm:$0xff]  ;;  %v39_v23 = vld [vmem:[%s1661_s0 + $0xb0] sm:$0xff] }
  0x3b   :  { %v738_v36 = vmul.f32 -1.442695, %v29_v30  ;;  %v747_v30 = vmul.f32 -1.442695, %v38_v10 }
  0x3c   :  { %821 = vpow2.f32 %v739_v29 }
  0x3e   :  { %654 = vperm.xlu1 %760, %v272_v31   ;;  %649 = vperm.xlu0 %759, %v271_v32   ;;  %v1166_v31 = vpop.eup %795  ;;  %v151_v32 = vadd.f32 1.0, %v790_v24  ;;  %v42_v24 = vld [vmem:[%s1661_s0 + $0xc8] sm:$0xff] }
  0x3f   :  { %v798_v33 = vpop.eup %797 }
  0x40   :  { %v1168_v35 = vpop.eup %799  ;;  %823 = vrcp.f32 %v151_v32  ;;  %v153_v40 = vadd.f32 1.0, %v798_v33  ;;  %v41_v32 = vld [vmem:[%s1661_s0 + $0xc0] sm:$0xff] }
  0x41   :  { %v1170_v37 = vpop.eup %801  ;;  %825 = vrcp.f32 %v154_v34  ;;  %v337_v34 = vsub.f32 1.0, %v1166_v31 }
  0x42   :  { %v804_v39 = vpop.eup %803  ;;  %827 = vpow2.f32 %v738_v36  ;;  %v746_v36 = vmul.f32 -1.442695, %v37_v15  ;;  %v278_v15 = vld [vmem:[%s1663_s2 + $0x28] sm:$0xff] }
  0x43   :  { %v1178_v42 = vpop.eup %805  ;;  %v156_v48 = vadd.f32 1.0, %v804_v39  ;;  %829 = vtanh.f32 %v379_v41  ;;  %v44_v39 = vld [vmem:[%s1661_s0 + $0xd8] sm:$0xff]  ;;  %v340_v41 = vsub.f32 1.0, %v1168_v35  ;;  %v433_v4 = vmul.f32 %v1128_v1, %v337_v34 }
  0x44   :  { %v1180_v43 = vpop.eup %807  ;;  %831 = vrcp.f32 %v153_v40 }
  0x45   :  { %v810_v47 = vpop.eup %809  ;;  %833 = vtanh.f32 %v382_v44  ;;  %v1269_v44 = vmul.f32 -1.442695, %v39_v23  ;;  %v342_v10 = vsub.f32 1.0, %v1180_v43  ;;  %v1322_v23 = vmul.f32 -1.442695, %v46_v63 }
  0x46   :  { %v1188_v49 = vpop.eup %811  ;;  %v155_v55 = vadd.f32 1.0, %v810_v47  ;;  %835 = vpow2.f32 %v741_v45  ;;  %v1271_v45 = vmul.f32 -1.442695, %v42_v24  ;;  %v280_v24 = vld [vmem:[%s1663_s2 + $0x38] sm:$0xff] }
  0x47   :  { %v1193_v51 = vpop.eup %813  ;;  %837 = vrcp.f32 %v156_v48  ;;  %v307_v48 = vmul.f32 %v1158_v27, %v275_v13  ;;  %v274_v27 = vld [vmem:[%s1663_s2 + $0x8] sm:$0xff] }
  0x48   :  { %v1198_v54 = vpop.eup %815  ;;  %839 = vtanh.f32 %v381_v52  ;;  %v338_v52 = vsub.f32 1.0, %v1178_v42  ;;  %v306_v13 = vmul.f32 %v1178_v42, %v274_v27 }
  0x49   :  { %v1200_v56 = vpop.eup %817  ;;  %841 = vpow2.f32 %v740_v53  ;;  %v388_v53 = vld [vmem:[%s1662_s1 + $0x98] sm:$0xff]  ;;  %v467_v16 = vadd.f32 %v435_v58, %v307_v48  ;;  %v344_v26 = vsub.f32 1.0, %v1198_v54  ;;  %v390_v48 = vld [vmem:[%s1662_s1 + $0xa8] sm:$0xff] }
  0x4a   :  { %v1205_v59 = vpop.eup %819  ;;  %843 = vrcp.f32 %v155_v55  ;;  %v1286_v55 = vmul.f32 -1.442695, %v41_v32  ;;  %v310_v32 = vmul.f32 %v1180_v43, %v278_v15  ;;  %v282_v15 = vld [vmem:[%s1663_s2 + $0x48] sm:$0xff] }
  0x4b   :  { %v822_v60 = vpop.eup %821  ;;  %845 = vpow2.f32 %v743_v57 }
  0x4c   :  { %v1210_v62 = vpop.eup %823  ;;  %v158_v8 = vadd.f32 1.0, %v822_v60  ;;  %847 = vtanh.f32 %v384_v61  ;;  %v1292_v61 = vmul.f32 -1.442695, %v44_v39 }
  0x4d   :  { %v1215_v3 = vpop.eup %825  ;;  %849 = vtanh.f32 %v383_v0  ;;  %v343_v46 = vsub.f32 1.0, %v1210_v62 }
  0x4e   :  { %v828_v6 = vpop.eup %827  ;;  %851 = vpow2.f32 %v742_v2  ;;  %v305_v2 = vmul.f32 %v1166_v31, %v273_v28  ;;  %v387_v31 = vld [vmem:[%s1662_s1 + $0x90] sm:$0xff] }
  0x4f   :  { %v1229_v12 = vpop.eup %829  ;;  %v157_v29 = vadd.f32 1.0, %v828_v6  ;;  %853 = vtanh.f32 %v386_v9  ;;  %v436_v9 = vmul.f32 %v1133_v7, %v340_v41 }
  0x50   :  { %v1243_v19 = vpop.eup %831  ;;  %855 = vrcp.f32 %v158_v8  ;;  %v308_v8 = vmul.f32 %v1168_v35, %v276_v50  ;;  %v45_v50 = vld [vmem:[%s1661_s0 + $0xe0] sm:$0xff] }
  0x51   :  { %v1251_v25 = vpop.eup %833  ;;  %857 = vtanh.f32 %v385_v14  ;;  %v434_v14 = vmul.f32 %v1141_v11, %v338_v52  ;;  %v465_v11 = vadd.f32 %v433_v4, %v305_v2  ;;  %v440_v4 = vmul.f32 %v1150_v21, %v344_v26 }
  0x52   :  { %v836_v33 = vpop.eup %835  ;;  %859 = vpow2.f32 %v745_v20  ;;  %v277_v20 = vld [vmem:[%s1663_s2 + $0x20] sm:$0xff] }
  0x53   :  { %v1266_v40 = vpop.eup %837  ;;  %861 = vrcp.f32 %v157_v29  ;;  %v160_v60 = vadd.f32 1.0, %v836_v33  ;;  %v438_v33 = vmul.f32 %v1143_v17, %v342_v10  ;;  %v466_v39 = vadd.f32 %v434_v14, %v306_v13  ;;  %v48_v17 = vld [vmem:[%s1661_s0 + $0xf8] sm:$0xff] }
  0x54   :  { %v1276_v47 = vpop.eup %839  ;;  %863 = vpow2.f32 %v744_v22  ;;  %v341_v22 = vsub.f32 1.0, %v1193_v51  ;;  %v309_v41 = vmul.f32 %v1193_v51, %v277_v20  ;;  %v348_v26 = vsub.f32 1.0, %v1266_v40 }
  0x55   :  { %v842_v57 = vpop.eup %841  ;;  %865 = vtanh.f32 %v388_v53  ;;  %v312_v53 = vmul.f32 %v1198_v54, %v280_v24  ;;  %v1358_v54 = vmul.f32 -1.442695, %v48_v17  ;;  %v284_v24 = vld [vmem:[%s1663_s2 + $0x58] sm:$0xff] }
  0x56   :  { %v1294_v0 = vpop.eup %843  ;;  %v159_v35 = vadd.f32 1.0, %v842_v57  ;;  %867 = vpow2.f32 %v747_v30  ;;  %v468_v30 = vadd.f32 %v436_v9, %v308_v8  ;;  %v437_v51 = vmul.f32 %v1145_v18, %v341_v22  ;;  %v279_v57 = vld [vmem:[%s1663_s2 + $0x30] sm:$0xff] }
  0x57   :  { %v846_v6 = vpop.eup %845  ;;  %869 = vrcp.f32 %v160_v60  ;;  %v1356_v18 = vmul.f32 -1.442695, %v45_v50  ;;  %v311_v21 = vmul.f32 %v1210_v62, %v279_v57  ;;  %v346_v9 = vsub.f32 1.0, %v1215_v3 }
  0x58   :  { %v1309_v1 = vpop.eup %847  ;;  %v162_v28 = vadd.f32 1.0, %v846_v6  ;;  %871 = vtanh.f32 %v387_v31  ;;  %v470_v6 = vadd.f32 %v438_v33, %v310_v32  ;;  %v469_v14 = vadd.f32 %v437_v51, %v309_v41 }
  0x59   :  { %v1316_v7 = vpop.eup %849  ;;  %873 = vpow2.f32 %v746_v36  ;;  %v472_v22 = vadd.f32 %v440_v4, %v312_v53  ;;  %v314_v33 = vmul.f32 %v1215_v3, %v282_v15  ;;  %v47_v3 = vld [vmem:[%s1661_s0 + $0xf0] sm:$0xff]  ;;  %v316_v53 = vmul.f32 %v1266_v40, %v284_v24 }
  0x5a   :  { %v852_v42 = vpop.eup %851  ;;  %875 = vrcp.f32 %v159_v35  ;;  %v345_v35 = vsub.f32 1.0, %v1243_v19 }
  0x5b   :  { %v1328_v29 = vpop.eup %853  ;;  %v161_v58 = vadd.f32 1.0, %v852_v42  ;;  %877 = vpow2.f32 %v1261_v38  ;;  %v439_v38 = vmul.f32 %v1170_v37, %v343_v46  ;;  %v389_v37 = vld [vmem:[%s1662_s1 + $0xa0] sm:$0xff] }
  0x5c   :  { %v1332_v34 = vpop.eup %855  ;;  %879 = vrcp.f32 %v162_v28  ;;  %v281_v42 = vld [vmem:[%s1663_s2 + $0x40] sm:$0xff]  ;;  %v347_v28 = vsub.f32 1.0, %v1294_v0  ;;  %v441_v17 = vmul.f32 %v1200_v56, %v345_v35 }
  0x5d   :  { %v1345_v43 = vpop.eup %857  ;;  %881 = vtanh.f32 %v390_v48  ;;  %v313_v50 = vmul.f32 %v1243_v19, %v281_v42  ;;  %v350_v40 = vsub.f32 1.0, %v1332_v34 }
  0x5e   :  { %v860_v27 = vpop.eup %859  ;;  %883 = vpow2.f32 %v1269_v44  ;;  %v443_v56 = vmul.f32 %v1229_v12, %v347_v28 }
  0x5f   :  { %v1354_v63 = vpop.eup %861  ;;  %885 = vrcp.f32 %v161_v58  ;;  %v444_v58 = vmul.f32 %v1205_v59, %v348_v26  ;;  %v473_v4 = vadd.f32 %v441_v17, %v313_v50 }
  0x60   :  { %v864_v8 = vpop.eup %863  ;;  %887 = vpow2.f32 %v1271_v45  ;;  %v471_v45 = vadd.f32 %v439_v38, %v311_v21 }
  0x61   :  { %v1372_v10 = vpop.eup %865  ;;  %v163_v32 = vadd.f32 1.0, %v864_v8  ;;  %889 = vpow2.f32 %v1286_v55  ;;  %v283_v55 = vld [vmem:[%s1663_s2 + $0x50] sm:$0xff]  ;;  %v349_v8 = vsub.f32 1.0, %v1354_v63  ;;  %v476_v15 = vadd.f32 %v444_v58, %v316_v53  ;;  %v394_v58 = vld [vmem:[%s1662_s1 + $0xc8] sm:$0xff] }
  0x62   :  { %v868_v62 = vpop.eup %867  ;;  %891 = vtanh.f32 %v389_v37  ;;  %v315_v19 = vmul.f32 %v1294_v0, %v283_v55 }
  0x63   :  { %v445_v28 = vmul.f32 %v1276_v47, %v349_v8 }
  0x64   :  { %v475_v35 = vadd.f32 %v443_v56, %v315_v19 }
  0x81   :  { %v510_v36 = vpop.permute.xlu1 %509  ;;  %v500_v52 = vpop.permute.xlu0 %499 }
  0x82   :  { %v659_v60 = vmul.f32 %v510_v36, %v467_v16  ;;  %v657_v2 = vmul.f32 %v500_v52, %v465_v11  ;;  %v164_v16 = vadd.f32 1.0, %v860_v27  ;;  %v1385_v11 = vpop.eup %869  ;;  %v166_v36 = vadd.f32 1.0, %v868_v62 }
  0x83   :  { %v352_v37 = vsub.f32 1.0, %v1385_v11 }
  0x84   :  { %692 = vst.msk [vmem:[%s1664_s4 + $0x10] sm:$0xff] %vm689_vm0, %v659_v60  ;;  %690 = vst.msk [vmem:[%s1664_s4] sm:$0xff] %vm689_vm0, %v657_v2  ;;  %893 = vrcp.f32 %v164_v16  ;;  %v288_v16 = vld [vmem:[%s1663_s2 + $0x78] sm:$0xff] }
  0x85   :  { %v515_v31 = vpop.permute.xlu1 %514  ;;  %v505_v13 = vpop.permute.xlu0 %504  ;;  %895 = vpow2.f32 %v1292_v61  ;;  %v756_v61 = vmul.f32 -1.442695, %v47_v3  ;;  %v448_v55 = vmul.f32 %v1309_v1, %v352_v37 }
  0x86   :  { %v660_v20 = vmul.f32 %v515_v31, %v468_v30  ;;  %v658_v44 = vmul.f32 %v505_v13, %v466_v39  ;;  %v1393_v30 = vpop.eup %871  ;;  %v442_v39 = vmul.f32 %v1188_v49, %v346_v9  ;;  %897 = vrcp.f32 %v163_v32  ;;  %v392_v13 = vld [vmem:[%s1662_s1 + $0xb8] sm:$0xff] }
  0x87   :  { %v874_v41 = vpop.eup %873  ;;  %899 = vpow2.f32 %v1298_v5  ;;  %v285_v5 = vld [vmem:[%s1663_s2 + $0x60] sm:$0xff] }
  0x88   :  { %693 = vst.msk [vmem:[%s1664_s4 + $0x18] sm:$0xff] %vm689_vm0, %v660_v20  ;;  %691 = vst.msk [vmem:[%s1664_s4 + $0x8] sm:$0xff] %vm689_vm0, %v658_v44  ;;  %v1413_v52 = vpop.eup %875  ;;  %v165_v59 = vadd.f32 1.0, %v874_v41  ;;  %v474_v2 = vadd.f32 %v442_v39, %v314_v33  ;;  %901 = vrcp.f32 %v166_v36  ;;  %v446_v20 = vmul.f32 %v1251_v25, %v350_v40  ;;  %v287_v44 = vld [vmem:[%s1663_s2 + $0x70] sm:$0xff] }
  0x89   :  { %v525_v46 = vpop.permute.xlu1 %524  ;;  %v520_v48 = vpop.permute.xlu0 %519  ;;  %903 = vpow2.f32 %v1322_v23  ;;  %v317_v26 = vmul.f32 %v1354_v63, %v285_v5  ;;  %v320_v33 = vmul.f32 %v1385_v11, %v288_v16  ;;  %v319_v41 = vmul.f32 %v1413_v52, %v287_v44  ;;  %v391_v63 = vld [vmem:[%s1662_s1 + $0xb0] sm:$0xff] }
  0x8a   :  { %v662_v49 = vmul.f32 %v525_v46, %v470_v6  ;;  %v661_v51 = vmul.f32 %v520_v48, %v469_v14  ;;  %v878_v57 = vpop.eup %877  ;;  %v286_v6 = vld [vmem:[%s1663_s2 + $0x68] sm:$0xff]  ;;  %905 = vpow2.f32 %v1356_v18  ;;  %v351_v18 = vsub.f32 1.0, %v1413_v52  ;;  %v291_v16 = vld [vmem:[%s1663_s2 + $0x90] sm:$0xff] }
  0x8b   :  { %v1420_v27 = vpop.eup %879  ;;  %v168_v31 = vadd.f32 1.0, %v878_v57  ;;  %v318_v23 = vmul.f32 %v1332_v34, %v286_v6  ;;  %907 = vrcp.f32 %v165_v59  ;;  %v477_v3 = vadd.f32 %v445_v28, %v317_v26  ;;  %v290_v52 = vld [vmem:[%s1663_s2 + $0x88] sm:$0xff]  ;;  %v393_v59 = vld [vmem:[%s1662_s1 + $0xc0] sm:$0xff]  ;;  %v292_v6 = vld [vmem:[%s1663_s2 + $0x98] sm:$0xff] }
  0x8c   :  { %695 = vst.msk [vmem:[%s1664_s4 + $0x28] sm:$0xff] %vm689_vm0, %v662_v49  ;;  %694 = vst.msk [vmem:[%s1664_s4 + $0x20] sm:$0xff] %vm689_vm0, %v661_v51  ;;  %v1432_v12 = vpop.eup %881  ;;  %909 = vtanh.f32 %v392_v13  ;;  %v447_v1 = vmul.f32 %v1316_v7, %v351_v18  ;;  %v354_v11 = vsub.f32 1.0, %v1420_v27  ;;  %v289_v7 = vld [vmem:[%s1663_s2 + $0x80] sm:$0xff]  ;;  %v480_v56 = vadd.f32 %v448_v55, %v320_v33 }
  0x8d   :  { %v535_v0 = vpop.permute.xlu1 %534  ;;  %v530_v60 = vpop.permute.xlu0 %529  ;;  %911 = vrcp.f32 %v168_v31  ;;  %v478_v36 = vadd.f32 %v446_v20, %v318_v23  ;;  %v396_v31 = vld [vmem:[%s1662_s1 + $0xd8] sm:$0xff]  ;;  %v395_v23 = vld [vmem:[%s1662_s1 + $0xd0] sm:$0xff] }
  0x8e   :  { %v884_v21 = vpop.eup %883  ;;  %v664_v38 = vmul.f32 %v535_v0, %v472_v22  ;;  %v663_v9 = vmul.f32 %v530_v60, %v471_v45  ;;  %913 = vpow2.f32 %v1358_v54  ;;  %v479_v60 = vadd.f32 %v447_v1, %v319_v41  ;;  %v293_v41 = vld [vmem:[%s1663_s2 + $0xa0] sm:$0xff] }
  0x8f   :  { %v1445_v14 = vpop.eup %885  ;;  %v167_v32 = vadd.f32 1.0, %v884_v21  ;;  %915 = vpow2.f32 %v756_v61 }
  0x90   :  { %v888_v62 = vpop.eup %887  ;;  %697 = vst.msk [vmem:[%s1664_s4 + $0x38] sm:$0xff] %vm689_vm0, %v664_v38  ;;  %696 = vst.msk [vmem:[%s1664_s4 + $0x30] sm:$0xff] %vm689_vm0, %v663_v9  ;;  %v353_v57 = vsub.f32 1.0, %v1445_v14  ;;  %v321_v9 = vmul.f32 %v1445_v14, %v289_v7 }
  0x91   :  { %v890_v22 = vpop.eup %889  ;;  %v545_v42 = vpop.permute.xlu1 %544  ;;  %v170_v46 = vadd.f32 1.0, %v888_v62  ;;  %917 = vrcp.f32 %v167_v32 }
  0x92   :  { %v540_v24 = vpop.permute.xlu0 %539  ;;  %v1468_v45 = vpop.eup %891  ;;  %v666_v34 = vmul.f32 %v545_v42, %v474_v2  ;;  %v169_v48 = vadd.f32 1.0, %v890_v22  ;;  %919 = vtanh.f32 %v391_v63  ;;  %v322_v2 = vmul.f32 %v1420_v27, %v290_v52 }
  0x93   :  { %v665_v25 = vmul.f32 %v540_v24, %v473_v4  ;;  %v894_v39 = vpop.eup %893  ;;  %921 = vrcp.f32 %v170_v46  ;;  %v450_v4 = vmul.f32 %v1328_v29, %v354_v11 }
  0x94   :  { %v896_v47 = vpop.eup %895  ;;  %699 = vst.msk [vmem:[%s1664_s4 + $0x48] sm:$0xff] %vm689_vm0, %v666_v34  ;;  %v356_v40 = vsub.f32 1.0, %v894_v39  ;;  %923 = vrcp.f32 %v169_v48  ;;  %v324_v62 = vmul.f32 %v894_v39, %v292_v6 }
  0x95   :  { %698 = vst.msk [vmem:[%s1664_s4 + $0x40] sm:$0xff] %vm689_vm0, %v665_v25  ;;  %v898_v50 = vpop.eup %897  ;;  %v555_v17 = vpop.permute.xlu1 %554  ;;  %v172_v61 = vadd.f32 1.0, %v896_v47  ;;  %925 = vtanh.f32 %v394_v58 }
  0x96   :  { %v550_v54 = vpop.permute.xlu0 %549  ;;  %v900_v49 = vpop.eup %899  ;;  %v668_v51 = vmul.f32 %v555_v17, %v476_v15  ;;  %v355_v5 = vsub.f32 1.0, %v898_v50  ;;  %927 = vtanh.f32 %v393_v59  ;;  %v452_v14 = vmul.f32 %v1372_v10, %v356_v40  ;;  %v294_v10 = vld [vmem:[%s1663_s2 + $0xa8] sm:$0xff]  ;;  %v295_v40 = vld [vmem:[%s1663_s2 + $0xb0] sm:$0xff] }
  0x97   :  { %v667_v53 = vmul.f32 %v550_v54, %v475_v35  ;;  %v1497_v19 = vpop.eup %901  ;;  %v171_v13 = vadd.f32 1.0, %v900_v49  ;;  %v449_v35 = vmul.f32 %v1345_v43, %v353_v57  ;;  %929 = vrcp.f32 %v172_v61 }
  0x98   :  { %v904_v0 = vpop.eup %903  ;;  %701 = vst.msk [vmem:[%s1664_s4 + $0x58] sm:$0xff] %vm689_vm0, %v668_v51  ;;  %v482_v43 = vadd.f32 %v450_v4, %v322_v2  ;;  %v358_v18 = vsub.f32 1.0, %v1497_v19  ;;  %931 = vtanh.f32 %v396_v31  ;;  %v323_v28 = vmul.f32 %v898_v50, %v291_v16  ;;  %v397_v50 = vld [vmem:[%s1662_s1 + $0xe0] sm:$0xff] }
  0x99   :  { %700 = vst.msk [vmem:[%s1664_s4 + $0x50] sm:$0xff] %vm689_vm0, %v667_v53  ;;  %v906_v8 = vpop.eup %905  ;;  %v565_v21 = vpop.permute.xlu1 %564  ;;  %v174_v20 = vadd.f32 1.0, %v904_v0  ;;  %v451_v32 = vmul.f32 %v1393_v30, %v355_v5  ;;  %933 = vrcp.f32 %v171_v13  ;;  %v481_v55 = vadd.f32 %v449_v35, %v321_v9  ;;  %v398_v30 = vld [vmem:[%s1662_s1 + $0xe8] sm:$0xff]  ;;  %v296_v53 = vld [vmem:[%s1663_s2 + $0xb8] sm:$0xff]  ;;  %v399_v9 = vld [vmem:[%s1662_s1 + $0xf0] sm:$0xff] }
  0x9a   :  { %v560_v38 = vpop.permute.xlu0 %559  ;;  %v908_v27 = vpop.eup %907  ;;  %v670_v15 = vmul.f32 %v565_v21, %v478_v36  ;;  %v173_v22 = vadd.f32 1.0, %v906_v8  ;;  %935 = vtanh.f32 %v395_v23  ;;  %v484_v46 = vadd.f32 %v452_v14, %v324_v62  ;;  %v297_v35 = vld [vmem:[%s1663_s2 + $0xc0] sm:$0xff] }
  0x9b   :  { %v669_v29 = vmul.f32 %v560_v38, %v477_v3  ;;  %v910_v37 = vpop.eup %909  ;;  %v357_v34 = vsub.f32 1.0, %v908_v27  ;;  %v326_v47 = vmul.f32 %v1497_v19, %v294_v10  ;;  %937 = vrcp.f32 %v174_v20 }
  0x9c   :  { %v912_v44 = vpop.eup %911  ;;  %703 = vst.msk [vmem:[%s1664_s4 + $0x68] sm:$0xff] %vm689_vm0, %v670_v15  ;;  %v454_v11 = vmul.f32 %v1432_v12, %v358_v18  ;;  %939 = vrcp.f32 %v173_v22  ;;  %v483_v52 = vadd.f32 %v451_v32, %v323_v28  ;;  %v325_v49 = vmul.f32 %v908_v27, %v293_v41 }
  0x9d   :  { %702 = vst.msk [vmem:[%s1664_s4 + $0x60] sm:$0xff] %vm689_vm0, %v669_v29  ;;  %v914_v42 = vpop.eup %913  ;;  %v575_v24 = vpop.permute.xlu1 %574  ;;  %v360_v48 = vsub.f32 1.0, %v912_v44  ;;  %v453_v51 = vmul.f32 %v1468_v45, %v357_v34  ;;  %941 = vtanh.f32 %v398_v30  ;;  %v328_v61 = vmul.f32 %v912_v44, %v296_v53  ;;  %v298_v29 = vld [vmem:[%s1663_s2 + $0xc8] sm:$0xff] }
  0x9e   :  { %v570_v26 = vpop.permute.xlu0 %569  ;;  %v916_v25 = vpop.eup %915  ;;  %v672_v33 = vmul.f32 %v575_v24, %v480_v56  ;;  %v176_v17 = vadd.f32 1.0, %v914_v42  ;;  %943 = vtanh.f32 %v397_v50  ;;  %v486_v45 = vadd.f32 %v454_v11, %v326_v47  ;;  %v300_v42 = vld [vmem:[%s1663_s2 + $0xd8] sm:$0xff] }
  0x9f   :  { %v671_v39 = vmul.f32 %v570_v26, %v479_v60  ;;  %v918_v63 = vpop.eup %917  ;;  %v175_v7 = vadd.f32 1.0, %v916_v25  ;;  %v456_v0 = vmul.f32 %v910_v37, %v360_v48  ;;  %v400_v60 = vld [vmem:[%s1662_s1 + $0xf8] sm:$0xff]  ;;  %v485_v8 = vadd.f32 %v453_v51, %v325_v49  ;;  %v299_v25 = vld [vmem:[%s1663_s2 + $0xd0] sm:$0xff] }
  0xa0   :  { %v920_v1 = vpop.eup %919  ;;  %705 = vst.msk [vmem:[%s1664_s4 + $0x78] sm:$0xff] %vm689_vm0, %v672_v33  ;;  %v359_v19 = vsub.f32 1.0, %v918_v63  ;;  %945 = vrcp.f32 %v176_v17  ;;  %v327_v27 = vmul.f32 %v918_v63, %v295_v40 }
  0xa1   :  { %704 = vst.msk [vmem:[%s1664_s4 + $0x70] sm:$0xff] %vm689_vm0, %v671_v39  ;;  %v922_v54 = vpop.eup %921  ;;  %v585_v36 = vpop.permute.xlu1 %584  ;;  %947 = vrcp.f32 %v175_v7  ;;  %v488_v62 = vadd.f32 %v456_v0, %v328_v61 }
  0xa2   :  { %v580_v3 = vpop.permute.xlu0 %579  ;;  %v924_v12 = vpop.eup %923  ;;  %v674_v57 = vmul.f32 %v585_v36, %v482_v43  ;;  %v362_v21 = vsub.f32 1.0, %v922_v54  ;;  %v455_v15 = vmul.f32 %v920_v1, %v359_v19  ;;  %949 = vtanh.f32 %v400_v60  ;;  %v302_v1 = vld [vmem:[%s1663_s2 + $0xe8] sm:$0xff]  ;;  %v304_v60 = vld [vmem:[%s1663_s2 + $0xf8] sm:$0xff] }
  0xa3   :  { %v673_v58 = vmul.f32 %v580_v3, %v481_v55  ;;  %v926_v56 = vpop.eup %925  ;;  %v361_v38 = vsub.f32 1.0, %v924_v12  ;;  %951 = vtanh.f32 %v399_v9  ;;  %v330_v43 = vmul.f32 %v922_v54, %v298_v29 }
  0xa4   :  { %v928_v59 = vpop.eup %927  ;;  %707 = vst.msk [vmem:[%s1664_s4 + $0x88] sm:$0xff] %vm689_vm0, %v674_v57  ;;  %v458_v10 = vmul.f32 %v926_v56, %v362_v21  ;;  %v329_v18 = vmul.f32 %v924_v12, %v297_v35  ;;  %v487_v32 = vadd.f32 %v455_v15, %v327_v27 }
  0xa5   :  { %706 = vst.msk [vmem:[%s1664_s4 + $0x80] sm:$0xff] %vm689_vm0, %v673_v58  ;;  %v930_v2 = vpop.eup %929  ;;  %v595_v4 = vpop.permute.xlu1 %594  ;;  %v457_v22 = vmul.f32 %v928_v59, %v361_v38 }
  0xa6   :  { %v590_v6 = vpop.permute.xlu0 %589  ;;  %v932_v5 = vpop.eup %931  ;;  %v676_v31 = vmul.f32 %v595_v4, %v484_v46  ;;  %v364_v14 = vsub.f32 1.0, %v930_v2  ;;  %v332_v39 = vmul.f32 %v930_v2, %v300_v42  ;;  %v490_v47 = vadd.f32 %v458_v10, %v330_v43  ;;  %v303_v4 = vld [vmem:[%s1663_s2 + $0xf0] sm:$0xff] }
  0xa7   :  { %v675_v13 = vmul.f32 %v590_v6, %v483_v52  ;;  %v934_v16 = vpop.eup %933  ;;  %v489_v30 = vadd.f32 %v457_v22, %v329_v18  ;;  %v301_v52 = vld [vmem:[%s1663_s2 + $0xe0] sm:$0xff] }
  0xa8   :  { %v936_v37 = vpop.eup %935  ;;  %709 = vst.msk [vmem:[%s1664_s4 + $0x98] sm:$0xff] %vm689_vm0, %v676_v31  ;;  %v363_v34 = vsub.f32 1.0, %v934_v16  ;;  %v460_v55 = vmul.f32 %v932_v5, %v364_v14  ;;  %v331_v36 = vmul.f32 %v934_v16, %v299_v25 }
  0xa9   :  { %708 = vst.msk [vmem:[%s1664_s4 + $0x90] sm:$0xff] %vm689_vm0, %v675_v13  ;;  %v938_v23 = vpop.eup %937  ;;  %v605_v20 = vpop.permute.xlu1 %604 }
  0xaa   :  { %v600_v44 = vpop.permute.xlu0 %599  ;;  %v940_v24 = vpop.eup %939  ;;  %v678_v26 = vmul.f32 %v605_v20, %v486_v45  ;;  %v366_v11 = vsub.f32 1.0, %v938_v23  ;;  %v459_v3 = vmul.f32 %v936_v37, %v363_v34  ;;  %v492_v51 = vadd.f32 %v460_v55, %v332_v39 }
  0xab   :  { %v677_v28 = vmul.f32 %v600_v44, %v485_v8  ;;  %v942_v33 = vpop.eup %941  ;;  %v365_v48 = vsub.f32 1.0, %v940_v24  ;;  %v334_v53 = vmul.f32 %v938_v23, %v302_v1  ;;  %v333_v19 = vmul.f32 %v940_v24, %v301_v52 }
  0xac   :  { %711 = vst.msk [vmem:[%s1664_s4 + $0xa8] sm:$0xff] %vm689_vm0, %v678_v26  ;;  %v944_v41 = vpop.eup %943  ;;  %v462_v58 = vmul.f32 %v942_v33, %v366_v11  ;;  %v491_v0 = vadd.f32 %v459_v3, %v331_v36 }
  0xad   :  { %710 = vst.msk [vmem:[%s1664_s4 + $0xa0] sm:$0xff] %vm689_vm0, %v677_v28  ;;  %v615_v63 = vpop.permute.xlu1 %614  ;;  %v946_v50 = vpop.eup %945  ;;  %v461_v56 = vmul.f32 %v944_v41, %v365_v48 }
  0xae   :  { %v610_v46 = vpop.permute.xlu0 %609  ;;  %v680_v17 = vmul.f32 %v615_v63, %v488_v62  ;;  %v948_v49 = vpop.eup %947  ;;  %v368_v40 = vsub.f32 1.0, %v946_v50  ;;  %v494_v21 = vadd.f32 %v462_v58, %v334_v53  ;;  %v336_v9 = vmul.f32 %v946_v50, %v304_v60 }
  0xaf   :  { %v679_v54 = vmul.f32 %v610_v46, %v487_v32  ;;  %v950_v7 = vpop.eup %949  ;;  %v367_v2 = vsub.f32 1.0, %v948_v49  ;;  %v493_v38 = vadd.f32 %v461_v56, %v333_v19  ;;  %v335_v27 = vmul.f32 %v948_v49, %v303_v4 }
  0xb0   :  { %713 = vst.msk [vmem:[%s1664_s4 + $0xb8] sm:$0xff] %vm689_vm0, %v680_v17  ;;  %v952_v59 = vpop.eup %951  ;;  %v464_v5 = vmul.f32 %v950_v7, %v368_v40 }
  0xb1   :  { %712 = vst.msk [vmem:[%s1664_s4 + $0xb0] sm:$0xff] %vm689_vm0, %v679_v54  ;;  %v625_v12 = vpop.permute.xlu1 %624  ;;  %v463_v15 = vmul.f32 %v952_v59, %v367_v2 }
  0xb2   :  { %v620_v57 = vpop.permute.xlu0 %619  ;;  %v682_v45 = vmul.f32 %v625_v12, %v490_v47  ;;  %v496_v62 = vadd.f32 %v464_v5, %v336_v9 }
  0xb3   :  { %v681_v61 = vmul.f32 %v620_v57, %v489_v30  ;;  %v495_v14 = vadd.f32 %v463_v15, %v335_v27 }
  0xb4   :  { %715 = vst.msk [vmem:[%s1664_s4 + $0xc8] sm:$0xff] %vm689_vm0, %v682_v45 }
  0xb5   :  { %714 = vst.msk [vmem:[%s1664_s4 + $0xc0] sm:$0xff] %vm689_vm0, %v681_v61  ;;  %v635_v6 = vpop.permute.xlu1 %634 }
  0xb6   :  { %v630_v8 = vpop.permute.xlu0 %629  ;;  %v684_v31 = vmul.f32 %v635_v6, %v492_v51 }
  0xb7   :  { %v683_v13 = vmul.f32 %v630_v8, %v491_v0 }
  0xb8   :  { %717 = vst.msk [vmem:[%s1664_s4 + $0xd8] sm:$0xff] %vm689_vm0, %v684_v31 }
  0xb9   :  { %716 = vst.msk [vmem:[%s1664_s4 + $0xd0] sm:$0xff] %vm689_vm0, %v683_v13  ;;  %v645_v29 = vpop.permute.xlu1 %644 }
  0xba   :  { %v640_v35 = vpop.permute.xlu0 %639  ;;  %v686_v16 = vmul.f32 %v645_v29, %v494_v21 }
  0xbb   :  { %v685_v37 = vmul.f32 %v640_v35, %v493_v38 }
  0xbc   :  { %719 = vst.msk [vmem:[%s1664_s4 + $0xe8] sm:$0xff] %vm689_vm0, %v686_v16 }
  0xbd   :  { %718 = vst.msk [vmem:[%s1664_s4 + $0xe0] sm:$0xff] %vm689_vm0, %v685_v37  ;;  %v655_v23 = vpop.permute.xlu1 %654 }
  0xbe   :  { %v650_v20 = vpop.permute.xlu0 %649  ;;  %v688_v44 = vmul.f32 %v655_v23, %v496_v62 }
  0xbf   :  { %v687_v43 = vmul.f32 %v650_v20, %v495_v14 }
  0xc0   :  { %721 = vst.msk [vmem:[%s1664_s4 + $0xf8] sm:$0xff] %vm689_vm0, %v688_v44 }
  0xc1   :  { %720 = vst.msk [vmem:[%s1664_s4 + $0xf0] sm:$0xff] %vm689_vm0, %v687_v43 }

</bundles_post_ra>
